<compile_context>
chip_gen: v6e
topology: v6e:2x2x1
jax: 0.10.0
libtpu: 0.0.40
codegen_flags: <defaults>
</compile_context>

<pallas_src>
import jax
import jax.numpy as jnp
from jax import lax
from jax.experimental import pallas as pl
from jax.experimental.pallas import tpu as pltpu

BN_EPS = 1e-5


# ----------------------------- activations -----------------------------------
def _apply_act(y, act):
    if act == "qgelu":          # QuickGELU: x * sigmoid(1.702 x)
        return y * jax.nn.sigmoid(1.702 * y)
    if act == "leaky":          # LeakyReLU (default negative slope 0.01)
        return jnp.where(y >= 0, y, 0.01 * y)
    if act == "tanh":
        return jnp.tanh(y)
    return y


# ----------------------------- Pallas kernels ---------------------------------
def _conv3x3_taps(xp_ref, w_ref, H, W):
    """3x3 stride-1 conv of the padded VMEM tile xp_ref[(1,H+2,W+2,C)] against
    per-tap weights w_ref[(9, C, Cout)].  Taps are shifted slices of the
    VMEM-resident tile (no HBM im2col); MXU operands are bf16, accumulation f32."""
    C = xp_ref.shape[3]
    acc = None
    for t in range(9):
        a, b = divmod(t, 3)
        tap = xp_ref[0, a:a + H, b:b + W, :].reshape(H * W, C)
        d = jnp.dot(tap.astype(jnp.bfloat16), w_ref[t],
                    preferred_element_type=jnp.float32)
        acc = d if acc is None else acc + d
    return acc


def _make_conv3x3_kernel(act):
    """Fused conv3x3 + folded-BN scale/bias + activation (stem & upsample layers)."""
    def kernel(xp_ref, w_ref, s_ref, b_ref, o_ref):
        H, W, Co = o_ref.shape[1], o_ref.shape[2], o_ref.shape[3]
        y = _conv3x3_taps(xp_ref, w_ref, H, W) * s_ref[...] + b_ref[...]
        o_ref[0] = _apply_act(y, act).reshape(H, W, Co).astype(o_ref.dtype)
    return kernel


def _resblock_kernel(xp_ref, w1_ref, s1_ref, b1_ref, w2_ref, s2_ref, b2_ref, o_ref):
    """Whole ResidualLayer + QuickGELU in one pallas_call:
         qgelu(x + BN2(conv1x1(leaky(BN1(conv3x3(x))))))
       The intermediate activation h stays in VMEM/vregs."""
    H, W, C = o_ref.shape[1], o_ref.shape[2], o_ref.shape[3]
    h = _conv3x3_taps(xp_ref, w1_ref, H, W) * s1_ref[...] + b1_ref[...]
    h = jnp.where(h >= 0, h, 0.01 * h)                        # LeakyReLU
    y = jnp.dot(h.astype(jnp.bfloat16), w2_ref[...],
                preferred_element_type=jnp.float32)
    y = y * s2_ref[...] + b2_ref[...]
    y = y + xp_ref[0, 1:1 + H, 1:1 + W, :].reshape(H * W, C)  # residual add (f32)
    o_ref[0] = _apply_act(y, "qgelu").reshape(H, W, C).astype(o_ref.dtype)


# ----------------------------- pallas_call wrappers ----------------------------
def _pad_hw(x_nhwc):
    # Tiny spatial zero-pad (the only HBM-side glue per conv).
    return jnp.pad(x_nhwc, ((0, 0), (1, 1), (1, 1), (0, 0)))


def conv3x3_call(xp, w, s, b, act):
    N, Hp2, Wp2, C = xp.shape
    H, W = Hp2 - 2, Wp2 - 2
    Co = w.shape[2]
    return pl.pallas_call(
        _make_conv3x3_kernel(act),
        out_shape=jax.ShapeDtypeStruct((N, H, W, Co), jnp.float32),
        grid=(N,),
        in_specs=[
            pl.BlockSpec((1, Hp2, Wp2, C), lambda n: (n, 0, 0, 0)),
            pl.BlockSpec((9, C, Co), lambda n: (0, 0, 0)),
            pl.BlockSpec((1, Co), lambda n: (0, 0)),
            pl.BlockSpec((1, Co), lambda n: (0, 0)),
        ],
        out_specs=pl.BlockSpec((1, H, W, Co), lambda n: (n, 0, 0, 0)),
        compiler_params=pltpu.CompilerParams(dimension_semantics=("parallel",)),
    )(xp, w, s, b)


def resblock_call(xp, w1, s1, b1, w2, s2, b2):
    N, Hp2, Wp2, C = xp.shape
    H, W = Hp2 - 2, Wp2 - 2
    return pl.pallas_call(
        _resblock_kernel,
        out_shape=jax.ShapeDtypeStruct((N, H, W, C), jnp.float32),
        grid=(N,),
        in_specs=[
            pl.BlockSpec((1, Hp2, Wp2, C), lambda n: (n, 0, 0, 0)),
            pl.BlockSpec((9, C, C), lambda n: (0, 0, 0)),
            pl.BlockSpec((1, C), lambda n: (0, 0)),
            pl.BlockSpec((1, C), lambda n: (0, 0)),
            pl.BlockSpec((C, C), lambda n: (0, 0)),
            pl.BlockSpec((1, C), lambda n: (0, 0)),
            pl.BlockSpec((1, C), lambda n: (0, 0)),
        ],
        out_specs=pl.BlockSpec((1, H, W, C), lambda n: (n, 0, 0, 0)),
        compiler_params=pltpu.CompilerParams(dimension_semantics=("parallel",)),
    )(xp, w1, s1, b1, w2, s2, b2)


def _pixel_shuffle(z, cout):
    # z: (N, H, W, 4*cout) with channel index = (2*r + c)*cout + co
    N, H, W, _ = z.shape
    z = z.reshape(N, H, W, 2, 2, cout)
    z = jnp.transpose(z, (0, 1, 3, 2, 4, 5))        # (N, H, r, W, c, cout)
    return z.reshape(N, 2 * H, 2 * W, cout)


# ----------------------------- parameter preparation ---------------------------
def _fold_bn(bn, conv_bias, cout):
    if bn is not None:
        s = bn["gamma"] / jnp.sqrt(bn["var"] + BN_EPS)
        b = bn["beta"] - bn["mean"] * s
    else:
        s = jnp.ones((cout,), jnp.float32)
        b = jnp.zeros((cout,), jnp.float32)
    if conv_bias is not None:
        b = b + conv_bias * s
    return s.reshape(1, cout), b.reshape(1, cout)


def _conv_w_to_taps(w_conv):
    # Conv2d OIHW (Cout, Cin, 3, 3) -> tap-major (9, Cin, Cout), bf16.
    co, ci, kh, kw = w_conv.shape
    return jnp.transpose(w_conv, (2, 3, 1, 0)).reshape(kh * kw, ci, co).astype(jnp.bfloat16)


def _ct3_to_taps(w_ct):
    # ConvTranspose2d (Cin, Cout, 3, 3) stride 1 pad 1 == Conv2d with flipped /
    # channel-swapped kernel and pad 1.
    w_conv = jnp.transpose(jnp.flip(w_ct, axis=(2, 3)), (1, 0, 2, 3))
    return _conv_w_to_taps(w_conv)


def _ct4_to_phase_taps(w_ct):
    """ConvTranspose2d (Cin, Cout, 4, 4) stride 2 pad 1, folded into a 3x3
    stride-1 conv on the 1-padded input with 4*Cout output channels (sub-pixel
    phases):  out[2m+r, 2n+c, co] = y[m, n, (2r+c)*Cout + co]."""
    ci, co = w_ct.shape[0], w_ct.shape[1]
    w = jnp.zeros((3, 3, ci, 4, co), jnp.float32)
    for r in range(2):
        for c in range(2):
            for a in range(2):
                for b_ in range(2):
                    w = w.at[r + a, c + b_, :, 2 * r + c, :].set(
                        w_ct[:, :, 3 - r - 2 * a, 3 - c - 2 * b_])
    return w.reshape(9, ci, 4 * co).astype(jnp.bfloat16)


def prepare_params(params):
    """One-time conversion of PyTorch-layout params into kernel-ready matrices
    (tap-major bf16 weights, folded eval-mode BN scale/bias).  Done outside jit."""
    stem = params["stem"]
    s, b = _fold_bn(stem["bn"], stem["b"], stem["w"].shape[1])
    prep = {"stem": dict(w=_ct3_to_taps(stem["w"]), s=s, b=b), "stages": []}
    for st in params["stages"]:
        c = st["res_w1"].shape[0]
        s1, b1 = _fold_bn(st["res_bn1"], None, c)
        s2, b2 = _fold_bn(st["res_bn2"], None, c)
        w2 = jnp.transpose(st["res_w2"][:, :, 0, 0], (1, 0)).astype(jnp.bfloat16)
        up_co = st["up_w"].shape[1]
        su, bu = _fold_bn(st["up_bn"], st["up_b"], up_co)
        prep["stages"].append(dict(
            res=dict(w1=_conv_w_to_taps(st["res_w1"]), s1=s1, b1=b1,
                     w2=w2, s2=s2, b2=b2),
            up=dict(w=_ct4_to_phase_taps(st["up_w"]),
                    s=jnp.tile(su, (1, 4)), b=jnp.tile(bu, (1, 4))),
        ))
    return prep


# ----------------------------- decoder forward (Pallas) ------------------------
def decoder_forward(x_nchw, prep):
    x = jnp.transpose(x_nchw, (0, 2, 3, 1))                  # NCHW -> NHWC
    st = prep["stem"]                                        # ConvT k3 s1 p1 + BN + QuickGELU
    x = conv3x3_call(_pad_hw(x), st["w"], st["s"], st["b"], "qgelu")
    n_stages = len(prep["stages"])
    for i, stage in enumerate(prep["stages"]):
        r = stage["res"]                                     # ResidualLayer + QuickGELU (fused)
        x = resblock_call(_pad_hw(x), r["w1"], r["s1"], r["b1"],
                          r["w2"], r["s2"], r["b2"])
        u = stage["up"]                                      # ConvT k4 s2 p1 (+BN) + act
        act = "tanh" if i == n_stages - 1 else "qgelu"
        z = conv3x3_call(_pad_hw(x), u["w"], u["s"], u["b"], act)
        x = _pixel_shuffle(z, u["w"].shape[2] // 4)
    return jnp.transpose(x, (0, 3, 1, 2))                    # NHWC -> NCHW


# ----------------------------- pure-JAX reference (validation) -----------------
def _ref_conv(x, w_conv, conv_bias, bn, act, *, pad, lhs_dilation=1,
              residual=None, quantize=False):
    q = (lambda t: t.astype(jnp.bfloat16).astype(jnp.float32)) if quantize else (lambda t: t)
    y = lax.conv_general_dilated(
        q(x), q(w_conv), window_strides=(1, 1),
        padding=[(pad, pad), (pad, pad)],
        lhs_dilation=(lhs_dilation, lhs_dilation),
        dimension_numbers=("NCHW", "OIHW", "NCHW"),
        precision=lax.Precision.HIGHEST)
    if conv_bias is not None:
        y = y + conv_bias[None, :, None, None]
    if bn is not None:
        s = bn["gamma"] / jnp.sqrt(bn["var"] + BN_EPS)
        b = bn["beta"] - bn["mean"] * s
        y = y * s[None, :, None, None] + b[None, :, None, None]
    if residual is not None:
        y = y + residual
    return _apply_act(y, act)


def _ct_to_conv(w_ct):
    return jnp.transpose(jnp.flip(w_ct, axis=(2, 3)), (1, 0, 2, 3))


def decoder_forward_ref(x, params, quantize=False):
    stem = params["stem"]
    x = _ref_conv(x, _ct_to_conv(stem["w"]), stem["b"], stem["bn"], "qgelu",
                  pad=1, quantize=quantize)
    stages = params["stages"]
    for i, st in enumerate(stages):
        h = _ref_conv(x, st["res_w1"], None, st["res_bn1"], "leaky", pad=1,
                      quantize=quantize)
        x = _ref_conv(h, st["res_w2"], None, st["res_bn2"], "qgelu", pad=0,
                      residual=x, quantize=quantize)
        last = i == len(stages) - 1
        x = _ref_conv(x, _ct_to_conv(st["up_w"]), st["up_b"], st["up_bn"],
                      "tanh" if last else "qgelu", pad=2, lhs_dilation=2,
                      quantize=quantize)
    return x


# ----------------------------- deterministic parameter init --------------------
def init_params(key, embedding_dim, hidden_dims, out_channels):
    dims = list(hidden_dims)
    first_out = dims[-1]
    dims_rev = list(reversed(dims)) + [out_channels]
    kit = iter(jax.random.split(key, 128))

    def nrm(shape, scale=0.1):
        return scale * jax.random.normal(next(kit), shape, jnp.float32)

    def bn_init(c):
        return dict(
            gamma=1.0 + 0.1 * jax.random.normal(next(kit), (c,), jnp.float32),
            beta=0.1 * jax.random.normal(next(kit), (c,), jnp.float32),
            mean=0.1 * jax.random.normal(next(kit), (c,), jnp.float32),
            var=jax.random.uniform(next(kit), (c,), jnp.float32, 0.5, 1.5),
        )

    params = {
        "stem": dict(w=nrm((embedding_dim, first_out, 3, 3)),   # ConvT weight (Cin,Cout,3,3)
                     b=nrm((first_out,)), bn=bn_init(first_out)),
        "stages": [],
    }
    last = len(dims_rev) - 1
    for i in range(last):
        ci, co = dims_rev[i], dims_rev[i + 1]
        params["stages"].append(dict(
            res_w1=nrm((ci, ci, 3, 3)), res_bn1=bn_init(ci),     # Conv2d (no bias)
            res_w2=nrm((ci, ci, 1, 1)), res_bn2=bn_init(ci),     # Conv2d (no bias)
            up_w=nrm((ci, co, 4, 4)), up_b=nrm((co,)),           # ConvT weight (Cin,Cout,4,4)
            up_bn=None if i == last - 1 else bn_init(co),
        ))
    return params


# ----------------------------- main --------------------------------------------
if __name__ == "__main__":
    embedding_dim, hidden_dims, out_channels = 16, [32, 16], 3
    key = jax.random.PRNGKey(0)
    kx, kp = jax.random.split(key)

    # PyTorch-style NCHW input: (batch=2, embedding_dim=16, 8, 8)
    x = jax.random.normal(kx, (2, embedding_dim, 8, 8), jnp.float32)
    params = init_params(kp, embedding_dim, hidden_dims, out_channels)
    prep = prepare_params(params)   # one-time weight/BN folding, outside jit

    fwd = jax.jit(decoder_forward)
    y = jax.block_until_ready(fwd(x, prep))
    assert y.shape == (2, out_channels, 32, 32), y.shape

    # Tight check against a reference that applies the same bf16 rounding to the
    # MXU operands (validates kernel math / layer wiring exactly).
    y_q = decoder_forward_ref(x, params, quantize=True)
    err_q = float(jnp.max(jnp.abs(y - y_q)))
    assert err_q < 2e-3, f"mismatch vs bf16-matched reference: {err_q}"

    # Sanity check against the pure-f32 (PyTorch-semantics) reference; residual
    # difference is only the bf16 rounding of the MXU operands.
    y_f32 = decoder_forward_ref(x, params, quantize=False)
    err_f = float(jnp.max(jnp.abs(y - y_f32)))
    assert err_f < 1e-1, f"mismatch vs f32 reference: {err_f}"

    print("KERNEL_OK")
</pallas_src>

<mosaic_0001>
module attributes {stable_mosaic.version = 11 : i64} {
  func.func @kernel(%arg0: i32, %arg1: memref<1x10x10x16xf32, #tpu.memory_space<vmem>>, %arg2: memref<9x16x16xbf16, #tpu.memory_space<vmem>>, %arg3: memref<1x16xf32, #tpu.memory_space<vmem>>, %arg4: memref<1x16xf32, #tpu.memory_space<vmem>>, %arg5: memref<1x8x8x16xf32, #tpu.memory_space<vmem>>) attributes {dimension_semantics = [#tpu.dimension_semantics<parallel>], iteration_bounds = array<i64: 2>, scalar_prefetch = 0 : i64, scratch_operands = 0 : i64, tpu.core_type = #tpu.core_type<tc>, window_params = [{transform_indices = @transform_0, window_bounds = array<i64: 1, 10, 10, 16>}, {pipeline_mode = #tpu.pipeline_mode<synchronous>, transform_indices = @transform_1, window_bounds = array<i64: 9, 16, 16>}, {pipeline_mode = #tpu.pipeline_mode<synchronous>, transform_indices = @transform_2, window_bounds = array<i64: 1, 16>}, {pipeline_mode = #tpu.pipeline_mode<synchronous>, transform_indices = @transform_3, window_bounds = array<i64: 1, 16>}, {transform_indices = @transform_4, window_bounds = array<i64: 1, 8, 8, 16>}]} {
    %c0 = arith.constant 0 : index
    %c0_0 = arith.constant 0 : index
    %c0_1 = arith.constant 0 : index
    %c0_2 = arith.constant 0 : index
    %0 = vector.load %arg1[%c0, %c0_0, %c0_1, %c0_2] : memref<1x10x10x16xf32, #tpu.memory_space<vmem>>, vector<1x8x8x16xf32>
    %1 = vector.shape_cast %0 : vector<1x8x8x16xf32> to vector<8x8x16xf32>
    %2 = vector.shape_cast %1 : vector<8x8x16xf32> to vector<64x16xf32>
    %3 = arith.truncf %2 : vector<64x16xf32> to vector<64x16xbf16>
    %c0_3 = arith.constant 0 : index
    %c0_4 = arith.constant 0 : index
    %c0_5 = arith.constant 0 : index
    %4 = vector.load %arg2[%c0_3, %c0_4, %c0_5] : memref<9x16x16xbf16, #tpu.memory_space<vmem>>, vector<1x16x16xbf16>
    %5 = vector.shape_cast %4 : vector<1x16x16xbf16> to vector<16x16xbf16>
    %cst = arith.constant dense<0.000000e+00> : vector<64x16xf32>
    %6 = tpu.matmul %3, %5, %cst {dimension_numbers = #tpu.dot_dimension_numbers<[1], [0], [0], [1], [0, 0, 1, 1], [], []>} : vector<64x16xbf16>, vector<16x16xbf16>, vector<64x16xf32> -> vector<64x16xf32>
    %c0_6 = arith.constant 0 : index
    %c0_7 = arith.constant 0 : index
    %c1 = arith.constant 1 : index
    %c0_8 = arith.constant 0 : index
    %7 = vector.load %arg1[%c0_6, %c0_7, %c1, %c0_8] : memref<1x10x10x16xf32, #tpu.memory_space<vmem>>, vector<1x8x8x16xf32>
    %8 = vector.shape_cast %7 : vector<1x8x8x16xf32> to vector<8x8x16xf32>
    %9 = vector.shape_cast %8 : vector<8x8x16xf32> to vector<64x16xf32>
    %10 = arith.truncf %9 : vector<64x16xf32> to vector<64x16xbf16>
    %c1_9 = arith.constant 1 : index
    %c0_10 = arith.constant 0 : index
    %c0_11 = arith.constant 0 : index
    %11 = vector.load %arg2[%c1_9, %c0_10, %c0_11] : memref<9x16x16xbf16, #tpu.memory_space<vmem>>, vector<1x16x16xbf16>
    %12 = vector.shape_cast %11 : vector<1x16x16xbf16> to vector<16x16xbf16>
    %cst_12 = arith.constant dense<0.000000e+00> : vector<64x16xf32>
    %13 = tpu.matmul %10, %12, %cst_12 {dimension_numbers = #tpu.dot_dimension_numbers<[1], [0], [0], [1], [0, 0, 1, 1], [], []>} : vector<64x16xbf16>, vector<16x16xbf16>, vector<64x16xf32> -> vector<64x16xf32>
    %14 = arith.addf %6, %13 : vector<64x16xf32>
    %c0_13 = arith.constant 0 : index
    %c0_14 = arith.constant 0 : index
    %c2 = arith.constant 2 : index
    %c0_15 = arith.constant 0 : index
    %15 = vector.load %arg1[%c0_13, %c0_14, %c2, %c0_15] : memref<1x10x10x16xf32, #tpu.memory_space<vmem>>, vector<1x8x8x16xf32>
    %16 = vector.shape_cast %15 : vector<1x8x8x16xf32> to vector<8x8x16xf32>
    %17 = vector.shape_cast %16 : vector<8x8x16xf32> to vector<64x16xf32>
    %18 = arith.truncf %17 : vector<64x16xf32> to vector<64x16xbf16>
    %c2_16 = arith.constant 2 : index
    %c0_17 = arith.constant 0 : index
    %c0_18 = arith.constant 0 : index
    %19 = vector.load %arg2[%c2_16, %c0_17, %c0_18] : memref<9x16x16xbf16, #tpu.memory_space<vmem>>, vector<1x16x16xbf16>
    %20 = vector.shape_cast %19 : vector<1x16x16xbf16> to vector<16x16xbf16>
    %cst_19 = arith.constant dense<0.000000e+00> : vector<64x16xf32>
    %21 = tpu.matmul %18, %20, %cst_19 {dimension_numbers = #tpu.dot_dimension_numbers<[1], [0], [0], [1], [0, 0, 1, 1], [], []>} : vector<64x16xbf16>, vector<16x16xbf16>, vector<64x16xf32> -> vector<64x16xf32>
    %22 = arith.addf %14, %21 : vector<64x16xf32>
    %c0_20 = arith.constant 0 : index
    %c1_21 = arith.constant 1 : index
    %c0_22 = arith.constant 0 : index
    %c0_23 = arith.constant 0 : index
    %23 = vector.load %arg1[%c0_20, %c1_21, %c0_22, %c0_23] : memref<1x10x10x16xf32, #tpu.memory_space<vmem>>, vector<1x8x8x16xf32>
    %24 = vector.shape_cast %23 : vector<1x8x8x16xf32> to vector<8x8x16xf32>
    %25 = vector.shape_cast %24 : vector<8x8x16xf32> to vector<64x16xf32>
    %26 = arith.truncf %25 : vector<64x16xf32> to vector<64x16xbf16>
    %c3 = arith.constant 3 : index
    %c0_24 = arith.constant 0 : index
    %c0_25 = arith.constant 0 : index
    %27 = vector.load %arg2[%c3, %c0_24, %c0_25] : memref<9x16x16xbf16, #tpu.memory_space<vmem>>, vector<1x16x16xbf16>
    %28 = vector.shape_cast %27 : vector<1x16x16xbf16> to vector<16x16xbf16>
    %cst_26 = arith.constant dense<0.000000e+00> : vector<64x16xf32>
    %29 = tpu.matmul %26, %28, %cst_26 {dimension_numbers = #tpu.dot_dimension_numbers<[1], [0], [0], [1], [0, 0, 1, 1], [], []>} : vector<64x16xbf16>, vector<16x16xbf16>, vector<64x16xf32> -> vector<64x16xf32>
    %30 = arith.addf %22, %29 : vector<64x16xf32>
    %c0_27 = arith.constant 0 : index
    %c1_28 = arith.constant 1 : index
    %c1_29 = arith.constant 1 : index
    %c0_30 = arith.constant 0 : index
    %31 = vector.load %arg1[%c0_27, %c1_28, %c1_29, %c0_30] : memref<1x10x10x16xf32, #tpu.memory_space<vmem>>, vector<1x8x8x16xf32>
    %32 = vector.shape_cast %31 : vector<1x8x8x16xf32> to vector<8x8x16xf32>
    %33 = vector.shape_cast %32 : vector<8x8x16xf32> to vector<64x16xf32>
    %34 = arith.truncf %33 : vector<64x16xf32> to vector<64x16xbf16>
    %c4 = arith.constant 4 : index
    %c0_31 = arith.constant 0 : index
    %c0_32 = arith.constant 0 : index
    %35 = vector.load %arg2[%c4, %c0_31, %c0_32] : memref<9x16x16xbf16, #tpu.memory_space<vmem>>, vector<1x16x16xbf16>
    %36 = vector.shape_cast %35 : vector<1x16x16xbf16> to vector<16x16xbf16>
    %cst_33 = arith.constant dense<0.000000e+00> : vector<64x16xf32>
    %37 = tpu.matmul %34, %36, %cst_33 {dimension_numbers = #tpu.dot_dimension_numbers<[1], [0], [0], [1], [0, 0, 1, 1], [], []>} : vector<64x16xbf16>, vector<16x16xbf16>, vector<64x16xf32> -> vector<64x16xf32>
    %38 = arith.addf %30, %37 : vector<64x16xf32>
    %c0_34 = arith.constant 0 : index
    %c1_35 = arith.constant 1 : index
    %c2_36 = arith.constant 2 : index
    %c0_37 = arith.constant 0 : index
    %39 = vector.load %arg1[%c0_34, %c1_35, %c2_36, %c0_37] : memref<1x10x10x16xf32, #tpu.memory_space<vmem>>, vector<1x8x8x16xf32>
    %40 = vector.shape_cast %39 : vector<1x8x8x16xf32> to vector<8x8x16xf32>
    %41 = vector.shape_cast %40 : vector<8x8x16xf32> to vector<64x16xf32>
    %42 = arith.truncf %41 : vector<64x16xf32> to vector<64x16xbf16>
    %c5 = arith.constant 5 : index
    %c0_38 = arith.constant 0 : index
    %c0_39 = arith.constant 0 : index
    %43 = vector.load %arg2[%c5, %c0_38, %c0_39] : memref<9x16x16xbf16, #tpu.memory_space<vmem>>, vector<1x16x16xbf16>
    %44 = vector.shape_cast %43 : vector<1x16x16xbf16> to vector<16x16xbf16>
    %cst_40 = arith.constant dense<0.000000e+00> : vector<64x16xf32>
    %45 = tpu.matmul %42, %44, %cst_40 {dimension_numbers = #tpu.dot_dimension_numbers<[1], [0], [0], [1], [0, 0, 1, 1], [], []>} : vector<64x16xbf16>, vector<16x16xbf16>, vector<64x16xf32> -> vector<64x16xf32>
    %46 = arith.addf %38, %45 : vector<64x16xf32>
    %c0_41 = arith.constant 0 : index
    %c2_42 = arith.constant 2 : index
    %c0_43 = arith.constant 0 : index
    %c0_44 = arith.constant 0 : index
    %47 = vector.load %arg1[%c0_41, %c2_42, %c0_43, %c0_44] : memref<1x10x10x16xf32, #tpu.memory_space<vmem>>, vector<1x8x8x16xf32>
    %48 = vector.shape_cast %47 : vector<1x8x8x16xf32> to vector<8x8x16xf32>
    %49 = vector.shape_cast %48 : vector<8x8x16xf32> to vector<64x16xf32>
    %50 = arith.truncf %49 : vector<64x16xf32> to vector<64x16xbf16>
    %c6 = arith.constant 6 : index
    %c0_45 = arith.constant 0 : index
    %c0_46 = arith.constant 0 : index
    %51 = vector.load %arg2[%c6, %c0_45, %c0_46] : memref<9x16x16xbf16, #tpu.memory_space<vmem>>, vector<1x16x16xbf16>
    %52 = vector.shape_cast %51 : vector<1x16x16xbf16> to vector<16x16xbf16>
    %cst_47 = arith.constant dense<0.000000e+00> : vector<64x16xf32>
    %53 = tpu.matmul %50, %52, %cst_47 {dimension_numbers = #tpu.dot_dimension_numbers<[1], [0], [0], [1], [0, 0, 1, 1], [], []>} : vector<64x16xbf16>, vector<16x16xbf16>, vector<64x16xf32> -> vector<64x16xf32>
    %54 = arith.addf %46, %53 : vector<64x16xf32>
    %c0_48 = arith.constant 0 : index
    %c2_49 = arith.constant 2 : index
    %c1_50 = arith.constant 1 : index
    %c0_51 = arith.constant 0 : index
    %55 = vector.load %arg1[%c0_48, %c2_49, %c1_50, %c0_51] : memref<1x10x10x16xf32, #tpu.memory_space<vmem>>, vector<1x8x8x16xf32>
    %56 = vector.shape_cast %55 : vector<1x8x8x16xf32> to vector<8x8x16xf32>
    %57 = vector.shape_cast %56 : vector<8x8x16xf32> to vector<64x16xf32>
    %58 = arith.truncf %57 : vector<64x16xf32> to vector<64x16xbf16>
    %c7 = arith.constant 7 : index
    %c0_52 = arith.constant 0 : index
    %c0_53 = arith.constant 0 : index
    %59 = vector.load %arg2[%c7, %c0_52, %c0_53] : memref<9x16x16xbf16, #tpu.memory_space<vmem>>, vector<1x16x16xbf16>
    %60 = vector.shape_cast %59 : vector<1x16x16xbf16> to vector<16x16xbf16>
    %cst_54 = arith.constant dense<0.000000e+00> : vector<64x16xf32>
    %61 = tpu.matmul %58, %60, %cst_54 {dimension_numbers = #tpu.dot_dimension_numbers<[1], [0], [0], [1], [0, 0, 1, 1], [], []>} : vector<64x16xbf16>, vector<16x16xbf16>, vector<64x16xf32> -> vector<64x16xf32>
    %62 = arith.addf %54, %61 : vector<64x16xf32>
    %c0_55 = arith.constant 0 : index
    %c2_56 = arith.constant 2 : index
    %c2_57 = arith.constant 2 : index
    %c0_58 = arith.constant 0 : index
    %63 = vector.load %arg1[%c0_55, %c2_56, %c2_57, %c0_58] : memref<1x10x10x16xf32, #tpu.memory_space<vmem>>, vector<1x8x8x16xf32>
    %64 = vector.shape_cast %63 : vector<1x8x8x16xf32> to vector<8x8x16xf32>
    %65 = vector.shape_cast %64 : vector<8x8x16xf32> to vector<64x16xf32>
    %66 = arith.truncf %65 : vector<64x16xf32> to vector<64x16xbf16>
    %c8 = arith.constant 8 : index
    %c0_59 = arith.constant 0 : index
    %c0_60 = arith.constant 0 : index
    %67 = vector.load %arg2[%c8, %c0_59, %c0_60] : memref<9x16x16xbf16, #tpu.memory_space<vmem>>, vector<1x16x16xbf16>
    %68 = vector.shape_cast %67 : vector<1x16x16xbf16> to vector<16x16xbf16>
    %cst_61 = arith.constant dense<0.000000e+00> : vector<64x16xf32>
    %69 = tpu.matmul %66, %68, %cst_61 {dimension_numbers = #tpu.dot_dimension_numbers<[1], [0], [0], [1], [0, 0, 1, 1], [], []>} : vector<64x16xbf16>, vector<16x16xbf16>, vector<64x16xf32> -> vector<64x16xf32>
    %70 = arith.addf %62, %69 : vector<64x16xf32>
    %c0_62 = arith.constant 0 : index
    %c0_63 = arith.constant 0 : index
    %71 = vector.load %arg3[%c0_62, %c0_63] : memref<1x16xf32, #tpu.memory_space<vmem>>, vector<1x16xf32>
    %72 = vector.broadcast %71 : vector<1x16xf32> to vector<64x16xf32>
    %73 = arith.mulf %70, %72 : vector<64x16xf32>
    %c0_64 = arith.constant 0 : index
    %c0_65 = arith.constant 0 : index
    %74 = vector.load %arg4[%c0_64, %c0_65] : memref<1x16xf32, #tpu.memory_space<vmem>>, vector<1x16xf32>
    %75 = vector.broadcast %74 : vector<1x16xf32> to vector<64x16xf32>
    %76 = arith.addf %73, %75 : vector<64x16xf32>
    %cst_66 = arith.constant 1.702000e+00 : f32
    %77 = vector.broadcast %cst_66 : f32 to vector<64x16xf32>
    %78 = arith.mulf %77, %76 : vector<64x16xf32>
    %79 = arith.negf %78 : vector<64x16xf32>
    %80 = math.exp %79 : vector<64x16xf32>
    %cst_67 = arith.constant 1.000000e+00 : f32
    %81 = vector.broadcast %cst_67 : f32 to vector<64x16xf32>
    %82 = arith.addf %81, %80 : vector<64x16xf32>
    %83 = arith.divf %81, %82 : vector<64x16xf32>
    %84 = arith.mulf %76, %83 : vector<64x16xf32>
    %85 = vector.shape_cast %84 : vector<64x16xf32> to vector<8x8x16xf32>
    %c0_68 = arith.constant 0 : index
    %c0_69 = arith.constant 0 : index
    %c0_70 = arith.constant 0 : index
    %c0_71 = arith.constant 0 : index
    %86 = vector.load %arg5[%c0_68, %c0_69, %c0_70, %c0_71] : memref<1x8x8x16xf32, #tpu.memory_space<vmem>>, vector<1x8x8x16xf32>
    %87 = vector.shape_cast %86 : vector<1x8x8x16xf32> to vector<8x8x16xf32>
    %88 = vector.shape_cast %85 : vector<8x8x16xf32> to vector<1x8x8x16xf32>
    tpu.vector_store %arg5[%c0_68, %c0_69, %c0_70, %c0_71], %88 {strides = array<i32>} : memref<1x8x8x16xf32, #tpu.memory_space<vmem>>, vector<1x8x8x16xf32>,
    return
  }
  func.func @transform_0(%arg0: i32) -> (i32, i32, i32, i32) {
    %c0_i32 = arith.constant 0 : i32
    %c0_i32_0 = arith.constant 0 : i32
    %c0_i32_1 = arith.constant 0 : i32
    %c0_i32_2 = arith.constant 0 : i32
    return %arg0, %c0_i32, %c0_i32_0, %c0_i32_1 : i32, i32, i32, i32
  }
  func.func @transform_1(%arg0: i32) -> (i32, i32, i32) {
    %c0_i32 = arith.constant 0 : i32
    %c0_i32_0 = arith.constant 0 : i32
    %c0_i32_1 = arith.constant 0 : i32
    %c0_i32_2 = arith.constant 0 : i32
    return %c0_i32, %c0_i32_0, %c0_i32_1 : i32, i32, i32
  }
  func.func @transform_2(%arg0: i32) -> (i32, i32) {
    %c0_i32 = arith.constant 0 : i32
    %c0_i32_0 = arith.constant 0 : i32
    %c0_i32_1 = arith.constant 0 : i32
    return %c0_i32, %c0_i32_0 : i32, i32
  }
  func.func @transform_3(%arg0: i32) -> (i32, i32) {
    %c0_i32 = arith.constant 0 : i32
    %c0_i32_0 = arith.constant 0 : i32
    %c0_i32_1 = arith.constant 0 : i32
    return %c0_i32, %c0_i32_0 : i32, i32
  }
  func.func @transform_4(%arg0: i32) -> (i32, i32, i32, i32) {
    %c0_i32 = arith.constant 0 : i32
    %c0_i32_0 = arith.constant 0 : i32
    %c0_i32_1 = arith.constant 0 : i32
    %c0_i32_2 = arith.constant 0 : i32
    return %arg0, %c0_i32, %c0_i32_0, %c0_i32_1 : i32, i32, i32, i32
  }
}

module attributes {stable_mosaic.version = 11 : i64} {
  func.func @kernel(%arg0: i32, %arg1: memref<1x10x10x16xf32, #tpu.memory_space<vmem>>, %arg2: memref<9x16x128xbf16, #tpu.memory_space<vmem>>, %arg3: memref<1x128xf32, #tpu.memory_space<vmem>>, %arg4: memref<1x128xf32, #tpu.memory_space<vmem>>, %arg5: memref<1x8x8x128xf32, #tpu.memory_space<vmem>>) attributes {dimension_semantics = [#tpu.dimension_semantics<parallel>], iteration_bounds = array<i64: 2>, scalar_prefetch = 0 : i64, scratch_operands = 0 : i64, tpu.core_type = #tpu.core_type<tc>, window_params = [{transform_indices = @transform_0, window_bounds = array<i64: 1, 10, 10, 16>}, {pipeline_mode = #tpu.pipeline_mode<synchronous>, transform_indices = @transform_1, window_bounds = array<i64: 9, 16, 128>}, {pipeline_mode = #tpu.pipeline_mode<synchronous>, transform_indices = @transform_2, window_bounds = array<i64: 1, 128>}, {pipeline_mode = #tpu.pipeline_mode<synchronous>, transform_indices = @transform_3, window_bounds = array<i64: 1, 128>}, {transform_indices = @transform_4, window_bounds = array<i64: 1, 8, 8, 128>}]} {
    %c0 = arith.constant 0 : index
    %c0_0 = arith.constant 0 : index
    %c0_1 = arith.constant 0 : index
    %c0_2 = arith.constant 0 : index
    %0 = vector.load %arg1[%c0, %c0_0, %c0_1, %c0_2] : memref<1x10x10x16xf32, #tpu.memory_space<vmem>>, vector<1x8x8x16xf32>
    %1 = vector.shape_cast %0 : vector<1x8x8x16xf32> to vector<8x8x16xf32>
    %2 = vector.shape_cast %1 : vector<8x8x16xf32> to vector<64x16xf32>
    %3 = arith.truncf %2 : vector<64x16xf32> to vector<64x16xbf16>
    %c0_3 = arith.constant 0 : index
    %c0_4 = arith.constant 0 : index
    %c0_5 = arith.constant 0 : index
    %4 = vector.load %arg2[%c0_3, %c0_4, %c0_5] : memref<9x16x128xbf16, #tpu.memory_space<vmem>>, vector<1x16x128xbf16>
    %5 = vector.shape_cast %4 : vector<1x16x128xbf16> to vector<16x128xbf16>
    %cst = arith.constant dense<0.000000e+00> : vector<64x128xf32>
    %6 = tpu.matmul %3, %5, %cst {dimension_numbers = #tpu.dot_dimension_numbers<[1], [0], [0], [1], [0, 0, 1, 1], [], []>} : vector<64x16xbf16>, vector<16x128xbf16>, vector<64x128xf32> -> vector<64x128xf32>
    %c0_6 = arith.constant 0 : index
    %c0_7 = arith.constant 0 : index
    %c1 = arith.constant 1 : index
    %c0_8 = arith.constant 0 : index
    %7 = vector.load %arg1[%c0_6, %c0_7, %c1, %c0_8] : memref<1x10x10x16xf32, #tpu.memory_space<vmem>>, vector<1x8x8x16xf32>
    %8 = vector.shape_cast %7 : vector<1x8x8x16xf32> to vector<8x8x16xf32>
    %9 = vector.shape_cast %8 : vector<8x8x16xf32> to vector<64x16xf32>
    %10 = arith.truncf %9 : vector<64x16xf32> to vector<64x16xbf16>
    %c1_9 = arith.constant 1 : index
    %c0_10 = arith.constant 0 : index
    %c0_11 = arith.constant 0 : index
    %11 = vector.load %arg2[%c1_9, %c0_10, %c0_11] : memref<9x16x128xbf16, #tpu.memory_space<vmem>>, vector<1x16x128xbf16>
    %12 = vector.shape_cast %11 : vector<1x16x128xbf16> to vector<16x128xbf16>
    %cst_12 = arith.constant dense<0.000000e+00> : vector<64x128xf32>
    %13 = tpu.matmul %10, %12, %cst_12 {dimension_numbers = #tpu.dot_dimension_numbers<[1], [0], [0], [1], [0, 0, 1, 1], [], []>} : vector<64x16xbf16>, vector<16x128xbf16>, vector<64x128xf32> -> vector<64x128xf32>
    %14 = arith.addf %6, %13 : vector<64x128xf32>
    %c0_13 = arith.constant 0 : index
    %c0_14 = arith.constant 0 : index
    %c2 = arith.constant 2 : index
    %c0_15 = arith.constant 0 : index
    %15 = vector.load %arg1[%c0_13, %c0_14, %c2, %c0_15] : memref<1x10x10x16xf32, #tpu.memory_space<vmem>>, vector<1x8x8x16xf32>
    %16 = vector.shape_cast %15 : vector<1x8x8x16xf32> to vector<8x8x16xf32>
    %17 = vector.shape_cast %16 : vector<8x8x16xf32> to vector<64x16xf32>
    %18 = arith.truncf %17 : vector<64x16xf32> to vector<64x16xbf16>
    %c2_16 = arith.constant 2 : index
    %c0_17 = arith.constant 0 : index
    %c0_18 = arith.constant 0 : index
    %19 = vector.load %arg2[%c2_16, %c0_17, %c0_18] : memref<9x16x128xbf16, #tpu.memory_space<vmem>>, vector<1x16x128xbf16>
    %20 = vector.shape_cast %19 : vector<1x16x128xbf16> to vector<16x128xbf16>
    %cst_19 = arith.constant dense<0.000000e+00> : vector<64x128xf32>
    %21 = tpu.matmul %18, %20, %cst_19 {dimension_numbers = #tpu.dot_dimension_numbers<[1], [0], [0], [1], [0, 0, 1, 1], [], []>} : vector<64x16xbf16>, vector<16x128xbf16>, vector<64x128xf32> -> vector<64x128xf32>
    %22 = arith.addf %14, %21 : vector<64x128xf32>
    %c0_20 = arith.constant 0 : index
    %c1_21 = arith.constant 1 : index
    %c0_22 = arith.constant 0 : index
    %c0_23 = arith.constant 0 : index
    %23 = vector.load %arg1[%c0_20, %c1_21, %c0_22, %c0_23] : memref<1x10x10x16xf32, #tpu.memory_space<vmem>>, vector<1x8x8x16xf32>
    %24 = vector.shape_cast %23 : vector<1x8x8x16xf32> to vector<8x8x16xf32>
    %25 = vector.shape_cast %24 : vector<8x8x16xf32> to vector<64x16xf32>
    %26 = arith.truncf %25 : vector<64x16xf32> to vector<64x16xbf16>
    %c3 = arith.constant 3 : index
    %c0_24 = arith.constant 0 : index
    %c0_25 = arith.constant 0 : index
    %27 = vector.load %arg2[%c3, %c0_24, %c0_25] : memref<9x16x128xbf16, #tpu.memory_space<vmem>>, vector<1x16x128xbf16>
    %28 = vector.shape_cast %27 : vector<1x16x128xbf16> to vector<16x128xbf16>
    %cst_26 = arith.constant dense<0.000000e+00> : vector<64x128xf32>
    %29 = tpu.matmul %26, %28, %cst_26 {dimension_numbers = #tpu.dot_dimension_numbers<[1], [0], [0], [1], [0, 0, 1, 1], [], []>} : vector<64x16xbf16>, vector<16x128xbf16>, vector<64x128xf32> -> vector<64x128xf32>
    %30 = arith.addf %22, %29 : vector<64x128xf32>
    %c0_27 = arith.constant 0 : index
    %c1_28 = arith.constant 1 : index
    %c1_29 = arith.constant 1 : index
    %c0_30 = arith.constant 0 : index
    %31 = vector.load %arg1[%c0_27, %c1_28, %c1_29, %c0_30] : memref<1x10x10x16xf32, #tpu.memory_space<vmem>>, vector<1x8x8x16xf32>
    %32 = vector.shape_cast %31 : vector<1x8x8x16xf32> to vector<8x8x16xf32>
    %33 = vector.shape_cast %32 : vector<8x8x16xf32> to vector<64x16xf32>
    %34 = arith.truncf %33 : vector<64x16xf32> to vector<64x16xbf16>
    %c4 = arith.constant 4 : index
    %c0_31 = arith.constant 0 : index
    %c0_32 = arith.constant 0 : index
    %35 = vector.load %arg2[%c4, %c0_31, %c0_32] : memref<9x16x128xbf16, #tpu.memory_space<vmem>>, vector<1x16x128xbf16>
    %36 = vector.shape_cast %35 : vector<1x16x128xbf16> to vector<16x128xbf16>
    %cst_33 = arith.constant dense<0.000000e+00> : vector<64x128xf32>
    %37 = tpu.matmul %34, %36, %cst_33 {dimension_numbers = #tpu.dot_dimension_numbers<[1], [0], [0], [1], [0, 0, 1, 1], [], []>} : vector<64x16xbf16>, vector<16x128xbf16>, vector<64x128xf32> -> vector<64x128xf32>
    %38 = arith.addf %30, %37 : vector<64x128xf32>
    %c0_34 = arith.constant 0 : index
    %c1_35 = arith.constant 1 : index
    %c2_36 = arith.constant 2 : index
    %c0_37 = arith.constant 0 : index
    %39 = vector.load %arg1[%c0_34, %c1_35, %c2_36, %c0_37] : memref<1x10x10x16xf32, #tpu.memory_space<vmem>>, vector<1x8x8x16xf32>
    %40 = vector.shape_cast %39 : vector<1x8x8x16xf32> to vector<8x8x16xf32>
    %41 = vector.shape_cast %40 : vector<8x8x16xf32> to vector<64x16xf32>
    %42 = arith.truncf %41 : vector<64x16xf32> to vector<64x16xbf16>
    %c5 = arith.constant 5 : index
    %c0_38 = arith.constant 0 : index
    %c0_39 = arith.constant 0 : index
    %43 = vector.load %arg2[%c5, %c0_38, %c0_39] : memref<9x16x128xbf16, #tpu.memory_space<vmem>>, vector<1x16x128xbf16>
    %44 = vector.shape_cast %43 : vector<1x16x128xbf16> to vector<16x128xbf16>
    %cst_40 = arith.constant dense<0.000000e+00> : vector<64x128xf32>
    %45 = tpu.matmul %42, %44, %cst_40 {dimension_numbers = #tpu.dot_dimension_numbers<[1], [0], [0], [1], [0, 0, 1, 1], [], []>} : vector<64x16xbf16>, vector<16x128xbf16>, vector<64x128xf32> -> vector<64x128xf32>
    %46 = arith.addf %38, %45 : vector<64x128xf32>
    %c0_41 = arith.constant 0 : index
    %c2_42 = arith.constant 2 : index
    %c0_43 = arith.constant 0 : index
    %c0_44 = arith.constant 0 : index
    %47 = vector.load %arg1[%c0_41, %c2_42, %c0_43, %c0_44] : memref<1x10x10x16xf32, #tpu.memory_space<vmem>>, vector<1x8x8x16xf32>
    %48 = vector.shape_cast %47 : vector<1x8x8x16xf32> to vector<8x8x16xf32>
    %49 = vector.shape_cast %48 : vector<8x8x16xf32> to vector<64x16xf32>
    %50 = arith.truncf %49 : vector<64x16xf32> to vector<64x16xbf16>
    %c6 = arith.constant 6 : index
    %c0_45 = arith.constant 0 : index
    %c0_46 = arith.constant 0 : index
    %51 = vector.load %arg2[%c6, %c0_45, %c0_46] : memref<9x16x128xbf16, #tpu.memory_space<vmem>>, vector<1x16x128xbf16>
    %52 = vector.shape_cast %51 : vector<1x16x128xbf16> to vector<16x128xbf16>
    %cst_47 = arith.constant dense<0.000000e+00> : vector<64x128xf32>
    %53 = tpu.matmul %50, %52, %cst_47 {dimension_numbers = #tpu.dot_dimension_numbers<[1], [0], [0], [1], [0, 0, 1, 1], [], []>} : vector<64x16xbf16>, vector<16x128xbf16>, vector<64x128xf32> -> vector<64x128xf32>
    %54 = arith.addf %46, %53 : vector<64x128xf32>
    %c0_48 = arith.constant 0 : index
    %c2_49 = arith.constant 2 : index
    %c1_50 = arith.constant 1 : index
    %c0_51 = arith.constant 0 : index
    %55 = vector.load %arg1[%c0_48, %c2_49, %c1_50, %c0_51] : memref<1x10x10x16xf32, #tpu.memory_space<vmem>>, vector<1x8x8x16xf32>
    %56 = vector.shape_cast %55 : vector<1x8x8x16xf32> to vector<8x8x16xf32>
    %57 = vector.shape_cast %56 : vector<8x8x16xf32> to vector<64x16xf32>
    %58 = arith.truncf %57 : vector<64x16xf32> to vector<64x16xbf16>
    %c7 = arith.constant 7 : index
    %c0_52 = arith.constant 0 : index
    %c0_53 = arith.constant 0 : index
    %59 = vector.load %arg2[%c7, %c0_52, %c0_53] : memref<9x16x128xbf16, #tpu.memory_space<vmem>>, vector<1x16x128xbf16>
    %60 = vector.shape_cast %59 : vector<1x16x128xbf16> to vector<16x128xbf16>
    %cst_54 = arith.constant dense<0.000000e+00> : vector<64x128xf32>
    %61 = tpu.matmul %58, %60, %cst_54 {dimension_numbers = #tpu.dot_dimension_numbers<[1], [0], [0], [1], [0, 0, 1, 1], [], []>} : vector<64x16xbf16>, vector<16x128xbf16>, vector<64x128xf32> -> vector<64x128xf32>
    %62 = arith.addf %54, %61 : vector<64x128xf32>
    %c0_55 = arith.constant 0 : index
    %c2_56 = arith.constant 2 : index
    %c2_57 = arith.constant 2 : index
    %c0_58 = arith.constant 0 : index
    %63 = vector.load %arg1[%c0_55, %c2_56, %c2_57, %c0_58] : memref<1x10x10x16xf32, #tpu.memory_space<vmem>>, vector<1x8x8x16xf32>
    %64 = vector.shape_cast %63 : vector<1x8x8x16xf32> to vector<8x8x16xf32>
    %65 = vector.shape_cast %64 : vector<8x8x16xf32> to vector<64x16xf32>
    %66 = arith.truncf %65 : vector<64x16xf32> to vector<64x16xbf16>
    %c8 = arith.constant 8 : index
    %c0_59 = arith.constant 0 : index
    %c0_60 = arith.constant 0 : index
    %67 = vector.load %arg2[%c8, %c0_59, %c0_60] : memref<9x16x128xbf16, #tpu.memory_space<vmem>>, vector<1x16x128xbf16>
    %68 = vector.shape_cast %67 : vector<1x16x128xbf16> to vector<16x128xbf16>
    %cst_61 = arith.constant dense<0.000000e+00> : vector<64x128xf32>
    %69 = tpu.matmul %66, %68, %cst_61 {dimension_numbers = #tpu.dot_dimension_numbers<[1], [0], [0], [1], [0, 0, 1, 1], [], []>} : vector<64x16xbf16>, vector<16x128xbf16>, vector<64x128xf32> -> vector<64x128xf32>
    %70 = arith.addf %62, %69 : vector<64x128xf32>
    %c0_62 = arith.constant 0 : index
    %c0_63 = arith.constant 0 : index
    %71 = vector.load %arg3[%c0_62, %c0_63] : memref<1x128xf32, #tpu.memory_space<vmem>>, vector<1x128xf32>
    %72 = vector.broadcast %71 : vector<1x128xf32> to vector<64x128xf32>
    %73 = arith.mulf %70, %72 : vector<64x128xf32>
    %c0_64 = arith.constant 0 : index
    %c0_65 = arith.constant 0 : index
    %74 = vector.load %arg4[%c0_64, %c0_65] : memref<1x128xf32, #tpu.memory_space<vmem>>, vector<1x128xf32>
    %75 = vector.broadcast %74 : vector<1x128xf32> to vector<64x128xf32>
    %76 = arith.addf %73, %75 : vector<64x128xf32>
    %cst_66 = arith.constant 1.702000e+00 : f32
    %77 = vector.broadcast %cst_66 : f32 to vector<64x128xf32>
    %78 = arith.mulf %77, %76 : vector<64x128xf32>
    %79 = arith.negf %78 : vector<64x128xf32>
    %80 = math.exp %79 : vector<64x128xf32>
    %cst_67 = arith.constant 1.000000e+00 : f32
    %81 = vector.broadcast %cst_67 : f32 to vector<64x128xf32>
    %82 = arith.addf %81, %80 : vector<64x128xf32>
    %83 = arith.divf %81, %82 : vector<64x128xf32>
    %84 = arith.mulf %76, %83 : vector<64x128xf32>
    %85 = vector.shape_cast %84 : vector<64x128xf32> to vector<8x8x128xf32>
    %c0_68 = arith.constant 0 : index
    %c0_69 = arith.constant 0 : index
    %c0_70 = arith.constant 0 : index
    %c0_71 = arith.constant 0 : index
    %86 = vector.load %arg5[%c0_68, %c0_69, %c0_70, %c0_71] : memref<1x8x8x128xf32, #tpu.memory_space<vmem>>, vector<1x8x8x128xf32>
    %87 = vector.shape_cast %86 : vector<1x8x8x128xf32> to vector<8x8x128xf32>
    %88 = vector.shape_cast %85 : vector<8x8x128xf32> to vector<1x8x8x128xf32>
    tpu.vector_store %arg5[%c0_68, %c0_69, %c0_70, %c0_71], %88 {strides = array<i32>} : memref<1x8x8x128xf32, #tpu.memory_space<vmem>>, vector<1x8x8x128xf32>,
    return
  }
  func.func @transform_0(%arg0: i32) -> (i32, i32, i32, i32) {
    %c0_i32 = arith.constant 0 : i32
    %c0_i32_0 = arith.constant 0 : i32
    %c0_i32_1 = arith.constant 0 : i32
    %c0_i32_2 = arith.constant 0 : i32
    return %arg0, %c0_i32, %c0_i32_0, %c0_i32_1 : i32, i32, i32, i32
  }
  func.func @transform_1(%arg0: i32) -> (i32, i32, i32) {
    %c0_i32 = arith.constant 0 : i32
    %c0_i32_0 = arith.constant 0 : i32
    %c0_i32_1 = arith.constant 0 : i32
    %c0_i32_2 = arith.constant 0 : i32
    return %c0_i32, %c0_i32_0, %c0_i32_1 : i32, i32, i32
  }
  func.func @transform_2(%arg0: i32) -> (i32, i32) {
    %c0_i32 = arith.constant 0 : i32
    %c0_i32_0 = arith.constant 0 : i32
    %c0_i32_1 = arith.constant 0 : i32
    return %c0_i32, %c0_i32_0 : i32, i32
  }
  func.func @transform_3(%arg0: i32) -> (i32, i32) {
    %c0_i32 = arith.constant 0 : i32
    %c0_i32_0 = arith.constant 0 : i32
    %c0_i32_1 = arith.constant 0 : i32
    return %c0_i32, %c0_i32_0 : i32, i32
  }
  func.func @transform_4(%arg0: i32) -> (i32, i32, i32, i32) {
    %c0_i32 = arith.constant 0 : i32
    %c0_i32_0 = arith.constant 0 : i32
    %c0_i32_1 = arith.constant 0 : i32
    %c0_i32_2 = arith.constant 0 : i32
    return %arg0, %c0_i32, %c0_i32_0, %c0_i32_1 : i32, i32, i32, i32
  }
}

module attributes {stable_mosaic.version = 11 : i64} {
  func.func @_resblock_kernel(%arg0: i32, %arg1: memref<1x10x10x16xf32, #tpu.memory_space<vmem>>, %arg2: memref<9x16x16xbf16, #tpu.memory_space<vmem>>, %arg3: memref<1x16xf32, #tpu.memory_space<vmem>>, %arg4: memref<1x16xf32, #tpu.memory_space<vmem>>, %arg5: memref<16x16xbf16, #tpu.memory_space<vmem>>, %arg6: memref<1x16xf32, #tpu.memory_space<vmem>>, %arg7: memref<1x16xf32, #tpu.memory_space<vmem>>, %arg8: memref<1x8x8x16xf32, #tpu.memory_space<vmem>>) attributes {dimension_semantics = [#tpu.dimension_semantics<parallel>], iteration_bounds = array<i64: 2>, scalar_prefetch = 0 : i64, scratch_operands = 0 : i64, tpu.core_type = #tpu.core_type<tc>, window_params = [{transform_indices = @transform_0, window_bounds = array<i64: 1, 10, 10, 16>}, {pipeline_mode = #tpu.pipeline_mode<synchronous>, transform_indices = @transform_1, window_bounds = array<i64: 9, 16, 16>}, {pipeline_mode = #tpu.pipeline_mode<synchronous>, transform_indices = @transform_2, window_bounds = array<i64: 1, 16>}, {pipeline_mode = #tpu.pipeline_mode<synchronous>, transform_indices = @transform_3, window_bounds = array<i64: 1, 16>}, {pipeline_mode = #tpu.pipeline_mode<synchronous>, transform_indices = @transform_4, window_bounds = array<i64: 16, 16>}, {pipeline_mode = #tpu.pipeline_mode<synchronous>, transform_indices = @transform_5, window_bounds = array<i64: 1, 16>}, {pipeline_mode = #tpu.pipeline_mode<synchronous>, transform_indices = @transform_6, window_bounds = array<i64: 1, 16>}, {transform_indices = @transform_7, window_bounds = array<i64: 1, 8, 8, 16>}]} {
    %c0 = arith.constant 0 : index
    %c0_0 = arith.constant 0 : index
    %c0_1 = arith.constant 0 : index
    %c0_2 = arith.constant 0 : index
    %0 = vector.load %arg1[%c0, %c0_0, %c0_1, %c0_2] : memref<1x10x10x16xf32, #tpu.memory_space<vmem>>, vector<1x8x8x16xf32>
    %1 = vector.shape_cast %0 : vector<1x8x8x16xf32> to vector<8x8x16xf32>
    %2 = vector.shape_cast %1 : vector<8x8x16xf32> to vector<64x16xf32>
    %3 = arith.truncf %2 : vector<64x16xf32> to vector<64x16xbf16>
    %c0_3 = arith.constant 0 : index
    %c0_4 = arith.constant 0 : index
    %c0_5 = arith.constant 0 : index
    %4 = vector.load %arg2[%c0_3, %c0_4, %c0_5] : memref<9x16x16xbf16, #tpu.memory_space<vmem>>, vector<1x16x16xbf16>
    %5 = vector.shape_cast %4 : vector<1x16x16xbf16> to vector<16x16xbf16>
    %cst = arith.constant dense<0.000000e+00> : vector<64x16xf32>
    %6 = tpu.matmul %3, %5, %cst {dimension_numbers = #tpu.dot_dimension_numbers<[1], [0], [0], [1], [0, 0, 1, 1], [], []>} : vector<64x16xbf16>, vector<16x16xbf16>, vector<64x16xf32> -> vector<64x16xf32>
    %c0_6 = arith.constant 0 : index
    %c0_7 = arith.constant 0 : index
    %c1 = arith.constant 1 : index
    %c0_8 = arith.constant 0 : index
    %7 = vector.load %arg1[%c0_6, %c0_7, %c1, %c0_8] : memref<1x10x10x16xf32, #tpu.memory_space<vmem>>, vector<1x8x8x16xf32>
    %8 = vector.shape_cast %7 : vector<1x8x8x16xf32> to vector<8x8x16xf32>
    %9 = vector.shape_cast %8 : vector<8x8x16xf32> to vector<64x16xf32>
    %10 = arith.truncf %9 : vector<64x16xf32> to vector<64x16xbf16>
    %c1_9 = arith.constant 1 : index
    %c0_10 = arith.constant 0 : index
    %c0_11 = arith.constant 0 : index
    %11 = vector.load %arg2[%c1_9, %c0_10, %c0_11] : memref<9x16x16xbf16, #tpu.memory_space<vmem>>, vector<1x16x16xbf16>
    %12 = vector.shape_cast %11 : vector<1x16x16xbf16> to vector<16x16xbf16>
    %cst_12 = arith.constant dense<0.000000e+00> : vector<64x16xf32>
    %13 = tpu.matmul %10, %12, %cst_12 {dimension_numbers = #tpu.dot_dimension_numbers<[1], [0], [0], [1], [0, 0, 1, 1], [], []>} : vector<64x16xbf16>, vector<16x16xbf16>, vector<64x16xf32> -> vector<64x16xf32>
    %14 = arith.addf %6, %13 : vector<64x16xf32>
    %c0_13 = arith.constant 0 : index
    %c0_14 = arith.constant 0 : index
    %c2 = arith.constant 2 : index
    %c0_15 = arith.constant 0 : index
    %15 = vector.load %arg1[%c0_13, %c0_14, %c2, %c0_15] : memref<1x10x10x16xf32, #tpu.memory_space<vmem>>, vector<1x8x8x16xf32>
    %16 = vector.shape_cast %15 : vector<1x8x8x16xf32> to vector<8x8x16xf32>
    %17 = vector.shape_cast %16 : vector<8x8x16xf32> to vector<64x16xf32>
    %18 = arith.truncf %17 : vector<64x16xf32> to vector<64x16xbf16>
    %c2_16 = arith.constant 2 : index
    %c0_17 = arith.constant 0 : index
    %c0_18 = arith.constant 0 : index
    %19 = vector.load %arg2[%c2_16, %c0_17, %c0_18] : memref<9x16x16xbf16, #tpu.memory_space<vmem>>, vector<1x16x16xbf16>
    %20 = vector.shape_cast %19 : vector<1x16x16xbf16> to vector<16x16xbf16>
    %cst_19 = arith.constant dense<0.000000e+00> : vector<64x16xf32>
    %21 = tpu.matmul %18, %20, %cst_19 {dimension_numbers = #tpu.dot_dimension_numbers<[1], [0], [0], [1], [0, 0, 1, 1], [], []>} : vector<64x16xbf16>, vector<16x16xbf16>, vector<64x16xf32> -> vector<64x16xf32>
    %22 = arith.addf %14, %21 : vector<64x16xf32>
    %c0_20 = arith.constant 0 : index
    %c1_21 = arith.constant 1 : index
    %c0_22 = arith.constant 0 : index
    %c0_23 = arith.constant 0 : index
    %23 = vector.load %arg1[%c0_20, %c1_21, %c0_22, %c0_23] : memref<1x10x10x16xf32, #tpu.memory_space<vmem>>, vector<1x8x8x16xf32>
    %24 = vector.shape_cast %23 : vector<1x8x8x16xf32> to vector<8x8x16xf32>
    %25 = vector.shape_cast %24 : vector<8x8x16xf32> to vector<64x16xf32>
    %26 = arith.truncf %25 : vector<64x16xf32> to vector<64x16xbf16>
    %c3 = arith.constant 3 : index
    %c0_24 = arith.constant 0 : index
    %c0_25 = arith.constant 0 : index
    %27 = vector.load %arg2[%c3, %c0_24, %c0_25] : memref<9x16x16xbf16, #tpu.memory_space<vmem>>, vector<1x16x16xbf16>
    %28 = vector.shape_cast %27 : vector<1x16x16xbf16> to vector<16x16xbf16>
    %cst_26 = arith.constant dense<0.000000e+00> : vector<64x16xf32>
    %29 = tpu.matmul %26, %28, %cst_26 {dimension_numbers = #tpu.dot_dimension_numbers<[1], [0], [0], [1], [0, 0, 1, 1], [], []>} : vector<64x16xbf16>, vector<16x16xbf16>, vector<64x16xf32> -> vector<64x16xf32>
    %30 = arith.addf %22, %29 : vector<64x16xf32>
    %c0_27 = arith.constant 0 : index
    %c1_28 = arith.constant 1 : index
    %c1_29 = arith.constant 1 : index
    %c0_30 = arith.constant 0 : index
    %31 = vector.load %arg1[%c0_27, %c1_28, %c1_29, %c0_30] : memref<1x10x10x16xf32, #tpu.memory_space<vmem>>, vector<1x8x8x16xf32>
    %32 = vector.shape_cast %31 : vector<1x8x8x16xf32> to vector<8x8x16xf32>
    %33 = vector.shape_cast %32 : vector<8x8x16xf32> to vector<64x16xf32>
    %34 = arith.truncf %33 : vector<64x16xf32> to vector<64x16xbf16>
    %c4 = arith.constant 4 : index
    %c0_31 = arith.constant 0 : index
    %c0_32 = arith.constant 0 : index
    %35 = vector.load %arg2[%c4, %c0_31, %c0_32] : memref<9x16x16xbf16, #tpu.memory_space<vmem>>, vector<1x16x16xbf16>
    %36 = vector.shape_cast %35 : vector<1x16x16xbf16> to vector<16x16xbf16>
    %cst_33 = arith.constant dense<0.000000e+00> : vector<64x16xf32>
    %37 = tpu.matmul %34, %36, %cst_33 {dimension_numbers = #tpu.dot_dimension_numbers<[1], [0], [0], [1], [0, 0, 1, 1], [], []>} : vector<64x16xbf16>, vector<16x16xbf16>, vector<64x16xf32> -> vector<64x16xf32>
    %38 = arith.addf %30, %37 : vector<64x16xf32>
    %c0_34 = arith.constant 0 : index
    %c1_35 = arith.constant 1 : index
    %c2_36 = arith.constant 2 : index
    %c0_37 = arith.constant 0 : index
    %39 = vector.load %arg1[%c0_34, %c1_35, %c2_36, %c0_37] : memref<1x10x10x16xf32, #tpu.memory_space<vmem>>, vector<1x8x8x16xf32>
    %40 = vector.shape_cast %39 : vector<1x8x8x16xf32> to vector<8x8x16xf32>
    %41 = vector.shape_cast %40 : vector<8x8x16xf32> to vector<64x16xf32>
    %42 = arith.truncf %41 : vector<64x16xf32> to vector<64x16xbf16>
    %c5 = arith.constant 5 : index
    %c0_38 = arith.constant 0 : index
    %c0_39 = arith.constant 0 : index
    %43 = vector.load %arg2[%c5, %c0_38, %c0_39] : memref<9x16x16xbf16, #tpu.memory_space<vmem>>, vector<1x16x16xbf16>
    %44 = vector.shape_cast %43 : vector<1x16x16xbf16> to vector<16x16xbf16>
    %cst_40 = arith.constant dense<0.000000e+00> : vector<64x16xf32>
    %45 = tpu.matmul %42, %44, %cst_40 {dimension_numbers = #tpu.dot_dimension_numbers<[1], [0], [0], [1], [0, 0, 1, 1], [], []>} : vector<64x16xbf16>, vector<16x16xbf16>, vector<64x16xf32> -> vector<64x16xf32>
    %46 = arith.addf %38, %45 : vector<64x16xf32>
    %c0_41 = arith.constant 0 : index
    %c2_42 = arith.constant 2 : index
    %c0_43 = arith.constant 0 : index
    %c0_44 = arith.constant 0 : index
    %47 = vector.load %arg1[%c0_41, %c2_42, %c0_43, %c0_44] : memref<1x10x10x16xf32, #tpu.memory_space<vmem>>, vector<1x8x8x16xf32>
    %48 = vector.shape_cast %47 : vector<1x8x8x16xf32> to vector<8x8x16xf32>
    %49 = vector.shape_cast %48 : vector<8x8x16xf32> to vector<64x16xf32>
    %50 = arith.truncf %49 : vector<64x16xf32> to vector<64x16xbf16>
    %c6 = arith.constant 6 : index
    %c0_45 = arith.constant 0 : index
    %c0_46 = arith.constant 0 : index
    %51 = vector.load %arg2[%c6, %c0_45, %c0_46] : memref<9x16x16xbf16, #tpu.memory_space<vmem>>, vector<1x16x16xbf16>
    %52 = vector.shape_cast %51 : vector<1x16x16xbf16> to vector<16x16xbf16>
    %cst_47 = arith.constant dense<0.000000e+00> : vector<64x16xf32>
    %53 = tpu.matmul %50, %52, %cst_47 {dimension_numbers = #tpu.dot_dimension_numbers<[1], [0], [0], [1], [0, 0, 1, 1], [], []>} : vector<64x16xbf16>, vector<16x16xbf16>, vector<64x16xf32> -> vector<64x16xf32>
    %54 = arith.addf %46, %53 : vector<64x16xf32>
    %c0_48 = arith.constant 0 : index
    %c2_49 = arith.constant 2 : index
    %c1_50 = arith.constant 1 : index
    %c0_51 = arith.constant 0 : index
    %55 = vector.load %arg1[%c0_48, %c2_49, %c1_50, %c0_51] : memref<1x10x10x16xf32, #tpu.memory_space<vmem>>, vector<1x8x8x16xf32>
    %56 = vector.shape_cast %55 : vector<1x8x8x16xf32> to vector<8x8x16xf32>
    %57 = vector.shape_cast %56 : vector<8x8x16xf32> to vector<64x16xf32>
    %58 = arith.truncf %57 : vector<64x16xf32> to vector<64x16xbf16>
    %c7 = arith.constant 7 : index
    %c0_52 = arith.constant 0 : index
    %c0_53 = arith.constant 0 : index
    %59 = vector.load %arg2[%c7, %c0_52, %c0_53] : memref<9x16x16xbf16, #tpu.memory_space<vmem>>, vector<1x16x16xbf16>
    %60 = vector.shape_cast %59 : vector<1x16x16xbf16> to vector<16x16xbf16>
    %cst_54 = arith.constant dense<0.000000e+00> : vector<64x16xf32>
    %61 = tpu.matmul %58, %60, %cst_54 {dimension_numbers = #tpu.dot_dimension_numbers<[1], [0], [0], [1], [0, 0, 1, 1], [], []>} : vector<64x16xbf16>, vector<16x16xbf16>, vector<64x16xf32> -> vector<64x16xf32>
    %62 = arith.addf %54, %61 : vector<64x16xf32>
    %c0_55 = arith.constant 0 : index
    %c2_56 = arith.constant 2 : index
    %c2_57 = arith.constant 2 : index
    %c0_58 = arith.constant 0 : index
    %63 = vector.load %arg1[%c0_55, %c2_56, %c2_57, %c0_58] : memref<1x10x10x16xf32, #tpu.memory_space<vmem>>, vector<1x8x8x16xf32>
    %64 = vector.shape_cast %63 : vector<1x8x8x16xf32> to vector<8x8x16xf32>
    %65 = vector.shape_cast %64 : vector<8x8x16xf32> to vector<64x16xf32>
    %66 = arith.truncf %65 : vector<64x16xf32> to vector<64x16xbf16>
    %c8 = arith.constant 8 : index
    %c0_59 = arith.constant 0 : index
    %c0_60 = arith.constant 0 : index
    %67 = vector.load %arg2[%c8, %c0_59, %c0_60] : memref<9x16x16xbf16, #tpu.memory_space<vmem>>, vector<1x16x16xbf16>
    %68 = vector.shape_cast %67 : vector<1x16x16xbf16> to vector<16x16xbf16>
    %cst_61 = arith.constant dense<0.000000e+00> : vector<64x16xf32>
    %69 = tpu.matmul %66, %68, %cst_61 {dimension_numbers = #tpu.dot_dimension_numbers<[1], [0], [0], [1], [0, 0, 1, 1], [], []>} : vector<64x16xbf16>, vector<16x16xbf16>, vector<64x16xf32> -> vector<64x16xf32>
    %70 = arith.addf %62, %69 : vector<64x16xf32>
    %c0_62 = arith.constant 0 : index
    %c0_63 = arith.constant 0 : index
    %71 = vector.load %arg3[%c0_62, %c0_63] : memref<1x16xf32, #tpu.memory_space<vmem>>, vector<1x16xf32>
    %72 = vector.broadcast %71 : vector<1x16xf32> to vector<64x16xf32>
    %73 = arith.mulf %70, %72 : vector<64x16xf32>
    %c0_64 = arith.constant 0 : index
    %c0_65 = arith.constant 0 : index
    %74 = vector.load %arg4[%c0_64, %c0_65] : memref<1x16xf32, #tpu.memory_space<vmem>>, vector<1x16xf32>
    %75 = vector.broadcast %74 : vector<1x16xf32> to vector<64x16xf32>
    %76 = arith.addf %73, %75 : vector<64x16xf32>
    %cst_66 = arith.constant 0.000000e+00 : f32
    %77 = vector.broadcast %cst_66 : f32 to vector<64x16xf32>
    %78 = arith.cmpf oge, %76, %77 : vector<64x16xf32>
    %cst_67 = arith.constant 0.00999999977 : f32
    %79 = vector.broadcast %cst_67 : f32 to vector<64x16xf32>
    %80 = arith.mulf %79, %76 : vector<64x16xf32>
    %81 = arith.select %78, %76, %80 : vector<64x16xi1>, vector<64x16xf32>
    %82 = arith.truncf %81 : vector<64x16xf32> to vector<64x16xbf16>
    %c0_68 = arith.constant 0 : index
    %c0_69 = arith.constant 0 : index
    %83 = vector.load %arg5[%c0_68, %c0_69] : memref<16x16xbf16, #tpu.memory_space<vmem>>, vector<16x16xbf16>
    %cst_70 = arith.constant dense<0.000000e+00> : vector<64x16xf32>
    %84 = tpu.matmul %82, %83, %cst_70 {dimension_numbers = #tpu.dot_dimension_numbers<[1], [0], [0], [1], [0, 0, 1, 1], [], []>} : vector<64x16xbf16>, vector<16x16xbf16>, vector<64x16xf32> -> vector<64x16xf32>
    %c0_71 = arith.constant 0 : index
    %c0_72 = arith.constant 0 : index
    %85 = vector.load %arg6[%c0_71, %c0_72] : memref<1x16xf32, #tpu.memory_space<vmem>>, vector<1x16xf32>
    %86 = vector.broadcast %85 : vector<1x16xf32> to vector<64x16xf32>
    %87 = arith.mulf %84, %86 : vector<64x16xf32>
    %c0_73 = arith.constant 0 : index
    %c0_74 = arith.constant 0 : index
    %88 = vector.load %arg7[%c0_73, %c0_74] : memref<1x16xf32, #tpu.memory_space<vmem>>, vector<1x16xf32>
    %89 = vector.broadcast %88 : vector<1x16xf32> to vector<64x16xf32>
    %90 = arith.addf %87, %89 : vector<64x16xf32>
    %c0_75 = arith.constant 0 : index
    %c1_76 = arith.constant 1 : index
    %c1_77 = arith.constant 1 : index
    %c0_78 = arith.constant 0 : index
    %91 = vector.load %arg1[%c0_75, %c1_76, %c1_77, %c0_78] : memref<1x10x10x16xf32, #tpu.memory_space<vmem>>, vector<1x8x8x16xf32>
    %92 = vector.shape_cast %91 : vector<1x8x8x16xf32> to vector<8x8x16xf32>
    %93 = vector.shape_cast %92 : vector<8x8x16xf32> to vector<64x16xf32>
    %94 = arith.addf %90, %93 : vector<64x16xf32>
    %cst_79 = arith.constant 1.702000e+00 : f32
    %95 = vector.broadcast %cst_79 : f32 to vector<64x16xf32>
    %96 = arith.mulf %95, %94 : vector<64x16xf32>
    %97 = arith.negf %96 : vector<64x16xf32>
    %98 = math.exp %97 : vector<64x16xf32>
    %cst_80 = arith.constant 1.000000e+00 : f32
    %99 = vector.broadcast %cst_80 : f32 to vector<64x16xf32>
    %100 = arith.addf %99, %98 : vector<64x16xf32>
    %101 = arith.divf %99, %100 : vector<64x16xf32>
    %102 = arith.mulf %94, %101 : vector<64x16xf32>
    %103 = vector.shape_cast %102 : vector<64x16xf32> to vector<8x8x16xf32>
    %c0_81 = arith.constant 0 : index
    %c0_82 = arith.constant 0 : index
    %c0_83 = arith.constant 0 : index
    %c0_84 = arith.constant 0 : index
    %104 = vector.load %arg8[%c0_81, %c0_82, %c0_83, %c0_84] : memref<1x8x8x16xf32, #tpu.memory_space<vmem>>, vector<1x8x8x16xf32>
    %105 = vector.shape_cast %104 : vector<1x8x8x16xf32> to vector<8x8x16xf32>
    %106 = vector.shape_cast %103 : vector<8x8x16xf32> to vector<1x8x8x16xf32>
    tpu.vector_store %arg8[%c0_81, %c0_82, %c0_83, %c0_84], %106 {strides = array<i32>} : memref<1x8x8x16xf32, #tpu.memory_space<vmem>>, vector<1x8x8x16xf32>,
    return
  }
  func.func @transform_0(%arg0: i32) -> (i32, i32, i32, i32) {
    %c0_i32 = arith.constant 0 : i32
    %c0_i32_0 = arith.constant 0 : i32
    %c0_i32_1 = arith.constant 0 : i32
    %c0_i32_2 = arith.constant 0 : i32
    return %arg0, %c0_i32, %c0_i32_0, %c0_i32_1 : i32, i32, i32, i32
  }
  func.func @transform_1(%arg0: i32) -> (i32, i32, i32) {
    %c0_i32 = arith.constant 0 : i32
    %c0_i32_0 = arith.constant 0 : i32
    %c0_i32_1 = arith.constant 0 : i32
    %c0_i32_2 = arith.constant 0 : i32
    return %c0_i32, %c0_i32_0, %c0_i32_1 : i32, i32, i32
  }
  func.func @transform_2(%arg0: i32) -> (i32, i32) {
    %c0_i32 = arith.constant 0 : i32
    %c0_i32_0 = arith.constant 0 : i32
    %c0_i32_1 = arith.constant 0 : i32
    return %c0_i32, %c0_i32_0 : i32, i32
  }
  func.func @transform_3(%arg0: i32) -> (i32, i32) {
    %c0_i32 = arith.constant 0 : i32
    %c0_i32_0 = arith.constant 0 : i32
    %c0_i32_1 = arith.constant 0 : i32
    return %c0_i32, %c0_i32_0 : i32, i32
  }
  func.func @transform_4(%arg0: i32) -> (i32, i32) {
    %c0_i32 = arith.constant 0 : i32
    %c0_i32_0 = arith.constant 0 : i32
    %c0_i32_1 = arith.constant 0 : i32
    return %c0_i32, %c0_i32_0 : i32, i32
  }
  func.func @transform_5(%arg0: i32) -> (i32, i32) {
    %c0_i32 = arith.constant 0 : i32
    %c0_i32_0 = arith.constant 0 : i32
    %c0_i32_1 = arith.constant 0 : i32
    return %c0_i32, %c0_i32_0 : i32, i32
  }
  func.func @transform_6(%arg0: i32) -> (i32, i32) {
    %c0_i32 = arith.constant 0 : i32
    %c0_i32_0 = arith.constant 0 : i32
    %c0_i32_1 = arith.constant 0 : i32
    return %c0_i32, %c0_i32_0 : i32, i32
  }
  func.func @transform_7(%arg0: i32) -> (i32, i32, i32, i32) {
    %c0_i32 = arith.constant 0 : i32
    %c0_i32_0 = arith.constant 0 : i32
    %c0_i32_1 = arith.constant 0 : i32
    %c0_i32_2 = arith.constant 0 : i32
    return %arg0, %c0_i32, %c0_i32_0, %c0_i32_1 : i32, i32, i32, i32
  }
}

module attributes {stable_mosaic.version = 11 : i64} {
  func.func @kernel(%arg0: i32, %arg1: memref<1x18x18x32xf32, #tpu.memory_space<vmem>>, %arg2: memref<9x32x12xbf16, #tpu.memory_space<vmem>>, %arg3: memref<1x12xf32, #tpu.memory_space<vmem>>, %arg4: memref<1x12xf32, #tpu.memory_space<vmem>>, %arg5: memref<1x16x16x12xf32, #tpu.memory_space<vmem>>) attributes {dimension_semantics = [#tpu.dimension_semantics<parallel>], iteration_bounds = array<i64: 2>, scalar_prefetch = 0 : i64, scratch_operands = 0 : i64, tpu.core_type = #tpu.core_type<tc>, window_params = [{transform_indices = @transform_0, window_bounds = array<i64: 1, 18, 18, 32>}, {pipeline_mode = #tpu.pipeline_mode<synchronous>, transform_indices = @transform_1, window_bounds = array<i64: 9, 32, 12>}, {pipeline_mode = #tpu.pipeline_mode<synchronous>, transform_indices = @transform_2, window_bounds = array<i64: 1, 12>}, {pipeline_mode = #tpu.pipeline_mode<synchronous>, transform_indices = @transform_3, window_bounds = array<i64: 1, 12>}, {transform_indices = @transform_4, window_bounds = array<i64: 1, 16, 16, 12>}]} {
    %c0 = arith.constant 0 : index
    %c0_0 = arith.constant 0 : index
    %c0_1 = arith.constant 0 : index
    %c0_2 = arith.constant 0 : index
    %0 = vector.load %arg1[%c0, %c0_0, %c0_1, %c0_2] : memref<1x18x18x32xf32, #tpu.memory_space<vmem>>, vector<1x16x16x32xf32>
    %1 = vector.shape_cast %0 : vector<1x16x16x32xf32> to vector<16x16x32xf32>
    %2 = vector.shape_cast %1 : vector<16x16x32xf32> to vector<256x32xf32>
    %3 = arith.truncf %2 : vector<256x32xf32> to vector<256x32xbf16>
    %c0_3 = arith.constant 0 : index
    %c0_4 = arith.constant 0 : index
    %c0_5 = arith.constant 0 : index
    %4 = vector.load %arg2[%c0_3, %c0_4, %c0_5] : memref<9x32x12xbf16, #tpu.memory_space<vmem>>, vector<1x32x12xbf16>
    %5 = vector.shape_cast %4 : vector<1x32x12xbf16> to vector<32x12xbf16>
    %cst = arith.constant dense<0.000000e+00> : vector<256x12xf32>
    %6 = tpu.matmul %3, %5, %cst {dimension_numbers = #tpu.dot_dimension_numbers<[1], [0], [0], [1], [0, 0, 1, 1], [], []>} : vector<256x32xbf16>, vector<32x12xbf16>, vector<256x12xf32> -> vector<256x12xf32>
    %c0_6 = arith.constant 0 : index
    %c0_7 = arith.constant 0 : index
    %c1 = arith.constant 1 : index
    %c0_8 = arith.constant 0 : index
    %7 = vector.load %arg1[%c0_6, %c0_7, %c1, %c0_8] : memref<1x18x18x32xf32, #tpu.memory_space<vmem>>, vector<1x16x16x32xf32>
    %8 = vector.shape_cast %7 : vector<1x16x16x32xf32> to vector<16x16x32xf32>
    %9 = vector.shape_cast %8 : vector<16x16x32xf32> to vector<256x32xf32>
    %10 = arith.truncf %9 : vector<256x32xf32> to vector<256x32xbf16>
    %c1_9 = arith.constant 1 : index
    %c0_10 = arith.constant 0 : index
    %c0_11 = arith.constant 0 : index
    %11 = vector.load %arg2[%c1_9, %c0_10, %c0_11] : memref<9x32x12xbf16, #tpu.memory_space<vmem>>, vector<1x32x12xbf16>
    %12 = vector.shape_cast %11 : vector<1x32x12xbf16> to vector<32x12xbf16>
    %cst_12 = arith.constant dense<0.000000e+00> : vector<256x12xf32>
    %13 = tpu.matmul %10, %12, %cst_12 {dimension_numbers = #tpu.dot_dimension_numbers<[1], [0], [0], [1], [0, 0, 1, 1], [], []>} : vector<256x32xbf16>, vector<32x12xbf16>, vector<256x12xf32> -> vector<256x12xf32>
    %14 = arith.addf %6, %13 : vector<256x12xf32>
    %c0_13 = arith.constant 0 : index
    %c0_14 = arith.constant 0 : index
    %c2 = arith.constant 2 : index
    %c0_15 = arith.constant 0 : index
    %15 = vector.load %arg1[%c0_13, %c0_14, %c2, %c0_15] : memref<1x18x18x32xf32, #tpu.memory_space<vmem>>, vector<1x16x16x32xf32>
    %16 = vector.shape_cast %15 : vector<1x16x16x32xf32> to vector<16x16x32xf32>
    %17 = vector.shape_cast %16 : vector<16x16x32xf32> to vector<256x32xf32>
    %18 = arith.truncf %17 : vector<256x32xf32> to vector<256x32xbf16>
    %c2_16 = arith.constant 2 : index
    %c0_17 = arith.constant 0 : index
    %c0_18 = arith.constant 0 : index
    %19 = vector.load %arg2[%c2_16, %c0_17, %c0_18] : memref<9x32x12xbf16, #tpu.memory_space<vmem>>, vector<1x32x12xbf16>
    %20 = vector.shape_cast %19 : vector<1x32x12xbf16> to vector<32x12xbf16>
    %cst_19 = arith.constant dense<0.000000e+00> : vector<256x12xf32>
    %21 = tpu.matmul %18, %20, %cst_19 {dimension_numbers = #tpu.dot_dimension_numbers<[1], [0], [0], [1], [0, 0, 1, 1], [], []>} : vector<256x32xbf16>, vector<32x12xbf16>, vector<256x12xf32> -> vector<256x12xf32>
    %22 = arith.addf %14, %21 : vector<256x12xf32>
    %c0_20 = arith.constant 0 : index
    %c1_21 = arith.constant 1 : index
    %c0_22 = arith.constant 0 : index
    %c0_23 = arith.constant 0 : index
    %23 = vector.load %arg1[%c0_20, %c1_21, %c0_22, %c0_23] : memref<1x18x18x32xf32, #tpu.memory_space<vmem>>, vector<1x16x16x32xf32>
    %24 = vector.shape_cast %23 : vector<1x16x16x32xf32> to vector<16x16x32xf32>
    %25 = vector.shape_cast %24 : vector<16x16x32xf32> to vector<256x32xf32>
    %26 = arith.truncf %25 : vector<256x32xf32> to vector<256x32xbf16>
    %c3 = arith.constant 3 : index
    %c0_24 = arith.constant 0 : index
    %c0_25 = arith.constant 0 : index
    %27 = vector.load %arg2[%c3, %c0_24, %c0_25] : memref<9x32x12xbf16, #tpu.memory_space<vmem>>, vector<1x32x12xbf16>
    %28 = vector.shape_cast %27 : vector<1x32x12xbf16> to vector<32x12xbf16>
    %cst_26 = arith.constant dense<0.000000e+00> : vector<256x12xf32>
    %29 = tpu.matmul %26, %28, %cst_26 {dimension_numbers = #tpu.dot_dimension_numbers<[1], [0], [0], [1], [0, 0, 1, 1], [], []>} : vector<256x32xbf16>, vector<32x12xbf16>, vector<256x12xf32> -> vector<256x12xf32>
    %30 = arith.addf %22, %29 : vector<256x12xf32>
    %c0_27 = arith.constant 0 : index
    %c1_28 = arith.constant 1 : index
    %c1_29 = arith.constant 1 : index
    %c0_30 = arith.constant 0 : index
    %31 = vector.load %arg1[%c0_27, %c1_28, %c1_29, %c0_30] : memref<1x18x18x32xf32, #tpu.memory_space<vmem>>, vector<1x16x16x32xf32>
    %32 = vector.shape_cast %31 : vector<1x16x16x32xf32> to vector<16x16x32xf32>
    %33 = vector.shape_cast %32 : vector<16x16x32xf32> to vector<256x32xf32>
    %34 = arith.truncf %33 : vector<256x32xf32> to vector<256x32xbf16>
    %c4 = arith.constant 4 : index
    %c0_31 = arith.constant 0 : index
    %c0_32 = arith.constant 0 : index
    %35 = vector.load %arg2[%c4, %c0_31, %c0_32] : memref<9x32x12xbf16, #tpu.memory_space<vmem>>, vector<1x32x12xbf16>
    %36 = vector.shape_cast %35 : vector<1x32x12xbf16> to vector<32x12xbf16>
    %cst_33 = arith.constant dense<0.000000e+00> : vector<256x12xf32>
    %37 = tpu.matmul %34, %36, %cst_33 {dimension_numbers = #tpu.dot_dimension_numbers<[1], [0], [0], [1], [0, 0, 1, 1], [], []>} : vector<256x32xbf16>, vector<32x12xbf16>, vector<256x12xf32> -> vector<256x12xf32>
    %38 = arith.addf %30, %37 : vector<256x12xf32>
    %c0_34 = arith.constant 0 : index
    %c1_35 = arith.constant 1 : index
    %c2_36 = arith.constant 2 : index
    %c0_37 = arith.constant 0 : index
    %39 = vector.load %arg1[%c0_34, %c1_35, %c2_36, %c0_37] : memref<1x18x18x32xf32, #tpu.memory_space<vmem>>, vector<1x16x16x32xf32>
    %40 = vector.shape_cast %39 : vector<1x16x16x32xf32> to vector<16x16x32xf32>
    %41 = vector.shape_cast %40 : vector<16x16x32xf32> to vector<256x32xf32>
    %42 = arith.truncf %41 : vector<256x32xf32> to vector<256x32xbf16>
    %c5 = arith.constant 5 : index
    %c0_38 = arith.constant 0 : index
    %c0_39 = arith.constant 0 : index
    %43 = vector.load %arg2[%c5, %c0_38, %c0_39] : memref<9x32x12xbf16, #tpu.memory_space<vmem>>, vector<1x32x12xbf16>
    %44 = vector.shape_cast %43 : vector<1x32x12xbf16> to vector<32x12xbf16>
    %cst_40 = arith.constant dense<0.000000e+00> : vector<256x12xf32>
    %45 = tpu.matmul %42, %44, %cst_40 {dimension_numbers = #tpu.dot_dimension_numbers<[1], [0], [0], [1], [0, 0, 1, 1], [], []>} : vector<256x32xbf16>, vector<32x12xbf16>, vector<256x12xf32> -> vector<256x12xf32>
    %46 = arith.addf %38, %45 : vector<256x12xf32>
    %c0_41 = arith.constant 0 : index
    %c2_42 = arith.constant 2 : index
    %c0_43 = arith.constant 0 : index
    %c0_44 = arith.constant 0 : index
    %47 = vector.load %arg1[%c0_41, %c2_42, %c0_43, %c0_44] : memref<1x18x18x32xf32, #tpu.memory_space<vmem>>, vector<1x16x16x32xf32>
    %48 = vector.shape_cast %47 : vector<1x16x16x32xf32> to vector<16x16x32xf32>
    %49 = vector.shape_cast %48 : vector<16x16x32xf32> to vector<256x32xf32>
    %50 = arith.truncf %49 : vector<256x32xf32> to vector<256x32xbf16>
    %c6 = arith.constant 6 : index
    %c0_45 = arith.constant 0 : index
    %c0_46 = arith.constant 0 : index
    %51 = vector.load %arg2[%c6, %c0_45, %c0_46] : memref<9x32x12xbf16, #tpu.memory_space<vmem>>, vector<1x32x12xbf16>
    %52 = vector.shape_cast %51 : vector<1x32x12xbf16> to vector<32x12xbf16>
    %cst_47 = arith.constant dense<0.000000e+00> : vector<256x12xf32>
    %53 = tpu.matmul %50, %52, %cst_47 {dimension_numbers = #tpu.dot_dimension_numbers<[1], [0], [0], [1], [0, 0, 1, 1], [], []>} : vector<256x32xbf16>, vector<32x12xbf16>, vector<256x12xf32> -> vector<256x12xf32>
    %54 = arith.addf %46, %53 : vector<256x12xf32>
    %c0_48 = arith.constant 0 : index
    %c2_49 = arith.constant 2 : index
    %c1_50 = arith.constant 1 : index
    %c0_51 = arith.constant 0 : index
    %55 = vector.load %arg1[%c0_48, %c2_49, %c1_50, %c0_51] : memref<1x18x18x32xf32, #tpu.memory_space<vmem>>, vector<1x16x16x32xf32>
    %56 = vector.shape_cast %55 : vector<1x16x16x32xf32> to vector<16x16x32xf32>
    %57 = vector.shape_cast %56 : vector<16x16x32xf32> to vector<256x32xf32>
    %58 = arith.truncf %57 : vector<256x32xf32> to vector<256x32xbf16>
    %c7 = arith.constant 7 : index
    %c0_52 = arith.constant 0 : index
    %c0_53 = arith.constant 0 : index
    %59 = vector.load %arg2[%c7, %c0_52, %c0_53] : memref<9x32x12xbf16, #tpu.memory_space<vmem>>, vector<1x32x12xbf16>
    %60 = vector.shape_cast %59 : vector<1x32x12xbf16> to vector<32x12xbf16>
    %cst_54 = arith.constant dense<0.000000e+00> : vector<256x12xf32>
    %61 = tpu.matmul %58, %60, %cst_54 {dimension_numbers = #tpu.dot_dimension_numbers<[1], [0], [0], [1], [0, 0, 1, 1], [], []>} : vector<256x32xbf16>, vector<32x12xbf16>, vector<256x12xf32> -> vector<256x12xf32>
    %62 = arith.addf %54, %61 : vector<256x12xf32>
    %c0_55 = arith.constant 0 : index
    %c2_56 = arith.constant 2 : index
    %c2_57 = arith.constant 2 : index
    %c0_58 = arith.constant 0 : index
    %63 = vector.load %arg1[%c0_55, %c2_56, %c2_57, %c0_58] : memref<1x18x18x32xf32, #tpu.memory_space<vmem>>, vector<1x16x16x32xf32>
    %64 = vector.shape_cast %63 : vector<1x16x16x32xf32> to vector<16x16x32xf32>
    %65 = vector.shape_cast %64 : vector<16x16x32xf32> to vector<256x32xf32>
    %66 = arith.truncf %65 : vector<256x32xf32> to vector<256x32xbf16>
    %c8 = arith.constant 8 : index
    %c0_59 = arith.constant 0 : index
    %c0_60 = arith.constant 0 : index
    %67 = vector.load %arg2[%c8, %c0_59, %c0_60] : memref<9x32x12xbf16, #tpu.memory_space<vmem>>, vector<1x32x12xbf16>
    %68 = vector.shape_cast %67 : vector<1x32x12xbf16> to vector<32x12xbf16>
    %cst_61 = arith.constant dense<0.000000e+00> : vector<256x12xf32>
    %69 = tpu.matmul %66, %68, %cst_61 {dimension_numbers = #tpu.dot_dimension_numbers<[1], [0], [0], [1], [0, 0, 1, 1], [], []>} : vector<256x32xbf16>, vector<32x12xbf16>, vector<256x12xf32> -> vector<256x12xf32>
    %70 = arith.addf %62, %69 : vector<256x12xf32>
    %c0_62 = arith.constant 0 : index
    %c0_63 = arith.constant 0 : index
    %71 = vector.load %arg3[%c0_62, %c0_63] : memref<1x12xf32, #tpu.memory_space<vmem>>, vector<1x12xf32>
    %72 = vector.broadcast %71 : vector<1x12xf32> to vector<256x12xf32>
    %73 = arith.mulf %70, %72 : vector<256x12xf32>
    %c0_64 = arith.constant 0 : index
    %c0_65 = arith.constant 0 : index
    %74 = vector.load %arg4[%c0_64, %c0_65] : memref<1x12xf32, #tpu.memory_space<vmem>>, vector<1x12xf32>
    %75 = vector.broadcast %74 : vector<1x12xf32> to vector<256x12xf32>
    %76 = arith.addf %73, %75 : vector<256x12xf32>
    %77 = math.tanh %76 : vector<256x12xf32>
    %78 = vector.shape_cast %77 : vector<256x12xf32> to vector<16x16x12xf32>
    %c0_66 = arith.constant 0 : index
    %c0_67 = arith.constant 0 : index
    %c0_68 = arith.constant 0 : index
    %c0_69 = arith.constant 0 : index
    %79 = vector.load %arg5[%c0_66, %c0_67, %c0_68, %c0_69] : memref<1x16x16x12xf32, #tpu.memory_space<vmem>>, vector<1x16x16x12xf32>
    %80 = vector.shape_cast %79 : vector<1x16x16x12xf32> to vector<16x16x12xf32>
    %81 = vector.shape_cast %78 : vector<16x16x12xf32> to vector<1x16x16x12xf32>
    tpu.vector_store %arg5[%c0_66, %c0_67, %c0_68, %c0_69], %81 {strides = array<i32>} : memref<1x16x16x12xf32, #tpu.memory_space<vmem>>, vector<1x16x16x12xf32>,
    return
  }
  func.func @transform_0(%arg0: i32) -> (i32, i32, i32, i32) {
    %c0_i32 = arith.constant 0 : i32
    %c0_i32_0 = arith.constant 0 : i32
    %c0_i32_1 = arith.constant 0 : i32
    %c0_i32_2 = arith.constant 0 : i32
    return %arg0, %c0_i32, %c0_i32_0, %c0_i32_1 : i32, i32, i32, i32
  }
  func.func @transform_1(%arg0: i32) -> (i32, i32, i32) {
    %c0_i32 = arith.constant 0 : i32
    %c0_i32_0 = arith.constant 0 : i32
    %c0_i32_1 = arith.constant 0 : i32
    %c0_i32_2 = arith.constant 0 : i32
    return %c0_i32, %c0_i32_0, %c0_i32_1 : i32, i32, i32
  }
  func.func @transform_2(%arg0: i32) -> (i32, i32) {
    %c0_i32 = arith.constant 0 : i32
    %c0_i32_0 = arith.constant 0 : i32
    %c0_i32_1 = arith.constant 0 : i32
    return %c0_i32, %c0_i32_0 : i32, i32
  }
  func.func @transform_3(%arg0: i32) -> (i32, i32) {
    %c0_i32 = arith.constant 0 : i32
    %c0_i32_0 = arith.constant 0 : i32
    %c0_i32_1 = arith.constant 0 : i32
    return %c0_i32, %c0_i32_0 : i32, i32
  }
  func.func @transform_4(%arg0: i32) -> (i32, i32, i32, i32) {
    %c0_i32 = arith.constant 0 : i32
    %c0_i32_0 = arith.constant 0 : i32
    %c0_i32_1 = arith.constant 0 : i32
    %c0_i32_2 = arith.constant 0 : i32
    return %arg0, %c0_i32, %c0_i32_0, %c0_i32_1 : i32, i32, i32, i32
  }
}

module attributes {stable_mosaic.version = 11 : i64} {
  func.func @_resblock_kernel(%arg0: i32, %arg1: memref<1x18x18x32xf32, #tpu.memory_space<vmem>>, %arg2: memref<9x32x32xbf16, #tpu.memory_space<vmem>>, %arg3: memref<1x32xf32, #tpu.memory_space<vmem>>, %arg4: memref<1x32xf32, #tpu.memory_space<vmem>>, %arg5: memref<32x32xbf16, #tpu.memory_space<vmem>>, %arg6: memref<1x32xf32, #tpu.memory_space<vmem>>, %arg7: memref<1x32xf32, #tpu.memory_space<vmem>>, %arg8: memref<1x16x16x32xf32, #tpu.memory_space<vmem>>) attributes {dimension_semantics = [#tpu.dimension_semantics<parallel>], iteration_bounds = array<i64: 2>, scalar_prefetch = 0 : i64, scratch_operands = 0 : i64, tpu.core_type = #tpu.core_type<tc>, window_params = [{transform_indices = @transform_0, window_bounds = array<i64: 1, 18, 18, 32>}, {pipeline_mode = #tpu.pipeline_mode<synchronous>, transform_indices = @transform_1, window_bounds = array<i64: 9, 32, 32>}, {pipeline_mode = #tpu.pipeline_mode<synchronous>, transform_indices = @transform_2, window_bounds = array<i64: 1, 32>}, {pipeline_mode = #tpu.pipeline_mode<synchronous>, transform_indices = @transform_3, window_bounds = array<i64: 1, 32>}, {pipeline_mode = #tpu.pipeline_mode<synchronous>, transform_indices = @transform_4, window_bounds = array<i64: 32, 32>}, {pipeline_mode = #tpu.pipeline_mode<synchronous>, transform_indices = @transform_5, window_bounds = array<i64: 1, 32>}, {pipeline_mode = #tpu.pipeline_mode<synchronous>, transform_indices = @transform_6, window_bounds = array<i64: 1, 32>}, {transform_indices = @transform_7, window_bounds = array<i64: 1, 16, 16, 32>}]} {
    %c0 = arith.constant 0 : index
    %c0_0 = arith.constant 0 : index
    %c0_1 = arith.constant 0 : index
    %c0_2 = arith.constant 0 : index
    %0 = vector.load %arg1[%c0, %c0_0, %c0_1, %c0_2] : memref<1x18x18x32xf32, #tpu.memory_space<vmem>>, vector<1x16x16x32xf32>
    %1 = vector.shape_cast %0 : vector<1x16x16x32xf32> to vector<16x16x32xf32>
    %2 = vector.shape_cast %1 : vector<16x16x32xf32> to vector<256x32xf32>
    %3 = arith.truncf %2 : vector<256x32xf32> to vector<256x32xbf16>
    %c0_3 = arith.constant 0 : index
    %c0_4 = arith.constant 0 : index
    %c0_5 = arith.constant 0 : index
    %4 = vector.load %arg2[%c0_3, %c0_4, %c0_5] : memref<9x32x32xbf16, #tpu.memory_space<vmem>>, vector<1x32x32xbf16>
    %5 = vector.shape_cast %4 : vector<1x32x32xbf16> to vector<32x32xbf16>
    %cst = arith.constant dense<0.000000e+00> : vector<256x32xf32>
    %6 = tpu.matmul %3, %5, %cst {dimension_numbers = #tpu.dot_dimension_numbers<[1], [0], [0], [1], [0, 0, 1, 1], [], []>} : vector<256x32xbf16>, vector<32x32xbf16>, vector<256x32xf32> -> vector<256x32xf32>
    %c0_6 = arith.constant 0 : index
    %c0_7 = arith.constant 0 : index
    %c1 = arith.constant 1 : index
    %c0_8 = arith.constant 0 : index
    %7 = vector.load %arg1[%c0_6, %c0_7, %c1, %c0_8] : memref<1x18x18x32xf32, #tpu.memory_space<vmem>>, vector<1x16x16x32xf32>
    %8 = vector.shape_cast %7 : vector<1x16x16x32xf32> to vector<16x16x32xf32>
    %9 = vector.shape_cast %8 : vector<16x16x32xf32> to vector<256x32xf32>
    %10 = arith.truncf %9 : vector<256x32xf32> to vector<256x32xbf16>
    %c1_9 = arith.constant 1 : index
    %c0_10 = arith.constant 0 : index
    %c0_11 = arith.constant 0 : index
    %11 = vector.load %arg2[%c1_9, %c0_10, %c0_11] : memref<9x32x32xbf16, #tpu.memory_space<vmem>>, vector<1x32x32xbf16>
    %12 = vector.shape_cast %11 : vector<1x32x32xbf16> to vector<32x32xbf16>
    %cst_12 = arith.constant dense<0.000000e+00> : vector<256x32xf32>
    %13 = tpu.matmul %10, %12, %cst_12 {dimension_numbers = #tpu.dot_dimension_numbers<[1], [0], [0], [1], [0, 0, 1, 1], [], []>} : vector<256x32xbf16>, vector<32x32xbf16>, vector<256x32xf32> -> vector<256x32xf32>
    %14 = arith.addf %6, %13 : vector<256x32xf32>
    %c0_13 = arith.constant 0 : index
    %c0_14 = arith.constant 0 : index
    %c2 = arith.constant 2 : index
    %c0_15 = arith.constant 0 : index
    %15 = vector.load %arg1[%c0_13, %c0_14, %c2, %c0_15] : memref<1x18x18x32xf32, #tpu.memory_space<vmem>>, vector<1x16x16x32xf32>
    %16 = vector.shape_cast %15 : vector<1x16x16x32xf32> to vector<16x16x32xf32>
    %17 = vector.shape_cast %16 : vector<16x16x32xf32> to vector<256x32xf32>
    %18 = arith.truncf %17 : vector<256x32xf32> to vector<256x32xbf16>
    %c2_16 = arith.constant 2 : index
    %c0_17 = arith.constant 0 : index
    %c0_18 = arith.constant 0 : index
    %19 = vector.load %arg2[%c2_16, %c0_17, %c0_18] : memref<9x32x32xbf16, #tpu.memory_space<vmem>>, vector<1x32x32xbf16>
    %20 = vector.shape_cast %19 : vector<1x32x32xbf16> to vector<32x32xbf16>
    %cst_19 = arith.constant dense<0.000000e+00> : vector<256x32xf32>
    %21 = tpu.matmul %18, %20, %cst_19 {dimension_numbers = #tpu.dot_dimension_numbers<[1], [0], [0], [1], [0, 0, 1, 1], [], []>} : vector<256x32xbf16>, vector<32x32xbf16>, vector<256x32xf32> -> vector<256x32xf32>
    %22 = arith.addf %14, %21 : vector<256x32xf32>
    %c0_20 = arith.constant 0 : index
    %c1_21 = arith.constant 1 : index
    %c0_22 = arith.constant 0 : index
    %c0_23 = arith.constant 0 : index
    %23 = vector.load %arg1[%c0_20, %c1_21, %c0_22, %c0_23] : memref<1x18x18x32xf32, #tpu.memory_space<vmem>>, vector<1x16x16x32xf32>
    %24 = vector.shape_cast %23 : vector<1x16x16x32xf32> to vector<16x16x32xf32>
    %25 = vector.shape_cast %24 : vector<16x16x32xf32> to vector<256x32xf32>
    %26 = arith.truncf %25 : vector<256x32xf32> to vector<256x32xbf16>
    %c3 = arith.constant 3 : index
    %c0_24 = arith.constant 0 : index
    %c0_25 = arith.constant 0 : index
    %27 = vector.load %arg2[%c3, %c0_24, %c0_25] : memref<9x32x32xbf16, #tpu.memory_space<vmem>>, vector<1x32x32xbf16>
    %28 = vector.shape_cast %27 : vector<1x32x32xbf16> to vector<32x32xbf16>
    %cst_26 = arith.constant dense<0.000000e+00> : vector<256x32xf32>
    %29 = tpu.matmul %26, %28, %cst_26 {dimension_numbers = #tpu.dot_dimension_numbers<[1], [0], [0], [1], [0, 0, 1, 1], [], []>} : vector<256x32xbf16>, vector<32x32xbf16>, vector<256x32xf32> -> vector<256x32xf32>
    %30 = arith.addf %22, %29 : vector<256x32xf32>
    %c0_27 = arith.constant 0 : index
    %c1_28 = arith.constant 1 : index
    %c1_29 = arith.constant 1 : index
    %c0_30 = arith.constant 0 : index
    %31 = vector.load %arg1[%c0_27, %c1_28, %c1_29, %c0_30] : memref<1x18x18x32xf32, #tpu.memory_space<vmem>>, vector<1x16x16x32xf32>
    %32 = vector.shape_cast %31 : vector<1x16x16x32xf32> to vector<16x16x32xf32>
    %33 = vector.shape_cast %32 : vector<16x16x32xf32> to vector<256x32xf32>
    %34 = arith.truncf %33 : vector<256x32xf32> to vector<256x32xbf16>
    %c4 = arith.constant 4 : index
    %c0_31 = arith.constant 0 : index
    %c0_32 = arith.constant 0 : index
    %35 = vector.load %arg2[%c4, %c0_31, %c0_32] : memref<9x32x32xbf16, #tpu.memory_space<vmem>>, vector<1x32x32xbf16>
    %36 = vector.shape_cast %35 : vector<1x32x32xbf16> to vector<32x32xbf16>
    %cst_33 = arith.constant dense<0.000000e+00> : vector<256x32xf32>
    %37 = tpu.matmul %34, %36, %cst_33 {dimension_numbers = #tpu.dot_dimension_numbers<[1], [0], [0], [1], [0, 0, 1, 1], [], []>} : vector<256x32xbf16>, vector<32x32xbf16>, vector<256x32xf32> -> vector<256x32xf32>
    %38 = arith.addf %30, %37 : vector<256x32xf32>
    %c0_34 = arith.constant 0 : index
    %c1_35 = arith.constant 1 : index
    %c2_36 = arith.constant 2 : index
    %c0_37 = arith.constant 0 : index
    %39 = vector.load %arg1[%c0_34, %c1_35, %c2_36, %c0_37] : memref<1x18x18x32xf32, #tpu.memory_space<vmem>>, vector<1x16x16x32xf32>
    %40 = vector.shape_cast %39 : vector<1x16x16x32xf32> to vector<16x16x32xf32>
    %41 = vector.shape_cast %40 : vector<16x16x32xf32> to vector<256x32xf32>
    %42 = arith.truncf %41 : vector<256x32xf32> to vector<256x32xbf16>
    %c5 = arith.constant 5 : index
    %c0_38 = arith.constant 0 : index
    %c0_39 = arith.constant 0 : index
    %43 = vector.load %arg2[%c5, %c0_38, %c0_39] : memref<9x32x32xbf16, #tpu.memory_space<vmem>>, vector<1x32x32xbf16>
    %44 = vector.shape_cast %43 : vector<1x32x32xbf16> to vector<32x32xbf16>
    %cst_40 = arith.constant dense<0.000000e+00> : vector<256x32xf32>
    %45 = tpu.matmul %42, %44, %cst_40 {dimension_numbers = #tpu.dot_dimension_numbers<[1], [0], [0], [1], [0, 0, 1, 1], [], []>} : vector<256x32xbf16>, vector<32x32xbf16>, vector<256x32xf32> -> vector<256x32xf32>
    %46 = arith.addf %38, %45 : vector<256x32xf32>
    %c0_41 = arith.constant 0 : index
    %c2_42 = arith.constant 2 : index
    %c0_43 = arith.constant 0 : index
    %c0_44 = arith.constant 0 : index
    %47 = vector.load %arg1[%c0_41, %c2_42, %c0_43, %c0_44] : memref<1x18x18x32xf32, #tpu.memory_space<vmem>>, vector<1x16x16x32xf32>
    %48 = vector.shape_cast %47 : vector<1x16x16x32xf32> to vector<16x16x32xf32>
    %49 = vector.shape_cast %48 : vector<16x16x32xf32> to vector<256x32xf32>
    %50 = arith.truncf %49 : vector<256x32xf32> to vector<256x32xbf16>
    %c6 = arith.constant 6 : index
    %c0_45 = arith.constant 0 : index
    %c0_46 = arith.constant 0 : index
    %51 = vector.load %arg2[%c6, %c0_45, %c0_46] : memref<9x32x32xbf16, #tpu.memory_space<vmem>>, vector<1x32x32xbf16>
    %52 = vector.shape_cast %51 : vector<1x32x32xbf16> to vector<32x32xbf16>
    %cst_47 = arith.constant dense<0.000000e+00> : vector<256x32xf32>
    %53 = tpu.matmul %50, %52, %cst_47 {dimension_numbers = #tpu.dot_dimension_numbers<[1], [0], [0], [1], [0, 0, 1, 1], [], []>} : vector<256x32xbf16>, vector<32x32xbf16>, vector<256x32xf32> -> vector<256x32xf32>
    %54 = arith.addf %46, %53 : vector<256x32xf32>
    %c0_48 = arith.constant 0 : index
    %c2_49 = arith.constant 2 : index
    %c1_50 = arith.constant 1 : index
    %c0_51 = arith.constant 0 : index
    %55 = vector.load %arg1[%c0_48, %c2_49, %c1_50, %c0_51] : memref<1x18x18x32xf32, #tpu.memory_space<vmem>>, vector<1x16x16x32xf32>
    %56 = vector.shape_cast %55 : vector<1x16x16x32xf32> to vector<16x16x32xf32>
    %57 = vector.shape_cast %56 : vector<16x16x32xf32> to vector<256x32xf32>
    %58 = arith.truncf %57 : vector<256x32xf32> to vector<256x32xbf16>
    %c7 = arith.constant 7 : index
    %c0_52 = arith.constant 0 : index
    %c0_53 = arith.constant 0 : index
    %59 = vector.load %arg2[%c7, %c0_52, %c0_53] : memref<9x32x32xbf16, #tpu.memory_space<vmem>>, vector<1x32x32xbf16>
    %60 = vector.shape_cast %59 : vector<1x32x32xbf16> to vector<32x32xbf16>
    %cst_54 = arith.constant dense<0.000000e+00> : vector<256x32xf32>
    %61 = tpu.matmul %58, %60, %cst_54 {dimension_numbers = #tpu.dot_dimension_numbers<[1], [0], [0], [1], [0, 0, 1, 1], [], []>} : vector<256x32xbf16>, vector<32x32xbf16>, vector<256x32xf32> -> vector<256x32xf32>
    %62 = arith.addf %54, %61 : vector<256x32xf32>
    %c0_55 = arith.constant 0 : index
    %c2_56 = arith.constant 2 : index
    %c2_57 = arith.constant 2 : index
    %c0_58 = arith.constant 0 : index
    %63 = vector.load %arg1[%c0_55, %c2_56, %c2_57, %c0_58] : memref<1x18x18x32xf32, #tpu.memory_space<vmem>>, vector<1x16x16x32xf32>
    %64 = vector.shape_cast %63 : vector<1x16x16x32xf32> to vector<16x16x32xf32>
    %65 = vector.shape_cast %64 : vector<16x16x32xf32> to vector<256x32xf32>
    %66 = arith.truncf %65 : vector<256x32xf32> to vector<256x32xbf16>
    %c8 = arith.constant 8 : index
    %c0_59 = arith.constant 0 : index
    %c0_60 = arith.constant 0 : index
    %67 = vector.load %arg2[%c8, %c0_59, %c0_60] : memref<9x32x32xbf16, #tpu.memory_space<vmem>>, vector<1x32x32xbf16>
    %68 = vector.shape_cast %67 : vector<1x32x32xbf16> to vector<32x32xbf16>
    %cst_61 = arith.constant dense<0.000000e+00> : vector<256x32xf32>
    %69 = tpu.matmul %66, %68, %cst_61 {dimension_numbers = #tpu.dot_dimension_numbers<[1], [0], [0], [1], [0, 0, 1, 1], [], []>} : vector<256x32xbf16>, vector<32x32xbf16>, vector<256x32xf32> -> vector<256x32xf32>
    %70 = arith.addf %62, %69 : vector<256x32xf32>
    %c0_62 = arith.constant 0 : index
    %c0_63 = arith.constant 0 : index
    %71 = vector.load %arg3[%c0_62, %c0_63] : memref<1x32xf32, #tpu.memory_space<vmem>>, vector<1x32xf32>
    %72 = vector.broadcast %71 : vector<1x32xf32> to vector<256x32xf32>
    %73 = arith.mulf %70, %72 : vector<256x32xf32>
    %c0_64 = arith.constant 0 : index
    %c0_65 = arith.constant 0 : index
    %74 = vector.load %arg4[%c0_64, %c0_65] : memref<1x32xf32, #tpu.memory_space<vmem>>, vector<1x32xf32>
    %75 = vector.broadcast %74 : vector<1x32xf32> to vector<256x32xf32>
    %76 = arith.addf %73, %75 : vector<256x32xf32>
    %cst_66 = arith.constant 0.000000e+00 : f32
    %77 = vector.broadcast %cst_66 : f32 to vector<256x32xf32>
    %78 = arith.cmpf oge, %76, %77 : vector<256x32xf32>
    %cst_67 = arith.constant 0.00999999977 : f32
    %79 = vector.broadcast %cst_67 : f32 to vector<256x32xf32>
    %80 = arith.mulf %79, %76 : vector<256x32xf32>
    %81 = arith.select %78, %76, %80 : vector<256x32xi1>, vector<256x32xf32>
    %82 = arith.truncf %81 : vector<256x32xf32> to vector<256x32xbf16>
    %c0_68 = arith.constant 0 : index
    %c0_69 = arith.constant 0 : index
    %83 = vector.load %arg5[%c0_68, %c0_69] : memref<32x32xbf16, #tpu.memory_space<vmem>>, vector<32x32xbf16>
    %cst_70 = arith.constant dense<0.000000e+00> : vector<256x32xf32>
    %84 = tpu.matmul %82, %83, %cst_70 {dimension_numbers = #tpu.dot_dimension_numbers<[1], [0], [0], [1], [0, 0, 1, 1], [], []>} : vector<256x32xbf16>, vector<32x32xbf16>, vector<256x32xf32> -> vector<256x32xf32>
    %c0_71 = arith.constant 0 : index
    %c0_72 = arith.constant 0 : index
    %85 = vector.load %arg6[%c0_71, %c0_72] : memref<1x32xf32, #tpu.memory_space<vmem>>, vector<1x32xf32>
    %86 = vector.broadcast %85 : vector<1x32xf32> to vector<256x32xf32>
    %87 = arith.mulf %84, %86 : vector<256x32xf32>
    %c0_73 = arith.constant 0 : index
    %c0_74 = arith.constant 0 : index
    %88 = vector.load %arg7[%c0_73, %c0_74] : memref<1x32xf32, #tpu.memory_space<vmem>>, vector<1x32xf32>
    %89 = vector.broadcast %88 : vector<1x32xf32> to vector<256x32xf32>
    %90 = arith.addf %87, %89 : vector<256x32xf32>
    %c0_75 = arith.constant 0 : index
    %c1_76 = arith.constant 1 : index
    %c1_77 = arith.constant 1 : index
    %c0_78 = arith.constant 0 : index
    %91 = vector.load %arg1[%c0_75, %c1_76, %c1_77, %c0_78] : memref<1x18x18x32xf32, #tpu.memory_space<vmem>>, vector<1x16x16x32xf32>
    %92 = vector.shape_cast %91 : vector<1x16x16x32xf32> to vector<16x16x32xf32>
    %93 = vector.shape_cast %92 : vector<16x16x32xf32> to vector<256x32xf32>
    %94 = arith.addf %90, %93 : vector<256x32xf32>
    %cst_79 = arith.constant 1.702000e+00 : f32
    %95 = vector.broadcast %cst_79 : f32 to vector<256x32xf32>
    %96 = arith.mulf %95, %94 : vector<256x32xf32>
    %97 = arith.negf %96 : vector<256x32xf32>
    %98 = math.exp %97 : vector<256x32xf32>
    %cst_80 = arith.constant 1.000000e+00 : f32
    %99 = vector.broadcast %cst_80 : f32 to vector<256x32xf32>
    %100 = arith.addf %99, %98 : vector<256x32xf32>
    %101 = arith.divf %99, %100 : vector<256x32xf32>
    %102 = arith.mulf %94, %101 : vector<256x32xf32>
    %103 = vector.shape_cast %102 : vector<256x32xf32> to vector<16x16x32xf32>
    %c0_81 = arith.constant 0 : index
    %c0_82 = arith.constant 0 : index
    %c0_83 = arith.constant 0 : index
    %c0_84 = arith.constant 0 : index
    %104 = vector.load %arg8[%c0_81, %c0_82, %c0_83, %c0_84] : memref<1x16x16x32xf32, #tpu.memory_space<vmem>>, vector<1x16x16x32xf32>
    %105 = vector.shape_cast %104 : vector<1x16x16x32xf32> to vector<16x16x32xf32>
    %106 = vector.shape_cast %103 : vector<16x16x32xf32> to vector<1x16x16x32xf32>
    tpu.vector_store %arg8[%c0_81, %c0_82, %c0_83, %c0_84], %106 {strides = array<i32>} : memref<1x16x16x32xf32, #tpu.memory_space<vmem>>, vector<1x16x16x32xf32>,
    return
  }
  func.func @transform_0(%arg0: i32) -> (i32, i32, i32, i32) {
    %c0_i32 = arith.constant 0 : i32
    %c0_i32_0 = arith.constant 0 : i32
    %c0_i32_1 = arith.constant 0 : i32
    %c0_i32_2 = arith.constant 0 : i32
    return %arg0, %c0_i32, %c0_i32_0, %c0_i32_1 : i32, i32, i32, i32
  }
  func.func @transform_1(%arg0: i32) -> (i32, i32, i32) {
    %c0_i32 = arith.constant 0 : i32
    %c0_i32_0 = arith.constant 0 : i32
    %c0_i32_1 = arith.constant 0 : i32
    %c0_i32_2 = arith.constant 0 : i32
    return %c0_i32, %c0_i32_0, %c0_i32_1 : i32, i32, i32
  }
  func.func @transform_2(%arg0: i32) -> (i32, i32) {
    %c0_i32 = arith.constant 0 : i32
    %c0_i32_0 = arith.constant 0 : i32
    %c0_i32_1 = arith.constant 0 : i32
    return %c0_i32, %c0_i32_0 : i32, i32
  }
  func.func @transform_3(%arg0: i32) -> (i32, i32) {
    %c0_i32 = arith.constant 0 : i32
    %c0_i32_0 = arith.constant 0 : i32
    %c0_i32_1 = arith.constant 0 : i32
    return %c0_i32, %c0_i32_0 : i32, i32
  }
  func.func @transform_4(%arg0: i32) -> (i32, i32) {
    %c0_i32 = arith.constant 0 : i32
    %c0_i32_0 = arith.constant 0 : i32
    %c0_i32_1 = arith.constant 0 : i32
    return %c0_i32, %c0_i32_0 : i32, i32
  }
  func.func @transform_5(%arg0: i32) -> (i32, i32) {
    %c0_i32 = arith.constant 0 : i32
    %c0_i32_0 = arith.constant 0 : i32
    %c0_i32_1 = arith.constant 0 : i32
    return %c0_i32, %c0_i32_0 : i32, i32
  }
  func.func @transform_6(%arg0: i32) -> (i32, i32) {
    %c0_i32 = arith.constant 0 : i32
    %c0_i32_0 = arith.constant 0 : i32
    %c0_i32_1 = arith.constant 0 : i32
    return %c0_i32, %c0_i32_0 : i32, i32
  }
  func.func @transform_7(%arg0: i32) -> (i32, i32, i32, i32) {
    %c0_i32 = arith.constant 0 : i32
    %c0_i32_0 = arith.constant 0 : i32
    %c0_i32_1 = arith.constant 0 : i32
    %c0_i32_2 = arith.constant 0 : i32
    return %arg0, %c0_i32, %c0_i32_0, %c0_i32_1 : i32, i32, i32, i32
  }
}

</mosaic_0001>

<bundles_post_ra>
// kernel: decoder_forward.5
= control target key start
LH: loop header
LB: loop body
LE: loop exit
PB: predicated region body
PF: predicated region fallthrough
CT: control target
= control target key end

     0   :  { %9 = vsyncpa [#allocation3], 0  ;;  %s2100_s0 = inlined_call_operand.vmem [shape: f32[2,10,10,16], index: 0, kind: input, shape index: {}]   ;;  %s2101_s1 = inlined_call_operand.hbm [shape: bf16[9,16,16], index: 1, kind: input, shape index: {}]   ;;  %s2102_s2 = inlined_call_operand.hbm [shape: f32[1,16], index: 2, kind: input, shape index: {}]   ;;  %s2103_s3 = inlined_call_operand.hbm [shape: f32[1,16], index: 3, kind: input, shape index: {}]   ;;  %s2104_s4 = inlined_call_operand.vmem [shape: f32[2,8,8,16], index: 4, kind: output, shape index: {}]  }
   0x1   :  { %10 = vsyncpa [#allocation5], 0  ;;  %s1831_s15 = smov 0  }
   0x2 LB: > { %s1801_s16 = smov [#allocation4]   ;;  %s1837_s18 = sadd.s32 4294967295, %s1799_s15   ;;  %s1799_s15 = sphi %s1831_s15, %s16_s15  }
   0x3   : > { %s162_s17 = sshll.u32 %s1801_s16, 4  ;;  %p1369_p0 = scmp.ge.s32.totalorder %s1799_s15, 1  ;;  %s163_s17 = int_to_ptr.vmem [resolvable:$true] %s162_s17 }
   0x4   : > { %p136_p1 = scmp.lt.s32.totalorder %s1799_s15, 3  ;;  %p2105_p2 = scmp.eq.s32.totalorder %s1837_s18, 0 }
   0x5   : > { %s1802_s20 = smov [#allocation2]   ;;  %s1803_s23 = smov [#allocation6]  }
   0x6   : > { %p1842_p3 = pnand %p1369_p0, %p136_p1  ;;  %s148_s21 = sshll.u32 %s1802_s20, 4  ;;  %s149_s21 = int_to_ptr.vmem [resolvable:$true] %s148_s21 }
   0x7   : > { %s173_s24 = sshll.u32 %s1803_s23, 4  ;;  %s1718_s25 = scalar_lea.vmem %s163_s17, 16  ;;  %s1854_s24 = int_to_ptr.vmem [resolvable:$true] %s173_s24 }
   0x8   : > { %s2107_s19 = scalar_select %p1842_p3, 1, 0 }
   0x9   : > { %p1637_p4 = pneg %p1842_p3  ;;  %p1719_p7 = scmp.ne.s32.totalorder %s163_s17, %s1718_s25 }
   0xa   : > { %s1725_s26 = scalar_lea.vmem %s163_s17, 32  ;;  %p1726_p10 = scmp.lt.s32.totalorder %s163_s17, %s163_s17 }
   0xb   : > { %p1850_p5 = pnand %p2105_p2, %p1637_p4  ;;  %p1727_p11 = scmp.lt.s32.totalorder %s1725_s26, %s1718_s25 }
   0xd   : > { %p1709_p6 = pneg %p1850_p5  ;;  %p1728_p12 = por %p1727_p11, %p1726_p10 }
   0xf   : > { %p1721_p8 = pnand %p1719_p7, %p1709_p6 }
  0x11   : > { %p1722_p9 = pneg %p1721_p8 }
  0x13   : > { %p1729_p13 = pnand %p1728_p12, %p1722_p9 }
  0x15   : > { %1732 = shalt.err (!%p1729_p13)
}
  0x16   : > { %1643 = dma.hbm_to_vmem [thread:$0]  (!%p1850_p5), %s2102_s2, 16, %s163_s17, [#allocation5]  }
  0x17   : > { %s1744_s29 = scalar_lea.vmem %s149_s21, 1152  ;;  %p1752_p7 = scmp.lt.s32.totalorder %s149_s21, %s149_s21 }
  0x18   : > { %p1745_p0 = scmp.ne.s32.totalorder %s149_s21, %s1744_s29  ;;  %p1753_p8 = scmp.lt.s32.totalorder %s1744_s29, %s1744_s29 }
  0x1a   : > { %p1747_p1 = pnand %p1745_p0, %p1709_p6  ;;  %p1754_p2 = por %p1753_p8, %p1752_p7 }
  0x1c   : > { %p1748_p4 = pneg %p1747_p1 }
  0x1e   : > { %p1755_p3 = pnand %p1754_p2, %p1748_p4 }
  0x20   : > { %1758 = shalt.err (!%p1755_p3)
}
  0x21   : > { %s1804_s30 = smov 64   ;;  %s1805_s5 = smov 4  }
  0x22   : > { %1640 = dma.hbm_to_vmem [thread:$0]  (!%p1850_p5), %s2101_s1, 1152, %s149_s21, [#allocation3], %s1804_s30, %s1804_s30, %s1805_s5  }
  0x23   : > { %s1770_s8 = scalar_lea.vmem %s1854_s24, 16  ;;  %s1777_s9 = scalar_lea.vmem %s1854_s24, 32 }
  0x24   : > { %p1771_p9 = scmp.ne.s32.totalorder %s1854_s24, %s1770_s8  ;;  %p1778_p3 = scmp.lt.s32.totalorder %s1854_s24, %s1854_s24 }
  0x25   : > { %p1779_p11 = scmp.lt.s32.totalorder %s1777_s9, %s1770_s8 }
  0x26   : > { %p1773_p10 = pnand %p1771_p9, %p1709_p6 }
  0x27   : > { %p1780_p12 = por %p1779_p11, %p1778_p3 }
  0x28   : > { %p1774_p2 = pneg %p1773_p10 }
  0x2a   : > { %p1781_p13 = pnand %p1780_p12, %p1774_p2 }
  0x2c   : > { %1784 = shalt.err (!%p1781_p13)
}
  0x2d   : > { %1646 = dma.hbm_to_vmem [thread:$0]  (!%p1850_p5), %s2103_s3, 16, %s1854_s24, [#allocation5]  }
  0x2e   : > { %p2109_p0 = scmp.ne.s32.totalorder %s2107_s19, 0 }
  0x2f   : > { %p2110_p6 = scmp.eq.s32.totalorder (!%p2109_p0), %s1837_s18, 0 }
  0x30   : > { %194 = sbr.rel (%p2109_p0) target bundleno = 378 (0x17a), region = 36 }
  0x35   : > { %1790 = dma.done.wait (%p2110_p6), [#allocation3], 1152   ;;  %p2111_p1 = pmov %p2110_p6 }
  0x37   : > { %1792 = vsyncadd (%p2111_p1), [#allocation3], 4294966144  ;;  %p2112_p4 = pmov %p2111_p1 }
  0x38   : > { %p2113_p7 = pmov %p2111_p1 }
  0x39   : > { %1794 = dma.done.wait (%p2112_p4), [#allocation5], 32  }
  0x3a   : > { %1796 = vsyncadd (%p2113_p7), [#allocation5], 4294967264  ;;  %p228_p8 = scmp.lt.s32.totalorder %s1837_s18, 1  ;;  %v1666_v0 = vld [vmem:[#allocation2 + $0x8] sm:$0xff]   ;;  %vm274_vm0 = vcmask 130048   ;;  %v1667_v13 = vld [vmem:[#allocation2] sm:$0xff]  }
  0x3b   : > { %1532 = vmatprep.subr.bf16.mxu0 %v1666_v0  ;;  %1622 = vmatprep.subr.bf16.mxu1 %v1666_v0  ;;  %v1668_v14 = vld [vmem:[#allocation2 + $0x10] sm:$0xff]   ;;  %v1669_v25 = vld [vmem:[#allocation2 + $0x18] sm:$0xff]   ;;  %v1670_v28 = vld [vmem:[#allocation2 + $0x20] sm:$0xff]  }
  0x3c   : > { %s2115_s18 = smov (!%p228_p8, %s1837_s18), 1  ;;  %1533 = vmatpush3.bf16.msra.mxu0 %v1666_v0  ;;  %1623 = vmatpush3.bf16.msra.mxu1 %v1666_v0  ;;  %v1671_v37 = vld [vmem:[#allocation2 + $0x28] sm:$0xff]   ;;  %v1672_v38 = vld [vmem:[#allocation2 + $0x30] sm:$0xff]   ;;  %v1673_v49 = vld [vmem:[#allocation2 + $0x38] sm:$0xff]  }
  0x3d   : > { %s1624_s12 = smul.u32 160, %s2115_s18  ;;  %1542 = vmatprep.subr.bf16.mxu1 %v1667_v13  ;;  %1552 = vmatprep.subr.bf16.mxu0 %v1668_v14  ;;  %v1674_v50 = vld [vmem:[#allocation2 + $0x40] sm:$0xff]   ;;  %s1486_s17 = sshll.u32 %s2115_s18, 6 }
  0x3e   : > { %s237_s21 = scalar_lea.vmem %s2104_s4, %s1486_s17 }
  0x3f   : > { %s1906_s16 = scalar_lea.vmem %s2100_s0, %s1624_s12 }
  0x40   : > { %v253_v1 = vld [vmem:[%s1906_s16 + $0x1] sm:$0xff]  ;;  %v1910_v2 = vld [vmem:[%s1906_s16 + $0x11] sm:$0xff] }
  0x41   : > { %v1913_v3 = vld [vmem:[%s1906_s16 + $0x41] sm:$0xff]  ;;  %v261_v4 = vpack.c.bf16 %v1910_v2, %v253_v1  ;;  %v1917_v5 = vld [vmem:[%s1906_s16 + $0x51] sm:$0xff] }
  0x42   : > { %v1920_v6 = vld [vmem:[%s1906_s16 + $0x21] sm:$0xff]  ;;  %v1923_v7 = vld [vmem:[%s1906_s16 + $0x31] sm:$0xff]  ;;  %v1927_v8 = vpack.c.bf16 %v1917_v5, %v1913_v3 }
  0x43   : > { %v1931_v9 = vpack.c.bf16 %v1923_v7, %v1920_v6  ;;  %v1934_v10 = vld [vmem:[%s1906_s16 + $0x61] sm:$0xff]  ;;  %v1937_v11 = vld [vmem:[%s1906_s16 + $0x71] sm:$0xff]  ;;  %1534 = vmatprep.mubr.msk.bf16.mxu0 %vm274_vm0, %v261_v4  ;;  %v656_v44 = vpack.c.bf16 %v1920_v6, %v1910_v2  ;;  %v657_v46 = vpack.c.bf16 %v1913_v3, %v1923_v7 }
  0x44   : > { %v1942_v12 = vpack.c.bf16 %v1937_v11, %v1934_v10  ;;  %1538 = vmatprep.mubr.msk.bf16.mxu1 %vm274_vm0, %v1927_v8  ;;  %v239_v15 = vld [vmem:[%s1906_s16] sm:$0xff]  ;;  %v240_v16 = vld [vmem:[%s1906_s16 + $0x10] sm:$0xff]  ;;  %v658_v48 = vpack.c.bf16 %v1934_v10, %v1917_v5 }
  0x45   : > { %1535 = vmatmul.mubr.msk.bf16.vlgmr.msra.gmra.mxu0 %vm274_vm0, %v1931_v9  ;;  %v435_v17 = vld [vmem:[%s1906_s16 + $0x2] sm:$0xff]  ;;  %v1954_v18 = vld [vmem:[%s1906_s16 + $0x12] sm:$0xff]  ;;  %v247_v19 = vpack.c.bf16 %v240_v16, %v239_v15 }
  0x46   : > { %1539 = vmatmul.mubr.msk.bf16.vlgmr.msra.gmra.mxu1 %vm274_vm0, %v1942_v12  ;;  %v443_v20 = vpack.c.bf16 %v1954_v18, %v435_v17  ;;  %v241_v21 = vld [vmem:[%s1906_s16 + $0x20] sm:$0xff]  ;;  %v242_v22 = vld [vmem:[%s1906_s16 + $0x30] sm:$0xff]  ;;  %1553 = vmatpush3.bf16.msra.mxu0 %v1668_v14 }
  0x47   : > { %v437_v23 = vld [vmem:[%s1906_s16 + $0x22] sm:$0xff]  ;;  %1543 = vmatpush3.bf16.msra.mxu1 %v1667_v13  ;;  %v1961_v24 = vld [vmem:[%s1906_s16 + $0x32] sm:$0xff]  ;;  %1544 = vmatprep.mubr.msk.bf16.mxu1 %vm274_vm0, %v247_v19  ;;  %v248_v26 = vpack.c.bf16 %v242_v22, %v241_v21  ;;  %v550_v43 = vpack.c.bf16 %v241_v21, %v240_v16 }
  0x48   : > { %1554 = vmatprep.mubr.msk.bf16.mxu0 %vm274_vm0, %v443_v20  ;;  %v1966_v27 = vpack.c.bf16 %v1961_v24, %v437_v23  ;;  %v243_v29 = vld [vmem:[%s1906_s16 + $0x40] sm:$0xff]  ;;  %v244_v30 = vld [vmem:[%s1906_s16 + $0x50] sm:$0xff]  ;;  %1562 = vmatprep.subr.bf16.mxu1 %v1669_v25  ;;  %v762_v55 = vpack.c.bf16 %v437_v23, %v1954_v18 }
  0x49   : > { %v439_v31 = vld [vmem:[%s1906_s16 + $0x42] sm:$0xff]  ;;  %v440_v32 = vld [vmem:[%s1906_s16 + $0x52] sm:$0xff]  ;;  %1572 = vmatprep.subr.bf16.mxu0 %v1670_v28  ;;  %v249_v33 = vpack.c.bf16 %v244_v30, %v243_v29  ;;  %v551_v45 = vpack.c.bf16 %v243_v29, %v242_v22 }
  0x4a   : > { %v1972_v34 = vpack.c.bf16 %v440_v32, %v439_v31  ;;  %v245_v35 = vld [vmem:[%s1906_s16 + $0x60] sm:$0xff]  ;;  %v246_v36 = vld [vmem:[%s1906_s16 + $0x70] sm:$0xff]  ;;  %v763_v56 = vpack.c.bf16 %v439_v31, %v1961_v24 }
  0x4b   : > { %v441_v39 = vld [vmem:[%s1906_s16 + $0x62] sm:$0xff]  ;;  %v442_v40 = vld [vmem:[%s1906_s16 + $0x72] sm:$0xff]  ;;  %v250_v41 = vpack.c.bf16 %v246_v36, %v245_v35  ;;  %v552_v47 = vpack.c.bf16 %v245_v35, %v244_v30 }
  0x4c   : > { %v446_v42 = vpack.c.bf16 %v442_v40, %v441_v39  ;;  %v1403_v51 = vld [vmem:[%s1906_s16 + $0x80] sm:$0xff]  ;;  %v764_v57 = vpack.c.bf16 %v441_v39, %v440_v32  ;;  %v1442_v59 = vld [vmem:[%s1906_s16 + $0x90] sm:$0xff] }
  0x4d   : > { %1555 = vmatmul.mubr.msk.bf16.vlgmr.msra.gmra.mxu0 %vm274_vm0, %v1966_v27  ;;  %v1416_v52 = vld [vmem:[%s1906_s16 + $0x81] sm:$0xff]  ;;  %v553_v53 = vpack.c.bf16 %v1403_v51, %v246_v36  ;;  %v872_v61 = vpack.c.bf16 %v1442_v59, %v1403_v51  ;;  %v1455_v62 = vld [vmem:[%s1906_s16 + $0x91] sm:$0xff] }
  0x4e   : > { %1545 = vmatmul.mubr.msk.bf16.vlgmr.msra.gmra.mxu1 %vm274_vm0, %v248_v26  ;;  %1573 = vmatpush3.bf16.msra.mxu0 %v1670_v28  ;;  %v659_v54 = vpack.c.bf16 %v1416_v52, %v1937_v11  ;;  %v1429_v58 = vld [vmem:[%s1906_s16 + $0x82] sm:$0xff]  ;;  %v1468_v63 = vld [vmem:[%s1906_s16 + $0x92] sm:$0xff]  ;;  %v978_v0 = vpack.c.bf16 %v1455_v62, %v1416_v52 }
  0x4f   : > { %1563 = vmatpush3.bf16.msra.mxu1 %v1669_v25  ;;  %1548 = vmatprep.mubr.msk.bf16.mxu1 %vm274_vm0, %v249_v33  ;;  %v765_v60 = vpack.c.bf16 %v1429_v58, %v442_v40  ;;  %v1084_v1 = vpack.c.bf16 %v1468_v63, %v1429_v58 }
  0x50   : > { %1558 = vmatprep.mubr.msk.bf16.mxu0 %vm274_vm0, %v1972_v34  ;;  %1582 = vmatprep.subr.bf16.mxu1 %v1671_v37 }
  0x51   : > { %1592 = vmatprep.subr.bf16.mxu0 %v1672_v38 }
  0x55   : > { %1559 = vmatmul.mubr.msk.bf16.gmra.mxu0 %vm274_vm0, %v446_v42 }
  0x56   : > { %1549 = vmatmul.mubr.msk.bf16.gmra.mxu1 %vm274_vm0, %v250_v41  ;;  %1574 = vmatprep.mubr.msk.bf16.mxu0 %vm274_vm0, %v656_v44 }
  0x57   : > { %1564 = vmatprep.mubr.msk.bf16.mxu1 %vm274_vm0, %v550_v43 }
  0x5d   : > { %1575 = vmatmul.mubr.msk.bf16.vlgmr.msra.gmra.mxu0 %vm274_vm0, %v657_v46 }
  0x5e   : > { %1565 = vmatmul.mubr.msk.bf16.vlgmr.msra.gmra.mxu1 %vm274_vm0, %v551_v45  ;;  %1593 = vmatpush3.bf16.msra.mxu0 %v1672_v38 }
  0x5f   : > { %1583 = vmatpush3.bf16.msra.mxu1 %v1671_v37  ;;  %1568 = vmatprep.mubr.msk.bf16.mxu1 %vm274_vm0, %v552_v47 }
  0x60   : > { %1578 = vmatprep.mubr.msk.bf16.mxu0 %vm274_vm0, %v658_v48  ;;  %1602 = vmatprep.subr.bf16.mxu1 %v1673_v49 }
  0x61   : > { %1612 = vmatprep.subr.bf16.mxu0 %v1674_v50 }
  0x65   : > { %1579 = vmatmul.mubr.msk.bf16.gmra.mxu0 %vm274_vm0, %v659_v54 }
  0x66   : > { %1569 = vmatmul.mubr.msk.bf16.gmra.mxu1 %vm274_vm0, %v553_v53  ;;  %1594 = vmatprep.mubr.msk.bf16.mxu0 %vm274_vm0, %v248_v26 }
  0x67   : > { %1584 = vmatprep.mubr.msk.bf16.mxu1 %vm274_vm0, %v762_v55 }
  0x6d   : > { %1595 = vmatmul.mubr.msk.bf16.vlgmr.msra.gmra.mxu0 %vm274_vm0, %v249_v33 }
  0x6e   : > { %1585 = vmatmul.mubr.msk.bf16.vlgmr.msra.gmra.mxu1 %vm274_vm0, %v763_v56  ;;  %1613 = vmatpush3.bf16.msra.mxu0 %v1674_v50 }
  0x6f   : > { %1603 = vmatpush3.bf16.msra.mxu1 %v1673_v49  ;;  %1588 = vmatprep.mubr.msk.bf16.mxu1 %vm274_vm0, %v764_v57 }
  0x70   : > { %1598 = vmatprep.mubr.msk.bf16.mxu0 %vm274_vm0, %v250_v41 }
  0x75   : > { %1599 = vmatmul.mubr.msk.bf16.gmra.mxu0 %vm274_vm0, %v872_v61 }
  0x76   : > { %1589 = vmatmul.mubr.msk.bf16.gmra.mxu1 %vm274_vm0, %v765_v60  ;;  %1614 = vmatprep.mubr.msk.bf16.mxu0 %vm274_vm0, %v1966_v27 }
  0x77   : > { %1604 = vmatprep.mubr.msk.bf16.mxu1 %vm274_vm0, %v1931_v9 }
  0x7d   : > { %1615 = vmatmul.mubr.msk.bf16.vlgmr.msra.gmra.mxu0 %vm274_vm0, %v1972_v34 }
  0x7e   : > { %1605 = vmatmul.mubr.msk.bf16.vlgmr.msra.gmra.mxu1 %vm274_vm0, %v1927_v8  ;;  %1618 = vmatprep.mubr.msk.bf16.mxu0 %vm274_vm0, %v446_v42 }
  0x7f   : > { %1608 = vmatprep.mubr.msk.bf16.mxu1 %vm274_vm0, %v1942_v12 }
  0x85   : > { %1619 = vmatmul.mubr.msk.bf16.gmra.mxu0 %vm274_vm0, %v1084_v1 }
  0x86   : > { %1609 = vmatmul.mubr.msk.bf16.gmra.mxu1 %vm274_vm0, %v978_v0 }
 0x105   : > { %v1536_v2 = vpop.f32.mrf.mxu0 }
 0x106   : > { %v1540_v3 = vpop.f32.mrf.mxu1 }
 0x107   : > { %v321_v4 = vpop.f32.mrf.mxu0 }
 0x108   : > { %v337_v5 = vpop.f32.mrf.mxu1 }
 0x109   : > { %v1537_v6 = vpop.f32.mrf.mxu0 }
 0x10a   : > { %v2030_v7 = vpop.f32.mrf.mxu1 }
 0x10b   : > { %v324_v8 = vpop.f32.mrf.mxu0 }
 0x10c   : > { %v2032_v9 = vpop.f32.mrf.mxu1 }
 0x10d   : > { %v1556_v11 = vpop.f32.mrf.mxu0 }
 0x10e   : > { %v1546_v10 = vpop.f32.mrf.mxu1 }
 0x10f   : > { %v502_v13 = vpop.f32.mrf.mxu0  ;;  %v413_v42 = vadd.f32 %v1546_v10, %v1536_v2 }
 0x110   : > { %v404_v12 = vpop.f32.mrf.mxu1 }
 0x111   : > { %v1557_v15 = vpop.f32.mrf.mxu0  ;;  %v405_v45 = vadd.f32 %v404_v12, %v321_v4  ;;  %v535_v48 = vadd.f32 %v1556_v11, %v413_v42 }
 0x112   : > { %v1547_v14 = vpop.f32.mrf.mxu1 }
 0x113   : > { %v505_v17 = vpop.f32.mrf.mxu0  ;;  %v416_v49 = vadd.f32 %v1547_v14, %v1537_v6  ;;  %v533_v52 = vadd.f32 %v502_v13, %v405_v45 }
 0x114   : > { %v407_v16 = vpop.f32.mrf.mxu1 }
 0x115   : > { %v1560_v19 = vpop.f32.mrf.mxu0  ;;  %v408_v53 = vadd.f32 %v407_v16, %v324_v8  ;;  %v536_v57 = vadd.f32 %v1557_v15, %v416_v49 }
 0x116   : > { %v1550_v18 = vpop.f32.mrf.mxu1 }
 0x117   : > { %v518_v21 = vpop.f32.mrf.mxu0  ;;  %v429_v59 = vadd.f32 %v1550_v18, %v1540_v3  ;;  %v534_v62 = vadd.f32 %v505_v17, %v408_v53 }
 0x118   : > { %v420_v20 = vpop.f32.mrf.mxu1 }
 0x119   : > { %v1561_v23 = vpop.f32.mrf.mxu0  ;;  %v421_v1 = vadd.f32 %v420_v20, %v337_v5  ;;  %v539_v12 = vadd.f32 %v1560_v19, %v429_v59 }
 0x11a   : > { %v1551_v22 = vpop.f32.mrf.mxu1 }
 0x11b   : > { %v521_v25 = vpop.f32.mrf.mxu0  ;;  %v432_v8 = vadd.f32 %v1551_v22, %v2030_v7  ;;  %v537_v18 = vadd.f32 %v518_v21, %v421_v1 }
 0x11c   : > { %v423_v24 = vpop.f32.mrf.mxu1 }
 0x11d   : > { %v1576_v27 = vpop.f32.mrf.mxu0  ;;  %v424_v13 = vadd.f32 %v423_v24, %v2032_v9 }
 0x11e   : > { %v1566_v26 = vpop.f32.mrf.mxu1 }
 0x11f   : > { %v715_v29 = vpop.f32.mrf.mxu0  ;;  %v642_v54 = vadd.f32 %v1566_v26, %v535_v48 }
 0x120   : > { %v609_v28 = vpop.f32.mrf.mxu1 }
 0x121   : > { %v1577_v31 = vpop.f32.mrf.mxu0  ;;  %v640_v58 = vadd.f32 %v609_v28, %v533_v52  ;;  %v748_v63 = vadd.f32 %v1576_v27, %v642_v54 }
 0x122   : > { %v1567_v30 = vpop.f32.mrf.mxu1 }
 0x123   : > { %v718_v33 = vpop.f32.mrf.mxu0  ;;  %v643_v0 = vadd.f32 %v1567_v30, %v536_v57  ;;  %v746_v10 = vadd.f32 %v715_v29, %v640_v58  ;;  %v540_v30 = vadd.f32 %v1561_v23, %v432_v8  ;;  %v538_v29 = vadd.f32 %v521_v25, %v424_v13  ;;  %v2045_v25 = vld [vmem:[#allocation6] ss:$0 sm:$0xff] }
 0x124   : > { %v612_v32 = vpop.f32.mrf.mxu1 }
 0x125   : > { %v1580_v35 = vpop.f32.mrf.mxu0  ;;  %v641_v6 = vadd.f32 %v612_v32, %v534_v62  ;;  %v749_v16 = vadd.f32 %v1577_v31, %v643_v0  ;;  %v2042_v31 = vld [vmem:[#allocation4] ss:$0 sm:$0xff] }
 0x126   : > { %v1570_v34 = vpop.f32.mrf.mxu1 }
 0x127   : > { %v2034_v37 = vpop.f32.mrf.mxu0  ;;  %v646_v26 = vadd.f32 %v1570_v34, %v539_v12  ;;  %v747_v28 = vadd.f32 %v718_v33, %v641_v6 }
 0x128   : > { %v625_v36 = vpop.f32.mrf.mxu1 }
 0x129   : > { %v2036_v39 = vpop.f32.mrf.mxu0  ;;  %v644_v32 = vadd.f32 %v625_v36, %v537_v18  ;;  %v752_v9 = vadd.f32 %v1580_v35, %v646_v26 }
 0x12a   : > { %v1571_v38 = vpop.f32.mrf.mxu1 }
 0x12b   : > { %v2038_v41 = vpop.f32.mrf.mxu0  ;;  %v647_v24 = vadd.f32 %v1571_v38, %v540_v30 }
 0x12c   : > { %v628_v40 = vpop.f32.mrf.mxu1 }
 0x12d   : > { %v1596_v44 = vpop.f32.mrf.mxu0  ;;  %v645_v45 = vadd.f32 %v628_v40, %v538_v29  ;;  %v753_v40 = vadd.f32 %v2036_v39, %v647_v24 }
 0x12e   : > { %v1586_v43 = vpop.f32.mrf.mxu1 }
 0x12f   : > { %v928_v47 = vpop.f32.mrf.mxu0  ;;  %v854_v11 = vadd.f32 %v1586_v43, %v748_v63  ;;  %v751_v52 = vadd.f32 %v2038_v41, %v645_v45 }
 0x130   : > { %v821_v46 = vpop.f32.mrf.mxu1 }
 0x131   : > { %v1597_v51 = vpop.f32.mrf.mxu0  ;;  %v852_v3 = vadd.f32 %v821_v46, %v746_v10  ;;  %v961_v5 = vadd.f32 %v1596_v44, %v854_v11  ;;  %v750_v44 = vadd.f32 %v2034_v37, %v644_v32 }
 0x132   : > { %v1587_v50 = vpop.f32.mrf.mxu1 }
 0x133   : > { %v931_v56 = vpop.f32.mrf.mxu0  ;;  %v855_v20 = vadd.f32 %v1587_v50, %v749_v16  ;;  %v959_v43 = vadd.f32 %v928_v47, %v852_v3 }
 0x134   : > { %v824_v55 = vpop.f32.mrf.mxu1 }
 0x135   : > { %v1600_v61 = vpop.f32.mrf.mxu0  ;;  %v853_v7 = vadd.f32 %v824_v55, %v747_v28  ;;  %v962_v46 = vadd.f32 %v1597_v51, %v855_v20 }
 0x136   : > { %v1590_v60 = vpop.f32.mrf.mxu1 }
 0x137   : > { %v944_v4 = vpop.f32.mrf.mxu0  ;;  %v858_v23 = vadd.f32 %v1590_v60, %v752_v9  ;;  %v960_v47 = vadd.f32 %v931_v56, %v853_v7 }
 0x138   : > { %v837_v2 = vpop.f32.mrf.mxu1 }
 0x139   : > { %v1601_v15 = vpop.f32.mrf.mxu0  ;;  %v856_v53 = vadd.f32 %v837_v2, %v750_v44  ;;  %v965_v59 = vadd.f32 %v1600_v61, %v858_v23 }
 0x13a   : > { %v1591_v14 = vpop.f32.mrf.mxu1 }
 0x13b   : > { %v947_v27 = vpop.f32.mrf.mxu0  ;;  %v859_v56 = vadd.f32 %v1591_v14, %v753_v40  ;;  %v963_v2 = vadd.f32 %v944_v4, %v856_v53 }
 0x13c   : > { %v840_v17 = vpop.f32.mrf.mxu1 }
 0x13d   : > { %v1616_v19 = vpop.f32.mrf.mxu0  ;;  %v857_v60 = vadd.f32 %v840_v17, %v751_v52  ;;  %v966_v14 = vadd.f32 %v1601_v15, %v859_v56 }
 0x13e   : > { %v1606_v42 = vpop.f32.mrf.mxu1 }
 0x13f   : > { %v1067_v22 = vadd.f32 %v1606_v42, %v961_v5  ;;  %v1140_v34 = vpop.f32.mrf.mxu0  ;;  %v964_v16 = vadd.f32 %v947_v27, %v857_v60 }
 0x140   : > { %v1034_v21 = vpop.f32.mrf.mxu1 }
 0x141   : > { %v1173_v48 = vadd.f32 %v1616_v19, %v1067_v22  ;;  %v1065_v33 = vadd.f32 %v1034_v21, %v959_v43  ;;  %v1617_v49 = vpop.f32.mrf.mxu0 }
 0x142   : > { %v1607_v36 = vpop.f32.mrf.mxu1 }
 0x143   : > { %v1188_v50 = vmul.f32 %v2042_v31, %v1173_v48  ;;  %v1171_v35 = vadd.f32 %v1140_v34, %v1065_v33  ;;  %v1068_v38 = vadd.f32 %v1607_v36, %v962_v46  ;;  %v1143_v54 = vpop.f32.mrf.mxu0 }
 0x144   : > { %v1037_v51 = vpop.f32.mrf.mxu1 }
 0x145   : > { %v2051_v55 = vadd.f32 %v2045_v25, %v1188_v50  ;;  %v1186_v37 = vmul.f32 %v2042_v31, %v1171_v35  ;;  %v1174_v57 = vadd.f32 %v1617_v49, %v1068_v38  ;;  %v1066_v58 = vadd.f32 %v1037_v51, %v960_v47  ;;  %v1620_v63 = vpop.f32.mrf.mxu0 }
 0x146   : > { %v1610_v62 = vpop.f32.mrf.mxu1 }
 0x147   : > { %v1478_v0 = vmul.f32 -1.702, %v2051_v55  ;;  %v2056_v39 = vadd.f32 %v2045_v25, %v1186_v37  ;;  %v1189_v41 = vmul.f32 %v2042_v31, %v1174_v57  ;;  %v1172_v1 = vadd.f32 %v1143_v54, %v1066_v58  ;;  %v1156_v11 = vpop.f32.mrf.mxu0 }
 0x148   : > { %v1071_v10 = vadd.f32 %v1610_v62, %v965_v59  ;;  %v1050_v6 = vpop.f32.mrf.mxu1 }
 0x149   : > { %v1229_v12 = vmul.f32 1.442695, %v1478_v0  ;;  %v1476_v8 = vmul.f32 -1.702, %v2056_v39  ;;  %v2061_v61 = vadd.f32 %v2045_v25, %v1189_v41  ;;  %v1187_v13 = vmul.f32 %v2042_v31, %v1172_v1  ;;  %v1621_v17 = vpop.f32.mrf.mxu0 }
 0x14a   : > { %v1177_v3 = vadd.f32 %v1620_v63, %v1071_v10  ;;  %v1069_v18 = vadd.f32 %v1050_v6, %v963_v2  ;;  %v1611_v26 = vpop.f32.mrf.mxu1 }
 0x14b   : > { %1675 = vpow2.f32 %v1229_v12  ;;  %v1225_v28 = vmul.f32 1.442695, %v1476_v8  ;;  %v1479_v4 = vmul.f32 -1.702, %v2061_v61  ;;  %v2066_v5 = vadd.f32 %v2045_v25, %v1187_v13  ;;  %v1159_v22 = vpop.f32.mrf.mxu0 }
 0x14c   : > { %v1192_v20 = vmul.f32 %v2042_v31, %v1177_v3  ;;  %v1175_v30 = vadd.f32 %v1156_v11, %v1069_v18  ;;  %v1072_v29 = vadd.f32 %v1611_v26, %v966_v14  ;;  %v1053_v32 = vpop.f32.mrf.mxu1 }
 0x14d   : > { %1677 = vpow2.f32 %v1225_v28  ;;  %v1231_v42 = vmul.f32 1.442695, %v1479_v4  ;;  %v1477_v15 = vmul.f32 -1.702, %v2066_v5  ;;  %v1070_v27 = vadd.f32 %v1053_v32, %v964_v16 }
 0x14e   : > { %v2071_v19 = vadd.f32 %v2045_v25, %v1192_v20  ;;  %v1190_v43 = vmul.f32 %v2042_v31, %v1175_v30  ;;  %v1178_v7 = vadd.f32 %v1621_v17, %v1072_v29 }
 0x14f   : > { %1679 = vpow2.f32 %v1231_v42  ;;  %v1227_v9 = vmul.f32 1.442695, %v1477_v15  ;;  %v1176_v24 = vadd.f32 %v1159_v22, %v1070_v27 }
 0x150   : > { %v1482_v45 = vmul.f32 -1.702, %v2071_v19  ;;  %v1205_v21 = vadd.f32 %v2045_v25, %v1190_v43  ;;  %v1193_v34 = vmul.f32 %v2042_v31, %v1178_v7 }
 0x151   : > { %1681 = vpow2.f32 %v1227_v9  ;;  %v1191_v46 = vmul.f32 %v2042_v31, %v1176_v24 }
 0x152   : > { %v1237_v48 = vmul.f32 1.442695, %v1482_v45  ;;  %v1480_v33 = vmul.f32 -1.702, %v1205_v21  ;;  %v1208_v44 = vadd.f32 %v2045_v25, %v1193_v34 }
 0x153   : > { %v1206_v23 = vadd.f32 %v2045_v25, %v1191_v46 }
 0x154   : > { %1683 = vpow2.f32 %v1237_v48  ;;  %v1233_v36 = vmul.f32 1.442695, %v1480_v33  ;;  %v1483_v49 = vmul.f32 -1.702, %v1208_v44 }
 0x155   : > { %v1481_v47 = vmul.f32 -1.702, %v1206_v23 }
 0x156   : > { %1685 = vpow2.f32 %v1233_v36  ;;  %v1239_v50 = vmul.f32 1.442695, %v1483_v49 }
 0x157   : > { %v1235_v35 = vmul.f32 1.442695, %v1481_v47 }
 0x158   : > { %v1676_v38 = vpop.eup %1675  ;;  %1687 = vpow2.f32 %v1239_v50 }
 0x159   : > { %v1243_v40 = vadd.f32 1.0, %v1676_v38  ;;  %1689 = vpow2.f32 %v1235_v35 }
 0x15a   : > { %v1678_v52 = vpop.eup %1677 }
 0x15b   : > { %1691 = vrcp.f32 %v1243_v40  ;;  %v1241_v31 = vadd.f32 1.0, %v1678_v52 }
 0x15c   : > { %v1680_v53 = vpop.eup %1679 }
 0x15d   : > { %1693 = vrcp.f32 %v1241_v31  ;;  %v1244_v51 = vadd.f32 1.0, %v1680_v53 }
 0x15e   : > { %v1682_v54 = vpop.eup %1681 }
 0x15f   : > { %1695 = vrcp.f32 %v1244_v51  ;;  %v1242_v25 = vadd.f32 1.0, %v1682_v54 }
 0x161   : > { %v1684_v37 = vpop.eup %1683  ;;  %1697 = vrcp.f32 %v1242_v25 }
 0x162   : > { %v1247_v57 = vadd.f32 1.0, %v1684_v37 }
 0x163   : > { %v1686_v58 = vpop.eup %1685 }
 0x164   : > { %1699 = vrcp.f32 %v1247_v57  ;;  %v1245_v59 = vadd.f32 1.0, %v1686_v58 }
 0x165   : > { %v1688_v56 = vpop.eup %1687 }
 0x166   : > { %v1690_v60 = vpop.eup %1689  ;;  %1701 = vrcp.f32 %v1245_v59  ;;  %v1248_v62 = vadd.f32 1.0, %v1688_v56 }
 0x167   : > { %v1246_v63 = vadd.f32 1.0, %v1690_v60 }
 0x168   : > { %v1692_v0 = vpop.eup %1691  ;;  %1703 = vrcp.f32 %v1248_v62 }
 0x169   : > { %v1267_v41 = vmul.f32 %v1692_v0, %v2051_v55  ;;  %1705 = vrcp.f32 %v1246_v63 }
 0x16a   : > { %v1694_v1 = vpop.eup %1693 }
 0x16b   : > { %1275 = vst.msk [vmem:[%s237_s21 + $0x10] sm:$0xff] %vm274_vm0, %v1267_v41  ;;  %v1265_v2 = vmul.f32 %v1694_v1, %v2056_v39 }
 0x16c   : > { %v1696_v10 = vpop.eup %1695 }
 0x16d   : > { %1273 = vst.msk [vmem:[%s237_s21] sm:$0xff] %vm274_vm0, %v1265_v2  ;;  %v1268_v6 = vmul.f32 %v1696_v10, %v2061_v61 }
 0x16e   : > { %v1698_v11 = vpop.eup %1697 }
 0x16f   : > { %1276 = vst.msk [vmem:[%s237_s21 + $0x18] sm:$0xff] %vm274_vm0, %v1268_v6  ;;  %v1266_v12 = vmul.f32 %v1698_v11, %v2066_v5 }
 0x171   : > { %v1700_v8 = vpop.eup %1699  ;;  %1274 = vst.msk [vmem:[%s237_s21 + $0x8] sm:$0xff] %vm274_vm0, %v1266_v12 }
 0x172   : > { %v1271_v55 = vmul.f32 %v1700_v8, %v2071_v19 }
 0x173   : > { %v1702_v13 = vpop.eup %1701 }
 0x174   : > { %1279 = vst.msk [vmem:[%s237_s21 + $0x30] sm:$0xff] %vm274_vm0, %v1271_v55  ;;  %v1269_v14 = vmul.f32 %v1702_v13, %v1205_v21 }
 0x175   : > { %v1704_v39 = vpop.eup %1703 }
 0x176   : > { %v1706_v16 = vpop.eup %1705  ;;  %1277 = vst.msk [vmem:[%s237_s21 + $0x20] sm:$0xff] %vm274_vm0, %v1269_v14  ;;  %v1272_v3 = vmul.f32 %v1704_v39, %v1208_v44 }
 0x177   : > { %v1270_v61 = vmul.f32 %v1706_v16, %v1206_v23 }
 0x178   : > { %1280 = vst.msk [vmem:[%s237_s21 + $0x38] sm:$0xff] %vm274_vm0, %v1272_v3 }
 0x179   : > { %1278 = vst.msk [vmem:[%s237_s21 + $0x28] sm:$0xff] %vm274_vm0, %v1270_v61 }
 0x17a PF: > { %s16_s15 = sadd.s32 1, %s1799_s15  }
 0x17b   : > { %p13_p5 = scmp.ge.s32.totalorder %s16_s15, 4  }
 0x17d   :  { %15 = sbr.rel (!%p13_p5) target bundleno = 2 (0x2), region = 89 }
 0x182   :  { %1302 = vsyncpa [#allocation3], 1 }
 0x183   :  { %1304 = vsyncpa [#allocation3 + $0x1], 1 }
 0x184   :  { %1305 = vsyncpa [#allocation5], 1 }

// kernel: decoder_forward.7
= control target key start
LH: loop header
LB: loop body
LE: loop exit
PB: predicated region body
PF: predicated region fallthrough
CT: control target
= control target key end

     0   :  { %9 = vsyncpa [#allocation3], 0  ;;  %s2092_s0 = inlined_call_operand.vmem [shape: f32[2,10,10,16], index: 0, kind: input, shape index: {}]   ;;  %s2093_s1 = inlined_call_operand.hbm [shape: bf16[9,16,128], index: 1, kind: input, shape index: {}]   ;;  %s2094_s2 = inlined_call_operand.hbm [shape: f32[1,128], index: 2, kind: input, shape index: {}]   ;;  %s2095_s3 = inlined_call_operand.hbm [shape: f32[1,128], index: 3, kind: input, shape index: {}]   ;;  %s2096_s4 = inlined_call_operand.vmem [shape: f32[2,8,8,128], index: 4, kind: output, shape index: {}]  }
   0x1   :  { %10 = vsyncpa [#allocation5], 0  ;;  %s1831_s15 = smov 0  }
   0x2 LB: > { %s1801_s16 = smov [#allocation4]   ;;  %s1837_s18 = sadd.s32 4294967295, %s1799_s15   ;;  %s1799_s15 = sphi %s1831_s15, %s16_s15  }
   0x3   : > { %s162_s17 = sshll.u32 %s1801_s16, 4  ;;  %p1369_p0 = scmp.ge.s32.totalorder %s1799_s15, 1  ;;  %s163_s17 = int_to_ptr.vmem [resolvable:$true] %s162_s17 }
   0x4   : > { %p136_p1 = scmp.lt.s32.totalorder %s1799_s15, 3  ;;  %p2097_p2 = scmp.eq.s32.totalorder %s1837_s18, 0 }
   0x5   : > { %s1802_s20 = smov [#allocation2]   ;;  %s1803_s23 = smov [#allocation6]  }
   0x6   : > { %p1842_p3 = pnand %p1369_p0, %p136_p1  ;;  %s148_s21 = sshll.u32 %s1802_s20, 4  ;;  %s149_s21 = int_to_ptr.vmem [resolvable:$true] %s148_s21 }
   0x7   : > { %s173_s24 = sshll.u32 %s1803_s23, 4  ;;  %s1718_s25 = scalar_lea.vmem %s163_s17, 16  ;;  %s1854_s24 = int_to_ptr.vmem [resolvable:$true] %s173_s24 }
   0x8   : > { %s2099_s19 = scalar_select %p1842_p3, 1, 0 }
   0x9   : > { %p1637_p4 = pneg %p1842_p3  ;;  %p1719_p7 = scmp.ne.s32.totalorder %s163_s17, %s1718_s25 }
   0xa   : > { %s1725_s26 = scalar_lea.vmem %s163_s17, 32  ;;  %p1726_p10 = scmp.lt.s32.totalorder %s163_s17, %s163_s17 }
   0xb   : > { %p1850_p5 = pnand %p2097_p2, %p1637_p4  ;;  %p1727_p11 = scmp.lt.s32.totalorder %s1725_s26, %s1718_s25 }
   0xd   : > { %p1709_p6 = pneg %p1850_p5  ;;  %p1728_p12 = por %p1727_p11, %p1726_p10 }
   0xf   : > { %p1721_p8 = pnand %p1719_p7, %p1709_p6 }
  0x11   : > { %p1722_p9 = pneg %p1721_p8 }
  0x13   : > { %p1729_p13 = pnand %p1728_p12, %p1722_p9 }
  0x15   : > { %1732 = shalt.err (!%p1729_p13)
}
  0x16   : > { %1643 = dma.hbm_to_vmem [thread:$0]  (!%p1850_p5), %s2094_s2, 16, %s163_s17, [#allocation5]  }
  0x17   : > { %s1744_s29 = scalar_lea.vmem %s149_s21, 1152  ;;  %p1752_p7 = scmp.lt.s32.totalorder %s149_s21, %s149_s21 }
  0x18   : > { %p1745_p0 = scmp.ne.s32.totalorder %s149_s21, %s1744_s29  ;;  %p1753_p8 = scmp.lt.s32.totalorder %s1744_s29, %s1744_s29 }
  0x1a   : > { %p1747_p1 = pnand %p1745_p0, %p1709_p6  ;;  %p1754_p2 = por %p1753_p8, %p1752_p7 }
  0x1c   : > { %p1748_p4 = pneg %p1747_p1 }
  0x1e   : > { %p1755_p3 = pnand %p1754_p2, %p1748_p4 }
  0x20   : > { %1758 = shalt.err (!%p1755_p3)
}
  0x21   : > { %s1804_s30 = smov 64   ;;  %s1805_s5 = smov 4  }
  0x22   : > { %1640 = dma.hbm_to_vmem [thread:$0]  (!%p1850_p5), %s2093_s1, 1152, %s149_s21, [#allocation3], %s1804_s30, %s1804_s30, %s1805_s5  }
  0x23   : > { %s1770_s8 = scalar_lea.vmem %s1854_s24, 16  ;;  %s1777_s9 = scalar_lea.vmem %s1854_s24, 32 }
  0x24   : > { %p1771_p9 = scmp.ne.s32.totalorder %s1854_s24, %s1770_s8  ;;  %p1778_p3 = scmp.lt.s32.totalorder %s1854_s24, %s1854_s24 }
  0x25   : > { %p1779_p11 = scmp.lt.s32.totalorder %s1777_s9, %s1770_s8 }
  0x26   : > { %p1773_p10 = pnand %p1771_p9, %p1709_p6 }
  0x27   : > { %p1780_p12 = por %p1779_p11, %p1778_p3 }
  0x28   : > { %p1774_p2 = pneg %p1773_p10 }
  0x2a   : > { %p1781_p13 = pnand %p1780_p12, %p1774_p2 }
  0x2c   : > { %1784 = shalt.err (!%p1781_p13)
}
  0x2d   : > { %1646 = dma.hbm_to_vmem [thread:$0]  (!%p1850_p5), %s2095_s3, 16, %s1854_s24, [#allocation5]  }
  0x2e   : > { %p2101_p0 = scmp.ne.s32.totalorder %s2099_s19, 0 }
  0x2f   : > { %p2102_p6 = scmp.eq.s32.totalorder (!%p2101_p0), %s1837_s18, 0 }
  0x30   : > { %194 = sbr.rel (%p2101_p0) target bundleno = 378 (0x17a), region = 36 }
  0x35   : > { %1790 = dma.done.wait (%p2102_p6), [#allocation3], 1152   ;;  %p2103_p1 = pmov %p2102_p6 }
  0x37   : > { %1792 = vsyncadd (%p2103_p1), [#allocation3], 4294966144  ;;  %p2104_p4 = pmov %p2103_p1 }
  0x38   : > { %p2105_p7 = pmov %p2103_p1 }
  0x39   : > { %1794 = dma.done.wait (%p2104_p4), [#allocation5], 32  }
  0x3a   : > { %1796 = vsyncadd (%p2105_p7), [#allocation5], 4294967264  ;;  %p228_p8 = scmp.lt.s32.totalorder %s1837_s18, 1  ;;  %v1666_v0 = vld [vmem:[#allocation2 + $0x8] sm:$0xff]   ;;  %vm274_vm0 = vcmask 130048   ;;  %v1667_v13 = vld [vmem:[#allocation2] sm:$0xff]  }
  0x3b   : > { %1532 = vmatprep.subr.bf16.mxu0 %v1666_v0  ;;  %1622 = vmatprep.subr.bf16.mxu1 %v1666_v0  ;;  %v1668_v14 = vld [vmem:[#allocation2 + $0x10] sm:$0xff]   ;;  %v1669_v25 = vld [vmem:[#allocation2 + $0x18] sm:$0xff]   ;;  %v1670_v28 = vld [vmem:[#allocation2 + $0x20] sm:$0xff]  }
  0x3c   : > { %s2107_s18 = smov (!%p228_p8, %s1837_s18), 1  ;;  %1533 = vmatpush3.bf16.msra.mxu0 %v1666_v0  ;;  %1623 = vmatpush3.bf16.msra.mxu1 %v1666_v0  ;;  %v1671_v37 = vld [vmem:[#allocation2 + $0x28] sm:$0xff]   ;;  %v1672_v38 = vld [vmem:[#allocation2 + $0x30] sm:$0xff]   ;;  %v1673_v49 = vld [vmem:[#allocation2 + $0x38] sm:$0xff]  }
  0x3d   : > { %s1624_s12 = smul.u32 160, %s2107_s18  ;;  %1542 = vmatprep.subr.bf16.mxu1 %v1667_v13  ;;  %1552 = vmatprep.subr.bf16.mxu0 %v1668_v14  ;;  %v1674_v50 = vld [vmem:[#allocation2 + $0x40] sm:$0xff]   ;;  %s1486_s17 = sshll.u32 %s2107_s18, 6 }
  0x3e   : > { %s237_s21 = scalar_lea.vmem %s2096_s4, %s1486_s17 }
  0x3f   : > { %s1906_s16 = scalar_lea.vmem %s2092_s0, %s1624_s12 }
  0x40   : > { %v253_v1 = vld [vmem:[%s1906_s16 + $0x1] sm:$0xff]  ;;  %v1910_v2 = vld [vmem:[%s1906_s16 + $0x11] sm:$0xff] }
  0x41   : > { %v1913_v3 = vld [vmem:[%s1906_s16 + $0x41] sm:$0xff]  ;;  %v261_v4 = vpack.c.bf16 %v1910_v2, %v253_v1  ;;  %v1917_v5 = vld [vmem:[%s1906_s16 + $0x51] sm:$0xff] }
  0x42   : > { %v1920_v6 = vld [vmem:[%s1906_s16 + $0x21] sm:$0xff]  ;;  %v1923_v7 = vld [vmem:[%s1906_s16 + $0x31] sm:$0xff]  ;;  %v1927_v8 = vpack.c.bf16 %v1917_v5, %v1913_v3 }
  0x43   : > { %v1931_v9 = vpack.c.bf16 %v1923_v7, %v1920_v6  ;;  %v1934_v10 = vld [vmem:[%s1906_s16 + $0x61] sm:$0xff]  ;;  %v1937_v11 = vld [vmem:[%s1906_s16 + $0x71] sm:$0xff]  ;;  %1534 = vmatprep.mubr.msk.bf16.mxu0 %vm274_vm0, %v261_v4  ;;  %v656_v44 = vpack.c.bf16 %v1920_v6, %v1910_v2  ;;  %v657_v46 = vpack.c.bf16 %v1913_v3, %v1923_v7 }
  0x44   : > { %v1942_v12 = vpack.c.bf16 %v1937_v11, %v1934_v10  ;;  %1538 = vmatprep.mubr.msk.bf16.mxu1 %vm274_vm0, %v1927_v8  ;;  %v239_v15 = vld [vmem:[%s1906_s16] sm:$0xff]  ;;  %v240_v16 = vld [vmem:[%s1906_s16 + $0x10] sm:$0xff]  ;;  %v658_v48 = vpack.c.bf16 %v1934_v10, %v1917_v5 }
  0x45   : > { %1535 = vmatmul.mubr.msk.bf16.vlgmr.msra.gmra.mxu0 %vm274_vm0, %v1931_v9  ;;  %v435_v17 = vld [vmem:[%s1906_s16 + $0x2] sm:$0xff]  ;;  %v1954_v18 = vld [vmem:[%s1906_s16 + $0x12] sm:$0xff]  ;;  %v247_v19 = vpack.c.bf16 %v240_v16, %v239_v15 }
  0x46   : > { %1539 = vmatmul.mubr.msk.bf16.vlgmr.msra.gmra.mxu1 %vm274_vm0, %v1942_v12  ;;  %v443_v20 = vpack.c.bf16 %v1954_v18, %v435_v17  ;;  %v241_v21 = vld [vmem:[%s1906_s16 + $0x20] sm:$0xff]  ;;  %v242_v22 = vld [vmem:[%s1906_s16 + $0x30] sm:$0xff]  ;;  %1553 = vmatpush3.bf16.msra.mxu0 %v1668_v14 }
  0x47   : > { %v437_v23 = vld [vmem:[%s1906_s16 + $0x22] sm:$0xff]  ;;  %1543 = vmatpush3.bf16.msra.mxu1 %v1667_v13  ;;  %v1961_v24 = vld [vmem:[%s1906_s16 + $0x32] sm:$0xff]  ;;  %1544 = vmatprep.mubr.msk.bf16.mxu1 %vm274_vm0, %v247_v19  ;;  %v248_v26 = vpack.c.bf16 %v242_v22, %v241_v21  ;;  %v550_v43 = vpack.c.bf16 %v241_v21, %v240_v16 }
  0x48   : > { %1554 = vmatprep.mubr.msk.bf16.mxu0 %vm274_vm0, %v443_v20  ;;  %v1966_v27 = vpack.c.bf16 %v1961_v24, %v437_v23  ;;  %v243_v29 = vld [vmem:[%s1906_s16 + $0x40] sm:$0xff]  ;;  %v244_v30 = vld [vmem:[%s1906_s16 + $0x50] sm:$0xff]  ;;  %1562 = vmatprep.subr.bf16.mxu1 %v1669_v25  ;;  %v762_v55 = vpack.c.bf16 %v437_v23, %v1954_v18 }
  0x49   : > { %v439_v31 = vld [vmem:[%s1906_s16 + $0x42] sm:$0xff]  ;;  %v440_v32 = vld [vmem:[%s1906_s16 + $0x52] sm:$0xff]  ;;  %1572 = vmatprep.subr.bf16.mxu0 %v1670_v28  ;;  %v249_v33 = vpack.c.bf16 %v244_v30, %v243_v29  ;;  %v551_v45 = vpack.c.bf16 %v243_v29, %v242_v22 }
  0x4a   : > { %v1972_v34 = vpack.c.bf16 %v440_v32, %v439_v31  ;;  %v245_v35 = vld [vmem:[%s1906_s16 + $0x60] sm:$0xff]  ;;  %v246_v36 = vld [vmem:[%s1906_s16 + $0x70] sm:$0xff]  ;;  %v763_v56 = vpack.c.bf16 %v439_v31, %v1961_v24 }
  0x4b   : > { %v441_v39 = vld [vmem:[%s1906_s16 + $0x62] sm:$0xff]  ;;  %v442_v40 = vld [vmem:[%s1906_s16 + $0x72] sm:$0xff]  ;;  %v250_v41 = vpack.c.bf16 %v246_v36, %v245_v35  ;;  %v552_v47 = vpack.c.bf16 %v245_v35, %v244_v30 }
  0x4c   : > { %v446_v42 = vpack.c.bf16 %v442_v40, %v441_v39  ;;  %v1403_v51 = vld [vmem:[%s1906_s16 + $0x80] sm:$0xff]  ;;  %v764_v57 = vpack.c.bf16 %v441_v39, %v440_v32  ;;  %v1442_v59 = vld [vmem:[%s1906_s16 + $0x90] sm:$0xff] }
  0x4d   : > { %1555 = vmatmul.mubr.msk.bf16.vlgmr.msra.gmra.mxu0 %vm274_vm0, %v1966_v27  ;;  %v1416_v52 = vld [vmem:[%s1906_s16 + $0x81] sm:$0xff]  ;;  %v553_v53 = vpack.c.bf16 %v1403_v51, %v246_v36  ;;  %v872_v61 = vpack.c.bf16 %v1442_v59, %v1403_v51  ;;  %v1455_v62 = vld [vmem:[%s1906_s16 + $0x91] sm:$0xff] }
  0x4e   : > { %1545 = vmatmul.mubr.msk.bf16.vlgmr.msra.gmra.mxu1 %vm274_vm0, %v248_v26  ;;  %1573 = vmatpush3.bf16.msra.mxu0 %v1670_v28  ;;  %v659_v54 = vpack.c.bf16 %v1416_v52, %v1937_v11  ;;  %v1429_v58 = vld [vmem:[%s1906_s16 + $0x82] sm:$0xff]  ;;  %v1468_v63 = vld [vmem:[%s1906_s16 + $0x92] sm:$0xff]  ;;  %v978_v0 = vpack.c.bf16 %v1455_v62, %v1416_v52 }
  0x4f   : > { %1563 = vmatpush3.bf16.msra.mxu1 %v1669_v25  ;;  %1548 = vmatprep.mubr.msk.bf16.mxu1 %vm274_vm0, %v249_v33  ;;  %v765_v60 = vpack.c.bf16 %v1429_v58, %v442_v40  ;;  %v1084_v1 = vpack.c.bf16 %v1468_v63, %v1429_v58 }
  0x50   : > { %1558 = vmatprep.mubr.msk.bf16.mxu0 %vm274_vm0, %v1972_v34  ;;  %1582 = vmatprep.subr.bf16.mxu1 %v1671_v37 }
  0x51   : > { %1592 = vmatprep.subr.bf16.mxu0 %v1672_v38 }
  0x55   : > { %1559 = vmatmul.mubr.msk.bf16.gmra.mxu0 %vm274_vm0, %v446_v42 }
  0x56   : > { %1549 = vmatmul.mubr.msk.bf16.gmra.mxu1 %vm274_vm0, %v250_v41  ;;  %1574 = vmatprep.mubr.msk.bf16.mxu0 %vm274_vm0, %v656_v44 }
  0x57   : > { %1564 = vmatprep.mubr.msk.bf16.mxu1 %vm274_vm0, %v550_v43 }
  0x5d   : > { %1575 = vmatmul.mubr.msk.bf16.vlgmr.msra.gmra.mxu0 %vm274_vm0, %v657_v46 }
  0x5e   : > { %1565 = vmatmul.mubr.msk.bf16.vlgmr.msra.gmra.mxu1 %vm274_vm0, %v551_v45  ;;  %1593 = vmatpush3.bf16.msra.mxu0 %v1672_v38 }
  0x5f   : > { %1583 = vmatpush3.bf16.msra.mxu1 %v1671_v37  ;;  %1568 = vmatprep.mubr.msk.bf16.mxu1 %vm274_vm0, %v552_v47 }
  0x60   : > { %1578 = vmatprep.mubr.msk.bf16.mxu0 %vm274_vm0, %v658_v48  ;;  %1602 = vmatprep.subr.bf16.mxu1 %v1673_v49 }
  0x61   : > { %1612 = vmatprep.subr.bf16.mxu0 %v1674_v50 }
  0x65   : > { %1579 = vmatmul.mubr.msk.bf16.gmra.mxu0 %vm274_vm0, %v659_v54 }
  0x66   : > { %1569 = vmatmul.mubr.msk.bf16.gmra.mxu1 %vm274_vm0, %v553_v53  ;;  %1594 = vmatprep.mubr.msk.bf16.mxu0 %vm274_vm0, %v248_v26 }
  0x67   : > { %1584 = vmatprep.mubr.msk.bf16.mxu1 %vm274_vm0, %v762_v55 }
  0x6d   : > { %1595 = vmatmul.mubr.msk.bf16.vlgmr.msra.gmra.mxu0 %vm274_vm0, %v249_v33 }
  0x6e   : > { %1585 = vmatmul.mubr.msk.bf16.vlgmr.msra.gmra.mxu1 %vm274_vm0, %v763_v56  ;;  %1613 = vmatpush3.bf16.msra.mxu0 %v1674_v50 }
  0x6f   : > { %1603 = vmatpush3.bf16.msra.mxu1 %v1673_v49  ;;  %1588 = vmatprep.mubr.msk.bf16.mxu1 %vm274_vm0, %v764_v57 }
  0x70   : > { %1598 = vmatprep.mubr.msk.bf16.mxu0 %vm274_vm0, %v250_v41 }
  0x75   : > { %1599 = vmatmul.mubr.msk.bf16.gmra.mxu0 %vm274_vm0, %v872_v61 }
  0x76   : > { %1589 = vmatmul.mubr.msk.bf16.gmra.mxu1 %vm274_vm0, %v765_v60  ;;  %1614 = vmatprep.mubr.msk.bf16.mxu0 %vm274_vm0, %v1966_v27 }
  0x77   : > { %1604 = vmatprep.mubr.msk.bf16.mxu1 %vm274_vm0, %v1931_v9 }
  0x7d   : > { %1615 = vmatmul.mubr.msk.bf16.vlgmr.msra.gmra.mxu0 %vm274_vm0, %v1972_v34 }
  0x7e   : > { %1605 = vmatmul.mubr.msk.bf16.vlgmr.msra.gmra.mxu1 %vm274_vm0, %v1927_v8  ;;  %1618 = vmatprep.mubr.msk.bf16.mxu0 %vm274_vm0, %v446_v42 }
  0x7f   : > { %1608 = vmatprep.mubr.msk.bf16.mxu1 %vm274_vm0, %v1942_v12 }
  0x85   : > { %1619 = vmatmul.mubr.msk.bf16.gmra.mxu0 %vm274_vm0, %v1084_v1 }
  0x86   : > { %1609 = vmatmul.mubr.msk.bf16.gmra.mxu1 %vm274_vm0, %v978_v0 }
 0x105   : > { %v1536_v2 = vpop.f32.mrf.mxu0 }
 0x106   : > { %v1540_v3 = vpop.f32.mrf.mxu1 }
 0x107   : > { %v321_v4 = vpop.f32.mrf.mxu0 }
 0x108   : > { %v337_v5 = vpop.f32.mrf.mxu1 }
 0x109   : > { %v1537_v6 = vpop.f32.mrf.mxu0 }
 0x10a   : > { %v2030_v7 = vpop.f32.mrf.mxu1 }
 0x10b   : > { %v324_v8 = vpop.f32.mrf.mxu0 }
 0x10c   : > { %v2032_v9 = vpop.f32.mrf.mxu1 }
 0x10d   : > { %v1556_v11 = vpop.f32.mrf.mxu0 }
 0x10e   : > { %v1546_v10 = vpop.f32.mrf.mxu1 }
 0x10f   : > { %v502_v13 = vpop.f32.mrf.mxu0  ;;  %v413_v42 = vadd.f32 %v1546_v10, %v1536_v2 }
 0x110   : > { %v404_v12 = vpop.f32.mrf.mxu1 }
 0x111   : > { %v1557_v15 = vpop.f32.mrf.mxu0  ;;  %v405_v45 = vadd.f32 %v404_v12, %v321_v4  ;;  %v535_v48 = vadd.f32 %v1556_v11, %v413_v42 }
 0x112   : > { %v1547_v14 = vpop.f32.mrf.mxu1 }
 0x113   : > { %v505_v17 = vpop.f32.mrf.mxu0  ;;  %v416_v49 = vadd.f32 %v1547_v14, %v1537_v6  ;;  %v533_v52 = vadd.f32 %v502_v13, %v405_v45 }
 0x114   : > { %v407_v16 = vpop.f32.mrf.mxu1 }
 0x115   : > { %v1560_v19 = vpop.f32.mrf.mxu0  ;;  %v408_v53 = vadd.f32 %v407_v16, %v324_v8  ;;  %v536_v57 = vadd.f32 %v1557_v15, %v416_v49 }
 0x116   : > { %v1550_v18 = vpop.f32.mrf.mxu1 }
 0x117   : > { %v518_v21 = vpop.f32.mrf.mxu0  ;;  %v429_v59 = vadd.f32 %v1550_v18, %v1540_v3  ;;  %v534_v62 = vadd.f32 %v505_v17, %v408_v53 }
 0x118   : > { %v420_v20 = vpop.f32.mrf.mxu1 }
 0x119   : > { %v1561_v23 = vpop.f32.mrf.mxu0  ;;  %v421_v1 = vadd.f32 %v420_v20, %v337_v5  ;;  %v539_v12 = vadd.f32 %v1560_v19, %v429_v59 }
 0x11a   : > { %v1551_v22 = vpop.f32.mrf.mxu1 }
 0x11b   : > { %v521_v25 = vpop.f32.mrf.mxu0  ;;  %v432_v8 = vadd.f32 %v1551_v22, %v2030_v7  ;;  %v537_v18 = vadd.f32 %v518_v21, %v421_v1 }
 0x11c   : > { %v423_v24 = vpop.f32.mrf.mxu1 }
 0x11d   : > { %v1576_v27 = vpop.f32.mrf.mxu0  ;;  %v424_v13 = vadd.f32 %v423_v24, %v2032_v9 }
 0x11e   : > { %v1566_v26 = vpop.f32.mrf.mxu1 }
 0x11f   : > { %v715_v29 = vpop.f32.mrf.mxu0  ;;  %v642_v54 = vadd.f32 %v1566_v26, %v535_v48 }
 0x120   : > { %v609_v28 = vpop.f32.mrf.mxu1 }
 0x121   : > { %v1577_v31 = vpop.f32.mrf.mxu0  ;;  %v640_v58 = vadd.f32 %v609_v28, %v533_v52  ;;  %v748_v63 = vadd.f32 %v1576_v27, %v642_v54 }
 0x122   : > { %v1567_v30 = vpop.f32.mrf.mxu1 }
 0x123   : > { %v718_v33 = vpop.f32.mrf.mxu0  ;;  %v643_v0 = vadd.f32 %v1567_v30, %v536_v57  ;;  %v746_v10 = vadd.f32 %v715_v29, %v640_v58  ;;  %v540_v30 = vadd.f32 %v1561_v23, %v432_v8  ;;  %v538_v29 = vadd.f32 %v521_v25, %v424_v13  ;;  %v2045_v25 = vld [vmem:[#allocation6] ss:$0 sm:$0xff] }
 0x124   : > { %v612_v32 = vpop.f32.mrf.mxu1 }
 0x125   : > { %v1580_v35 = vpop.f32.mrf.mxu0  ;;  %v641_v6 = vadd.f32 %v612_v32, %v534_v62  ;;  %v749_v16 = vadd.f32 %v1577_v31, %v643_v0  ;;  %v2042_v31 = vld [vmem:[#allocation4] ss:$0 sm:$0xff] }
 0x126   : > { %v1570_v34 = vpop.f32.mrf.mxu1 }
 0x127   : > { %v2034_v37 = vpop.f32.mrf.mxu0  ;;  %v646_v26 = vadd.f32 %v1570_v34, %v539_v12  ;;  %v747_v28 = vadd.f32 %v718_v33, %v641_v6 }
 0x128   : > { %v625_v36 = vpop.f32.mrf.mxu1 }
 0x129   : > { %v2036_v39 = vpop.f32.mrf.mxu0  ;;  %v644_v32 = vadd.f32 %v625_v36, %v537_v18  ;;  %v752_v9 = vadd.f32 %v1580_v35, %v646_v26 }
 0x12a   : > { %v1571_v38 = vpop.f32.mrf.mxu1 }
 0x12b   : > { %v2038_v41 = vpop.f32.mrf.mxu0  ;;  %v647_v24 = vadd.f32 %v1571_v38, %v540_v30 }
 0x12c   : > { %v628_v40 = vpop.f32.mrf.mxu1 }
 0x12d   : > { %v1596_v44 = vpop.f32.mrf.mxu0  ;;  %v645_v45 = vadd.f32 %v628_v40, %v538_v29  ;;  %v753_v40 = vadd.f32 %v2036_v39, %v647_v24 }
 0x12e   : > { %v1586_v43 = vpop.f32.mrf.mxu1 }
 0x12f   : > { %v928_v47 = vpop.f32.mrf.mxu0  ;;  %v854_v11 = vadd.f32 %v1586_v43, %v748_v63  ;;  %v751_v52 = vadd.f32 %v2038_v41, %v645_v45 }
 0x130   : > { %v821_v46 = vpop.f32.mrf.mxu1 }
 0x131   : > { %v1597_v51 = vpop.f32.mrf.mxu0  ;;  %v852_v3 = vadd.f32 %v821_v46, %v746_v10  ;;  %v961_v5 = vadd.f32 %v1596_v44, %v854_v11  ;;  %v750_v44 = vadd.f32 %v2034_v37, %v644_v32 }
 0x132   : > { %v1587_v50 = vpop.f32.mrf.mxu1 }
 0x133   : > { %v931_v56 = vpop.f32.mrf.mxu0  ;;  %v855_v20 = vadd.f32 %v1587_v50, %v749_v16  ;;  %v959_v43 = vadd.f32 %v928_v47, %v852_v3 }
 0x134   : > { %v824_v55 = vpop.f32.mrf.mxu1 }
 0x135   : > { %v1600_v61 = vpop.f32.mrf.mxu0  ;;  %v853_v7 = vadd.f32 %v824_v55, %v747_v28  ;;  %v962_v46 = vadd.f32 %v1597_v51, %v855_v20 }
 0x136   : > { %v1590_v60 = vpop.f32.mrf.mxu1 }
 0x137   : > { %v944_v4 = vpop.f32.mrf.mxu0  ;;  %v858_v23 = vadd.f32 %v1590_v60, %v752_v9  ;;  %v960_v47 = vadd.f32 %v931_v56, %v853_v7 }
 0x138   : > { %v837_v2 = vpop.f32.mrf.mxu1 }
 0x139   : > { %v1601_v15 = vpop.f32.mrf.mxu0  ;;  %v856_v53 = vadd.f32 %v837_v2, %v750_v44  ;;  %v965_v59 = vadd.f32 %v1600_v61, %v858_v23 }
 0x13a   : > { %v1591_v14 = vpop.f32.mrf.mxu1 }
 0x13b   : > { %v947_v27 = vpop.f32.mrf.mxu0  ;;  %v859_v56 = vadd.f32 %v1591_v14, %v753_v40  ;;  %v963_v2 = vadd.f32 %v944_v4, %v856_v53 }
 0x13c   : > { %v840_v17 = vpop.f32.mrf.mxu1 }
 0x13d   : > { %v1616_v19 = vpop.f32.mrf.mxu0  ;;  %v857_v60 = vadd.f32 %v840_v17, %v751_v52  ;;  %v966_v14 = vadd.f32 %v1601_v15, %v859_v56 }
 0x13e   : > { %v1606_v42 = vpop.f32.mrf.mxu1 }
 0x13f   : > { %v1067_v22 = vadd.f32 %v1606_v42, %v961_v5  ;;  %v1140_v34 = vpop.f32.mrf.mxu0  ;;  %v964_v16 = vadd.f32 %v947_v27, %v857_v60 }
 0x140   : > { %v1034_v21 = vpop.f32.mrf.mxu1 }
 0x141   : > { %v1173_v48 = vadd.f32 %v1616_v19, %v1067_v22  ;;  %v1065_v33 = vadd.f32 %v1034_v21, %v959_v43  ;;  %v1617_v49 = vpop.f32.mrf.mxu0 }
 0x142   : > { %v1607_v36 = vpop.f32.mrf.mxu1 }
 0x143   : > { %v1188_v50 = vmul.f32 %v2042_v31, %v1173_v48  ;;  %v1171_v35 = vadd.f32 %v1140_v34, %v1065_v33  ;;  %v1068_v38 = vadd.f32 %v1607_v36, %v962_v46  ;;  %v1143_v54 = vpop.f32.mrf.mxu0 }
 0x144   : > { %v1037_v51 = vpop.f32.mrf.mxu1 }
 0x145   : > { %v2051_v55 = vadd.f32 %v2045_v25, %v1188_v50  ;;  %v1186_v37 = vmul.f32 %v2042_v31, %v1171_v35  ;;  %v1174_v57 = vadd.f32 %v1617_v49, %v1068_v38  ;;  %v1066_v58 = vadd.f32 %v1037_v51, %v960_v47  ;;  %v1620_v63 = vpop.f32.mrf.mxu0 }
 0x146   : > { %v1610_v62 = vpop.f32.mrf.mxu1 }
 0x147   : > { %v1478_v0 = vmul.f32 -1.702, %v2051_v55  ;;  %v2056_v39 = vadd.f32 %v2045_v25, %v1186_v37  ;;  %v1189_v41 = vmul.f32 %v2042_v31, %v1174_v57  ;;  %v1172_v1 = vadd.f32 %v1143_v54, %v1066_v58  ;;  %v1156_v11 = vpop.f32.mrf.mxu0 }
 0x148   : > { %v1071_v10 = vadd.f32 %v1610_v62, %v965_v59  ;;  %v1050_v6 = vpop.f32.mrf.mxu1 }
 0x149   : > { %v1229_v12 = vmul.f32 1.442695, %v1478_v0  ;;  %v1476_v8 = vmul.f32 -1.702, %v2056_v39  ;;  %v2061_v61 = vadd.f32 %v2045_v25, %v1189_v41  ;;  %v1187_v13 = vmul.f32 %v2042_v31, %v1172_v1  ;;  %v1621_v17 = vpop.f32.mrf.mxu0 }
 0x14a   : > { %v1177_v3 = vadd.f32 %v1620_v63, %v1071_v10  ;;  %v1069_v18 = vadd.f32 %v1050_v6, %v963_v2  ;;  %v1611_v26 = vpop.f32.mrf.mxu1 }
 0x14b   : > { %1675 = vpow2.f32 %v1229_v12  ;;  %v1225_v28 = vmul.f32 1.442695, %v1476_v8  ;;  %v1479_v4 = vmul.f32 -1.702, %v2061_v61  ;;  %v2066_v5 = vadd.f32 %v2045_v25, %v1187_v13  ;;  %v1159_v22 = vpop.f32.mrf.mxu0 }
 0x14c   : > { %v1192_v20 = vmul.f32 %v2042_v31, %v1177_v3  ;;  %v1175_v30 = vadd.f32 %v1156_v11, %v1069_v18  ;;  %v1072_v29 = vadd.f32 %v1611_v26, %v966_v14  ;;  %v1053_v32 = vpop.f32.mrf.mxu1 }
 0x14d   : > { %1677 = vpow2.f32 %v1225_v28  ;;  %v1231_v42 = vmul.f32 1.442695, %v1479_v4  ;;  %v1477_v15 = vmul.f32 -1.702, %v2066_v5  ;;  %v1070_v27 = vadd.f32 %v1053_v32, %v964_v16 }
 0x14e   : > { %v2071_v19 = vadd.f32 %v2045_v25, %v1192_v20  ;;  %v1190_v43 = vmul.f32 %v2042_v31, %v1175_v30  ;;  %v1178_v7 = vadd.f32 %v1621_v17, %v1072_v29 }
 0x14f   : > { %1679 = vpow2.f32 %v1231_v42  ;;  %v1227_v9 = vmul.f32 1.442695, %v1477_v15  ;;  %v1176_v24 = vadd.f32 %v1159_v22, %v1070_v27 }
 0x150   : > { %v1482_v45 = vmul.f32 -1.702, %v2071_v19  ;;  %v1205_v21 = vadd.f32 %v2045_v25, %v1190_v43  ;;  %v1193_v34 = vmul.f32 %v2042_v31, %v1178_v7 }
 0x151   : > { %1681 = vpow2.f32 %v1227_v9  ;;  %v1191_v46 = vmul.f32 %v2042_v31, %v1176_v24 }
 0x152   : > { %v1237_v48 = vmul.f32 1.442695, %v1482_v45  ;;  %v1480_v33 = vmul.f32 -1.702, %v1205_v21  ;;  %v1208_v44 = vadd.f32 %v2045_v25, %v1193_v34 }
 0x153   : > { %v1206_v23 = vadd.f32 %v2045_v25, %v1191_v46 }
 0x154   : > { %1683 = vpow2.f32 %v1237_v48  ;;  %v1233_v36 = vmul.f32 1.442695, %v1480_v33  ;;  %v1483_v49 = vmul.f32 -1.702, %v1208_v44 }
 0x155   : > { %v1481_v47 = vmul.f32 -1.702, %v1206_v23 }
 0x156   : > { %1685 = vpow2.f32 %v1233_v36  ;;  %v1239_v50 = vmul.f32 1.442695, %v1483_v49 }
 0x157   : > { %v1235_v35 = vmul.f32 1.442695, %v1481_v47 }
 0x158   : > { %v1676_v38 = vpop.eup %1675  ;;  %1687 = vpow2.f32 %v1239_v50 }
 0x159   : > { %v1243_v40 = vadd.f32 1.0, %v1676_v38  ;;  %1689 = vpow2.f32 %v1235_v35 }
 0x15a   : > { %v1678_v52 = vpop.eup %1677 }
 0x15b   : > { %1691 = vrcp.f32 %v1243_v40  ;;  %v1241_v31 = vadd.f32 1.0, %v1678_v52 }
 0x15c   : > { %v1680_v53 = vpop.eup %1679 }
 0x15d   : > { %1693 = vrcp.f32 %v1241_v31  ;;  %v1244_v51 = vadd.f32 1.0, %v1680_v53 }
 0x15e   : > { %v1682_v54 = vpop.eup %1681 }
 0x15f   : > { %1695 = vrcp.f32 %v1244_v51  ;;  %v1242_v25 = vadd.f32 1.0, %v1682_v54 }
 0x161   : > { %v1684_v37 = vpop.eup %1683  ;;  %1697 = vrcp.f32 %v1242_v25 }
 0x162   : > { %v1247_v57 = vadd.f32 1.0, %v1684_v37 }
 0x163   : > { %v1686_v58 = vpop.eup %1685 }
 0x164   : > { %1699 = vrcp.f32 %v1247_v57  ;;  %v1245_v59 = vadd.f32 1.0, %v1686_v58 }
 0x165   : > { %v1688_v56 = vpop.eup %1687 }
 0x166   : > { %v1690_v60 = vpop.eup %1689  ;;  %1701 = vrcp.f32 %v1245_v59  ;;  %v1248_v62 = vadd.f32 1.0, %v1688_v56 }
 0x167   : > { %v1246_v63 = vadd.f32 1.0, %v1690_v60 }
 0x168   : > { %v1692_v0 = vpop.eup %1691  ;;  %1703 = vrcp.f32 %v1248_v62 }
 0x169   : > { %v1267_v41 = vmul.f32 %v1692_v0, %v2051_v55  ;;  %1705 = vrcp.f32 %v1246_v63 }
 0x16a   : > { %v1694_v1 = vpop.eup %1693 }
 0x16b   : > { %1275 = vst [vmem:[%s237_s21 + $0x10] sm:$0xff] %v1267_v41  ;;  %v1265_v2 = vmul.f32 %v1694_v1, %v2056_v39 }
 0x16c   : > { %v1696_v10 = vpop.eup %1695 }
 0x16d   : > { %1273 = vst [vmem:[%s237_s21] sm:$0xff] %v1265_v2  ;;  %v1268_v6 = vmul.f32 %v1696_v10, %v2061_v61 }
 0x16e   : > { %v1698_v11 = vpop.eup %1697 }
 0x16f   : > { %1276 = vst [vmem:[%s237_s21 + $0x18] sm:$0xff] %v1268_v6  ;;  %v1266_v12 = vmul.f32 %v1698_v11, %v2066_v5 }
 0x171   : > { %v1700_v8 = vpop.eup %1699  ;;  %1274 = vst [vmem:[%s237_s21 + $0x8] sm:$0xff] %v1266_v12 }
 0x172   : > { %v1271_v13 = vmul.f32 %v1700_v8, %v2071_v19 }
 0x173   : > { %v1702_v14 = vpop.eup %1701 }
 0x174   : > { %1279 = vst [vmem:[%s237_s21 + $0x30] sm:$0xff] %v1271_v13  ;;  %v1269_v55 = vmul.f32 %v1702_v14, %v1205_v21 }
 0x175   : > { %v1704_v16 = vpop.eup %1703 }
 0x176   : > { %v1706_v3 = vpop.eup %1705  ;;  %1277 = vst [vmem:[%s237_s21 + $0x20] sm:$0xff] %v1269_v55  ;;  %v1272_v18 = vmul.f32 %v1704_v16, %v1208_v44 }
 0x177   : > { %v1270_v39 = vmul.f32 %v1706_v3, %v1206_v23 }
 0x178   : > { %1280 = vst [vmem:[%s237_s21 + $0x38] sm:$0xff] %v1272_v18 }
 0x179   : > { %1278 = vst [vmem:[%s237_s21 + $0x28] sm:$0xff] %v1270_v39 }
 0x17a PF: > { %s16_s15 = sadd.s32 1, %s1799_s15  }
 0x17b   : > { %p13_p5 = scmp.ge.s32.totalorder %s16_s15, 4  }
 0x17d   :  { %15 = sbr.rel (!%p13_p5) target bundleno = 2 (0x2), region = 89 }
 0x182   :  { %1302 = vsyncpa [#allocation3], 1 }
 0x183   :  { %1304 = vsyncpa [#allocation3 + $0x1], 1 }
 0x184   :  { %1305 = vsyncpa [#allocation5], 1 }

// kernel: decoder_forward.6
= control target key start
LH: loop header
LB: loop body
LE: loop exit
PB: predicated region body
PF: predicated region fallthrough
CT: control target
= control target key end

     0   :  { %12 = vsyncpa [#allocation3], 0  ;;  %s2599_s0 = inlined_call_operand.vmem [shape: f32[2,10,10,16], index: 0, kind: input, shape index: {}]   ;;  %s2600_s1 = inlined_call_operand.hbm [shape: bf16[9,16,16], index: 1, kind: input, shape index: {}]   ;;  %s2601_s2 = inlined_call_operand.hbm [shape: f32[1,16], index: 2, kind: input, shape index: {}]   ;;  %s2602_s3 = inlined_call_operand.hbm [shape: f32[1,16], index: 3, kind: input, shape index: {}]   ;;  %s2603_s4 = inlined_call_operand.hbm [shape: bf16[16,16], index: 4, kind: input, shape index: {}]   ;;  %s2604_s5 = inlined_call_operand.hbm [shape: f32[1,16], index: 5, kind: input, shape index: {}]   ;;  %s2605_s6 = inlined_call_operand.hbm [shape: f32[1,16], index: 6, kind: input, shape index: {}]   ;;  %s2606_s7 = inlined_call_operand.vmem [shape: f32[2,8,8,16], index: 7, kind: output, shape index: {}]  }
   0x1   :  { %13 = vsyncpa [#allocation5], 0 }
   0x2   :  { %14 = vsyncpa [#allocation8], 0 }
   0x3   :  { %15 = vsyncpa [#allocation11], 0  ;;  %s2293_s24 = smov 0  }
   0x4 LB: > { %s2245_s25 = smov [#allocation4]   ;;  %s2299_s27 = sadd.s32 4294967295, %s2243_s24   ;;  %s2243_s24 = sphi %s2293_s24, %s21_s24  }
   0x5   : > { %s230_s26 = sshll.u32 %s2245_s25, 4  ;;  %p1670_p0 = scmp.ge.s32.totalorder %s2243_s24, 1  ;;  %s231_s26 = int_to_ptr.vmem [resolvable:$true] %s230_s26 }
   0x6   : > { %p204_p1 = scmp.lt.s32.totalorder %s2243_s24, 3  ;;  %p2607_p2 = scmp.eq.s32.totalorder %s2299_s27, 0 }
   0x7   : > { %s2246_s29 = smov [#allocation7]   ;;  %s2247_s9 = smov [#allocation2]  }
   0x8   : > { %p2304_p3 = pnand %p1670_p0, %p204_p1  ;;  %s251_s30 = sshll.u32 %s2246_s29, 4  ;;  %s2310_s30 = int_to_ptr.vmem [resolvable:$true] %s251_s30 }
   0x9   : > { %s216_s10 = sshll.u32 %s2247_s9, 4  ;;  %s2248_s11 = smov [#allocation6]   ;;  %s2318_s10 = int_to_ptr.vmem [resolvable:$true] %s216_s10 }
   0xa   : > { %p1976_p4 = pneg %p2304_p3  ;;  %s2320_s12 = sshll.u32 %s2248_s11, 4  ;;  %s242_s12 = int_to_ptr.vmem [resolvable:$true] %s2320_s12 }
   0xb   : > { %s2076_s14 = scalar_lea.vmem %s231_s26, 16  ;;  %s2083_s15 = scalar_lea.vmem %s231_s26, 32 }
   0xc   : > { %p2314_p5 = pnand %p2607_p2, %p1976_p4  ;;  %p2077_p7 = scmp.ne.s32.totalorder %s231_s26, %s2076_s14 }
   0xd   : > { %p2084_p10 = scmp.lt.s32.totalorder %s231_s26, %s231_s26  ;;  %p2085_p11 = scmp.lt.s32.totalorder %s2083_s15, %s2076_s14 }
   0xe   : > { %p2324_p6 = pneg %p2314_p5 }
   0xf   : > { %p2086_p12 = por %p2085_p11, %p2084_p10 }
  0x10   : > { %p2079_p8 = pnand %p2077_p7, %p2324_p6 }
  0x12   : > { %p2080_p9 = pneg %p2079_p8 }
  0x14   : > { %p2087_p13 = pnand %p2086_p12, %p2080_p9 }
  0x16   : > { %2090 = shalt.err (!%p2087_p13)
}
  0x17   : > { %1982 = dma.hbm_to_vmem [thread:$0]  (!%p2314_p5), %s2601_s2, 16, %s231_s26, [#allocation5]  }
  0x18   : > { %s2102_s18 = scalar_lea.vmem %s2310_s30, 128  ;;  %p2110_p7 = scmp.lt.s32.totalorder %s2310_s30, %s2310_s30 }
  0x19   : > { %p2103_p0 = scmp.ne.s32.totalorder %s2310_s30, %s2102_s18  ;;  %p2111_p8 = scmp.lt.s32.totalorder %s2102_s18, %s2102_s18 }
  0x1b   : > { %p2105_p1 = pnand %p2103_p0, %p2324_p6  ;;  %p2112_p9 = por %p2111_p8, %p2110_p7 }
  0x1d   : > { %p2106_p4 = pneg %p2105_p1 }
  0x1f   : > { %p2113_p10 = pnand %p2112_p9, %p2106_p4 }
  0x21   : > { %2116 = shalt.err (!%p2113_p10)
}
  0x22   : > { %s2249_s19 = smov 64   ;;  %s2250_s20 = smov 4  }
  0x23   : > { %1988 = dma.hbm_to_vmem [thread:$0]  (!%p2314_p5), %s2603_s4, 128, %s2310_s30, [#allocation8], %s2249_s19, %s2249_s19, %s2250_s20  }
  0x24   : > { %s2128_s23 = scalar_lea.vmem %s2318_s10, 1152  ;;  %p2136_p0 = scmp.lt.s32.totalorder %s2318_s10, %s2318_s10 }
  0x25   : > { %p2129_p11 = scmp.ne.s32.totalorder %s2318_s10, %s2128_s23  ;;  %p2137_p1 = scmp.lt.s32.totalorder %s2128_s23, %s2128_s23 }
  0x27   : > { %p2131_p12 = pnand %p2129_p11, %p2324_p6  ;;  %p2138_p4 = por %p2137_p1, %p2136_p0 }
  0x29   : > { %p2132_p13 = pneg %p2131_p12 }
  0x2b   : > { %p2139_p7 = pnand %p2138_p4, %p2132_p13 }
  0x2d   : > { %2142 = shalt.err (!%p2139_p7)
}
  0x2e   : > { %1979 = dma.hbm_to_vmem [thread:$0]  (!%p2314_p5), %s2600_s1, 1152, %s2318_s10, [#allocation3], %s2249_s19, %s2249_s19, %s2250_s20  }
  0x2f   : > { %s2154_s29 = scalar_lea.vmem %s242_s12, 16  ;;  %s2161_s30 = scalar_lea.vmem %s242_s12, 32 }
  0x30   : > { %p2155_p8 = scmp.ne.s32.totalorder %s242_s12, %s2154_s29  ;;  %p2162_p11 = scmp.lt.s32.totalorder %s242_s12, %s242_s12 }
  0x31   : > { %p2163_p12 = scmp.lt.s32.totalorder %s2161_s30, %s2154_s29 }
  0x32   : > { %p2157_p9 = pnand %p2155_p8, %p2324_p6 }
  0x33   : > { %p2164_p13 = por %p2163_p12, %p2162_p11 }
  0x34   : > { %p2158_p10 = pneg %p2157_p9 }
  0x36   : > { %p2165_p0 = pnand %p2164_p13, %p2158_p10 }
  0x38   : > { %2168 = shalt.err (!%p2165_p0)
}
  0x39   : > { %1985 = dma.hbm_to_vmem [thread:$0]  (!%p2314_p5), %s2602_s3, 16, %s242_s12, [#allocation5]  }
  0x3a   : > { %s2251_s10 = smov [#allocation9]   ;;  %s2252_s15 = smov [#allocation10]  }
  0x3b   : > { %s265_s14 = sshll.u32 %s2251_s10, 4  ;;  %s276_s16 = sshll.u32 %s2252_s15, 4  ;;  %s266_s14 = int_to_ptr.vmem [resolvable:$true] %s265_s14  ;;  %s277_s16 = int_to_ptr.vmem [resolvable:$true] %s276_s16 }
  0x3c   : > { %s2180_s17 = scalar_lea.vmem %s266_s14, 16  ;;  %s2187_s18 = scalar_lea.vmem %s266_s14, 32 }
  0x3d   : > { %p2181_p1 = scmp.ne.s32.totalorder %s266_s14, %s2180_s17  ;;  %p2188_p8 = scmp.lt.s32.totalorder %s266_s14, %s266_s14 }
  0x3e   : > { %p2189_p9 = scmp.lt.s32.totalorder %s2187_s18, %s2180_s17 }
  0x3f   : > { %p2183_p4 = pnand %p2181_p1, %p2324_p6 }
  0x40   : > { %p2190_p10 = por %p2189_p9, %p2188_p8 }
  0x41   : > { %p2184_p7 = pneg %p2183_p4 }
  0x43   : > { %p2191_p11 = pnand %p2190_p10, %p2184_p7 }
  0x45   : > { %2194 = shalt.err (!%p2191_p11)
}
  0x46   : > { %1991 = dma.hbm_to_vmem [thread:$0]  (!%p2314_p5), %s2604_s5, 16, %s266_s14, [#allocation8]  }
  0x47   : > { %s2206_s20 = scalar_lea.vmem %s277_s16, 16  ;;  %s2213_s21 = scalar_lea.vmem %s277_s16, 32 }
  0x48   : > { %p2207_p12 = scmp.ne.s32.totalorder %s277_s16, %s2206_s20  ;;  %p2214_p1 = scmp.lt.s32.totalorder %s277_s16, %s277_s16 }
  0x49   : > { %p2215_p4 = scmp.lt.s32.totalorder %s2213_s21, %s2206_s20 }
  0x4a   : > { %p2209_p13 = pnand %p2207_p12, %p2324_p6 }
  0x4b   : > { %p2216_p2 = por %p2215_p4, %p2214_p1 }
  0x4c   : > { %p2210_p0 = pneg %p2209_p13 }
  0x4e   : > { %p2217_p8 = pnand %p2216_p2, %p2210_p0 }
  0x50   : > { %2220 = shalt.err (!%p2217_p8)
}
  0x51   : > { %1994 = dma.hbm_to_vmem [thread:$0]  (!%p2314_p5), %s2605_s6, 16, %s277_s16, [#allocation11]  }
  0x52   : > { %297 = sbr.rel (%p2304_p3) target bundleno = 636 (0x27c), region = 48 }
  0x57   : > { %p2619_p7 = scmp.eq.s32.totalorder %s2299_s27, 0 }
  0x59   : > { %2226 = dma.done.wait (%p2619_p7), [#allocation3], 1152   ;;  %p2620_p6 = pmov %p2619_p7 }
  0x5b   : > { %2228 = vsyncadd (%p2620_p6), [#allocation3], 4294966144  ;;  %p2621_p9 = pmov %p2620_p6 }
  0x5c   : > { %p2622_p2 = pmov %p2620_p6 }
  0x5d   : > { %2230 = dma.done.wait (%p2621_p9), [#allocation5], 32  }
  0x5e   : > { %2232 = vsyncadd (%p2622_p2), [#allocation5], 4294967264  ;;  %p2623_p10 = pmov %p2622_p2 }
  0x5f   : > { %p2624_p5 = pmov %p2622_p2 }
  0x60   : > { %2234 = dma.done.wait (%p2623_p10), [#allocation8], 144  }
  0x61   : > { %2236 = vsyncadd (%p2624_p5), [#allocation8], 4294967152  ;;  %p2625_p3 = pmov %p2622_p2 }
  0x62   : > { %p2626_p11 = pmov %p2622_p2 }
  0x63   : > { %2238 = dma.done.wait (%p2625_p3), [#allocation11], 16  }
  0x64   : > { %2240 = vsyncadd (%p2626_p11), [#allocation11], 4294967280  ;;  %p349_p12 = scmp.lt.s32.totalorder %s2299_s27, 1  ;;  %v2023_v0 = vld [vmem:[#allocation2 + $0x8] sm:$0xff]   ;;  %v2024_v1 = vld [vmem:[#allocation2] sm:$0xff]   ;;  %vm395_vm0 = vcmask 130048  }
  0x65   : > { %1851 = vmatprep.subr.bf16.mxu0 %v2023_v0  ;;  %1861 = vmatprep.subr.bf16.mxu1 %v2024_v1  ;;  %v2025_v14 = vld [vmem:[#allocation2 + $0x10] sm:$0xff]   ;;  %v2026_v25 = vld [vmem:[#allocation2 + $0x18] sm:$0xff]   ;;  %v2027_v31 = vld [vmem:[#allocation2 + $0x20] sm:$0xff]  }
  0x66   : > { %s2648_s27 = smov (!%p349_p12, %s2299_s27), 1  ;;  %1852 = vmatpush3.bf16.msra.mxu0 %v2023_v0  ;;  %1862 = vmatpush3.bf16.msra.mxu1 %v2024_v1  ;;  %v2028_v33 = vld [vmem:[#allocation2 + $0x28] sm:$0xff]   ;;  %v2029_v42 = vld [vmem:[#allocation2 + $0x30] sm:$0xff]   ;;  %v2030_v43 = vld [vmem:[#allocation2 + $0x38] sm:$0xff]  }
  0x67   : > { %s1951_s28 = smul.u32 160, %s2648_s27  ;;  %1871 = vmatprep.subr.bf16.mxu0 %v2025_v14  ;;  %1881 = vmatprep.subr.bf16.mxu1 %v2026_v25  ;;  %v2031_v55 = vld [vmem:[#allocation2 + $0x40] sm:$0xff]   ;;  %s1800_s26 = sshll.u32 %s2648_s27, 6 }
  0x68   : > { %s358_s9 = scalar_lea.vmem %s2606_s7, %s1800_s26 }
  0x69   : > { %s2407_s25 = scalar_lea.vmem %s2599_s0, %s1951_s28 }
  0x6a   : > { %v374_v2 = vld [vmem:[%s2407_s25 + $0x1] sm:$0xff]  ;;  %v2411_v3 = vld [vmem:[%s2407_s25 + $0x11] sm:$0xff] }
  0x6b   : > { %2627 = vst [vmem:[#allocation16_spill] sm:$0xff] %v2411_v3  ;;  %v360_v4 = vld [vmem:[%s2407_s25] sm:$0xff]  ;;  %v382_v5 = vpack.c.bf16 %v2411_v3, %v374_v2  ;;  %v361_v6 = vld [vmem:[%s2407_s25 + $0x10] sm:$0xff] }
  0x6c   : > { %v2417_v7 = vld [vmem:[%s2407_s25 + $0x21] sm:$0xff]  ;;  %v2420_v8 = vld [vmem:[%s2407_s25 + $0x31] sm:$0xff]  ;;  %v368_v9 = vpack.c.bf16 %v361_v6, %v360_v4 }
  0x6d   : > { %2628 = vst [vmem:[#allocation17_spill] sm:$0xff] %v2417_v7  ;;  %2629 = vst [vmem:[#allocation18_spill] sm:$0xff] %v2420_v8  ;;  %v2424_v10 = vpack.c.bf16 %v2420_v8, %v2417_v7  ;;  %v362_v11 = vld [vmem:[%s2407_s25 + $0x20] sm:$0xff]  ;;  %v363_v12 = vld [vmem:[%s2407_s25 + $0x30] sm:$0xff]  ;;  %1853 = vmatprep.mubr.msk.bf16.mxu0 %vm395_vm0, %v382_v5  ;;  %v777_v49 = vpack.c.bf16 %v2417_v7, %v2411_v3 }
  0x6e   : > { %v2429_v13 = vpack.c.bf16 %v363_v12, %v362_v11  ;;  %v2432_v15 = vld [vmem:[%s2407_s25 + $0x41] sm:$0xff]  ;;  %1863 = vmatprep.mubr.msk.bf16.mxu1 %vm395_vm0, %v368_v9  ;;  %v2438_v16 = vld [vmem:[%s2407_s25 + $0x51] sm:$0xff]  ;;  %v671_v32 = vpack.c.bf16 %v362_v11, %v361_v6 }
  0x6f   : > { %2630 = vst [vmem:[#allocation19_spill] sm:$0xff] %v2432_v15  ;;  %1854 = vmatmul.mubr.msk.bf16.vlgmr.msra.gmra.mxu0 %vm395_vm0, %v2424_v10  ;;  %2631 = vst [vmem:[#allocation20_spill] sm:$0xff] %v2438_v16  ;;  %v364_v17 = vld [vmem:[%s2407_s25 + $0x40] sm:$0xff]  ;;  %v365_v18 = vld [vmem:[%s2407_s25 + $0x50] sm:$0xff]  ;;  %v2446_v19 = vpack.c.bf16 %v2438_v16, %v2432_v15  ;;  %v778_v51 = vpack.c.bf16 %v2432_v15, %v2420_v8 }
  0x70   : > { %1864 = vmatmul.mubr.msk.bf16.vlgmr.msra.gmra.mxu1 %vm395_vm0, %v2429_v13  ;;  %v2448_v20 = vpack.c.bf16 %v365_v18, %v364_v17  ;;  %v2451_v21 = vld [vmem:[%s2407_s25 + $0x61] sm:$0xff]  ;;  %v2454_v22 = vld [vmem:[%s2407_s25 + $0x71] sm:$0xff]  ;;  %1872 = vmatpush3.bf16.msra.mxu0 %v2025_v14  ;;  %v672_v39 = vpack.c.bf16 %v364_v17, %v363_v12 }
  0x71   : > { %2632 = vst [vmem:[#allocation21_spill] sm:$0xff] %v2451_v21  ;;  %2633 = vst [vmem:[#allocation22_spill] sm:$0xff] %v2454_v22  ;;  %v366_v23 = vld [vmem:[%s2407_s25 + $0x60] sm:$0xff]  ;;  %v367_v24 = vld [vmem:[%s2407_s25 + $0x70] sm:$0xff]  ;;  %1857 = vmatprep.mubr.msk.bf16.mxu0 %vm395_vm0, %v2446_v19  ;;  %v2466_v28 = vpack.c.bf16 %v2454_v22, %v2451_v21  ;;  %1882 = vmatpush3.bf16.msra.mxu1 %v2026_v25  ;;  %v779_v53 = vpack.c.bf16 %v2451_v21, %v2438_v16 }
  0x72   : > { %1867 = vmatprep.mubr.msk.bf16.mxu1 %vm395_vm0, %v2448_v20  ;;  %v556_v26 = vld [vmem:[%s2407_s25 + $0x2] sm:$0xff]  ;;  %v557_v27 = vld [vmem:[%s2407_s25 + $0x12] sm:$0xff]  ;;  %v2468_v29 = vpack.c.bf16 %v367_v24, %v366_v23  ;;  %1891 = vmatprep.subr.bf16.mxu0 %v2027_v31  ;;  %v673_v41 = vpack.c.bf16 %v366_v23, %v365_v18 }
  0x73   : > { %v564_v30 = vpack.c.bf16 %v557_v27, %v556_v26  ;;  %v558_v34 = vld [vmem:[%s2407_s25 + $0x22] sm:$0xff]  ;;  %v559_v35 = vld [vmem:[%s2407_s25 + $0x32] sm:$0xff]  ;;  %1901 = vmatprep.subr.bf16.mxu1 %v2028_v33 }
  0x74   : > { %v560_v36 = vld [vmem:[%s2407_s25 + $0x42] sm:$0xff]  ;;  %v561_v37 = vld [vmem:[%s2407_s25 + $0x52] sm:$0xff]  ;;  %v565_v38 = vpack.c.bf16 %v559_v35, %v558_v34  ;;  %v883_v50 = vpack.c.bf16 %v558_v34, %v557_v27 }
  0x75   : > { %v566_v40 = vpack.c.bf16 %v561_v37, %v560_v36  ;;  %v562_v44 = vld [vmem:[%s2407_s25 + $0x62] sm:$0xff]  ;;  %v563_v45 = vld [vmem:[%s2407_s25 + $0x72] sm:$0xff]  ;;  %v884_v52 = vpack.c.bf16 %v560_v36, %v559_v35 }
  0x76   : > { %v1710_v46 = vld [vmem:[%s2407_s25 + $0x80] sm:$0xff]  ;;  %v567_v47 = vpack.c.bf16 %v563_v45, %v562_v44  ;;  %v885_v54 = vpack.c.bf16 %v562_v44, %v561_v37  ;;  %v1749_v60 = vld [vmem:[%s2407_s25 + $0x90] sm:$0xff] }
  0x77   : > { %1858 = vmatmul.mubr.msk.bf16.gmra.mxu0 %vm395_vm0, %v2466_v28  ;;  %v674_v48 = vpack.c.bf16 %v1710_v46, %v367_v24  ;;  %v2500_v56 = vld [vmem:[%s2407_s25 + $0x81] sm:$0xff]  ;;  %v1762_v61 = vld [vmem:[%s2407_s25 + $0x91] sm:$0xff]  ;;  %v993_v62 = vpack.c.bf16 %v1749_v60, %v1710_v46 }
  0x78   : > { %1868 = vmatmul.mubr.msk.bf16.gmra.mxu1 %vm395_vm0, %v2468_v29  ;;  %1873 = vmatprep.mubr.msk.bf16.mxu0 %vm395_vm0, %v564_v30  ;;  %2634 = vst [vmem:[#allocation23_spill] sm:$0xff] %v2500_v56  ;;  %v1736_v57 = vld [vmem:[%s2407_s25 + $0x82] sm:$0xff]  ;;  %v780_v58 = vpack.c.bf16 %v2500_v56, %v2454_v22  ;;  %v1099_v63 = vpack.c.bf16 %v1762_v61, %v2500_v56  ;;  %v1775_v0 = vld [vmem:[%s2407_s25 + $0x92] sm:$0xff] }
  0x79   : > { %1883 = vmatprep.mubr.msk.bf16.mxu1 %vm395_vm0, %v671_v32  ;;  %v886_v59 = vpack.c.bf16 %v1736_v57, %v563_v45  ;;  %v1205_v1 = vpack.c.bf16 %v1775_v0, %v1736_v57  ;;  %v2032_v2 = vld [vmem:[#allocation7] sm:$0xff]  }
  0x7f   : > { %1874 = vmatmul.mubr.msk.bf16.vlgmr.msra.gmra.mxu0 %vm395_vm0, %v565_v38 }
  0x80   : > { %1892 = vmatpush3.bf16.msra.mxu0 %v2027_v31  ;;  %1884 = vmatmul.mubr.msk.bf16.vlgmr.msra.gmra.mxu1 %vm395_vm0, %v672_v39 }
  0x81   : > { %1877 = vmatprep.mubr.msk.bf16.mxu0 %vm395_vm0, %v566_v40  ;;  %1887 = vmatprep.mubr.msk.bf16.mxu1 %vm395_vm0, %v673_v41 }
  0x82   : > { %1902 = vmatpush3.bf16.msra.mxu1 %v2028_v33  ;;  %1911 = vmatprep.subr.bf16.mxu0 %v2029_v42 }
  0x83   : > { %1921 = vmatprep.subr.bf16.mxu1 %v2030_v43 }
  0x87   : > { %1878 = vmatmul.mubr.msk.bf16.gmra.mxu0 %vm395_vm0, %v567_v47 }
  0x88   : > { %1888 = vmatmul.mubr.msk.bf16.gmra.mxu1 %vm395_vm0, %v674_v48  ;;  %1893 = vmatprep.mubr.msk.bf16.mxu0 %vm395_vm0, %v777_v49 }
  0x89   : > { %1903 = vmatprep.mubr.msk.bf16.mxu1 %vm395_vm0, %v883_v50 }
  0x8f   : > { %1894 = vmatmul.mubr.msk.bf16.vlgmr.msra.gmra.mxu0 %vm395_vm0, %v778_v51 }
  0x90   : > { %1912 = vmatpush3.bf16.msra.mxu0 %v2029_v42  ;;  %1904 = vmatmul.mubr.msk.bf16.vlgmr.msra.gmra.mxu1 %vm395_vm0, %v884_v52 }
  0x91   : > { %1897 = vmatprep.mubr.msk.bf16.mxu0 %vm395_vm0, %v779_v53  ;;  %1907 = vmatprep.mubr.msk.bf16.mxu1 %vm395_vm0, %v885_v54 }
  0x92   : > { %1922 = vmatpush3.bf16.msra.mxu1 %v2030_v43  ;;  %1931 = vmatprep.subr.bf16.mxu0 %v2031_v55 }
  0x93   : > { %1941 = vmatprep.subr.bf16.mxu1 %v2032_v2 }
  0x97   : > { %1898 = vmatmul.mubr.msk.bf16.gmra.mxu0 %vm395_vm0, %v780_v58 }
  0x98   : > { %1908 = vmatmul.mubr.msk.bf16.gmra.mxu1 %vm395_vm0, %v886_v59  ;;  %1913 = vmatprep.mubr.msk.bf16.mxu0 %vm395_vm0, %v2429_v13 }
  0x99   : > { %1923 = vmatprep.mubr.msk.bf16.mxu1 %vm395_vm0, %v2424_v10 }
  0x9f   : > { %1914 = vmatmul.mubr.msk.bf16.vlgmr.msra.gmra.mxu0 %vm395_vm0, %v2448_v20 }
  0xa0   : > { %1932 = vmatpush3.bf16.msra.mxu0 %v2031_v55  ;;  %1924 = vmatmul.mubr.msk.bf16.vlgmr.msra.gmra.mxu1 %vm395_vm0, %v2446_v19 }
  0xa1   : > { %1917 = vmatprep.mubr.msk.bf16.mxu0 %vm395_vm0, %v2468_v29  ;;  %1927 = vmatprep.mubr.msk.bf16.mxu1 %vm395_vm0, %v2466_v28 }
  0xa2   : > { %1942 = vmatpush3.bf16.msra.mxu1 %v2032_v2 }
  0xa7   : > { %1918 = vmatmul.mubr.msk.bf16.gmra.mxu0 %vm395_vm0, %v993_v62 }
  0xa8   : > { %1928 = vmatmul.mubr.msk.bf16.gmra.mxu1 %vm395_vm0, %v1099_v63  ;;  %1933 = vmatprep.mubr.msk.bf16.mxu0 %vm395_vm0, %v565_v38 }
  0xaf   : > { %1934 = vmatmul.mubr.msk.bf16.vlgmr.msra.gmra.mxu0 %vm395_vm0, %v566_v40 }
  0xb0   : > { %1937 = vmatprep.mubr.msk.bf16.mxu0 %vm395_vm0, %v567_v47 }
  0xb7   : > { %1938 = vmatmul.mubr.msk.bf16.gmra.mxu0 %vm395_vm0, %v1205_v1 }
 0x12f   : > { %v1855_v4 = vpop.f32.mrf.mxu0 }
 0x130   : > { %v1865_v5 = vpop.f32.mrf.mxu1 }
 0x131   : > { %v442_v6 = vpop.f32.mrf.mxu0  ;;  %v534_v55 = vadd.f32 %v1865_v5, %v1855_v4 }
 0x132   : > { %v525_v9 = vpop.f32.mrf.mxu1 }
 0x133   : > { %v1856_v10 = vpop.f32.mrf.mxu0  ;;  %v526_v59 = vadd.f32 %v525_v9, %v442_v6 }
 0x134   : > { %v1866_v11 = vpop.f32.mrf.mxu1 }
 0x135   : > { %v445_v12 = vpop.f32.mrf.mxu0  ;;  %v537_v63 = vadd.f32 %v1866_v11, %v1856_v10 }
 0x136   : > { %v528_v13 = vpop.f32.mrf.mxu1 }
 0x137   : > { %v1859_v14 = vpop.f32.mrf.mxu0  ;;  %v529_v22 = vadd.f32 %v528_v13, %v445_v12 }
 0x138   : > { %v1869_v17 = vpop.f32.mrf.mxu1 }
 0x139   : > { %v458_v18 = vpop.f32.mrf.mxu0  ;;  %v550_v5 = vadd.f32 %v1869_v17, %v1859_v14 }
 0x13a   : > { %v541_v19 = vpop.f32.mrf.mxu1 }
 0x13b   : > { %v1860_v20 = vpop.f32.mrf.mxu0  ;;  %v542_v6 = vadd.f32 %v541_v19, %v458_v18 }
 0x13c   : > { %v1870_v23 = vpop.f32.mrf.mxu1 }
 0x13d   : > { %v2531_v24 = vpop.f32.mrf.mxu0  ;;  %v553_v10 = vadd.f32 %v1870_v23, %v1860_v20 }
 0x13e   : > { %v544_v25 = vpop.f32.mrf.mxu1 }
 0x13f   : > { %v1875_v26 = vpop.f32.mrf.mxu0 }
 0x140   : > { %v1885_v27 = vpop.f32.mrf.mxu1  ;;  %v656_v60 = vadd.f32 %v1875_v26, %v534_v55 }
 0x141   : > { %v623_v28 = vpop.f32.mrf.mxu0 }
 0x142   : > { %v730_v29 = vpop.f32.mrf.mxu1  ;;  %v654_v0 = vadd.f32 %v623_v28, %v526_v59  ;;  %v763_v21 = vadd.f32 %v1885_v27, %v656_v60 }
 0x143   : > { %v1876_v30 = vpop.f32.mrf.mxu0 }
 0x144   : > { %v1886_v31 = vpop.f32.mrf.mxu1  ;;  %v657_v56 = vadd.f32 %v1876_v30, %v537_v63  ;;  %v761_v15 = vadd.f32 %v730_v29, %v654_v0  ;;  %v545_v30 = vadd.f32 %v544_v25, %v2531_v24 }
 0x145   : > { %v626_v32 = vpop.f32.mrf.mxu0 }
 0x146   : > { %v733_v33 = vpop.f32.mrf.mxu1  ;;  %v655_v8 = vadd.f32 %v626_v32, %v529_v22  ;;  %v764_v9 = vadd.f32 %v1886_v31, %v657_v56 }
 0x147   : > { %v1879_v34 = vpop.f32.mrf.mxu0 }
 0x148   : > { %v1889_v35 = vpop.f32.mrf.mxu1  ;;  %v660_v55 = vadd.f32 %v1879_v34, %v550_v5  ;;  %v762_v12 = vadd.f32 %v733_v33, %v655_v8 }
 0x149   : > { %v639_v36 = vpop.f32.mrf.mxu0 }
 0x14a   : > { %v746_v37 = vpop.f32.mrf.mxu1  ;;  %v658_v11 = vadd.f32 %v639_v36, %v542_v6  ;;  %v767_v14 = vadd.f32 %v1889_v35, %v660_v55 }
 0x14b   : > { %v1880_v38 = vpop.f32.mrf.mxu0 }
 0x14c   : > { %v2533_v39 = vpop.f32.mrf.mxu1  ;;  %v661_v29 = vadd.f32 %v1880_v38, %v553_v10  ;;  %v765_v56 = vadd.f32 %v746_v37, %v658_v11 }
 0x14d   : > { %v642_v40 = vpop.f32.mrf.mxu0 }
 0x14e   : > { %v2535_v41 = vpop.f32.mrf.mxu1  ;;  %v659_v22 = vadd.f32 %v642_v40, %v545_v30 }
 0x14f   : > { %v1895_v42 = vpop.f32.mrf.mxu0 }
 0x150   : > { %v1905_v43 = vpop.f32.mrf.mxu1  ;;  %v869_v3 = vadd.f32 %v1895_v42, %v763_v21  ;;  %v766_v8 = vadd.f32 %v2535_v41, %v659_v22 }
 0x151   : > { %v836_v44 = vpop.f32.mrf.mxu0 }
 0x152   : > { %v942_v45 = vpop.f32.mrf.mxu1  ;;  %v867_v26 = vadd.f32 %v836_v44, %v761_v15  ;;  %v975_v28 = vadd.f32 %v1905_v43, %v869_v3  ;;  %v768_v3 = vadd.f32 %v2533_v39, %v661_v29  ;;  %v1781_v43 = vld [vmem:[#allocation4] ss:$0 sm:$0xff] }
 0x153   : > { %v1896_v46 = vpop.f32.mrf.mxu0 }
 0x154   : > { %v1906_v47 = vpop.f32.mrf.mxu1  ;;  %v870_v59 = vadd.f32 %v1896_v46, %v764_v9  ;;  %v973_v21 = vadd.f32 %v942_v45, %v867_v26 }
 0x155   : > { %v839_v48 = vpop.f32.mrf.mxu0 }
 0x156   : > { %v945_v49 = vpop.f32.mrf.mxu1  ;;  %v868_v17 = vadd.f32 %v839_v48, %v762_v12  ;;  %v976_v15 = vadd.f32 %v1906_v47, %v870_v59 }
 0x157   : > { %v1899_v50 = vpop.f32.mrf.mxu0 }
 0x158   : > { %v2537_v51 = vpop.f32.mrf.mxu1  ;;  %v873_v20 = vadd.f32 %v1899_v50, %v767_v14  ;;  %v974_v25 = vadd.f32 %v945_v49, %v868_v17 }
 0x159   : > { %v852_v52 = vpop.f32.mrf.mxu0 }
 0x15a   : > { %v2539_v53 = vpop.f32.mrf.mxu1  ;;  %v871_v32 = vadd.f32 %v852_v52, %v765_v56  ;;  %v979_v37 = vadd.f32 %v2537_v51, %v873_v20 }
 0x15b   : > { %v1900_v54 = vpop.f32.mrf.mxu0 }
 0x15c   : > { %v2541_v57 = vpop.f32.mrf.mxu1  ;;  %v874_v36 = vadd.f32 %v1900_v54, %v768_v3  ;;  %v977_v47 = vadd.f32 %v2539_v53, %v871_v32 }
 0x15d   : > { %2635 = vst [vmem:[#allocation24_spill] sm:$0xff] %v2541_v57  ;;  %v855_v58 = vpop.f32.mrf.mxu0 }
 0x15e   : > { %v2543_v61 = vpop.f32.mrf.mxu1  ;;  %v872_v44 = vadd.f32 %v855_v58, %v766_v8 }
 0x15f   : > { %2636 = vst [vmem:[#allocation25_spill] sm:$0xff] %v2543_v61  ;;  %v1915_v62 = vpop.f32.mrf.mxu0 }
 0x160   : > { %v1925_v1 = vpop.f32.mrf.mxu1  ;;  %v1082_v42 = vadd.f32 %v1915_v62, %v975_v28 }
 0x161   : > { %v1049_v2 = vpop.f32.mrf.mxu0 }
 0x162   : > { %v1155_v16 = vpop.f32.mrf.mxu1  ;;  %v1080_v19 = vadd.f32 %v1049_v2, %v973_v21  ;;  %v1188_v34 = vadd.f32 %v1925_v1, %v1082_v42 }
 0x163   : > { %v1916_v7 = vpop.f32.mrf.mxu0 }
 0x164   : > { %v1926_v4 = vpop.f32.mrf.mxu1  ;;  %v1083_v24 = vadd.f32 %v1916_v7, %v976_v15  ;;  %v1186_v35 = vadd.f32 %v1155_v16, %v1080_v19  ;;  %v2637_v41 = vld [vmem:[#allocation24_spill] sm:$0xff]  ;;  %v1782_v16 = vld [vmem:[#allocation6] ss:$0 sm:$0xff] }
 0x165   : > { %v1052_v57 = vpop.f32.mrf.mxu0  ;;  %v980_v49 = vadd.f32 %v2637_v41, %v874_v36 }
 0x166   : > { %v1158_v27 = vpop.f32.mrf.mxu1  ;;  %v1081_v45 = vadd.f32 %v1052_v57, %v974_v25  ;;  %v1189_v39 = vadd.f32 %v1926_v4, %v1083_v24  ;;  %v2638_v0 = vld [vmem:[#allocation25_spill] sm:$0xff] }
 0x167   : > { %v1919_v61 = vpop.f32.mrf.mxu0  ;;  %v978_v1 = vadd.f32 %v2638_v0, %v872_v44 }
 0x168   : > { %v1929_v31 = vpop.f32.mrf.mxu1  ;;  %v1086_v50 = vadd.f32 %v1919_v61, %v979_v37  ;;  %v1187_v51 = vadd.f32 %v1158_v27, %v1081_v45 }
 0x169   : > { %v1065_v13 = vpop.f32.mrf.mxu0 }
 0x16a   : > { %v1171_v38 = vpop.f32.mrf.mxu1  ;;  %v1084_v60 = vadd.f32 %v1065_v13, %v977_v47  ;;  %v1192_v5 = vadd.f32 %v1929_v31, %v1086_v50  ;;  %v1788_v50 = vld [vmem:[#allocation9] ss:$0 sm:$0xff] }
 0x16b   : > { %v1920_v18 = vpop.f32.mrf.mxu0 }
 0x16c   : > { %v1930_v54 = vpop.f32.mrf.mxu1  ;;  %v1087_v57 = vadd.f32 %v1920_v18, %v980_v49  ;;  %v1190_v9 = vadd.f32 %v1171_v38, %v1084_v60 }
 0x16d   : > { %v1068_v23 = vpop.f32.mrf.mxu0 }
 0x16e   : > { %v1085_v53 = vadd.f32 %v1068_v23, %v978_v1  ;;  %v1174_v26 = vpop.f32.mrf.mxu1  ;;  %v1193_v30 = vadd.f32 %v1930_v54, %v1087_v57  ;;  %v2640_v57 = vld [vmem:[#allocation16_spill] sm:$0xff] }
 0x16f   : > { %v1935_v33 = vpop.f32.mrf.mxu0 }
 0x170   : > { %v1294_v40 = vadd.f32 %v1935_v33, %v1188_v34  ;;  %v1191_v13 = vadd.f32 %v1174_v26, %v1085_v53 }
 0x171   : > { %v1261_v46 = vpop.f32.mrf.mxu0 }
 0x172   : > { %v1292_v48 = vadd.f32 %v1261_v46, %v1186_v35  ;;  %v1309_v7 = vmul.f32 %v1781_v43, %v1294_v40 }
 0x173   : > { %v1936_v52 = vpop.f32.mrf.mxu0 }
 0x174   : > { %v1307_v62 = vmul.f32 %v1781_v43, %v1292_v48  ;;  %v1295_v63 = vadd.f32 %v1936_v52, %v1189_v39  ;;  %v1324_v4 = vadd.f32 %v1782_v16, %v1309_v7  ;;  %v1789_v52 = vld [vmem:[#allocation10] ss:$0 sm:$0xff] }
 0x175   : > { %v1264_v58 = vpop.f32.mrf.mxu0 }
 0x176   : > { %v1310_v2 = vmul.f32 %v1781_v43, %v1295_v63  ;;  %v1293_v6 = vadd.f32 %v1264_v58, %v1187_v51  ;;  %v1322_v55 = vadd.f32 %v1782_v16, %v1307_v62  ;;  %v1340_v29 = vmul.f32 0.01, %v1324_v4  ;;  %v2639_v62 = vld [vmem:[#allocation18_spill] sm:$0xff] }
 0x177   : > { %v1939_v61 = vpop.f32.mrf.mxu0  ;;  %vm1332_vm4 = vcmp.ge.f32.partialorder %v1324_v4, 0.0 }
 0x178   : > { %v1325_v10 = vadd.f32 %v1782_v16, %v1310_v2  ;;  %v1308_v11 = vmul.f32 %v1781_v43, %v1293_v6  ;;  %v1298_v28 = vadd.f32 %v1939_v61, %v1192_v5  ;;  %v1338_v14 = vmul.f32 0.01, %v1322_v55 }
 0x179   : > { %v1277_v59 = vpop.f32.mrf.mxu0  ;;  %vm1330_vm2 = vcmp.ge.f32.partialorder %v1322_v55, 0.0  ;;  %v1348_v8 = vsel %vm1332_vm4, %v1324_v4, %v1340_v29 }
 0x17a   : > { %v1296_v12 = vadd.f32 %v1277_v59, %v1190_v9  ;;  %v1341_v27 = vmul.f32 0.01, %v1325_v10  ;;  %v1323_v21 = vadd.f32 %v1782_v16, %v1308_v11  ;;  %vm1333_vm1 = vcmp.ge.f32.partialorder %v1325_v10, 0.0  ;;  %v2641_v9 = vld [vmem:[#allocation19_spill] sm:$0xff] }
 0x17b   : > { %v1940_v42 = vpop.f32.mrf.mxu0  ;;  %v1313_v56 = vmul.f32 %v1781_v43, %v1298_v28  ;;  %v1346_v24 = vsel %vm1330_vm2, %v1322_v55, %v1338_v14 }
 0x17c   : > { %v1311_v22 = vmul.f32 %v1781_v43, %v1296_v12  ;;  %v1299_v17 = vadd.f32 %v1940_v42, %v1193_v30  ;;  %vm1331_vm3 = vcmp.ge.f32.partialorder %v1323_v21, 0.0  ;;  %v1339_v18 = vmul.f32 0.01, %v1323_v21  ;;  %v2642_v30 = vld [vmem:[#allocation17_spill] sm:$0xff] }
 0x17d   : > { %v1280_v15 = vpop.f32.mrf.mxu0  ;;  %v1349_v23 = vsel %vm1333_vm1, %v1325_v10, %v1341_v27  ;;  %v1328_v25 = vadd.f32 %v1782_v16, %v1313_v56 }
 0x17e   : > { %v1326_v19 = vadd.f32 %v1782_v16, %v1311_v22  ;;  %v1314_v31 = vmul.f32 %v1781_v43, %v1299_v17  ;;  %v1297_v20 = vadd.f32 %v1280_v15, %v1191_v13  ;;  %v1347_v3 = vsel %vm1331_vm3, %v1323_v21, %v1339_v18  ;;  %v2643_v22 = vld [vmem:[#allocation22_spill] sm:$0xff] }
 0x17f   : > { %v1354_v33 = vpack.c.bf16 %v1347_v3, %v1346_v24  ;;  %v1355_v36 = vpack.c.bf16 %v1349_v23, %v1348_v8  ;;  %v1344_v44 = vmul.f32 0.01, %v1328_v25  ;;  %vm1336_vm8 = vcmp.ge.f32.partialorder %v1328_v25, 0.0  ;;  %v2644_v23 = vld [vmem:[#allocation20_spill] sm:$0xff] }
 0x180   : > { %v1329_v32 = vadd.f32 %v1782_v16, %v1314_v31  ;;  %v1312_v34 = vmul.f32 %v1781_v43, %v1297_v20  ;;  %v1342_v35 = vmul.f32 0.01, %v1326_v19  ;;  %vm1334_vm5 = vcmp.ge.f32.partialorder %v1326_v19, 0.0 }
 0x181   : > { %1943 = vmatprep.mubr.msk.bf16.mxu1 %vm395_vm0, %v1354_v33  ;;  %v1352_v39 = vsel %vm1336_vm8, %v1328_v25, %v1344_v44 }
 0x182   : > { %v1327_v38 = vadd.f32 %v1782_v16, %v1312_v34  ;;  %v1345_v40 = vmul.f32 0.01, %v1329_v32  ;;  %vm1337_vm6 = vcmp.ge.f32.partialorder %v1329_v32, 0.0  ;;  %1944 = vmatmul.mubr.msk.bf16.vlgmr.msra.gmra.mxu1 %vm395_vm0, %v1355_v36  ;;  %v1350_v45 = vsel %vm1334_vm5, %v1326_v19, %v1342_v35  ;;  %v2646_v36 = vld [vmem:[#allocation21_spill] sm:$0xff] }
 0x184   : > { %vm1335_vm7 = vcmp.ge.f32.partialorder %v1327_v38, 0.0  ;;  %v1343_v37 = vmul.f32 0.01, %v1327_v38  ;;  %v1353_v47 = vsel %vm1337_vm6, %v1329_v32, %v1345_v40  ;;  %v2645_v32 = vld [vmem:[#allocation23_spill] sm:$0xff] }
 0x185   : > { %v1357_v48 = vpack.c.bf16 %v1353_v47, %v1352_v39 }
 0x186   : > { %v1351_v43 = vsel %vm1335_vm7, %v1327_v38, %v1343_v37 }
 0x187   : > { %v1356_v46 = vpack.c.bf16 %v1351_v43, %v1350_v45 }
 0x189   : > { %1947 = vmatprep.mubr.msk.bf16.mxu1 %vm395_vm0, %v1356_v46 }
 0x18a   : > { %1948 = vmatmul.mubr.msk.bf16.gmra.mxu1 %vm395_vm0, %v1357_v48 }
 0x242   : > { %v1945_v7 = vpop.f32.mrf.mxu1 }
 0x243   : > { %v1452_v41 = vmul.f32 %v1945_v7, %v1788_v50 }
 0x244   : > { %v1412_v49 = vpop.f32.mrf.mxu1 }
 0x245   : > { %v1467_v60 = vadd.f32 %v1789_v52, %v1452_v41  ;;  %v1450_v54 = vmul.f32 %v1788_v50, %v1412_v49 }
 0x246   : > { %v1946_v16 = vpop.f32.mrf.mxu1 }
 0x247   : > { %v2557_v63 = vadd.f32 %v1467_v60, %v2639_v62  ;;  %v1465_v0 = vadd.f32 %v1789_v52, %v1450_v54  ;;  %v1453_v1 = vmul.f32 %v1946_v16, %v1788_v50 }
 0x248   : > { %v1415_v51 = vpop.f32.mrf.mxu1 }
 0x249   : > { %v1792_v58 = vmul.f32 -1.702, %v2557_v63  ;;  %v2561_v2 = vadd.f32 %v1465_v0, %v2640_v57  ;;  %v1468_v5 = vadd.f32 %v1789_v52, %v1453_v1  ;;  %v1451_v53 = vmul.f32 %v1788_v50, %v1415_v51 }
 0x24a   : > { %v1949_v4 = vpop.f32.mrf.mxu1 }
 0x24b   : > { %v1501_v6 = vmul.f32 1.442695, %v1792_v58  ;;  %v1790_v61 = vmul.f32 -1.702, %v2561_v2  ;;  %v2565_v26 = vadd.f32 %v1468_v5, %v2641_v9  ;;  %v1466_v55 = vadd.f32 %v1789_v52, %v1451_v53 }
 0x24c   : > { %v1456_v10 = vmul.f32 %v1949_v4, %v1788_v50  ;;  %v1428_v11 = vpop.f32.mrf.mxu1 }
 0x24d   : > { %2033 = vpow2.f32 %v1501_v6  ;;  %v1497_v28 = vmul.f32 1.442695, %v1790_v61  ;;  %v1793_v59 = vmul.f32 -1.702, %v2565_v26  ;;  %v2569_v12 = vadd.f32 %v1466_v55, %v2642_v30 }
 0x24e   : > { %v1471_v13 = vadd.f32 %v1789_v52, %v1456_v10  ;;  %v1454_v29 = vmul.f32 %v1788_v50, %v1428_v11  ;;  %v1950_v27 = vpop.f32.mrf.mxu1 }
 0x24f   : > { %2035 = vpow2.f32 %v1497_v28  ;;  %v1503_v21 = vmul.f32 1.442695, %v1793_v59  ;;  %v1791_v42 = vmul.f32 -1.702, %v2569_v12  ;;  %v1457_v14 = vmul.f32 %v1950_v27, %v1788_v50 }
 0x250   : > { %v2573_v17 = vadd.f32 %v1471_v13, %v2643_v22  ;;  %v1469_v18 = vadd.f32 %v1789_v52, %v1454_v29  ;;  %v1431_v56 = vpop.f32.mrf.mxu1 }
 0x251   : > { %2037 = vpow2.f32 %v1503_v21  ;;  %v1499_v15 = vmul.f32 1.442695, %v1791_v42  ;;  %v1472_v19 = vadd.f32 %v1789_v52, %v1457_v14  ;;  %v1455_v31 = vmul.f32 %v1788_v50, %v1431_v56 }
 0x252   : > { %v1796_v20 = vmul.f32 -1.702, %v2573_v17  ;;  %v1477_v3 = vadd.f32 %v1469_v18, %v2644_v23 }
 0x253   : > { %2039 = vpow2.f32 %v1499_v15  ;;  %v1480_v34 = vadd.f32 %v2645_v32, %v1472_v19  ;;  %v1470_v24 = vadd.f32 %v1789_v52, %v1455_v31 }
 0x254   : > { %v1509_v8 = vmul.f32 1.442695, %v1796_v20  ;;  %v1794_v25 = vmul.f32 -1.702, %v1477_v3 }
 0x255   : > { %v1797_v33 = vmul.f32 -1.702, %v1480_v34  ;;  %v1478_v35 = vadd.f32 %v1470_v24, %v2646_v36 }
 0x256   : > { %2041 = vpow2.f32 %v1509_v8  ;;  %v1505_v38 = vmul.f32 1.442695, %v1794_v25 }
 0x257   : > { %v1511_v40 = vmul.f32 1.442695, %v1797_v33  ;;  %v1795_v37 = vmul.f32 -1.702, %v1478_v35 }
 0x258   : > { %2043 = vpow2.f32 %v1505_v38 }
 0x259   : > { %2045 = vpow2.f32 %v1511_v40  ;;  %v1507_v44 = vmul.f32 1.442695, %v1795_v37 }
 0x25a   : > { %v2034_v45 = vpop.eup %2033 }
 0x25b   : > { %v1515_v43 = vadd.f32 1.0, %v2034_v45  ;;  %2047 = vpow2.f32 %v1507_v44 }
 0x25c   : > { %v2036_v46 = vpop.eup %2035 }
 0x25d   : > { %2049 = vrcp.f32 %v1515_v43  ;;  %v1513_v47 = vadd.f32 1.0, %v2036_v46 }
 0x25e   : > { %v2038_v39 = vpop.eup %2037 }
 0x25f   : > { %2051 = vrcp.f32 %v1513_v47  ;;  %v1516_v48 = vadd.f32 1.0, %v2038_v39 }
 0x260   : > { %v2040_v50 = vpop.eup %2039 }
 0x261   : > { %2053 = vrcp.f32 %v1516_v48  ;;  %v1514_v7 = vadd.f32 1.0, %v2040_v50 }
 0x263   : > { %v2042_v52 = vpop.eup %2041  ;;  %2055 = vrcp.f32 %v1514_v7 }
 0x264   : > { %v1519_v41 = vadd.f32 1.0, %v2042_v52 }
 0x265   : > { %v2044_v49 = vpop.eup %2043 }
 0x266   : > { %v2046_v60 = vpop.eup %2045  ;;  %2057 = vrcp.f32 %v1519_v41  ;;  %v1517_v54 = vadd.f32 1.0, %v2044_v49 }
 0x267   : > { %v1520_v16 = vadd.f32 1.0, %v2046_v60 }
 0x268   : > { %v2048_v62 = vpop.eup %2047  ;;  %2059 = vrcp.f32 %v1517_v54 }
 0x269   : > { %2061 = vrcp.f32 %v1520_v16  ;;  %v1518_v0 = vadd.f32 1.0, %v2048_v62 }
 0x26a   : > { %v2050_v1 = vpop.eup %2049 }
 0x26b   : > { %v1539_v51 = vmul.f32 %v2050_v1, %v2557_v63  ;;  %2063 = vrcp.f32 %v1518_v0 }
 0x26c   : > { %v2052_v58 = vpop.eup %2051 }
 0x26d   : > { %1547 = vst.msk [vmem:[%s358_s9 + $0x10] sm:$0xff] %vm395_vm0, %v1539_v51  ;;  %v1537_v57 = vmul.f32 %v2052_v58, %v2561_v2 }
 0x26e   : > { %v2054_v5 = vpop.eup %2053 }
 0x26f   : > { %1545 = vst.msk [vmem:[%s358_s9] sm:$0xff] %vm395_vm0, %v1537_v57  ;;  %v1540_v53 = vmul.f32 %v2054_v5, %v2565_v26 }
 0x270   : > { %v2056_v4 = vpop.eup %2055 }
 0x271   : > { %1548 = vst.msk [vmem:[%s358_s9 + $0x18] sm:$0xff] %vm395_vm0, %v1540_v53  ;;  %v1538_v6 = vmul.f32 %v2056_v4, %v2569_v12 }
 0x273   : > { %v2058_v61 = vpop.eup %2057  ;;  %1546 = vst.msk [vmem:[%s358_s9 + $0x8] sm:$0xff] %vm395_vm0, %v1538_v6 }
 0x274   : > { %v1543_v63 = vmul.f32 %v2058_v61, %v2573_v17 }
 0x275   : > { %v2060_v9 = vpop.eup %2059 }
 0x276   : > { %v2062_v55 = vpop.eup %2061  ;;  %1551 = vst.msk [vmem:[%s358_s9 + $0x30] sm:$0xff] %vm395_vm0, %v1543_v63  ;;  %v1541_v2 = vmul.f32 %v2060_v9, %v1477_v3 }
 0x277   : > { %v1544_v10 = vmul.f32 %v2062_v55, %v1480_v34 }
 0x278   : > { %v2064_v11 = vpop.eup %2063  ;;  %1549 = vst.msk [vmem:[%s358_s9 + $0x20] sm:$0xff] %vm395_vm0, %v1541_v2 }
 0x279   : > { %1552 = vst.msk [vmem:[%s358_s9 + $0x38] sm:$0xff] %vm395_vm0, %v1544_v10  ;;  %v1542_v26 = vmul.f32 %v2064_v11, %v1478_v35 }
 0x27b   : > { %1550 = vst.msk [vmem:[%s358_s9 + $0x28] sm:$0xff] %vm395_vm0, %v1542_v26 }
 0x27c PF: > { %s21_s24 = sadd.s32 1, %s2243_s24  }
 0x27d   : > { %p18_p13 = scmp.ge.s32.totalorder %s21_s24, 4  }
 0x27f   :  { %20 = sbr.rel (!%p18_p13) target bundleno = 4 (0x4), region = 113 }
 0x284   :  { %1574 = vsyncpa [#allocation3], 1 }
 0x285   :  { %1576 = vsyncpa [#allocation3 + $0x1], 1 }
 0x286   :  { %1577 = vsyncpa [#allocation5], 1 }
 0x287   :  { %1578 = vsyncpa [#allocation8], 1 }
 0x288   :  { %1579 = vsyncpa [#allocation11], 1 }

// kernel: decoder_forward.9
= control target key start
LH: loop header
LB: loop body
LE: loop exit
PB: predicated region body
PF: predicated region fallthrough
CT: control target
= control target key end

     0   :  { %s4102_s15 = smov 0   ;;  %s5302_s0 = inlined_call_operand.vmem [shape: f32[2,18,18,32], index: 0, kind: input, shape index: {}]   ;;  %s5303_s1 = inlined_call_operand.vmem [shape: bf16[9,32,12], index: 1, kind: input, shape index: {}]   ;;  %s5304_s2 = inlined_call_operand.vmem [shape: f32[1,12], index: 2, kind: input, shape index: {}]   ;;  %s5305_s3 = inlined_call_operand.vmem [shape: f32[1,12], index: 3, kind: input, shape index: {}]   ;;  %s5306_s4 = inlined_call_operand.vmem [shape: f32[2,16,16,12], index: 4, kind: output, shape index: {}]  }
   0x1 LB: > { %s3089_s16 = sadd.s32 4294967295, %s4075_s15   ;;  %p3093_p0 = scmp.ge.s32.totalorder %s4075_s15, 1  ;;  %s4075_s15 = sphi %s4102_s15, %s14_s15  }
   0x2   : > { %p162_p1 = scmp.lt.s32.totalorder %s4075_s15, 3 }
   0x4   : > { %p163_p2 = pnand %p3093_p0, %p162_p1 }
   0x6   : > { %166 = sbr.rel (%p163_p2) target bundleno = 525 (0x20d), region = 36 }
   0xb   : > { %v3987_v0 = vld [vmem:[%s5303_s1 + $0x18] sm:$0xff]   ;;  %p188_p3 = scmp.lt.s32.totalorder %s3089_s16, 1  ;;  %v3988_v1 = vld [vmem:[%s5303_s1 + $0x10] sm:$0xff]   ;;  %v3989_v2 = vld [vmem:[%s5303_s1 + $0x8] sm:$0xff]   ;;  %vm316_vm0 = vcmask 261120   ;;  %vm3001_vm1 = vcmask 97280  }
   0xc   : > { %3650 = vmatprep.subr.bf16.mxu0 %v3987_v0  ;;  %3974 = vmatprep.subr.bf16.mxu1 %v3987_v0  ;;  %v3990_v3 = vld [vmem:[%s5303_s1 + $0x28] sm:$0xff]   ;;  %v3991_v11 = vld [vmem:[%s5303_s1] sm:$0xff]   ;;  %v4180_v32 = vld [vmem:[%s5303_s1 + $0x38] sm:$0xff]  }
   0xd   : > { %s5390_s16 = smov (!%p188_p3, %s3089_s16), 1  ;;  %3651 = vmatpush3.bf16.msra.mxu0 %v3987_v0  ;;  %3976 = vmatpush3.bf16.msra.mxu1 %v3987_v0  ;;  %v3992_v23 = vld [vmem:[%s5303_s1 + $0x20] sm:$0xff]   ;;  %v3994_v43 = vld [vmem:[%s5303_s1 + $0x48] sm:$0xff]  }
   0xe   : > { %3652 = vmatprep.subr.bf16.mxu0 %v3988_v1  ;;  %3975 = vmatprep.subr.bf16.mxu1 %v3988_v1  ;;  %s3978_s23 = smul.u32 432, %s5390_s16  ;;  %s3487_s11 = sshll.u32 %s5390_s16, 8 }
   0xf   : > { %s5128_s13 = scalar_lea.vmem %s5306_s4, %s3487_s11 }
  0x10   : > { %s4128_s28 = scalar_lea.vmem %s5302_s0, %s3978_s23 }
  0x11   : > { %3653 = vmatpush3.bf16.msra.mxu0 %v3988_v1  ;;  %3977 = vmatpush3.bf16.msra.mxu1 %v3988_v1  ;;  %v251_v4 = vld [vmem:[%s4128_s28 + $0x1] sm:$0xff]  ;;  %v252_v5 = vld [vmem:[%s4128_s28 + $0x9] sm:$0xff]  ;;  %v253_v9 = vld [vmem:[%s4128_s28 + $0x19] sm:$0xff] }
  0x12   : > { %v267_v6 = vld [vmem:[%s4128_s28 + $0xc1] sm:$0xff]  ;;  %v283_v7 = vpack.c.bf16 %v252_v5, %v251_v4  ;;  %v268_v8 = vld [vmem:[%s4128_s28 + $0xc9] sm:$0xff]  ;;  %3686 = vmatprep.subr.bf16.mxu1 %v3989_v2  ;;  %3722 = vmatprep.subr.bf16.mxu0 %v3990_v3  ;;  %v269_v14 = vld [vmem:[%s4128_s28 + $0xd9] sm:$0xff] }
  0x13   : > { %v254_v10 = vld [vmem:[%s4128_s28 + $0x21] sm:$0xff]  ;;  %v4139_v12 = vpack.c.bf16 %v268_v8, %v267_v6  ;;  %v255_v16 = vld [vmem:[%s4128_s28 + $0x31] sm:$0xff]  ;;  %v256_v18 = vld [vmem:[%s4128_s28 + $0x39] sm:$0xff] }
  0x14   : > { %v4141_v13 = vpack.c.bf16 %v254_v10, %v253_v9  ;;  %v270_v15 = vld [vmem:[%s4128_s28 + $0xe1] sm:$0xff]  ;;  %3654 = vmatprep.mubr.msk.bf16.mxu0 %vm316_vm0, %v283_v7  ;;  %v271_v19 = vld [vmem:[%s4128_s28 + $0xf1] sm:$0xff]  ;;  %v272_v20 = vld [vmem:[%s4128_s28 + $0xf9] sm:$0xff]  ;;  %v4156_v21 = vpack.c.bf16 %v256_v18, %v255_v16 }
  0x15   : > { %v4147_v17 = vpack.c.bf16 %v270_v15, %v269_v14  ;;  %3670 = vmatprep.mubr.msk.bf16.mxu1 %vm316_vm0, %v4139_v12  ;;  %v4158_v22 = vpack.c.bf16 %v272_v20, %v271_v19  ;;  %v257_v24 = vld [vmem:[%s4128_s28 + $0x49] sm:$0xff]  ;;  %v258_v25 = vld [vmem:[%s4128_s28 + $0x51] sm:$0xff]  ;;  %v259_v28 = vld [vmem:[%s4128_s28 + $0x61] sm:$0xff] }
  0x16   : > { %3655 = vmatmul.mubr.msk.bf16.vlgmr.msra.gmra.mxu0 %vm316_vm0, %v4141_v13  ;;  %v273_v26 = vld [vmem:[%s4128_s28 + $0x109] sm:$0xff]  ;;  %v274_v27 = vld [vmem:[%s4128_s28 + $0x111] sm:$0xff]  ;;  %v275_v30 = vld [vmem:[%s4128_s28 + $0x121] sm:$0xff]  ;;  %v4182_v33 = vpack.c.bf16 %v258_v25, %v257_v24 }
  0x17   : > { %3671 = vmatmul.mubr.msk.bf16.vlgmr.msra.gmra.mxu1 %vm316_vm0, %v4147_v17  ;;  %3723 = vmatpush3.bf16.msra.mxu0 %v3990_v3  ;;  %v260_v29 = vld [vmem:[%s4128_s28 + $0x69] sm:$0xff]  ;;  %v4184_v34 = vpack.c.bf16 %v274_v27, %v273_v26  ;;  %v261_v37 = vld [vmem:[%s4128_s28 + $0x79] sm:$0xff]  ;;  %v262_v38 = vld [vmem:[%s4128_s28 + $0x81] sm:$0xff] }
  0x18   : > { %3687 = vmatpush3.bf16.msra.mxu1 %v3989_v2  ;;  %3658 = vmatprep.mubr.msk.bf16.mxu0 %vm316_vm0, %v4156_v21  ;;  %v276_v31 = vld [vmem:[%s4128_s28 + $0x129] sm:$0xff]  ;;  %v4186_v35 = vpack.c.bf16 %v260_v29, %v259_v28  ;;  %v277_v39 = vld [vmem:[%s4128_s28 + $0x139] sm:$0xff]  ;;  %v278_v40 = vld [vmem:[%s4128_s28 + $0x141] sm:$0xff]  ;;  %v4210_v46 = vpack.c.bf16 %v262_v38, %v261_v37 }
  0x19   : > { %3674 = vmatprep.mubr.msk.bf16.mxu1 %vm316_vm0, %v4158_v22  ;;  %3688 = vmatprep.subr.bf16.mxu1 %v3991_v11  ;;  %v4188_v36 = vpack.c.bf16 %v276_v31, %v275_v30  ;;  %v263_v41 = vld [vmem:[%s4128_s28 + $0x91] sm:$0xff]  ;;  %v264_v42 = vld [vmem:[%s4128_s28 + $0x99] sm:$0xff]  ;;  %v4212_v47 = vpack.c.bf16 %v278_v40, %v277_v39  ;;  %v265_v50 = vld [vmem:[%s4128_s28 + $0xa9] sm:$0xff] }
  0x1a   : > { %3724 = vmatprep.subr.bf16.mxu0 %v3992_v23  ;;  %v279_v44 = vld [vmem:[%s4128_s28 + $0x151] sm:$0xff]  ;;  %v280_v45 = vld [vmem:[%s4128_s28 + $0x159] sm:$0xff]  ;;  %v4214_v48 = vpack.c.bf16 %v264_v42, %v263_v41  ;;  %v281_v52 = vld [vmem:[%s4128_s28 + $0x169] sm:$0xff] }
  0x1b   : > { %3725 = vmatpush3.bf16.msra.mxu0 %v3992_v23  ;;  %v4216_v49 = vpack.c.bf16 %v280_v45, %v279_v44  ;;  %v266_v51 = vld [vmem:[%s4128_s28 + $0xb1] sm:$0xff]  ;;  %v747_v54 = vld [vmem:[%s4128_s28 + $0x2] sm:$0xff]  ;;  %v749_v62 = vld [vmem:[%s4128_s28 + $0x1a] sm:$0xff] }
  0x1c   : > { %3689 = vmatpush3.bf16.msra.mxu1 %v3991_v11  ;;  %3794 = vmatprep.subr.bf16.mxu0 %v3994_v43  ;;  %v282_v53 = vld [vmem:[%s4128_s28 + $0x171] sm:$0xff]  ;;  %v199_v56 = vld [vmem:[%s4128_s28] sm:$0xff]  ;;  %v200_v57 = vld [vmem:[%s4128_s28 + $0x8] sm:$0xff]  ;;  %v4234_v58 = vpack.c.bf16 %v266_v51, %v265_v50 }
  0x1d   : > { %3758 = vmatprep.subr.bf16.mxu1 %v4180_v32  ;;  %v748_v55 = vld [vmem:[%s4128_s28 + $0xa] sm:$0xff]  ;;  %v4236_v59 = vpack.c.bf16 %v282_v53, %v281_v52  ;;  %v231_v61 = vpack.c.bf16 %v200_v57, %v199_v56  ;;  %v750_v63 = vld [vmem:[%s4128_s28 + $0x22] sm:$0xff]  ;;  %v201_v0 = vld [vmem:[%s4128_s28 + $0x18] sm:$0xff] }
  0x1e   : > { %3659 = vmatmul.mubr.msk.bf16.gmra.mxu0 %vm316_vm0, %v4182_v33  ;;  %v779_v60 = vpack.c.bf16 %v748_v55, %v747_v54  ;;  %v202_v1 = vld [vmem:[%s4128_s28 + $0x20] sm:$0xff]  ;;  %v203_v2 = vld [vmem:[%s4128_s28 + $0x30] sm:$0xff]  ;;  %v204_v3 = vld [vmem:[%s4128_s28 + $0x38] sm:$0xff]  ;;  %v4250_v4 = vpack.c.bf16 %v750_v63, %v749_v62 }
  0x1f   : > { %3675 = vmatmul.mubr.msk.bf16.gmra.mxu1 %vm316_vm0, %v4184_v34  ;;  %3662 = vmatprep.mubr.msk.bf16.mxu0 %vm316_vm0, %v4186_v35  ;;  %v751_v5 = vld [vmem:[%s4128_s28 + $0x32] sm:$0xff]  ;;  %v752_v6 = vld [vmem:[%s4128_s28 + $0x3a] sm:$0xff]  ;;  %v4254_v7 = vpack.c.bf16 %v202_v1, %v201_v0  ;;  %v4256_v8 = vpack.c.bf16 %v204_v3, %v203_v2  ;;  %v753_v10 = vld [vmem:[%s4128_s28 + $0x4a] sm:$0xff] }
  0x20   : > { %3678 = vmatprep.mubr.msk.bf16.mxu1 %vm316_vm0, %v4188_v36  ;;  %v4258_v9 = vpack.c.bf16 %v752_v6, %v751_v5  ;;  %v754_v11 = vld [vmem:[%s4128_s28 + $0x52] sm:$0xff]  ;;  %v205_v15 = vld [vmem:[%s4128_s28 + $0x48] sm:$0xff]  ;;  %v3996_v19 = vld [vmem:[%s5303_s1 + $0x40] sm:$0xff]  }
  0x21   : > { %v3995_v14 = vld [vmem:[%s5303_s1 + $0x30] sm:$0xff]   ;;  %v755_v18 = vld [vmem:[%s4128_s28 + $0x62] sm:$0xff]  ;;  %v4291_v26 = vld [vmem:[%s5303_s1 + $0x58] sm:$0xff]   ;;  %v4293_v27 = vpack.c.bf16 %v754_v11, %v753_v10 }
  0x22   : > { %v206_v16 = vld [vmem:[%s4128_s28 + $0x50] sm:$0xff]  ;;  %v4282_v23 = vld [vmem:[%s5303_s1 + $0x68] sm:$0xff]   ;;  %v207_v24 = vld [vmem:[%s4128_s28 + $0x60] sm:$0xff] }
  0x23   : > { %v756_v20 = vld [vmem:[%s4128_s28 + $0x6a] sm:$0xff]  ;;  %v4295_v28 = vpack.c.bf16 %v206_v16, %v205_v15  ;;  %v209_v31 = vld [vmem:[%s4128_s28 + $0x78] sm:$0xff]  ;;  %v758_v37 = vld [vmem:[%s4128_s28 + $0x82] sm:$0xff] }
  0x24   : > { %v208_v25 = vld [vmem:[%s4128_s28 + $0x68] sm:$0xff]  ;;  %v4297_v29 = vpack.c.bf16 %v756_v20, %v755_v18  ;;  %v210_v38 = vld [vmem:[%s4128_s28 + $0x80] sm:$0xff]  ;;  %v759_v39 = vld [vmem:[%s4128_s28 + $0x92] sm:$0xff] }
  0x25   : > { %v4299_v30 = vpack.c.bf16 %v208_v25, %v207_v24  ;;  %v760_v40 = vld [vmem:[%s4128_s28 + $0x9a] sm:$0xff]  ;;  %v211_v41 = vld [vmem:[%s4128_s28 + $0x90] sm:$0xff]  ;;  %v4321_v44 = vpack.c.bf16 %v210_v38, %v209_v31  ;;  %v213_v51 = vld [vmem:[%s4128_s28 + $0xa8] sm:$0xff] }
  0x26   : > { %3663 = vmatmul.mubr.msk.bf16.gmra.mxu0 %vm316_vm0, %v4210_v46  ;;  %v212_v42 = vld [vmem:[%s4128_s28 + $0x98] sm:$0xff]  ;;  %v4323_v45 = vpack.c.bf16 %v760_v40, %v759_v39  ;;  %v761_v52 = vld [vmem:[%s4128_s28 + $0xaa] sm:$0xff]  ;;  %v763_v55 = vld [vmem:[%s4128_s28 + $0xc2] sm:$0xff] }
  0x27   : > { %3679 = vmatmul.mubr.msk.bf16.gmra.mxu1 %vm316_vm0, %v4212_v47  ;;  %3666 = vmatprep.mubr.msk.bf16.mxu0 %vm316_vm0, %v4214_v48  ;;  %v4325_v50 = vpack.c.bf16 %v212_v42, %v211_v41  ;;  %v762_v53 = vld [vmem:[%s4128_s28 + $0xb2] sm:$0xff]  ;;  %v764_v56 = vld [vmem:[%s4128_s28 + $0xca] sm:$0xff]  ;;  %v215_v57 = vld [vmem:[%s4128_s28 + $0xc0] sm:$0xff] }
  0x28   : > { %3682 = vmatprep.mubr.msk.bf16.mxu1 %vm316_vm0, %v4216_v49  ;;  %v214_v54 = vld [vmem:[%s4128_s28 + $0xb0] sm:$0xff]  ;;  %v4347_v63 = vpack.c.bf16 %v764_v56, %v763_v55  ;;  %v217_v1 = vld [vmem:[%s4128_s28 + $0xd8] sm:$0xff]  ;;  %v766_v3 = vld [vmem:[%s4128_s28 + $0xe2] sm:$0xff] }
  0x29   : > { %v4345_v62 = vpack.c.bf16 %v214_v54, %v213_v51  ;;  %v765_v2 = vld [vmem:[%s4128_s28 + $0xda] sm:$0xff]  ;;  %v767_v6 = vld [vmem:[%s4128_s28 + $0xf2] sm:$0xff]  ;;  %v221_v20 = vld [vmem:[%s4128_s28 + $0x108] sm:$0xff] }
  0x2a   : > { %v218_v5 = vld [vmem:[%s4128_s28 + $0xe0] sm:$0xff]  ;;  %v219_v11 = vld [vmem:[%s4128_s28 + $0xf0] sm:$0xff]  ;;  %v4367_v15 = vpack.c.bf16 %v766_v3, %v765_v2  ;;  %v224_v39 = vld [vmem:[%s4128_s28 + $0x128] sm:$0xff] }
  0x2b   : > { %v768_v10 = vld [vmem:[%s4128_s28 + $0xfa] sm:$0xff]  ;;  %v4369_v16 = vpack.c.bf16 %v218_v5, %v217_v1  ;;  %v769_v24 = vld [vmem:[%s4128_s28 + $0x10a] sm:$0xff]  ;;  %v770_v25 = vld [vmem:[%s4128_s28 + $0x112] sm:$0xff] }
  0x2c   : > { %v4371_v18 = vpack.c.bf16 %v768_v10, %v767_v6  ;;  %v222_v31 = vld [vmem:[%s4128_s28 + $0x110] sm:$0xff]  ;;  %v223_v38 = vld [vmem:[%s4128_s28 + $0x120] sm:$0xff]  ;;  %v4391_v40 = vpack.c.bf16 %v770_v25, %v769_v24  ;;  %v228_v1 = vld [vmem:[%s4128_s28 + $0x158] sm:$0xff] }
  0x2d   : > { %v4393_v41 = vpack.c.bf16 %v222_v31, %v221_v20  ;;  %v4397_v51 = vpack.c.bf16 %v224_v39, %v223_v38  ;;  %v774_v54 = vld [vmem:[%s4128_s28 + $0x142] sm:$0xff]  ;;  %v775_v56 = vld [vmem:[%s4128_s28 + $0x152] sm:$0xff]  ;;  %v777_v10 = vld [vmem:[%s4128_s28 + $0x16a] sm:$0xff] }
  0x2e   : > { %3667 = vmatmul.mubr.msk.bf16.gmra.mxu0 %vm316_vm0, %v4234_v58  ;;  %v226_v55 = vld [vmem:[%s4128_s28 + $0x140] sm:$0xff]  ;;  %v230_v20 = vld [vmem:[%s4128_s28 + $0x170] sm:$0xff] }
  0x2f   : > { %3683 = vmatmul.mubr.msk.bf16.gmra.mxu1 %vm316_vm0, %v4236_v59  ;;  %3726 = vmatprep.mubr.msk.bf16.mxu0 %vm316_vm0, %v779_v60  ;;  %v216_v60 = vld [vmem:[%s4128_s28 + $0xc8] sm:$0xff]  ;;  %v3999_v31 = vld [vmem:[%s5303_s1 + $0x50] sm:$0xff]   ;;  %v3352_v38 = vld [vmem:[%s4128_s28 + $0x1a0] sm:$0xff] }
  0x30   : > { %3690 = vmatprep.mubr.msk.bf16.mxu1 %vm316_vm0, %v231_v61  ;;  %v4343_v61 = vpack.c.bf16 %v762_v53, %v761_v52  ;;  %v4349_v0 = vpack.c.bf16 %v216_v60, %v215_v57  ;;  %v225_v52 = vld [vmem:[%s4128_s28 + $0x138] sm:$0xff]  ;;  %v227_v60 = vld [vmem:[%s4128_s28 + $0x150] sm:$0xff] }
  0x31   : > { %v773_v53 = vld [vmem:[%s4128_s28 + $0x13a] sm:$0xff]  ;;  %v4417_v3 = vpack.c.bf16 %v226_v55, %v225_v52  ;;  %v4421_v6 = vpack.c.bf16 %v228_v1, %v227_v60  ;;  %v3375_v52 = vld [vmem:[%s4128_s28 + $0x31] sm:$0xff] }
  0x32   : > { %v776_v57 = vld [vmem:[%s4128_s28 + $0x15a] sm:$0xff]  ;;  %v4415_v2 = vpack.c.bf16 %v774_v54, %v773_v53 }
  0x33   : > { %v4419_v5 = vpack.c.bf16 %v776_v57, %v775_v56  ;;  %v3376_v53 = vld [vmem:[%s4128_s28 + $0x39] sm:$0xff] }
  0x34   : > { %v2311_v1 = vpack.c.bf16 %v3376_v53, %v3375_v52 }
  0x36   : > { %3727 = vmatmul.mubr.msk.bf16.vlgmr.msra.gmra.mxu0 %vm316_vm0, %v4250_v4 }
  0x37   : > { %3691 = vmatmul.mubr.msk.bf16.vlgmr.msra.gmra.mxu1 %vm316_vm0, %v4254_v7  ;;  %3795 = vmatpush3.bf16.msra.mxu0 %v3994_v43 }
  0x38   : > { %3759 = vmatpush3.bf16.msra.mxu1 %v4180_v32  ;;  %3694 = vmatprep.mubr.msk.bf16.mxu1 %vm316_vm0, %v4256_v8  ;;  %v757_v32 = vld [vmem:[%s4128_s28 + $0x7a] sm:$0xff] }
  0x39   : > { %3730 = vmatprep.mubr.msk.bf16.mxu0 %vm316_vm0, %v4258_v9  ;;  %3760 = vmatprep.subr.bf16.mxu1 %v3995_v14  ;;  %v4319_v43 = vpack.c.bf16 %v758_v37, %v757_v32  ;;  %v771_v32 = vld [vmem:[%s4128_s28 + $0x122] sm:$0xff]  ;;  %v772_v37 = vld [vmem:[%s4128_s28 + $0x12a] sm:$0xff] }
  0x3a   : > { %3796 = vmatprep.subr.bf16.mxu0 %v3996_v19  ;;  %v4395_v42 = vpack.c.bf16 %v772_v37, %v771_v32  ;;  %v4000_v32 = vld [vmem:[%s5303_s1 + $0x60] sm:$0xff]   ;;  %v3351_v37 = vld [vmem:[%s4128_s28 + $0x198] sm:$0xff] }
  0x3b   : > { %3797 = vmatpush3.bf16.msra.mxu0 %v3996_v19  ;;  %v2020_v55 = vpack.c.bf16 %v3352_v38, %v3351_v37  ;;  %v3383_v37 = vld [vmem:[%s4128_s28 + $0x91] sm:$0xff]  ;;  %v3384_v38 = vld [vmem:[%s4128_s28 + $0x99] sm:$0xff] }
  0x3c   : > { %3761 = vmatpush3.bf16.msra.mxu1 %v3995_v14  ;;  %3866 = vmatprep.subr.bf16.mxu0 %v4282_v23  ;;  %v220_v14 = vld [vmem:[%s4128_s28 + $0xf8] sm:$0xff] }
  0x3d   : > { %3830 = vmatprep.subr.bf16.mxu1 %v4291_v26  ;;  %v4373_v19 = vpack.c.bf16 %v220_v14, %v219_v11  ;;  %v778_v11 = vld [vmem:[%s4128_s28 + $0x172] sm:$0xff]  ;;  %v229_v14 = vld [vmem:[%s4128_s28 + $0x168] sm:$0xff] }
  0x3e   : > { %3731 = vmatmul.mubr.msk.bf16.gmra.mxu0 %vm316_vm0, %v4293_v27  ;;  %v4435_v24 = vpack.c.bf16 %v778_v11, %v777_v10  ;;  %v4437_v25 = vpack.c.bf16 %v230_v20, %v229_v14  ;;  %v3377_v10 = vld [vmem:[%s4128_s28 + $0x49] sm:$0xff]  ;;  %v3378_v11 = vld [vmem:[%s4128_s28 + $0x51] sm:$0xff]  ;;  %v3379_v20 = vld [vmem:[%s4128_s28 + $0x61] sm:$0xff] }
  0x3f   : > { %3695 = vmatmul.mubr.msk.bf16.gmra.mxu1 %vm316_vm0, %v4295_v28  ;;  %3734 = vmatprep.mubr.msk.bf16.mxu0 %vm316_vm0, %v4297_v29 }
  0x40   : > { %3698 = vmatprep.mubr.msk.bf16.mxu1 %vm316_vm0, %v4299_v30 }
  0x46   : > { %3735 = vmatmul.mubr.msk.bf16.gmra.mxu0 %vm316_vm0, %v4319_v43 }
  0x47   : > { %3699 = vmatmul.mubr.msk.bf16.gmra.mxu1 %vm316_vm0, %v4321_v44  ;;  %3738 = vmatprep.mubr.msk.bf16.mxu0 %vm316_vm0, %v4323_v45 }
  0x48   : > { %3702 = vmatprep.mubr.msk.bf16.mxu1 %vm316_vm0, %v4325_v50 }
  0x4e   : > { %3739 = vmatmul.mubr.msk.bf16.gmra.mxu0 %vm316_vm0, %v4343_v61 }
  0x4f   : > { %3703 = vmatmul.mubr.msk.bf16.gmra.mxu1 %vm316_vm0, %v4345_v62  ;;  %3742 = vmatprep.mubr.msk.bf16.mxu0 %vm316_vm0, %v4347_v63 }
  0x50   : > { %3706 = vmatprep.mubr.msk.bf16.mxu1 %vm316_vm0, %v4349_v0 }
  0x56   : > { %3743 = vmatmul.mubr.msk.bf16.gmra.mxu0 %vm316_vm0, %v4367_v15 }
  0x57   : > { %3707 = vmatmul.mubr.msk.bf16.gmra.mxu1 %vm316_vm0, %v4369_v16  ;;  %3746 = vmatprep.mubr.msk.bf16.mxu0 %vm316_vm0, %v4371_v18 }
  0x58   : > { %3710 = vmatprep.mubr.msk.bf16.mxu1 %vm316_vm0, %v4373_v19 }
  0x5e   : > { %3747 = vmatmul.mubr.msk.bf16.gmra.mxu0 %vm316_vm0, %v4391_v40 }
  0x5f   : > { %3711 = vmatmul.mubr.msk.bf16.gmra.mxu1 %vm316_vm0, %v4393_v41  ;;  %3750 = vmatprep.mubr.msk.bf16.mxu0 %vm316_vm0, %v4395_v42 }
  0x60   : > { %3714 = vmatprep.mubr.msk.bf16.mxu1 %vm316_vm0, %v4397_v51 }
  0x66   : > { %3751 = vmatmul.mubr.msk.bf16.gmra.mxu0 %vm316_vm0, %v4415_v2 }
  0x67   : > { %3715 = vmatmul.mubr.msk.bf16.gmra.mxu1 %vm316_vm0, %v4417_v3  ;;  %3754 = vmatprep.mubr.msk.bf16.mxu0 %vm316_vm0, %v4419_v5 }
  0x68   : > { %3718 = vmatprep.mubr.msk.bf16.mxu1 %vm316_vm0, %v4421_v6 }
  0x6e   : > { %3755 = vmatmul.mubr.msk.bf16.gmra.mxu0 %vm316_vm0, %v4435_v24 }
  0x6f   : > { %3719 = vmatmul.mubr.msk.bf16.gmra.mxu1 %vm316_vm0, %v4437_v25  ;;  %3798 = vmatprep.mubr.msk.bf16.mxu0 %vm316_vm0, %v4141_v13  ;;  %v4002_v13 = vld [vmem:[%s5303_s1 + $0x88] sm:$0xff]  }
  0x70   : > { %3762 = vmatprep.mubr.msk.bf16.mxu1 %vm316_vm0, %v4254_v7 }
  0x76   : > { %3799 = vmatmul.mubr.msk.bf16.vlgmr.msra.gmra.mxu0 %vm316_vm0, %v4156_v21  ;;  %v4001_v21 = vld [vmem:[%s5303_s1 + $0x78] sm:$0xff]  }
  0x77   : > { %3763 = vmatmul.mubr.msk.bf16.vlgmr.msra.gmra.mxu1 %vm316_vm0, %v4256_v8  ;;  %3867 = vmatpush3.bf16.msra.mxu0 %v4282_v23 }
  0x78   : > { %3831 = vmatpush3.bf16.msra.mxu1 %v4291_v26  ;;  %3766 = vmatprep.mubr.msk.bf16.mxu1 %vm316_vm0, %v4295_v28 }
  0x79   : > { %3802 = vmatprep.mubr.msk.bf16.mxu0 %vm316_vm0, %v4182_v33  ;;  %3832 = vmatprep.subr.bf16.mxu1 %v3999_v31  ;;  %v3190_v33 = vld [vmem:[%s4128_s28 + $0x188] sm:$0xff] }
  0x7a   : > { %3868 = vmatprep.subr.bf16.mxu0 %v4000_v32 }
  0x7b   : > { %3869 = vmatpush3.bf16.msra.mxu0 %v4000_v32  ;;  %v2312_v32 = vpack.c.bf16 %v3378_v11, %v3377_v10 }
  0x7c   : > { %3833 = vmatpush3.bf16.msra.mxu1 %v3999_v31  ;;  %3938 = vmatprep.subr.bf16.mxu0 %v4002_v13 }
  0x7d   : > { %3902 = vmatprep.subr.bf16.mxu1 %v4001_v21 }
  0x7e   : > { %3803 = vmatmul.mubr.msk.bf16.gmra.mxu0 %vm316_vm0, %v4186_v35 }
  0x7f   : > { %3767 = vmatmul.mubr.msk.bf16.gmra.mxu1 %vm316_vm0, %v4299_v30  ;;  %3806 = vmatprep.mubr.msk.bf16.mxu0 %vm316_vm0, %v4210_v46  ;;  %v4004_v46 = vld [vmem:[%s5303_s1 + $0x80] sm:$0xff]  }
  0x80   : > { %3770 = vmatprep.mubr.msk.bf16.mxu1 %vm316_vm0, %v4321_v44 }
  0x86   : > { %3807 = vmatmul.mubr.msk.bf16.gmra.mxu0 %vm316_vm0, %v4214_v48 }
  0x87   : > { %3771 = vmatmul.mubr.msk.bf16.gmra.mxu1 %vm316_vm0, %v4325_v50  ;;  %3810 = vmatprep.mubr.msk.bf16.mxu0 %vm316_vm0, %v4234_v58 }
  0x88   : > { %3774 = vmatprep.mubr.msk.bf16.mxu1 %vm316_vm0, %v4345_v62 }
  0x8e   : > { %3811 = vmatmul.mubr.msk.bf16.gmra.mxu0 %vm316_vm0, %v4139_v12  ;;  %v3243_v12 = vld [vmem:[%s4128_s28 + $0x181] sm:$0xff] }
  0x8f   : > { %3775 = vmatmul.mubr.msk.bf16.gmra.mxu1 %vm316_vm0, %v4349_v0  ;;  %3814 = vmatprep.mubr.msk.bf16.mxu0 %vm316_vm0, %v4147_v17  ;;  %v3244_v17 = vld [vmem:[%s4128_s28 + $0x189] sm:$0xff] }
  0x90   : > { %3778 = vmatprep.mubr.msk.bf16.mxu1 %vm316_vm0, %v4369_v16 }
  0x96   : > { %3815 = vmatmul.mubr.msk.bf16.gmra.mxu0 %vm316_vm0, %v4158_v22  ;;  %v3189_v22 = vld [vmem:[%s4128_s28 + $0x180] sm:$0xff] }
  0x97   : > { %3779 = vmatmul.mubr.msk.bf16.gmra.mxu1 %vm316_vm0, %v4373_v19  ;;  %3818 = vmatprep.mubr.msk.bf16.mxu0 %vm316_vm0, %v4184_v34  ;;  %v4521_v34 = vpack.c.bf16 %v3244_v17, %v3243_v12  ;;  %v1101_v35 = vpack.c.bf16 %v3190_v33, %v3189_v22 }
  0x98   : > { %3782 = vmatprep.mubr.msk.bf16.mxu1 %vm316_vm0, %v4393_v41 }
  0x9e   : > { %3819 = vmatmul.mubr.msk.bf16.gmra.mxu0 %vm316_vm0, %v4188_v36  ;;  %v4003_v36 = vld [vmem:[%s5303_s1 + $0x70] sm:$0xff]  }
  0x9f   : > { %3783 = vmatmul.mubr.msk.bf16.gmra.mxu1 %vm316_vm0, %v4397_v51  ;;  %3822 = vmatprep.mubr.msk.bf16.mxu0 %vm316_vm0, %v4212_v47 }
  0xa0   : > { %3786 = vmatprep.mubr.msk.bf16.mxu1 %vm316_vm0, %v4417_v3 }
  0xa6   : > { %3823 = vmatmul.mubr.msk.bf16.gmra.mxu0 %vm316_vm0, %v4216_v49 }
  0xa7   : > { %3787 = vmatmul.mubr.msk.bf16.gmra.mxu1 %vm316_vm0, %v4421_v6  ;;  %3826 = vmatprep.mubr.msk.bf16.mxu0 %vm316_vm0, %v4236_v59 }
  0xa8   : > { %3790 = vmatprep.mubr.msk.bf16.mxu1 %vm316_vm0, %v4437_v25 }
  0xae   : > { %3827 = vmatmul.mubr.msk.bf16.gmra.mxu0 %vm316_vm0, %v4521_v34 }
  0xaf   : > { %3791 = vmatmul.mubr.msk.bf16.gmra.mxu1 %vm316_vm0, %v1101_v35  ;;  %3870 = vmatprep.mubr.msk.bf16.mxu0 %vm316_vm0, %v4256_v8 }
  0xb0   : > { %3834 = vmatprep.mubr.msk.bf16.mxu1 %vm316_vm0, %v4250_v4 }
  0xb6   : > { %3871 = vmatmul.mubr.msk.bf16.vlgmr.msra.gmra.mxu0 %vm316_vm0, %v4295_v28 }
  0xb7   : > { %3835 = vmatmul.mubr.msk.bf16.vlgmr.msra.gmra.mxu1 %vm316_vm0, %v4258_v9  ;;  %3939 = vmatpush3.bf16.msra.mxu0 %v4002_v13 }
  0xb8   : > { %3903 = vmatpush3.bf16.msra.mxu1 %v4001_v21  ;;  %3838 = vmatprep.mubr.msk.bf16.mxu1 %vm316_vm0, %v4293_v27 }
  0xb9   : > { %3874 = vmatprep.mubr.msk.bf16.mxu0 %vm316_vm0, %v4299_v30  ;;  %3904 = vmatprep.subr.bf16.mxu1 %v4003_v36 }
  0xba   : > { %3940 = vmatprep.subr.bf16.mxu0 %v4004_v46 }
  0xbb   : > { %3941 = vmatpush3.bf16.msra.mxu0 %v4004_v46 }
  0xbc   : > { %3905 = vmatpush3.bf16.msra.mxu1 %v4003_v36  ;;  %v3382_v36 = vld [vmem:[%s4128_s28 + $0x81] sm:$0xff] }
  0xbe   : > { %3875 = vmatmul.mubr.msk.bf16.gmra.mxu0 %vm316_vm0, %v4321_v44 }
  0xbf   : > { %3839 = vmatmul.mubr.msk.bf16.gmra.mxu1 %vm316_vm0, %v4297_v29  ;;  %3878 = vmatprep.mubr.msk.bf16.mxu0 %vm316_vm0, %v4325_v50 }
  0xc0   : > { %3842 = vmatprep.mubr.msk.bf16.mxu1 %vm316_vm0, %v4319_v43 }
  0xc6   : > { %3879 = vmatmul.mubr.msk.bf16.gmra.mxu0 %vm316_vm0, %v4345_v62 }
  0xc7   : > { %3843 = vmatmul.mubr.msk.bf16.gmra.mxu1 %vm316_vm0, %v4323_v45  ;;  %3882 = vmatprep.mubr.msk.bf16.mxu0 %vm316_vm0, %v4349_v0 }
  0xc8   : > { %3846 = vmatprep.mubr.msk.bf16.mxu1 %vm316_vm0, %v4343_v61 }
  0xce   : > { %3883 = vmatmul.mubr.msk.bf16.gmra.mxu0 %vm316_vm0, %v4369_v16 }
  0xcf   : > { %3847 = vmatmul.mubr.msk.bf16.gmra.mxu1 %vm316_vm0, %v4347_v63  ;;  %3886 = vmatprep.mubr.msk.bf16.mxu0 %vm316_vm0, %v4373_v19 }
  0xd0   : > { %3850 = vmatprep.mubr.msk.bf16.mxu1 %vm316_vm0, %v4367_v15 }
  0xd6   : > { %v4568_v47 = vpop.f32.mrf.mxu0  ;;  %3887 = vmatmul.mubr.msk.bf16.gmra.mxu0 %vm316_vm0, %v4393_v41  ;;  %v3297_v41 = vld [vmem:[%s4128_s28 + $0x182] sm:$0xff] }
  0xd7   : > { %v4572_v48 = vpop.f32.mrf.mxu1  ;;  %3851 = vmatmul.mubr.msk.bf16.gmra.mxu1 %vm316_vm0, %v4371_v18  ;;  %3890 = vmatprep.mubr.msk.bf16.mxu0 %vm316_vm0, %v4397_v51 }
  0xd8   : > { %v4578_v49 = vpop.f32.mrf.mxu0  ;;  %3854 = vmatprep.mubr.msk.bf16.mxu1 %vm316_vm0, %v4391_v40 }
  0xd9   : > { %v4582_v58 = vpop.f32.mrf.mxu1 }
  0xda   : > { %v4584_v59 = vpop.f32.mrf.mxu0 }
  0xdb   : > { %v4586_v4 = vpop.f32.mrf.mxu1 }
  0xdc   : > { %v4588_v7 = vpop.f32.mrf.mxu0 }
  0xdd   : > { %v4590_v8 = vpop.f32.mrf.mxu1 }
  0xde   : > { %v4592_v23 = vpop.f32.mrf.mxu0  ;;  %3891 = vmatmul.mubr.msk.bf16.gmra.mxu0 %vm316_vm0, %v4417_v3 }
  0xdf   : > { %v4596_v26 = vpop.f32.mrf.mxu1  ;;  %3855 = vmatmul.mubr.msk.bf16.gmra.mxu1 %vm316_vm0, %v4395_v42  ;;  %3894 = vmatprep.mubr.msk.bf16.mxu0 %vm316_vm0, %v4421_v6  ;;  %v3298_v42 = vld [vmem:[%s4128_s28 + $0x18a] sm:$0xff] }
  0xe0   : > { %v4602_v28 = vpop.f32.mrf.mxu0  ;;  %3858 = vmatprep.mubr.msk.bf16.mxu1 %vm316_vm0, %v4415_v2  ;;  %v4641_v57 = vpack.c.bf16 %v3298_v42, %v3297_v41 }
  0xe1   : > { %v4606_v30 = vpop.f32.mrf.mxu1 }
  0xe2   : > { %v4608_v44 = vpop.f32.mrf.mxu0 }
  0xe3   : > { %v4610_v50 = vpop.f32.mrf.mxu1 }
  0xe4   : > { %v4612_v62 = vpop.f32.mrf.mxu0 }
  0xe5   : > { %v4614_v0 = vpop.f32.mrf.mxu1 }
  0xe6   : > { %v4616_v16 = vpop.f32.mrf.mxu0  ;;  %3895 = vmatmul.mubr.msk.bf16.gmra.mxu0 %vm316_vm0, %v4437_v25 }
  0xe7   : > { %v4620_v19 = vpop.f32.mrf.mxu1  ;;  %3859 = vmatmul.mubr.msk.bf16.gmra.mxu1 %vm316_vm0, %v4419_v5  ;;  %3898 = vmatprep.mubr.msk.bf16.mxu0 %vm316_vm0, %v1101_v35  ;;  %v3381_v35 = vld [vmem:[%s4128_s28 + $0x79] sm:$0xff] }
  0xe8   : > { %v4627_v39 = vpop.f32.mrf.mxu0  ;;  %3862 = vmatprep.mubr.msk.bf16.mxu1 %vm316_vm0, %v4435_v24  ;;  %v3380_v24 = vld [vmem:[%s4128_s28 + $0x69] sm:$0xff]  ;;  %v2314_v53 = vpack.c.bf16 %v3382_v36, %v3381_v35 }
  0xe9   : > { %v4633_v51 = vpop.f32.mrf.mxu1  ;;  %v2313_v13 = vpack.c.bf16 %v3380_v24, %v3379_v20 }
  0xea   : > { %v4637_v54 = vpop.f32.mrf.mxu0 }
  0xeb   : > { %v4639_v56 = vpop.f32.mrf.mxu1 }
  0xec   : > { %v4643_v60 = vpop.f32.mrf.mxu0 }
  0xed   : > { %v4645_v2 = vpop.f32.mrf.mxu1 }
  0xee   : > { %v4647_v3 = vpop.f32.mrf.mxu0  ;;  %3899 = vmatmul.mubr.msk.bf16.gmra.mxu0 %vm316_vm0, %v2020_v55 }
  0xef   : > { %v4650_v5 = vpop.f32.mrf.mxu1  ;;  %3863 = vmatmul.mubr.msk.bf16.gmra.mxu1 %vm316_vm0, %v4641_v57  ;;  %3942 = vmatprep.mubr.msk.bf16.mxu0 %vm316_vm0, %v4258_v9 }
  0xf0   : > { %v4656_v6 = vpop.f32.mrf.mxu0  ;;  %3906 = vmatprep.mubr.msk.bf16.mxu1 %vm316_vm0, %v2311_v1  ;;  %v2315_v1 = vpack.c.bf16 %v3384_v38, %v3383_v37 }
  0xf1   : > { %v4661_v14 = vpop.f32.mrf.mxu1 }
  0xf2   : > { %v4665_v25 = vpop.f32.mrf.mxu0 }
  0xf3   : > { %v4667_v31 = vpop.f32.mrf.mxu1 }
  0xf4   : > { %v4669_v9 = vpop.f32.mrf.mxu0 }
  0xf5   : > { %v4671_v21 = vpop.f32.mrf.mxu1 }
  0xf6   : > { %v3728_v12 = vpop.f32.mrf.mxu0  ;;  %3943 = vmatmul.mubr.msk.bf16.vlgmr.msra.gmra.mxu0 %vm316_vm0, %v4293_v27 }
  0xf7   : > { %v3692_v17 = vpop.f32.mrf.mxu1  ;;  %3907 = vmatmul.mubr.msk.bf16.vlgmr.msra.gmra.mxu1 %vm316_vm0, %v2312_v32  ;;  %3946 = vmatprep.mubr.msk.bf16.mxu0 %vm316_vm0, %v4297_v29 }
  0xf8   : > { %v629_v22 = vadd.f32 %v3692_v17, %v4568_v47  ;;  %v894_v33 = vpop.f32.mrf.mxu0  ;;  %3910 = vmatprep.mubr.msk.bf16.mxu1 %vm316_vm0, %v2313_v13  ;;  %v3386_v17 = vld [vmem:[%s4128_s28 + $0xb1] sm:$0xff] }
  0xf9   : > { %v620_v46 = vpop.f32.mrf.mxu1 }
  0xfa   : > { %v4684_v41 = vadd.f32 %v3728_v12, %v629_v22  ;;  %v621_v27 = vadd.f32 %v620_v46, %v4578_v49  ;;  %v3729_v42 = vpop.f32.mrf.mxu0  ;;  %v3385_v12 = vld [vmem:[%s4128_s28 + $0xa9] sm:$0xff]  ;;  %v3387_v22 = vld [vmem:[%s4128_s28 + $0xc1] sm:$0xff] }
  0xfb   : > { %v3693_v52 = vpop.f32.mrf.mxu1  ;;  %v2316_v37 = vpack.c.bf16 %v3386_v17, %v3385_v12 }
  0xfc   : > { %v4687_v55 = vadd.f32 %v894_v33, %v621_v27  ;;  %v632_v29 = vadd.f32 %v3693_v52, %v4584_v59  ;;  %v897_v47 = vpop.f32.mrf.mxu0  ;;  %v3388_v33 = vld [vmem:[%s4128_s28 + $0xc9] sm:$0xff] }
  0xfd   : > { %v623_v10 = vpop.f32.mrf.mxu1  ;;  %v2317_v27 = vpack.c.bf16 %v3388_v33, %v3387_v22 }
  0xfe   : > { %v4690_v11 = vadd.f32 %v3729_v42, %v632_v29  ;;  %v624_v20 = vadd.f32 %v623_v10, %v4588_v7  ;;  %v3732_v24 = vpop.f32.mrf.mxu0  ;;  %3947 = vmatmul.mubr.msk.bf16.gmra.mxu0 %vm316_vm0, %v4319_v43  ;;  %v3389_v10 = vld [vmem:[%s4128_s28 + $0xd9] sm:$0xff] }
  0xff   : > { %v3696_v49 = vpop.f32.mrf.mxu1  ;;  %3911 = vmatmul.mubr.msk.bf16.gmra.mxu1 %vm316_vm0, %v2314_v53  ;;  %3950 = vmatprep.mubr.msk.bf16.mxu0 %vm316_vm0, %v4323_v45 }
 0x100   : > { %v4698_v59 = vadd.f32 %v897_v47, %v624_v20  ;;  %v645_v32 = vadd.f32 %v3696_v49, %v4592_v23  ;;  %v910_v13 = vpop.f32.mrf.mxu0  ;;  %3914 = vmatprep.mubr.msk.bf16.mxu1 %vm316_vm0, %v2315_v1  ;;  %v3390_v20 = vld [vmem:[%s4128_s28 + $0xe1] sm:$0xff]  ;;  %v3392_v49 = vld [vmem:[%s4128_s28 + $0xf9] sm:$0xff] }
 0x101   : > { %v636_v7 = vpop.f32.mrf.mxu1 }
 0x102   : > { %v4706_v35 = vadd.f32 %v3732_v24, %v645_v32  ;;  %v637_v43 = vadd.f32 %v636_v7, %v4602_v28  ;;  %v3733_v36 = vpop.f32.mrf.mxu0  ;;  %v3391_v24 = vld [vmem:[%s4128_s28 + $0xf1] sm:$0xff] }
 0x103   : > { %v3697_v46 = vpop.f32.mrf.mxu1  ;;  %v2319_v22 = vpack.c.bf16 %v3392_v49, %v3391_v24 }
 0x104   : > { %v4709_v45 = vadd.f32 %v910_v13, %v637_v43  ;;  %v648_v23 = vadd.f32 %v3697_v46, %v4608_v44  ;;  %v913_v38 = vpop.f32.mrf.mxu0 }
 0x105   : > { %v639_v42 = vpop.f32.mrf.mxu1 }
 0x106   : > { %v4712_v52 = vadd.f32 %v3733_v36, %v648_v23  ;;  %v640_v53 = vadd.f32 %v639_v42, %v4612_v62  ;;  %v3736_v29 = vpop.f32.mrf.mxu0  ;;  %3951 = vmatmul.mubr.msk.bf16.gmra.mxu0 %vm316_vm0, %v4343_v61  ;;  %v3450_v42 = vld [vmem:[%s4128_s28 + $0x12a] sm:$0xff] }
 0x107   : > { %v3700_v28 = vpop.f32.mrf.mxu1  ;;  %3915 = vmatmul.mubr.msk.bf16.gmra.mxu1 %vm316_vm0, %v2316_v37  ;;  %3954 = vmatprep.mubr.msk.bf16.mxu0 %vm316_vm0, %v4347_v63  ;;  %v2318_v63 = vpack.c.bf16 %v3390_v20, %v3389_v10 }
 0x108   : > { %v4720_v44 = vadd.f32 %v913_v38, %v640_v53  ;;  %v661_v47 = vadd.f32 %v3700_v28, %v4616_v16  ;;  %v926_v1 = vpop.f32.mrf.mxu0  ;;  %3918 = vmatprep.mubr.msk.bf16.mxu1 %vm316_vm0, %v2317_v27  ;;  %v3449_v27 = vld [vmem:[%s4128_s28 + $0x122] sm:$0xff] }
 0x109   : > { %v652_v62 = vpop.f32.mrf.mxu1 }
 0x10a   : > { %v4728_v32 = vadd.f32 %v3736_v29, %v661_v47  ;;  %v653_v61 = vadd.f32 %v652_v62, %v4627_v39  ;;  %v3737_v13 = vpop.f32.mrf.mxu0  ;;  %v3395_v29 = vld [vmem:[%s4128_s28 + $0x121] sm:$0xff] }
 0x10b   : > { %v3701_v12 = vpop.f32.mrf.mxu1 }
 0x10c   : > { %v4731_v17 = vadd.f32 %v926_v1, %v653_v61  ;;  %v664_v16 = vadd.f32 %v3701_v12, %v4637_v54  ;;  %v929_v7 = vpop.f32.mrf.mxu0  ;;  %v3393_v54 = vld [vmem:[%s4128_s28 + $0x109] sm:$0xff] }
 0x10d   : > { %v655_v33 = vpop.f32.mrf.mxu1 }
 0x10e   : > { %v4734_v43 = vadd.f32 %v3737_v13, %v664_v16  ;;  %v656_v36 = vadd.f32 %v655_v33, %v4643_v60  ;;  %v3740_v39 = vpop.f32.mrf.mxu0  ;;  %3955 = vmatmul.mubr.msk.bf16.gmra.mxu0 %vm316_vm0, %v4367_v15  ;;  %v3394_v60 = vld [vmem:[%s4128_s28 + $0x111] sm:$0xff]  ;;  %v3396_v15 = vld [vmem:[%s4128_s28 + $0x129] sm:$0xff]  ;;  %v3451_v16 = vld [vmem:[%s4128_s28 + $0x13a] sm:$0xff] }
 0x10f   : > { %v3704_v46 = vpop.f32.mrf.mxu1  ;;  %3919 = vmatmul.mubr.msk.bf16.gmra.mxu1 %vm316_vm0, %v2318_v63  ;;  %3958 = vmatprep.mubr.msk.bf16.mxu0 %vm316_vm0, %v4371_v18  ;;  %v2320_v10 = vpack.c.bf16 %v3394_v60, %v3393_v54  ;;  %v2321_v49 = vpack.c.bf16 %v3396_v15, %v3395_v29  ;;  %v3399_v54 = vld [vmem:[%s4128_s28 + $0x151] sm:$0xff] }
 0x110   : > { %v4743_v37 = vadd.f32 %v929_v7, %v656_v36  ;;  %v677_v23 = vadd.f32 %v3704_v46, %v4647_v3  ;;  %v942_v38 = vpop.f32.mrf.mxu0  ;;  %3922 = vmatprep.mubr.msk.bf16.mxu1 %vm316_vm0, %v2319_v22  ;;  %v2627_v3 = vpack.c.bf16 %v3450_v42, %v3449_v27  ;;  %v3452_v7 = vld [vmem:[%s4128_s28 + $0x142] sm:$0xff]  ;;  %v3454_v46 = vld [vmem:[%s4128_s28 + $0x15a] sm:$0xff] }
 0x111   : > { %v668_v53 = vpop.f32.mrf.mxu1  ;;  %v2628_v42 = vpack.c.bf16 %v3452_v7, %v3451_v16 }
 0x112   : > { %v4752_v28 = vadd.f32 %v3740_v39, %v677_v23  ;;  %v669_v47 = vadd.f32 %v668_v53, %v4656_v6  ;;  %v3741_v1 = vpop.f32.mrf.mxu0  ;;  %v3453_v39 = vld [vmem:[%s4128_s28 + $0x152] sm:$0xff] }
 0x113   : > { %v3705_v18 = vpop.f32.mrf.mxu1  ;;  %v3400_v23 = vld [vmem:[%s4128_s28 + $0x159] sm:$0xff] }
 0x114   : > { %v4755_v20 = vadd.f32 %v942_v38, %v669_v47  ;;  %v680_v62 = vadd.f32 %v3705_v18, %v4665_v25  ;;  %v945_v24 = vpop.f32.mrf.mxu0  ;;  %v3397_v25 = vld [vmem:[%s4128_s28 + $0x139] sm:$0xff]  ;;  %v2323_v18 = vpack.c.bf16 %v3400_v23, %v3399_v54 }
 0x115   : > { %v671_v61 = vpop.f32.mrf.mxu1 }
 0x116   : > { %v4758_v13 = vadd.f32 %v3741_v1, %v680_v62  ;;  %v672_v6 = vadd.f32 %v671_v61, %v4669_v9  ;;  %v3744_v12 = vpop.f32.mrf.mxu0  ;;  %3959 = vmatmul.mubr.msk.bf16.gmra.mxu0 %vm316_vm0, %v4391_v40  ;;  %v3398_v9 = vld [vmem:[%s4128_s28 + $0x141] sm:$0xff]  ;;  %v3456_v61 = vld [vmem:[%s4128_s28 + $0x172] sm:$0xff] }
 0x117   : > { %v3708_v63 = vpop.f32.mrf.mxu1  ;;  %3923 = vmatmul.mubr.msk.bf16.gmra.mxu1 %vm316_vm0, %v2320_v10  ;;  %3962 = vmatprep.mubr.msk.bf16.mxu0 %vm316_vm0, %v2627_v3  ;;  %v2322_v29 = vpack.c.bf16 %v3398_v9, %v3397_v25  ;;  %v3402_v25 = vld [vmem:[%s4128_s28 + $0x171] sm:$0xff] }
 0x118   : > { %v4768_v22 = vadd.f32 %v945_v24, %v672_v6  ;;  %v693_v33 = vadd.f32 %v3708_v63, %v4572_v48  ;;  %v958_v36 = vpop.f32.mrf.mxu0  ;;  %3926 = vmatprep.mubr.msk.bf16.mxu1 %vm316_vm0, %v2321_v49  ;;  %v2629_v48 = vpack.c.bf16 %v3454_v46, %v3453_v39  ;;  %v3455_v49 = vld [vmem:[%s4128_s28 + $0x16a] sm:$0xff] }
 0x119   : > { %v684_v40 = vpop.f32.mrf.mxu1  ;;  %v3401_v63 = vld [vmem:[%s4128_s28 + $0x169] sm:$0xff] }
 0x11a   : > { %v4777_v38 = vadd.f32 %v3744_v12, %v693_v33  ;;  %v685_v60 = vadd.f32 %v684_v40, %v4582_v58  ;;  %v3745_v27 = vpop.f32.mrf.mxu0  ;;  %v2324_v39 = vpack.c.bf16 %v3402_v25, %v3401_v63 }
 0x11b   : > { %v3709_v53 = vpop.f32.mrf.mxu1 }
 0x11c   : > { %v4780_v15 = vadd.f32 %v958_v36, %v685_v60  ;;  %v696_v47 = vadd.f32 %v3709_v53, %v4586_v4  ;;  %v961_v1 = vpop.f32.mrf.mxu0  ;;  %v2630_v36 = vpack.c.bf16 %v3456_v61, %v3455_v49  ;;  %v3460_v53 = vld [vmem:[%s4128_s28 + $0x1a2] sm:$0xff] }
 0x11d   : > { %v687_v10 = vpop.f32.mrf.mxu1 }
 0x11e   : > { %v4783_v3 = vadd.f32 %v3745_v27, %v696_v47  ;;  %v688_v58 = vadd.f32 %v687_v10, %v4590_v8  ;;  %v3748_v62 = vpop.f32.mrf.mxu0  ;;  %3963 = vmatmul.mubr.msk.bf16.gmra.mxu0 %vm316_vm0, %v2628_v42  ;;  %v3459_v42 = vld [vmem:[%s4128_s28 + $0x19a] sm:$0xff] }
 0x11f   : > { %v3712_v24 = vpop.f32.mrf.mxu1  ;;  %3927 = vmatmul.mubr.msk.bf16.gmra.mxu1 %vm316_vm0, %v2322_v29  ;;  %3966 = vmatprep.mubr.msk.bf16.mxu0 %vm316_vm0, %v2629_v48  ;;  %v3406_v47 = vld [vmem:[%s4128_s28 + $0x1a1] sm:$0xff] }
 0x120   : > { %v4791_v4 = vadd.f32 %v961_v1, %v688_v58  ;;  %v709_v6 = vadd.f32 %v3712_v24, %v4596_v26  ;;  %v974_v12 = vpop.f32.mrf.mxu0  ;;  %3930 = vmatprep.mubr.msk.bf16.mxu1 %vm316_vm0, %v2323_v18 }
 0x121   : > { %v700_v8 = vpop.f32.mrf.mxu1 }
 0x122   : > { %v4797_v16 = vadd.f32 %v3748_v62, %v709_v6  ;;  %v701_v7 = vadd.f32 %v700_v8, %v4606_v30  ;;  %v3749_v33 = vpop.f32.mrf.mxu0  ;;  %v2632_v62 = vpack.c.bf16 %v3460_v53, %v3459_v42 }
 0x123   : > { %v3713_v9 = vpop.f32.mrf.mxu1 }
 0x124   : > { %v4800_v46 = vadd.f32 %v974_v12, %v701_v7  ;;  %v712_v26 = vadd.f32 %v3713_v9, %v4610_v50  ;;  %v977_v40 = vpop.f32.mrf.mxu0 }
 0x125   : > { %v703_v54 = vpop.f32.mrf.mxu1 }
 0x126   : > { %v4803_v23 = vadd.f32 %v3749_v33, %v712_v26  ;;  %v704_v60 = vadd.f32 %v703_v54, %v4614_v0  ;;  %v3752_v27 = vpop.f32.mrf.mxu0  ;;  %3967 = vmatmul.mubr.msk.bf16.gmra.mxu0 %vm316_vm0, %v2630_v36  ;;  %v3405_v0 = vld [vmem:[%s4128_s28 + $0x199] sm:$0xff] }
 0x127   : > { %v3716_v30 = vpop.f32.mrf.mxu1  ;;  %3931 = vmatmul.mubr.msk.bf16.gmra.mxu1 %vm316_vm0, %v2324_v39  ;;  %3970 = vmatprep.mubr.msk.bf16.mxu0 %vm316_vm0, %v4641_v57  ;;  %v2326_v24 = vpack.c.bf16 %v3406_v47, %v3405_v0 }
 0x128   : > { %v4812_v50 = vadd.f32 %v977_v40, %v704_v60  ;;  %v725_v29 = vadd.f32 %v3716_v30, %v4620_v19  ;;  %v990_v48 = vpop.f32.mrf.mxu0  ;;  %3934 = vmatprep.mubr.msk.bf16.mxu1 %vm316_vm0, %v4521_v34 }
 0x129   : > { %v716_v1 = vpop.f32.mrf.mxu1 }
 0x12a   : > { %v4819_v18 = vadd.f32 %v3752_v27, %v725_v29  ;;  %v717_v10 = vadd.f32 %v716_v1, %v4633_v51  ;;  %v3753_v58 = vpop.f32.mrf.mxu0 }
 0x12b   : > { %v3717_v57 = vpop.f32.mrf.mxu1 }
 0x12c   : > { %v4822_v49 = vadd.f32 %v990_v48, %v717_v10  ;;  %v728_v61 = vadd.f32 %v3717_v57, %v4639_v56  ;;  %v993_v19 = vpop.f32.mrf.mxu0 }
 0x12d   : > { %v719_v6 = vpop.f32.mrf.mxu1 }
 0x12e   : > { %v4825_v12 = vadd.f32 %v3753_v58, %v728_v61  ;;  %v720_v34 = vadd.f32 %v719_v6, %v4645_v2  ;;  %v3756_v63 = vpop.f32.mrf.mxu0  ;;  %3971 = vmatmul.mubr.msk.bf16.gmra.mxu0 %vm316_vm0, %v2632_v62 }
 0x12f   : > { %v3720_v25 = vpop.f32.mrf.mxu1  ;;  %3935 = vmatmul.mubr.msk.bf16.gmra.mxu1 %vm316_vm0, %v2326_v24 }
 0x130   : > { %v4830_v51 = vadd.f32 %v993_v19, %v720_v34  ;;  %v741_v8 = vadd.f32 %v3720_v25, %v4650_v5  ;;  %v1006_v7 = vpop.f32.mrf.mxu0 }
 0x131   : > { %v732_v33 = vpop.f32.mrf.mxu1 }
 0x132   : > { %v4833_v36 = vadd.f32 %v3756_v63, %v741_v8  ;;  %v733_v56 = vadd.f32 %v732_v33, %v4661_v14  ;;  %v3757_v9 = vpop.f32.mrf.mxu0 }
 0x133   : > { %v3721_v39 = vpop.f32.mrf.mxu1 }
 0x134   : > { %v4836_v26 = vadd.f32 %v1006_v7, %v733_v56  ;;  %v744_v2 = vadd.f32 %v3721_v39, %v4667_v31  ;;  %v1009_v40 = vpop.f32.mrf.mxu0 }
 0x135   : > { %v735_v54 = vpop.f32.mrf.mxu1 }
 0x136   : > { %v4839_v60 = vadd.f32 %v3757_v9, %v744_v2  ;;  %v736_v27 = vadd.f32 %v735_v54, %v4671_v21  ;;  %v3800_v30 = vpop.f32.mrf.mxu0 }
 0x137   : > { %v3764_v5 = vpop.f32.mrf.mxu1 }
 0x138   : > { %v4842_v42 = vadd.f32 %v1009_v40, %v736_v27  ;;  %v1330_v53 = vadd.f32 %v3764_v5, %v4684_v41  ;;  %v1507_v29 = vpop.f32.mrf.mxu0 }
 0x139   : > { %v1201_v14 = vpop.f32.mrf.mxu1 }
 0x13a   : > { %v4845_v48 = vadd.f32 %v3800_v30, %v1330_v53  ;;  %v1328_v0 = vadd.f32 %v1201_v14, %v4687_v55  ;;  %v3801_v47 = vpop.f32.mrf.mxu0 }
 0x13b   : > { %v3765_v31 = vpop.f32.mrf.mxu1 }
 0x13c   : > { %v4848_v1 = vadd.f32 %v1507_v29, %v1328_v0  ;;  %v1331_v10 = vadd.f32 %v3765_v31, %v4690_v11  ;;  %v1510_v58 = vpop.f32.mrf.mxu0 }
 0x13d   : > { %v1204_v21 = vpop.f32.mrf.mxu1 }
 0x13e   : > { %v4851_v62 = vadd.f32 %v3801_v47, %v1331_v10  ;;  %v1329_v57 = vadd.f32 %v1204_v21, %v4698_v59  ;;  %v3804_v24 = vpop.f32.mrf.mxu0 }
 0x13f   : > { %v3768_v41 = vpop.f32.mrf.mxu1 }
 0x140   : > { %v4854_v61 = vadd.f32 %v1510_v58, %v1329_v57  ;;  %v1334_v19 = vadd.f32 %v3768_v41, %v4706_v35  ;;  %v1523_v6 = vpop.f32.mrf.mxu0 }
 0x141   : > { %v1217_v55 = vpop.f32.mrf.mxu1 }
 0x142   : > { %v4857_v34 = vadd.f32 %v3804_v24, %v1334_v19  ;;  %v1332_v63 = vadd.f32 %v1217_v55, %v4709_v45  ;;  %v3805_v25 = vpop.f32.mrf.mxu0 }
 0x143   : > { %v3769_v11 = vpop.f32.mrf.mxu1 }
 0x144   : > { %v4860_v8 = vadd.f32 %v1523_v6, %v1332_v63  ;;  %v1335_v7 = vadd.f32 %v3769_v11, %v4712_v52  ;;  %v1526_v33 = vpop.f32.mrf.mxu0 }
 0x145   : > { %v1220_v59 = vpop.f32.mrf.mxu1 }
 0x146   : > { %v4863_v56 = vadd.f32 %v3805_v25, %v1335_v7  ;;  %v1333_v9 = vadd.f32 %v1220_v59, %v4720_v44  ;;  %v3808_v39 = vpop.f32.mrf.mxu0 }
 0x147   : > { %v3772_v35 = vpop.f32.mrf.mxu1 }
 0x148   : > { %v4866_v2 = vadd.f32 %v1526_v33, %v1333_v9  ;;  %v1338_v40 = vadd.f32 %v3772_v35, %v4728_v32  ;;  %v1539_v54 = vpop.f32.mrf.mxu0 }
 0x149   : > { %v1233_v45 = vpop.f32.mrf.mxu1 }
 0x14a   : > { %v4869_v27 = vadd.f32 %v3808_v39, %v1338_v40  ;;  %v1336_v30 = vadd.f32 %v1233_v45, %v4731_v17  ;;  %v3809_v5 = vpop.f32.mrf.mxu0 }
 0x14b   : > { %v3773_v52 = vpop.f32.mrf.mxu1 }
 0x14c   : > { %v4872_v53 = vadd.f32 %v1539_v54, %v1336_v30  ;;  %v1339_v29 = vadd.f32 %v3773_v52, %v4734_v43  ;;  %v1542_v14 = vpop.f32.mrf.mxu0 }
 0x14d   : > { %v1236_v44 = vpop.f32.mrf.mxu1 }
 0x14e   : > { %v4875_v0 = vadd.f32 %v3809_v5, %v1339_v29  ;;  %v1337_v47 = vadd.f32 %v1236_v44, %v4743_v37  ;;  %v3812_v31 = vpop.f32.mrf.mxu0 }
 0x14f   : > { %v3776_v32 = vpop.f32.mrf.mxu1 }
 0x150   : > { %v4878_v10 = vadd.f32 %v1542_v14, %v1337_v47  ;;  %v1342_v58 = vadd.f32 %v3776_v32, %v4752_v28  ;;  %v1555_v21 = vpop.f32.mrf.mxu0 }
 0x151   : > { %v1249_v17 = vpop.f32.mrf.mxu1 }
 0x152   : > { %v4881_v57 = vadd.f32 %v3812_v31, %v1342_v58  ;;  %v1340_v24 = vadd.f32 %v1249_v17, %v4755_v20  ;;  %v3813_v41 = vpop.f32.mrf.mxu0 }
 0x153   : > { %v3777_v43 = vpop.f32.mrf.mxu1 }
 0x154   : > { %v4884_v19 = vadd.f32 %v1555_v21, %v1340_v24  ;;  %v1343_v6 = vadd.f32 %v3777_v43, %v4758_v13  ;;  %v1558_v55 = vpop.f32.mrf.mxu0 }
 0x155   : > { %v1252_v37 = vpop.f32.mrf.mxu1 }
 0x156   : > { %v4887_v63 = vadd.f32 %v3813_v41, %v1343_v6  ;;  %v1341_v25 = vadd.f32 %v1252_v37, %v4768_v22  ;;  %v3816_v11 = vpop.f32.mrf.mxu0 }
 0x157   : > { %v3780_v28 = vpop.f32.mrf.mxu1 }
 0x158   : > { %v4890_v7 = vadd.f32 %v1558_v55, %v1341_v25  ;;  %v1346_v33 = vadd.f32 %v3780_v28, %v4777_v38  ;;  %v1571_v59 = vpop.f32.mrf.mxu0 }
 0x159   : > { %v1265_v20 = vpop.f32.mrf.mxu1 }
 0x15a   : > { %v4893_v9 = vadd.f32 %v3816_v11, %v1346_v33  ;;  %v1344_v39 = vadd.f32 %v1265_v20, %v4780_v15  ;;  %v3817_v35 = vpop.f32.mrf.mxu0 }
 0x15b   : > { %v3781_v13 = vpop.f32.mrf.mxu1 }
 0x15c   : > { %v4896_v40 = vadd.f32 %v1571_v59, %v1344_v39  ;;  %v1347_v54 = vadd.f32 %v3781_v13, %v4783_v3  ;;  %v1574_v45 = vpop.f32.mrf.mxu0 }
 0x15d   : > { %v1268_v22 = vpop.f32.mrf.mxu1 }
 0x15e   : > { %v4899_v30 = vadd.f32 %v3817_v35, %v1347_v54  ;;  %v1345_v5 = vadd.f32 %v1268_v22, %v4791_v4  ;;  %v3820_v52 = vpop.f32.mrf.mxu0 }
 0x15f   : > { %v3784_v38 = vpop.f32.mrf.mxu1 }
 0x160   : > { %5307 = vst [vmem:[#allocation2_spill] sm:$0xff] %v4899_v30  ;;  %v4902_v29 = vadd.f32 %v1574_v45, %v1345_v5  ;;  %v1350_v14 = vadd.f32 %v3784_v38, %v4797_v16  ;;  %v1587_v44 = vpop.f32.mrf.mxu0 }
 0x161   : > { %v1281_v15 = vpop.f32.mrf.mxu1 }
 0x162   : > { %5308 = vst [vmem:[#allocation3_spill] sm:$0xff] %v4902_v29  ;;  %v4905_v47 = vadd.f32 %v3820_v52, %v1350_v14  ;;  %v1348_v31 = vadd.f32 %v1281_v15, %v4800_v46  ;;  %v3821_v32 = vpop.f32.mrf.mxu0 }
 0x163   : > { %v3785_v3 = vpop.f32.mrf.mxu1 }
 0x164   : > { %5309 = vst [vmem:[#allocation4_spill] sm:$0xff] %v4905_v47  ;;  %v4908_v58 = vadd.f32 %v1587_v44, %v1348_v31  ;;  %v1351_v21 = vadd.f32 %v3785_v3, %v4803_v23  ;;  %v1590_v17 = vpop.f32.mrf.mxu0 }
 0x165   : > { %v1284_v4 = vpop.f32.mrf.mxu1 }
 0x166   : > { %5310 = vst [vmem:[#allocation5_spill] sm:$0xff] %v4908_v58  ;;  %v4911_v24 = vadd.f32 %v3821_v32, %v1351_v21  ;;  %v1349_v41 = vadd.f32 %v1284_v4, %v4812_v50  ;;  %v3824_v43 = vpop.f32.mrf.mxu0 }
 0x167   : > { %v3788_v16 = vpop.f32.mrf.mxu1 }
 0x168   : > { %5311 = vst [vmem:[#allocation6_spill] sm:$0xff] %v4911_v24  ;;  %v4914_v6 = vadd.f32 %v1590_v17, %v1349_v41  ;;  %v1354_v55 = vadd.f32 %v3788_v16, %v4819_v18  ;;  %v1603_v37 = vpop.f32.mrf.mxu0 }
 0x169   : > { %v1297_v46 = vpop.f32.mrf.mxu1 }
 0x16a   : > { %5312 = vst [vmem:[#allocation7_spill] sm:$0xff] %v4914_v6  ;;  %v4917_v25 = vadd.f32 %v3824_v43, %v1354_v55  ;;  %v1352_v11 = vadd.f32 %v1297_v46, %v4822_v49  ;;  %v3825_v28 = vpop.f32.mrf.mxu0 }
 0x16b   : > { %v3789_v23 = vpop.f32.mrf.mxu1 }
 0x16c   : > { %5313 = vst [vmem:[#allocation8_spill] sm:$0xff] %v4917_v25  ;;  %v4920_v33 = vadd.f32 %v1603_v37, %v1352_v11  ;;  %v1355_v59 = vadd.f32 %v3789_v23, %v4825_v12  ;;  %v1606_v20 = vpop.f32.mrf.mxu0 }
 0x16d   : > { %v1300_v50 = vpop.f32.mrf.mxu1 }
 0x16e   : > { %5314 = vst [vmem:[#allocation9_spill] sm:$0xff] %v4920_v33  ;;  %v4923_v39 = vadd.f32 %v3825_v28, %v1355_v59  ;;  %v1353_v35 = vadd.f32 %v1300_v50, %v4830_v51  ;;  %v3828_v13 = vpop.f32.mrf.mxu0 }
 0x16f   : > { %v3792_v18 = vpop.f32.mrf.mxu1 }
 0x170   : > { %5315 = vst [vmem:[#allocation10_spill] sm:$0xff] %v4923_v39  ;;  %v4926_v54 = vadd.f32 %v1606_v20, %v1353_v35  ;;  %v1358_v45 = vadd.f32 %v3792_v18, %v4833_v36  ;;  %v1619_v22 = vpop.f32.mrf.mxu0 }
 0x171   : > { %v1313_v49 = vpop.f32.mrf.mxu1 }
 0x172   : > { %5316 = vst [vmem:[#allocation11_spill] sm:$0xff] %v4926_v54  ;;  %v4929_v5 = vadd.f32 %v3828_v13, %v1358_v45  ;;  %v1356_v52 = vadd.f32 %v1313_v49, %v4836_v26  ;;  %v3829_v38 = vpop.f32.mrf.mxu0 }
 0x173   : > { %v3793_v12 = vpop.f32.mrf.mxu1 }
 0x174   : > { %5317 = vst [vmem:[#allocation12_spill] sm:$0xff] %v4929_v5  ;;  %v4932_v14 = vadd.f32 %v1619_v22, %v1356_v52  ;;  %v1359_v44 = vadd.f32 %v3793_v12, %v4839_v60  ;;  %v1622_v15 = vpop.f32.mrf.mxu0 }
 0x175   : > { %v1316_v51 = vpop.f32.mrf.mxu1 }
 0x176   : > { %5318 = vst [vmem:[#allocation13_spill] sm:$0xff] %v4932_v14  ;;  %v4935_v31 = vadd.f32 %v3829_v38, %v1359_v44  ;;  %v1357_v32 = vadd.f32 %v1316_v51, %v4842_v42  ;;  %v4938_v3 = vpop.f32.mrf.mxu0 }
 0x177   : > { %v3836_v36 = vpop.f32.mrf.mxu1 }
 0x178   : > { %5319 = vst [vmem:[#allocation14_spill] sm:$0xff] %v4935_v31  ;;  %v4940_v21 = vadd.f32 %v1622_v15, %v1357_v32  ;;  %v4942_v17 = vpop.f32.mrf.mxu0 }
 0x179   : > { %v1813_v26 = vpop.f32.mrf.mxu1 }
 0x17a   : > { %5320 = vst [vmem:[#allocation15_spill] sm:$0xff] %v4940_v21  ;;  %v4944_v4 = vpop.f32.mrf.mxu0 }
 0x17b   : > { %v3837_v41 = vpop.f32.mrf.mxu1 }
 0x17c   : > { %v4946_v43 = vpop.f32.mrf.mxu0 }
 0x17d   : > { %v4948_v60 = vpop.f32.mrf.mxu1 }
 0x17e   : > { %v4950_v16 = vpop.f32.mrf.mxu0 }
 0x17f   : > { %v4952_v55 = vpop.f32.mrf.mxu1 }
 0x180   : > { %v4954_v42 = vpop.f32.mrf.mxu0 }
 0x181   : > { %v4956_v37 = vpop.f32.mrf.mxu1 }
 0x182   : > { %v4958_v46 = vpop.f32.mrf.mxu0 }
 0x183   : > { %v4960_v11 = vpop.f32.mrf.mxu1 }
 0x184   : > { %v4962_v28 = vpop.f32.mrf.mxu0 }
 0x185   : > { %v4964_v23 = vpop.f32.mrf.mxu1 }
 0x186   : > { %v4966_v59 = vpop.f32.mrf.mxu0 }
 0x187   : > { %v4968_v20 = vpop.f32.mrf.mxu1 }
 0x188   : > { %v4970_v50 = vpop.f32.mrf.mxu0 }
 0x189   : > { %v4972_v35 = vpop.f32.mrf.mxu1 }
 0x18a   : > { %v4974_v13 = vpop.f32.mrf.mxu0 }
 0x18b   : > { %v4976_v18 = vpop.f32.mrf.mxu1 }
 0x18c   : > { %v4978_v45 = vpop.f32.mrf.mxu0 }
 0x18d   : > { %v4980_v22 = vpop.f32.mrf.mxu1 }
 0x18e   : > { %v4982_v49 = vpop.f32.mrf.mxu0 }
 0x18f   : > { %v4984_v52 = vpop.f32.mrf.mxu1 }
 0x190   : > { %v4986_v38 = vpop.f32.mrf.mxu0 }
 0x191   : > { %v4988_v12 = vpop.f32.mrf.mxu1 }
 0x192   : > { %v4990_v44 = vpop.f32.mrf.mxu0 }
 0x193   : > { %v4992_v15 = vpop.f32.mrf.mxu1 }
 0x194   : > { %v4994_v51 = vpop.f32.mrf.mxu0 }
 0x195   : > { %v4996_v32 = vpop.f32.mrf.mxu1 }
 0x196   : > { %v4998_v21 = vpop.f32.mrf.mxu0 }
 0x197   : > { %v5000_v31 = vpop.f32.mrf.mxu1 }
 0x198   : > { %v5002_v14 = vpop.f32.mrf.mxu0 }
 0x199   : > { %5321 = vst [vmem:[#allocation16_spill] sm:$0xff] %v5002_v14  ;;  %v5004_v5 = vpop.f32.mrf.mxu1 }
 0x19a   : > { %v5006_v54 = vpop.f32.mrf.mxu0 }
 0x19b   : > { %5322 = vst [vmem:[#allocation17_spill] sm:$0xff] %v5006_v54  ;;  %v5008_v39 = vpop.f32.mrf.mxu1 }
 0x19c   : > { %5323 = vst [vmem:[#allocation18_spill] sm:$0xff] %v5008_v39  ;;  %v5010_v33 = vpop.f32.mrf.mxu0 }
 0x19d   : > { %5324 = vst [vmem:[#allocation19_spill] sm:$0xff] %v5010_v33  ;;  %v5012_v25 = vpop.f32.mrf.mxu1 }
 0x19e   : > { %5325 = vst [vmem:[#allocation20_spill] sm:$0xff] %v5012_v25  ;;  %v5014_v6 = vpop.f32.mrf.mxu0 }
 0x19f   : > { %5326 = vst [vmem:[#allocation21_spill] sm:$0xff] %v5014_v6  ;;  %v5016_v24 = vpop.f32.mrf.mxu1 }
 0x1a0   : > { %5327 = vst [vmem:[#allocation22_spill] sm:$0xff] %v5016_v24  ;;  %v5018_v58 = vpop.f32.mrf.mxu0 }
 0x1a1   : > { %5328 = vst [vmem:[#allocation23_spill] sm:$0xff] %v5018_v58  ;;  %v5020_v47 = vpop.f32.mrf.mxu1 }
 0x1a2   : > { %5329 = vst [vmem:[#allocation24_spill] sm:$0xff] %v5020_v47  ;;  %v5022_v29 = vpop.f32.mrf.mxu0 }
 0x1a3   : > { %5330 = vst [vmem:[#allocation25_spill] sm:$0xff] %v5022_v29  ;;  %v5024_v14 = vpop.f32.mrf.mxu1 }
 0x1a4   : > { %5331 = vst [vmem:[#allocation26_spill] sm:$0xff] %v5024_v14  ;;  %v5026_v30 = vpop.f32.mrf.mxu0 }
 0x1a5   : > { %5332 = vst [vmem:[#allocation27_spill] sm:$0xff] %v5026_v30  ;;  %v5028_v54 = vpop.f32.mrf.mxu1 }
 0x1a6   : > { %5333 = vst [vmem:[#allocation28_spill] sm:$0xff] %v5028_v54  ;;  %v5030_v39 = vpop.f32.mrf.mxu0 }
 0x1a7   : > { %5334 = vst [vmem:[#allocation29_spill] sm:$0xff] %v5030_v39  ;;  %v5032_v33 = vpop.f32.mrf.mxu1 }
 0x1a8   : > { %5335 = vst [vmem:[#allocation30_spill] sm:$0xff] %v5032_v33  ;;  %v5034_v25 = vpop.f32.mrf.mxu0 }
 0x1a9   : > { %5336 = vst [vmem:[#allocation31_spill] sm:$0xff] %v5034_v25  ;;  %v5036_v6 = vpop.f32.mrf.mxu1  ;;  %v1942_v25 = vadd.f32 %v3836_v36, %v4845_v48  ;;  %v1941_v48 = vadd.f32 %v4948_v60, %v4854_v61  ;;  %v5082_v61 = vld [vmem:[%s5305_s3] ss:$0 sm:$0xff] }
 0x1aa   : > { %5337 = vst [vmem:[#allocation32_spill] sm:$0xff] %v5036_v6  ;;  %v5038_v24 = vpop.f32.mrf.mxu0 }
 0x1ab   : > { %5338 = vst [vmem:[#allocation33_spill] sm:$0xff] %v5038_v24  ;;  %v5040_v58 = vpop.f32.mrf.mxu1  ;;  %v1940_v24 = vadd.f32 %v1813_v26, %v4848_v1  ;;  %v5072_v1 = vld [vmem:[%s5304_s2] ss:$0 sm:$0xff] }
 0x1ac   : > { %5339 = vst [vmem:[#allocation34_spill] sm:$0xff] %v5040_v58  ;;  %v5042_v47 = vpop.f32.mrf.mxu0 }
 0x1ad   : > { %5340 = vst [vmem:[#allocation35_spill] sm:$0xff] %v5042_v47  ;;  %v5044_v29 = vpop.f32.mrf.mxu1 }
 0x1ae   : > { %5341 = vst [vmem:[#allocation36_spill] sm:$0xff] %v5044_v29  ;;  %v5046_v14 = vpop.f32.mrf.mxu0 }
 0x1af   : > { %5342 = vst [vmem:[#allocation37_spill] sm:$0xff] %v5046_v14  ;;  %v5048_v30 = vpop.f32.mrf.mxu1  ;;  %v2249_v14 = vadd.f32 %v4938_v3, %v1942_v25 }
 0x1b0   : > { %5343 = vst [vmem:[#allocation38_spill] sm:$0xff] %v5048_v30  ;;  %v5050_v54 = vpop.f32.mrf.mxu0  ;;  %v1943_v30 = vadd.f32 %v3837_v41, %v4851_v62  ;;  %v1946_v41 = vadd.f32 %v4952_v55, %v4857_v34 }
 0x1b1   : > { %5344 = vst [vmem:[#allocation39_spill] sm:$0xff] %v5050_v54  ;;  %v5052_v39 = vpop.f32.mrf.mxu1 }
 0x1b2   : > { %5345 = vst [vmem:[#allocation40_spill] sm:$0xff] %v5052_v39  ;;  %v5055_v33 = vpop.f32.mrf.mxu0  ;;  %v2247_v39 = vadd.f32 %v4942_v17, %v1940_v24  ;;  %v1944_v24 = vadd.f32 %v4956_v37, %v4860_v8 }
 0x1b3   : > { %5346 = vst [vmem:[#allocation41_spill] sm:$0xff] %v5055_v33  ;;  %v5057_v6 = vpop.f32.mrf.mxu1 }
 0x1b4   : > { %v5060_v58 = vpop.f32.mrf.mxu0 }
 0x1b5   : > { %5347 = vst [vmem:[#allocation42_spill] sm:$0xff] %v5060_v58  ;;  %v5062_v47 = vpop.f32.mrf.mxu1  ;;  %v2250_v58 = vadd.f32 %v4944_v4, %v1943_v30  ;;  %v1947_v4 = vadd.f32 %v4960_v11, %v4863_v56 }
 0x1b6   : > { %v3944_v29 = vpop.f32.mrf.mxu0 }
 0x1b7   : > { %v3908_v54 = vpop.f32.mrf.mxu1 }
 0x1b8   : > { %v2555_v36 = vadd.f32 %v3908_v54, %v2249_v14  ;;  %v2732_v33 = vpop.f32.mrf.mxu0  ;;  %v2248_v14 = vadd.f32 %v4946_v43, %v1941_v48  ;;  %v2251_v43 = vadd.f32 %v4954_v42, %v1944_v24 }
 0x1b9   : > { %v2426_v26 = vpop.f32.mrf.mxu1 }
 0x1ba   : > { %v2861_v25 = vadd.f32 %v3944_v29, %v2555_v36  ;;  %v2553_v3 = vadd.f32 %v2426_v26, %v2247_v39  ;;  %v3945_v62 = vpop.f32.mrf.mxu0  ;;  %v2253_v26 = vadd.f32 %v4950_v16, %v1946_v41 }
 0x1bb   : > { %v3909_v54 = vpop.f32.mrf.mxu1 }
 0x1bc   : > { %v2900_v17 = vmul.f32 %v5072_v1, %v2861_v25  ;;  %v2859_v30 = vadd.f32 %v2732_v33, %v2553_v3  ;;  %v2556_v29 = vadd.f32 %v3909_v54, %v2250_v58  ;;  %v2735_v39 = vpop.f32.mrf.mxu0  ;;  %v1945_v33 = vadd.f32 %v4964_v23, %v4866_v2 }
 0x1bd   : > { %v2429_v34 = vpop.f32.mrf.mxu1  ;;  %v2254_v3 = vadd.f32 %v4958_v46, %v1947_v4  ;;  %v1951_v4 = vadd.f32 %v4976_v18, %v4875_v0 }
 0x1be   : > { %v2939_v60 = vadd.f32 %v5082_v61, %v2900_v17  ;;  %v2898_v8 = vmul.f32 %v5072_v1, %v2859_v30  ;;  %v2862_v55 = vadd.f32 %v3945_v62, %v2556_v29  ;;  %v2554_v37 = vadd.f32 %v2429_v34, %v2248_v14  ;;  %v3948_v36 = vpop.f32.mrf.mxu0 }
 0x1bf   : > { %v3912_v58 = vpop.f32.mrf.mxu1  ;;  %v1950_v62 = vadd.f32 %v4968_v20, %v4869_v27  ;;  %v2252_v24 = vadd.f32 %v4962_v28, %v1945_v33 }
 0x1c0   : > { %4005 = vtanh.f32 %v2939_v60  ;;  %v2937_v48 = vadd.f32 %v5082_v61, %v2898_v8  ;;  %v2901_v56 = vmul.f32 %v5072_v1, %v2862_v55  ;;  %v2860_v11 = vadd.f32 %v2735_v39, %v2554_v37  ;;  %v2748_v25 = vpop.f32.mrf.mxu0 }
 0x1c1   : > { %v2559_v54 = vadd.f32 %v3912_v58, %v2253_v26  ;;  %v2442_v16 = vpop.f32.mrf.mxu1  ;;  %v2257_v20 = vadd.f32 %v4966_v59, %v1950_v62  ;;  %v1948_v39 = vadd.f32 %v4972_v35, %v4872_v53  ;;  %v2258_v58 = vadd.f32 %v4974_v13, %v1951_v4 }
 0x1c2   : > { %4007 = vtanh.f32 %v2937_v48  ;;  %v2940_v42 = vadd.f32 %v5082_v61, %v2901_v56  ;;  %v2899_v2 = vmul.f32 %v5072_v1, %v2860_v11  ;;  %v2557_v23 = vadd.f32 %v2442_v16, %v2251_v43  ;;  %v3949_v41 = vpop.f32.mrf.mxu0 }
 0x1c3   : > { %v2865_v14 = vadd.f32 %v3948_v36, %v2559_v54  ;;  %v3913_v17 = vpop.f32.mrf.mxu1  ;;  %v1949_v36 = vadd.f32 %v4980_v22, %v4878_v10  ;;  %v2255_v33 = vadd.f32 %v4970_v50, %v1948_v39  ;;  %v1954_v48 = vadd.f32 %v4984_v52, %v4881_v57 }
 0x1c4   : > { %4009 = vtanh.f32 %v2940_v42  ;;  %v2938_v30 = vadd.f32 %v5082_v61, %v2899_v2  ;;  %v2863_v46 = vadd.f32 %v2748_v25, %v2557_v23  ;;  %v2560_v29 = vadd.f32 %v3913_v17, %v2254_v3  ;;  %v2751_v27 = vpop.f32.mrf.mxu0 }
 0x1c5   : > { %v2904_v34 = vmul.f32 %v5072_v1, %v2865_v14  ;;  %v2445_v28 = vpop.f32.mrf.mxu1  ;;  %v2256_v3 = vadd.f32 %v4978_v45, %v1949_v36  ;;  %v1952_v62 = vadd.f32 %v4988_v12, %v4884_v19  ;;  %v2261_v19 = vadd.f32 %v4982_v49, %v1954_v48 }
 0x1c6   : > { %4011 = vtanh.f32 %v2938_v30  ;;  %v2902_v60 = vmul.f32 %v5072_v1, %v2863_v46  ;;  %v2866_v8 = vadd.f32 %v3949_v41, %v2560_v29  ;;  %v2558_v55 = vadd.f32 %v2445_v28, %v2252_v24  ;;  %v3952_v37 = vpop.f32.mrf.mxu0 }
 0x1c7   : > { %v2943_v59 = vadd.f32 %v5082_v61, %v2904_v34  ;;  %v3916_v26 = vpop.f32.mrf.mxu1  ;;  %v2259_v17 = vadd.f32 %v4986_v38, %v1952_v62  ;;  %v1955_v30 = vadd.f32 %v4992_v15, %v4887_v63  ;;  %v1953_v49 = vadd.f32 %v4996_v32, %v4890_v7 }
 0x1c8   : > { %v2941_v53 = vadd.f32 %v5082_v61, %v2902_v60  ;;  %v2905_v0 = vmul.f32 %v5072_v1, %v2866_v8  ;;  %v2864_v35 = vadd.f32 %v2751_v27, %v2558_v55  ;;  %v2563_v18 = vadd.f32 %v3916_v26, %v2257_v20  ;;  %v2764_v43 = vpop.f32.mrf.mxu0 }
 0x1c9   : > { %4013 = vtanh.f32 %v2943_v59  ;;  %v2458_v10 = vpop.f32.mrf.mxu1  ;;  %v1958_v38 = vadd.f32 %v5000_v31, %v4893_v9  ;;  %v2260_v36 = vadd.f32 %v4994_v51, %v1953_v49  ;;  %v1956_v9 = vadd.f32 %v5004_v5, %v4896_v40  ;;  %v5349_v51 = vld [vmem:[#allocation18_spill] sm:$0xff] }
 0x1ca   : > { %4015 = vtanh.f32 %v2941_v53  ;;  %v2944_v22 = vadd.f32 %v5082_v61, %v2905_v0  ;;  %v2903_v56 = vmul.f32 %v5072_v1, %v2864_v35  ;;  %v2869_v11 = vadd.f32 %v3952_v37, %v2563_v18  ;;  %v3953_v25 = vpop.f32.mrf.mxu0  ;;  %v5348_v35 = vld [vmem:[#allocation2_spill] sm:$0xff] }
 0x1cb   : > { %v2561_v57 = vadd.f32 %v2458_v10, %v2255_v33  ;;  %v3917_v50 = vpop.f32.mrf.mxu1  ;;  %v2262_v37 = vadd.f32 %v4990_v44, %v1955_v30  ;;  %v2265_v44 = vadd.f32 %v4998_v21, %v1958_v38  ;;  %v1959_v18 = vadd.f32 %v5349_v51, %v5348_v35  ;;  %v5363_v35 = vld [vmem:[#allocation7_spill] sm:$0xff]  ;;  %v5364_v51 = vld [vmem:[#allocation28_spill] sm:$0xff] }
 0x1cc   : > { %4017 = vtanh.f32 %v2944_v22  ;;  %v2942_v13 = vadd.f32 %v5082_v61, %v2903_v56  ;;  %v2908_v52 = vmul.f32 %v5072_v1, %v2869_v11  ;;  %v2564_v54 = vadd.f32 %v3917_v50, %v2258_v58  ;;  %v2767_v16 = vpop.f32.mrf.mxu0  ;;  %v5350_v56 = vld [vmem:[#allocation16_spill] sm:$0xff] }
 0x1cd   : > { %v4006_v45 = vpop.eup %4005  ;;  %v2867_v12 = vadd.f32 %v2764_v43, %v2561_v57  ;;  %v2461_v42 = vpop.f32.mrf.mxu1  ;;  %v2263_v11 = vadd.f32 %v5350_v56, %v1956_v9  ;;  %v5365_v56 = vld [vmem:[#allocation25_spill] sm:$0xff] }
 0x1ce   : > { %3004 = vst.msk [vmem:[%s5128_s13 + $0x10] sm:$0xff] %vm3001_vm1, %v4006_v45  ;;  %4019 = vtanh.f32 %v2942_v13  ;;  %v2947_v2 = vadd.f32 %v5082_v61, %v2908_v52  ;;  %v2870_v23 = vadd.f32 %v3953_v25, %v2564_v54  ;;  %v2562_v41 = vadd.f32 %v2461_v42, %v2256_v3  ;;  %v3956_v24 = vpop.f32.mrf.mxu0  ;;  %v5351_v52 = vld [vmem:[#allocation17_spill] sm:$0xff]  ;;  %v5353_v45 = vld [vmem:[#allocation20_spill] sm:$0xff]  ;;  %v5355_v42 = vld [vmem:[#allocation22_spill] sm:$0xff] }
 0x1cf   : > { %v4008_v14 = vpop.eup %4007  ;;  %v2906_v46 = vmul.f32 %v5072_v1, %v2867_v12  ;;  %v3920_v29 = vpop.f32.mrf.mxu1  ;;  %v2266_v54 = vadd.f32 %v5351_v52, %v1959_v18  ;;  %v5354_v12 = vld [vmem:[#allocation4_spill] sm:$0xff]  ;;  %v1961_v18 = vadd.f32 %v5364_v51, %v5363_v35  ;;  %v5366_v52 = vld [vmem:[#allocation27_spill] sm:$0xff]  ;;  %v5379_v51 = vld [vmem:[#allocation38_spill] sm:$0xff] }
 0x1d0   : > { %3002 = vst.msk [vmem:[%s5128_s13] sm:$0xff] %vm3001_vm1, %v4008_v14  ;;  %4021 = vtanh.f32 %v2947_v2  ;;  %v2909_v27 = vmul.f32 %v5072_v1, %v2870_v23  ;;  %v2868_v20 = vadd.f32 %v2767_v16, %v2562_v41  ;;  %v2567_v39 = vadd.f32 %v3920_v29, %v2261_v19  ;;  %v2780_v4 = vpop.f32.mrf.mxu0  ;;  %v5352_v16 = vld [vmem:[#allocation3_spill] sm:$0xff]  ;;  %v5357_v29 = vld [vmem:[#allocation24_spill] sm:$0xff] }
 0x1d1   : > { %v4010_v34 = vpop.eup %4009  ;;  %v2945_v63 = vadd.f32 %v5082_v61, %v2906_v46  ;;  %v2474_v15 = vpop.f32.mrf.mxu1  ;;  %v1957_v19 = vadd.f32 %v5353_v45, %v5352_v16  ;;  %v1962_v2 = vadd.f32 %v5355_v42, %v5354_v12  ;;  %v5356_v46 = vld [vmem:[#allocation5_spill] sm:$0xff]  ;;  %v5367_v16 = vld [vmem:[#allocation8_spill] sm:$0xff]  ;;  %v5368_v45 = vld [vmem:[#allocation30_spill] sm:$0xff] }
 0x1d2   : > { %3005 = vst.msk [vmem:[%s5128_s13 + $0x18] sm:$0xff] %vm3001_vm1, %v4010_v34  ;;  %v2948_v7 = vadd.f32 %v5082_v61, %v2909_v27  ;;  %v2907_v32 = vmul.f32 %v5072_v1, %v2868_v20  ;;  %v2873_v28 = vadd.f32 %v3956_v24, %v2567_v39  ;;  %v2565_v60 = vadd.f32 %v2474_v15, %v2259_v17  ;;  %v3957_v8 = vpop.f32.mrf.mxu0  ;;  %v5369_v12 = vld [vmem:[#allocation9_spill] sm:$0xff]  ;;  %v5370_v42 = vld [vmem:[#allocation32_spill] sm:$0xff] }
 0x1d3   : > { %v4012_v55 = vpop.eup %4011  ;;  %4023 = vtanh.f32 %v2945_v63  ;;  %v3921_v31 = vpop.f32.mrf.mxu1  ;;  %v1960_v27 = vadd.f32 %v5357_v29, %v5356_v46  ;;  %v5371_v46 = vld [vmem:[#allocation10_spill] sm:$0xff]  ;;  %v5378_v35 = vld [vmem:[#allocation12_spill] sm:$0xff] }
 0x1d4   : > { %3003 = vst.msk [vmem:[%s5128_s13 + $0x8] sm:$0xff] %vm3001_vm1, %v4012_v55  ;;  %4025 = vtanh.f32 %v2948_v7  ;;  %v2946_v59 = vadd.f32 %v5082_v61, %v2907_v32  ;;  %v2912_v26 = vmul.f32 %v5072_v1, %v2873_v28  ;;  %v2871_v53 = vadd.f32 %v2780_v4, %v2565_v60  ;;  %v2783_v0 = vpop.f32.mrf.mxu0  ;;  %v5358_v32 = vld [vmem:[#allocation19_spill] sm:$0xff]  ;;  %v5359_v60 = vld [vmem:[#allocation21_spill] sm:$0xff]  ;;  %v5360_v55 = vld [vmem:[#allocation6_spill] sm:$0xff] }
 0x1d5   : > { %v2568_v43 = vadd.f32 %v3921_v31, %v2262_v37  ;;  %v2477_v40 = vpop.f32.mrf.mxu1  ;;  %v2264_v28 = vadd.f32 %v5358_v32, %v1957_v19  ;;  %v5361_v37 = vld [vmem:[#allocation26_spill] sm:$0xff]  ;;  %v1966_v19 = vadd.f32 %v5368_v45, %v5367_v16  ;;  %v5373_v32 = vld [vmem:[#allocation29_spill] sm:$0xff]  ;;  %v5383_v45 = vld [vmem:[#allocation40_spill] sm:$0xff] }
 0x1d6   : > { %v4014_v5 = vpop.eup %4013  ;;  %4027 = vtanh.f32 %v2946_v59  ;;  %v2951_v33 = vadd.f32 %v5082_v61, %v2912_v26  ;;  %v2910_v58 = vmul.f32 %v5072_v1, %v2871_v53  ;;  %v2566_v48 = vadd.f32 %v2477_v40, %v2260_v36  ;;  %v3960_v10 = vpop.f32.mrf.mxu0  ;;  %v5372_v29 = vld [vmem:[#allocation34_spill] sm:$0xff]  ;;  %v5382_v16 = vld [vmem:[#allocation13_spill] sm:$0xff] }
 0x1d7   : > { %v4016_v22 = vpop.eup %4015  ;;  %3008 = vst.msk [vmem:[%s5128_s13 + $0x30] sm:$0xff] %vm3001_vm1, %v4014_v5  ;;  %v2874_v21 = vadd.f32 %v3957_v8, %v2568_v43  ;;  %v3924_v25 = vpop.f32.mrf.mxu1  ;;  %v2269_v8 = vadd.f32 %v5359_v60, %v1962_v2  ;;  %v1963_v36 = vadd.f32 %v5361_v37, %v5360_v55  ;;  %v1964_v2 = vadd.f32 %v5370_v42, %v5369_v12  ;;  %v5374_v60 = vld [vmem:[#allocation31_spill] sm:$0xff]  ;;  %v5376_v37 = vld [vmem:[#allocation36_spill] sm:$0xff]  ;;  %v5384_v12 = vld [vmem:[#allocation14_spill] sm:$0xff] }
 0x1d8   : > { %3006 = vst.msk [vmem:[%s5128_s13 + $0x20] sm:$0xff] %vm3001_vm1, %v4016_v22  ;;  %4029 = vtanh.f32 %v2951_v33  ;;  %v2949_v3 = vadd.f32 %v5082_v61, %v2910_v58  ;;  %v2872_v62 = vadd.f32 %v2783_v0, %v2566_v48  ;;  %v2571_v57 = vadd.f32 %v3924_v25, %v2265_v44  ;;  %v2796_v50 = vpop.f32.mrf.mxu0  ;;  %v5362_v0 = vld [vmem:[#allocation23_spill] sm:$0xff] }
 0x1d9   : > { %v4018_v13 = vpop.eup %4017  ;;  %v2913_v23 = vmul.f32 %v5072_v1, %v2874_v21  ;;  %v2490_v41 = vpop.f32.mrf.mxu1  ;;  %v2267_v44 = vadd.f32 %v5362_v0, %v1960_v27  ;;  %v1967_v27 = vadd.f32 %v5372_v29, %v5371_v46  ;;  %v5375_v55 = vld [vmem:[#allocation11_spill] sm:$0xff]  ;;  %v5377_v0 = vld [vmem:[#allocation33_spill] sm:$0xff]  ;;  %v1971_v42 = vadd.f32 %v5057_v6, %v5384_v12 }
 0x1da   : > { %3009 = vst.msk [vmem:[%s5128_s13 + $0x38] sm:$0xff] %vm3001_vm1, %v4018_v13  ;;  %4031 = vtanh.f32 %v2949_v3  ;;  %v2911_v24 = vmul.f32 %v5072_v1, %v2872_v62  ;;  %v2877_v14 = vadd.f32 %v3960_v10, %v2571_v57  ;;  %v2569_v17 = vadd.f32 %v2490_v41, %v2263_v11  ;;  %v3961_v30 = vpop.f32.mrf.mxu0 }
 0x1db   : > { %v4020_v49 = vpop.eup %4019  ;;  %v2952_v20 = vadd.f32 %v5082_v61, %v2913_v23  ;;  %v3925_v39 = vpop.f32.mrf.mxu1  ;;  %v2270_v11 = vadd.f32 %v5365_v56, %v1963_v36  ;;  %v1965_v36 = vadd.f32 %v5376_v37, %v5375_v55  ;;  %v5380_v56 = vld [vmem:[#allocation35_spill] sm:$0xff]  ;;  %v5388_v55 = vld [vmem:[#allocation42_spill] sm:$0xff] }
 0x1dc   : > { %3007 = vst.msk [vmem:[%s5128_s13 + $0x28] sm:$0xff] %vm3001_vm1, %v4020_v49  ;;  %v2950_v4 = vadd.f32 %v5082_v61, %v2911_v24  ;;  %v2916_v34 = vmul.f32 %v5072_v1, %v2877_v14  ;;  %v2875_v38 = vadd.f32 %v2796_v50, %v2569_v17  ;;  %v2572_v63 = vadd.f32 %v3925_v39, %v2266_v54  ;;  %v2799_v15 = vpop.f32.mrf.mxu0 }
 0x1dd   : > { %v4022_v7 = vpop.eup %4021  ;;  %4033 = vtanh.f32 %v2952_v20  ;;  %v2493_v9 = vpop.f32.mrf.mxu1  ;;  %v2268_v54 = vadd.f32 %v5366_v52, %v1961_v18  ;;  %v1970_v18 = vadd.f32 %v5379_v51, %v5378_v35  ;;  %v5381_v52 = vld [vmem:[#allocation37_spill] sm:$0xff] }
 0x1de   : > { %3012 = vst.msk [vmem:[%s5128_s13 + $0x50] sm:$0xff] %vm3001_vm1, %v4022_v7  ;;  %4035 = vtanh.f32 %v2950_v4  ;;  %v2955_v31 = vadd.f32 %v5082_v61, %v2916_v34  ;;  %v2914_v59 = vmul.f32 %v5072_v1, %v2875_v38  ;;  %v2878_v26 = vadd.f32 %v3961_v30, %v2572_v63  ;;  %v3964_v53 = vpop.f32.mrf.mxu0 }
 0x1df   : > { %v2570_v43 = vadd.f32 %v2493_v9, %v2264_v28  ;;  %v3928_v40 = vpop.f32.mrf.mxu1  ;;  %v2273_v28 = vadd.f32 %v5373_v32, %v1966_v19  ;;  %v1968_v19 = vadd.f32 %v5383_v45, %v5382_v16 }
 0x1e0   : > { %v4024_v5 = vpop.eup %4023  ;;  %4037 = vtanh.f32 %v2955_v31  ;;  %v2953_v33 = vadd.f32 %v5082_v61, %v2914_v59  ;;  %v2917_v58 = vmul.f32 %v5072_v1, %v2878_v26  ;;  %v2575_v48 = vadd.f32 %v3928_v40, %v2269_v8  ;;  %v2812_v10 = vpop.f32.mrf.mxu0 }
 0x1e1   : > { %v4026_v22 = vpop.eup %4025  ;;  %3010 = vst.msk [vmem:[%s5128_s13 + $0x40] sm:$0xff] %vm3001_vm1, %v4024_v5  ;;  %v2876_v21 = vadd.f32 %v2799_v15, %v2570_v43  ;;  %v2506_v25 = vpop.f32.mrf.mxu1  ;;  %v2271_v8 = vadd.f32 %v5374_v60, %v1964_v2 }
 0x1e2   : > { %3013 = vst.msk [vmem:[%s5128_s13 + $0x58] sm:$0xff] %vm3001_vm1, %v4026_v22  ;;  %4039 = vtanh.f32 %v2953_v33  ;;  %v2956_v3 = vadd.f32 %v5082_v61, %v2917_v58  ;;  %v2881_v62 = vadd.f32 %v3964_v53, %v2575_v48  ;;  %v2573_v57 = vadd.f32 %v2506_v25, %v2267_v44  ;;  %v3965_v50 = vpop.f32.mrf.mxu0 }
 0x1e3   : > { %v4028_v13 = vpop.eup %4027  ;;  %v2915_v23 = vmul.f32 %v5072_v1, %v2876_v21  ;;  %v3929_v41 = vpop.f32.mrf.mxu1  ;;  %v2274_v44 = vadd.f32 %v5377_v0, %v1967_v27 }
 0x1e4   : > { %3011 = vst.msk [vmem:[%s5128_s13 + $0x48] sm:$0xff] %vm3001_vm1, %v4028_v13  ;;  %4041 = vtanh.f32 %v2956_v3  ;;  %v2920_v24 = vmul.f32 %v5072_v1, %v2881_v62  ;;  %v2879_v14 = vadd.f32 %v2812_v10, %v2573_v57  ;;  %v2576_v17 = vadd.f32 %v3929_v41, %v2270_v11  ;;  %v2815_v30 = vpop.f32.mrf.mxu0 }
 0x1e5   : > { %v4030_v49 = vpop.eup %4029  ;;  %v2954_v20 = vadd.f32 %v5082_v61, %v2915_v23  ;;  %v2509_v39 = vpop.f32.mrf.mxu1  ;;  %v2272_v11 = vadd.f32 %v5380_v56, %v1965_v36 }
 0x1e6   : > { %3016 = vst.msk [vmem:[%s5128_s13 + $0x70] sm:$0xff] %vm3001_vm1, %v4030_v49  ;;  %v2959_v4 = vadd.f32 %v5082_v61, %v2920_v24  ;;  %v2918_v34 = vmul.f32 %v5072_v1, %v2879_v14  ;;  %v2882_v38 = vadd.f32 %v3965_v50, %v2576_v17  ;;  %v2574_v63 = vadd.f32 %v2509_v39, %v2268_v54  ;;  %v3968_v15 = vpop.f32.mrf.mxu0  ;;  %v5385_v49 = vld [vmem:[#allocation15_spill] sm:$0xff] }
 0x1e7   : > { %v4032_v7 = vpop.eup %4031  ;;  %4043 = vtanh.f32 %v2954_v20  ;;  %v3932_v9 = vpop.f32.mrf.mxu1  ;;  %v2277_v54 = vadd.f32 %v5381_v52, %v1970_v18  ;;  %v1969_v46 = vadd.f32 %v5062_v47, %v5385_v49 }
 0x1e8   : > { %3014 = vst.msk [vmem:[%s5128_s13 + $0x60] sm:$0xff] %vm3001_vm1, %v4032_v7  ;;  %4045 = vtanh.f32 %v2959_v4  ;;  %v2957_v31 = vadd.f32 %v5082_v61, %v2918_v34  ;;  %v2921_v59 = vmul.f32 %v5072_v1, %v2882_v38  ;;  %v2880_v26 = vadd.f32 %v2815_v30, %v2574_v63  ;;  %v2828_v53 = vpop.f32.mrf.mxu0  ;;  %v5386_v63 = vld [vmem:[#allocation39_spill] sm:$0xff]  ;;  %v5387_v7 = vld [vmem:[#allocation41_spill] sm:$0xff] }
 0x1e9   : > { %v2579_v43 = vadd.f32 %v3932_v9, %v2273_v28  ;;  %v2522_v40 = vpop.f32.mrf.mxu1  ;;  %v2278_v32 = vadd.f32 %v5387_v7, %v1971_v42  ;;  %v2276_v37 = vadd.f32 %v5388_v55, %v1969_v46 }
 0x1ea   : > { %v4034_v5 = vpop.eup %4033  ;;  %4047 = vtanh.f32 %v2957_v31  ;;  %v2960_v33 = vadd.f32 %v5082_v61, %v2921_v59  ;;  %v2919_v58 = vmul.f32 %v5072_v1, %v2880_v26  ;;  %v2577_v48 = vadd.f32 %v2522_v40, %v2271_v8  ;;  %v3969_v10 = vpop.f32.mrf.mxu0 }
 0x1eb   : > { %v4036_v22 = vpop.eup %4035  ;;  %3017 = vst.msk [vmem:[%s5128_s13 + $0x78] sm:$0xff] %vm3001_vm1, %v4034_v5  ;;  %v2885_v21 = vadd.f32 %v3968_v15, %v2579_v43  ;;  %v3933_v25 = vpop.f32.mrf.mxu1  ;;  %v2275_v15 = vadd.f32 %v5386_v63, %v1968_v19 }
 0x1ec   : > { %3015 = vst.msk [vmem:[%s5128_s13 + $0x68] sm:$0xff] %vm3001_vm1, %v4036_v22  ;;  %4049 = vtanh.f32 %v2960_v33  ;;  %v2958_v3 = vadd.f32 %v5082_v61, %v2919_v58  ;;  %v2883_v62 = vadd.f32 %v2828_v53, %v2577_v48  ;;  %v2580_v57 = vadd.f32 %v3933_v25, %v2274_v44  ;;  %v2831_v50 = vpop.f32.mrf.mxu0 }
 0x1ed   : > { %v4038_v13 = vpop.eup %4037  ;;  %v2924_v2 = vmul.f32 %v5072_v1, %v2885_v21  ;;  %v2525_v23 = vpop.f32.mrf.mxu1 }
 0x1ee   : > { %3020 = vst.msk [vmem:[%s5128_s13 + $0x90] sm:$0xff] %vm3001_vm1, %v4038_v13  ;;  %4051 = vtanh.f32 %v2958_v3  ;;  %v2922_v41 = vmul.f32 %v5072_v1, %v2883_v62  ;;  %v2886_v24 = vadd.f32 %v3969_v10, %v2580_v57  ;;  %v2578_v14 = vadd.f32 %v2525_v23, %v2272_v11  ;;  %v3972_v17 = vpop.f32.mrf.mxu0 }
 0x1ef   : > { %v4040_v30 = vpop.eup %4039  ;;  %v2963_v29 = vadd.f32 %v5082_v61, %v2924_v2  ;;  %v3936_v27 = vpop.f32.mrf.mxu1 }
 0x1f0   : > { %3018 = vst.msk [vmem:[%s5128_s13 + $0x80] sm:$0xff] %vm3001_vm1, %v4040_v30  ;;  %v2961_v6 = vadd.f32 %v5082_v61, %v2922_v41  ;;  %v2925_v20 = vmul.f32 %v5072_v1, %v2886_v24  ;;  %v2884_v39 = vadd.f32 %v2831_v50, %v2578_v14  ;;  %v2583_v4 = vadd.f32 %v3936_v27, %v2277_v54  ;;  %v2844_v34 = vpop.f32.mrf.mxu0 }
 0x1f1   : > { %v4042_v38 = vpop.eup %4041  ;;  %4053 = vtanh.f32 %v2963_v29  ;;  %v2538_v28 = vpop.f32.mrf.mxu1 }
 0x1f2   : > { %3021 = vst.msk [vmem:[%s5128_s13 + $0x98] sm:$0xff] %vm3001_vm1, %v4042_v38  ;;  %4055 = vtanh.f32 %v2961_v6  ;;  %v2964_v47 = vadd.f32 %v5082_v61, %v2925_v20  ;;  %v2923_v60 = vmul.f32 %v5072_v1, %v2884_v39  ;;  %v2889_v8 = vadd.f32 %v3972_v17, %v2583_v4  ;;  %v3973_v31 = vpop.f32.mrf.mxu0 }
 0x1f3   : > { %v2581_v36 = vadd.f32 %v2538_v28, %v2275_v15  ;;  %v3937_v9 = vpop.f32.mrf.mxu1 }
 0x1f4   : > { %v4044_v59 = vpop.eup %4043  ;;  %4057 = vtanh.f32 %v2964_v47  ;;  %v2962_v26 = vadd.f32 %v5082_v61, %v2923_v60  ;;  %v2928_v53 = vmul.f32 %v5072_v1, %v2889_v8  ;;  %v2584_v0 = vadd.f32 %v3937_v9, %v2278_v32  ;;  %v2847_v58 = vpop.f32.mrf.mxu0 }
 0x1f5   : > { %v4046_v44 = vpop.eup %4045  ;;  %3019 = vst.msk [vmem:[%s5128_s13 + $0x88] sm:$0xff] %vm3001_vm1, %v4044_v59  ;;  %v2887_v35 = vadd.f32 %v2844_v34, %v2581_v36  ;;  %v2541_v51 = vpop.f32.mrf.mxu1 }
 0x1f6   : > { %3024 = vst.msk [vmem:[%s5128_s13 + $0xb0] sm:$0xff] %vm3001_vm1, %v4046_v44  ;;  %4059 = vtanh.f32 %v2962_v26  ;;  %v2967_v18 = vadd.f32 %v5082_v61, %v2928_v53  ;;  %v2890_v43 = vadd.f32 %v3973_v31, %v2584_v0  ;;  %v2582_v40 = vadd.f32 %v2541_v51, %v2276_v37 }
 0x1f7   : > { %v4048_v5 = vpop.eup %4047  ;;  %v2926_v33 = vmul.f32 %v5072_v1, %v2887_v35 }
 0x1f8   : > { %3022 = vst.msk [vmem:[%s5128_s13 + $0xa0] sm:$0xff] %vm3001_vm1, %v4048_v5  ;;  %4061 = vtanh.f32 %v2967_v18  ;;  %v2929_v48 = vmul.f32 %v5072_v1, %v2890_v43  ;;  %v2888_v10 = vadd.f32 %v2847_v58, %v2582_v40 }
 0x1f9   : > { %v4050_v22 = vpop.eup %4049  ;;  %v2965_v56 = vadd.f32 %v5082_v61, %v2926_v33 }
 0x1fa   : > { %3025 = vst.msk [vmem:[%s5128_s13 + $0xb8] sm:$0xff] %vm3001_vm1, %v4050_v22  ;;  %v2968_v11 = vadd.f32 %v5082_v61, %v2929_v48  ;;  %v2927_v21 = vmul.f32 %v5072_v1, %v2888_v10 }
 0x1fb   : > { %v4052_v25 = vpop.eup %4051  ;;  %4063 = vtanh.f32 %v2965_v56 }
 0x1fc   : > { %3023 = vst.msk [vmem:[%s5128_s13 + $0xa8] sm:$0xff] %vm3001_vm1, %v4052_v25  ;;  %4065 = vtanh.f32 %v2968_v11  ;;  %v2966_v3 = vadd.f32 %v5082_v61, %v2927_v21 }
 0x1fe   : > { %v4054_v62 = vpop.eup %4053  ;;  %4067 = vtanh.f32 %v2966_v3 }
 0x1ff   : > { %v4056_v57 = vpop.eup %4055  ;;  %3028 = vst.msk [vmem:[%s5128_s13 + $0xd0] sm:$0xff] %vm3001_vm1, %v4054_v62 }
 0x200   : > { %3026 = vst.msk [vmem:[%s5128_s13 + $0xc0] sm:$0xff] %vm3001_vm1, %v4056_v57 }
 0x201   : > { %v4058_v50 = vpop.eup %4057 }
 0x202   : > { %3029 = vst.msk [vmem:[%s5128_s13 + $0xd8] sm:$0xff] %vm3001_vm1, %v4058_v50 }
 0x203   : > { %v4060_v1 = vpop.eup %4059 }
 0x204   : > { %3027 = vst.msk [vmem:[%s5128_s13 + $0xc8] sm:$0xff] %vm3001_vm1, %v4060_v1 }
 0x205   : > { %v4062_v13 = vpop.eup %4061 }
 0x206   : > { %3032 = vst.msk [vmem:[%s5128_s13 + $0xf0] sm:$0xff] %vm3001_vm1, %v4062_v13 }
 0x208   : > { %v4064_v52 = vpop.eup %4063 }
 0x209   : > { %v4066_v54 = vpop.eup %4065  ;;  %3030 = vst.msk [vmem:[%s5128_s13 + $0xe0] sm:$0xff] %vm3001_vm1, %v4064_v52 }
 0x20a   : > { %3033 = vst.msk [vmem:[%s5128_s13 + $0xf8] sm:$0xff] %vm3001_vm1, %v4066_v54 }
 0x20b   : > { %v4068_v61 = vpop.eup %4067 }
 0x20c   : > { %3031 = vst.msk [vmem:[%s5128_s13 + $0xe8] sm:$0xff] %vm3001_vm1, %v4068_v61 }
 0x20d PF: > { %s14_s15 = sadd.s32 1, %s4075_s15  }
 0x20e   : > { %p11_p4 = scmp.ge.s32.totalorder %s14_s15, 4  }
 0x210   :  { %13 = sbr.rel (!%p11_p4) target bundleno = 1 (0x1), region = 76 }

// kernel: decoder_forward.8
= control target key start
LH: loop header
LB: loop body
LE: loop exit
PB: predicated region body
PF: predicated region fallthrough
CT: control target
= control target key end

     0   :  { %s5068_s24 = smov 0   ;;  %s6549_s0 = inlined_call_operand.vmem [shape: f32[2,18,18,32], index: 0, kind: input, shape index: {}]   ;;  %s6550_s1 = inlined_call_operand.vmem [shape: bf16[9,32,32], index: 1, kind: input, shape index: {}]   ;;  %s6551_s2 = inlined_call_operand.vmem [shape: f32[1,32], index: 2, kind: input, shape index: {}]   ;;  %s6552_s3 = inlined_call_operand.vmem [shape: f32[1,32], index: 3, kind: input, shape index: {}]   ;;  %s6553_s4 = inlined_call_operand.vmem [shape: bf16[32,32], index: 4, kind: input, shape index: {}]   ;;  %s6554_s5 = inlined_call_operand.vmem [shape: f32[1,32], index: 5, kind: input, shape index: {}]   ;;  %s6555_s6 = inlined_call_operand.vmem [shape: f32[1,32], index: 6, kind: input, shape index: {}]   ;;  %s6556_s7 = inlined_call_operand.vmem [shape: f32[2,16,16,32], index: 7, kind: output, shape index: {}]  }
   0x1 LB: > { %s3840_s25 = sadd.s32 4294967295, %s5026_s24   ;;  %p3844_p0 = scmp.ge.s32.totalorder %s5026_s24, 1  ;;  %s5026_s24 = sphi %s5068_s24, %s17_s24  }
   0x2   : > { %p237_p1 = scmp.lt.s32.totalorder %s5026_s24, 3 }
   0x4   : > { %p238_p2 = pnand %p3844_p0, %p237_p1 }
   0x6   : > { %241 = sbr.rel (%p238_p2) target bundleno = 795 (0x31b), region = 48 }
   0xb   : > { %v4840_v0 = vld [vmem:[%s6550_s1 + $0x18] sm:$0xff]   ;;  %p269_p3 = scmp.lt.s32.totalorder %s3840_s25, 1  ;;  %v4841_v1 = vld [vmem:[%s6550_s1 + $0x8] sm:$0xff]   ;;  %v4842_v2 = vld [vmem:[%s6550_s1 + $0x10] sm:$0xff]   ;;  %vm397_vm0 = vcmask 261120  }
   0xc   : > { %4471 = vmatprep.subr.bf16.mxu0 %v4840_v0  ;;  %4507 = vmatprep.subr.bf16.mxu1 %v4841_v1  ;;  %v4843_v3 = vld [vmem:[%s6550_s1] sm:$0xff]   ;;  %v4844_v4 = vld [vmem:[%s6550_s1 + $0x28] sm:$0xff]   ;;  %v4846_v5 = vld [vmem:[%s6550_s1 + $0x38] sm:$0xff]  }
   0xd   : > { %s6584_s25 = smov (!%p269_p3, %s3840_s25), 1  ;;  %4472 = vmatpush3.bf16.msra.mxu0 %v4840_v0  ;;  %4508 = vmatpush3.bf16.msra.mxu1 %v4841_v1  ;;  %v4845_v13 = vld [vmem:[%s6550_s1 + $0x20] sm:$0xff]   ;;  %v4847_v55 = vld [vmem:[%s6550_s1 + $0x30] sm:$0xff]   ;;  %v5199_v59 = vld [vmem:[%s6550_s1 + $0x48] sm:$0xff]  }
   0xe   : > { %4473 = vmatprep.subr.bf16.mxu0 %v4842_v2  ;;  %s4831_s11 = smul.u32 432, %s6584_s25  ;;  %4509 = vmatprep.subr.bf16.mxu1 %v4843_v3  ;;  %s4290_s14 = sshll.u32 %s6584_s25, 8 }
   0xf   : > { %s6362_s17 = scalar_lea.vmem %s6556_s7, %s4290_s14 }
  0x10   : > { %s5097_s16 = scalar_lea.vmem %s6549_s0, %s4831_s11 }
  0x11   : > { %4474 = vmatpush3.bf16.msra.mxu0 %v4842_v2  ;;  %v332_v6 = vld [vmem:[%s5097_s16 + $0x1] sm:$0xff]  ;;  %v333_v7 = vld [vmem:[%s5097_s16 + $0x9] sm:$0xff]  ;;  %4510 = vmatpush3.bf16.msra.mxu1 %v4843_v3  ;;  %v334_v11 = vld [vmem:[%s5097_s16 + $0x19] sm:$0xff] }
  0x12   : > { %v280_v8 = vld [vmem:[%s5097_s16] sm:$0xff]  ;;  %v364_v9 = vpack.c.bf16 %v333_v7, %v332_v6  ;;  %v281_v10 = vld [vmem:[%s5097_s16 + $0x8] sm:$0xff]  ;;  %4543 = vmatprep.subr.bf16.mxu0 %v4844_v4  ;;  %v282_v16 = vld [vmem:[%s5097_s16 + $0x18] sm:$0xff]  ;;  %4579 = vmatprep.subr.bf16.mxu1 %v4846_v5 }
  0x13   : > { %v335_v12 = vld [vmem:[%s5097_s16 + $0x21] sm:$0xff]  ;;  %v312_v14 = vpack.c.bf16 %v281_v10, %v280_v8  ;;  %v336_v18 = vld [vmem:[%s5097_s16 + $0x31] sm:$0xff]  ;;  %v337_v20 = vld [vmem:[%s5097_s16 + $0x39] sm:$0xff] }
  0x14   : > { %v5111_v15 = vpack.c.bf16 %v335_v12, %v334_v11  ;;  %v283_v17 = vld [vmem:[%s5097_s16 + $0x20] sm:$0xff]  ;;  %4475 = vmatprep.mubr.msk.bf16.mxu0 %vm397_vm0, %v364_v9  ;;  %v284_v21 = vld [vmem:[%s5097_s16 + $0x30] sm:$0xff]  ;;  %v285_v22 = vld [vmem:[%s5097_s16 + $0x38] sm:$0xff]  ;;  %v5125_v23 = vpack.c.bf16 %v337_v20, %v336_v18 }
  0x15   : > { %v5117_v19 = vpack.c.bf16 %v283_v17, %v282_v16  ;;  %4511 = vmatprep.mubr.msk.bf16.mxu1 %vm397_vm0, %v312_v14  ;;  %v5127_v24 = vpack.c.bf16 %v285_v22, %v284_v21  ;;  %v338_v25 = vld [vmem:[%s5097_s16 + $0x49] sm:$0xff]  ;;  %v339_v26 = vld [vmem:[%s5097_s16 + $0x51] sm:$0xff]  ;;  %v340_v29 = vld [vmem:[%s5097_s16 + $0x61] sm:$0xff] }
  0x16   : > { %4476 = vmatmul.mubr.msk.bf16.vlgmr.msra.gmra.mxu0 %vm397_vm0, %v5111_v15  ;;  %v286_v27 = vld [vmem:[%s5097_s16 + $0x48] sm:$0xff]  ;;  %v287_v28 = vld [vmem:[%s5097_s16 + $0x50] sm:$0xff]  ;;  %v288_v31 = vld [vmem:[%s5097_s16 + $0x60] sm:$0xff]  ;;  %v5143_v33 = vpack.c.bf16 %v339_v26, %v338_v25 }
  0x17   : > { %4512 = vmatmul.mubr.msk.bf16.vlgmr.msra.gmra.mxu1 %vm397_vm0, %v5117_v19  ;;  %4544 = vmatpush3.bf16.msra.mxu0 %v4844_v4  ;;  %v341_v30 = vld [vmem:[%s5097_s16 + $0x69] sm:$0xff]  ;;  %v5145_v34 = vpack.c.bf16 %v287_v28, %v286_v27  ;;  %v342_v37 = vld [vmem:[%s5097_s16 + $0x79] sm:$0xff]  ;;  %v343_v38 = vld [vmem:[%s5097_s16 + $0x81] sm:$0xff] }
  0x18   : > { %4479 = vmatprep.mubr.msk.bf16.mxu0 %vm397_vm0, %v5125_v23  ;;  %4515 = vmatprep.mubr.msk.bf16.mxu1 %vm397_vm0, %v5127_v24  ;;  %v289_v32 = vld [vmem:[%s5097_s16 + $0x68] sm:$0xff]  ;;  %v5147_v35 = vpack.c.bf16 %v341_v30, %v340_v29  ;;  %v290_v39 = vld [vmem:[%s5097_s16 + $0x78] sm:$0xff]  ;;  %v291_v40 = vld [vmem:[%s5097_s16 + $0x80] sm:$0xff]  ;;  %v5167_v45 = vpack.c.bf16 %v343_v38, %v342_v37 }
  0x19   : > { %4545 = vmatprep.subr.bf16.mxu0 %v4845_v13  ;;  %4580 = vmatpush3.bf16.msra.mxu1 %v4846_v5  ;;  %v5149_v36 = vpack.c.bf16 %v289_v32, %v288_v31  ;;  %v344_v41 = vld [vmem:[%s5097_s16 + $0x91] sm:$0xff]  ;;  %v345_v42 = vld [vmem:[%s5097_s16 + $0x99] sm:$0xff]  ;;  %v5169_v46 = vpack.c.bf16 %v291_v40, %v290_v39  ;;  %v346_v49 = vld [vmem:[%s5097_s16 + $0xa9] sm:$0xff] }
  0x1a   : > { %v292_v43 = vld [vmem:[%s5097_s16 + $0x90] sm:$0xff]  ;;  %v293_v44 = vld [vmem:[%s5097_s16 + $0x98] sm:$0xff]  ;;  %v5171_v47 = vpack.c.bf16 %v345_v42, %v344_v41  ;;  %v294_v51 = vld [vmem:[%s5097_s16 + $0xa8] sm:$0xff]  ;;  %4581 = vmatprep.subr.bf16.mxu1 %v4847_v55 }
  0x1b   : > { %4546 = vmatpush3.bf16.msra.mxu0 %v4845_v13  ;;  %v5173_v48 = vpack.c.bf16 %v293_v44, %v292_v43  ;;  %v347_v50 = vld [vmem:[%s5097_s16 + $0xb1] sm:$0xff]  ;;  %v348_v53 = vld [vmem:[%s5097_s16 + $0xc1] sm:$0xff]  ;;  %v349_v54 = vld [vmem:[%s5097_s16 + $0xc9] sm:$0xff] }
  0x1c   : > { %v295_v52 = vld [vmem:[%s5097_s16 + $0xb0] sm:$0xff]  ;;  %v296_v56 = vld [vmem:[%s5097_s16 + $0xc0] sm:$0xff]  ;;  %v297_v57 = vld [vmem:[%s5097_s16 + $0xc8] sm:$0xff]  ;;  %v5194_v58 = vpack.c.bf16 %v347_v50, %v346_v49  ;;  %v5203_v61 = vpack.c.bf16 %v349_v54, %v348_v53  ;;  %4615 = vmatprep.subr.bf16.mxu0 %v5199_v59 }
  0x1d   : > { %v5201_v60 = vpack.c.bf16 %v295_v52, %v294_v51  ;;  %4582 = vmatpush3.bf16.msra.mxu1 %v4847_v55  ;;  %v5205_v62 = vpack.c.bf16 %v297_v57, %v296_v56  ;;  %v350_v63 = vld [vmem:[%s5097_s16 + $0xd9] sm:$0xff]  ;;  %v351_v0 = vld [vmem:[%s5097_s16 + $0xe1] sm:$0xff]  ;;  %v352_v3 = vld [vmem:[%s5097_s16 + $0xf1] sm:$0xff] }
  0x1e   : > { %4480 = vmatmul.mubr.msk.bf16.gmra.mxu0 %vm397_vm0, %v5143_v33  ;;  %v298_v1 = vld [vmem:[%s5097_s16 + $0xd8] sm:$0xff]  ;;  %v299_v2 = vld [vmem:[%s5097_s16 + $0xe0] sm:$0xff]  ;;  %v300_v5 = vld [vmem:[%s5097_s16 + $0xf0] sm:$0xff]  ;;  %v5224_v7 = vpack.c.bf16 %v351_v0, %v350_v63 }
  0x1f   : > { %4516 = vmatmul.mubr.msk.bf16.gmra.mxu1 %vm397_vm0, %v5145_v34  ;;  %4483 = vmatprep.mubr.msk.bf16.mxu0 %vm397_vm0, %v5147_v35  ;;  %v353_v4 = vld [vmem:[%s5097_s16 + $0xf9] sm:$0xff]  ;;  %v5226_v8 = vpack.c.bf16 %v299_v2, %v298_v1  ;;  %v354_v11 = vld [vmem:[%s5097_s16 + $0x109] sm:$0xff]  ;;  %v355_v12 = vld [vmem:[%s5097_s16 + $0x111] sm:$0xff] }
  0x20   : > { %4519 = vmatprep.mubr.msk.bf16.mxu1 %vm397_vm0, %v5149_v36  ;;  %v301_v6 = vld [vmem:[%s5097_s16 + $0xf8] sm:$0xff]  ;;  %v5228_v9 = vpack.c.bf16 %v353_v4, %v352_v3  ;;  %v302_v13 = vld [vmem:[%s5097_s16 + $0x108] sm:$0xff]  ;;  %v303_v14 = vld [vmem:[%s5097_s16 + $0x110] sm:$0xff]  ;;  %v5254_v22 = vpack.c.bf16 %v355_v12, %v354_v11 }
  0x21   : > { %v5230_v10 = vpack.c.bf16 %v301_v6, %v300_v5  ;;  %v356_v16 = vld [vmem:[%s5097_s16 + $0x121] sm:$0xff]  ;;  %v5242_v17 = vld [vmem:[%s6550_s1 + $0x58] sm:$0xff]   ;;  %v357_v18 = vld [vmem:[%s5097_s16 + $0x129] sm:$0xff]  ;;  %v5256_v25 = vpack.c.bf16 %v303_v14, %v302_v13 }
  0x22   : > { %v304_v20 = vld [vmem:[%s5097_s16 + $0x120] sm:$0xff]  ;;  %4651 = vmatprep.subr.bf16.mxu1 %v5242_v17  ;;  %v305_v21 = vld [vmem:[%s5097_s16 + $0x128] sm:$0xff]  ;;  %v5258_v26 = vpack.c.bf16 %v357_v18, %v356_v16  ;;  %v306_v30 = vld [vmem:[%s5097_s16 + $0x138] sm:$0xff] }
  0x23   : > { %v5260_v27 = vpack.c.bf16 %v305_v21, %v304_v20  ;;  %v358_v28 = vld [vmem:[%s5097_s16 + $0x139] sm:$0xff]  ;;  %v359_v29 = vld [vmem:[%s5097_s16 + $0x141] sm:$0xff]  ;;  %v360_v32 = vld [vmem:[%s5097_s16 + $0x151] sm:$0xff] }
  0x24   : > { %v307_v31 = vld [vmem:[%s5097_s16 + $0x140] sm:$0xff]  ;;  %v308_v38 = vld [vmem:[%s5097_s16 + $0x150] sm:$0xff]  ;;  %v309_v39 = vld [vmem:[%s5097_s16 + $0x158] sm:$0xff]  ;;  %v5278_v40 = vpack.c.bf16 %v359_v29, %v358_v28 }
  0x25   : > { %v361_v37 = vld [vmem:[%s5097_s16 + $0x159] sm:$0xff]  ;;  %v5280_v41 = vpack.c.bf16 %v307_v31, %v306_v30  ;;  %v5284_v43 = vpack.c.bf16 %v309_v39, %v308_v38  ;;  %v362_v44 = vld [vmem:[%s5097_s16 + $0x169] sm:$0xff]  ;;  %v363_v49 = vld [vmem:[%s5097_s16 + $0x171] sm:$0xff] }
  0x26   : > { %4484 = vmatmul.mubr.msk.bf16.gmra.mxu0 %vm397_vm0, %v5167_v45  ;;  %v5282_v42 = vpack.c.bf16 %v361_v37, %v360_v32  ;;  %v310_v50 = vld [vmem:[%s5097_s16 + $0x168] sm:$0xff]  ;;  %v311_v51 = vld [vmem:[%s5097_s16 + $0x170] sm:$0xff]  ;;  %v5300_v54 = vpack.c.bf16 %v363_v49, %v362_v44  ;;  %v830_v57 = vld [vmem:[%s5097_s16 + $0x1a] sm:$0xff] }
  0x27   : > { %4520 = vmatmul.mubr.msk.bf16.gmra.mxu1 %vm397_vm0, %v5169_v46  ;;  %4487 = vmatprep.mubr.msk.bf16.mxu0 %vm397_vm0, %v5171_v47  ;;  %v828_v52 = vld [vmem:[%s5097_s16 + $0x2] sm:$0xff]  ;;  %v829_v53 = vld [vmem:[%s5097_s16 + $0xa] sm:$0xff]  ;;  %v5302_v55 = vpack.c.bf16 %v311_v51, %v310_v50  ;;  %v832_v0 = vld [vmem:[%s5097_s16 + $0x32] sm:$0xff] }
  0x28   : > { %4523 = vmatprep.mubr.msk.bf16.mxu1 %vm397_vm0, %v5173_v48  ;;  %v860_v56 = vpack.c.bf16 %v829_v53, %v828_v52  ;;  %v831_v63 = vld [vmem:[%s5097_s16 + $0x22] sm:$0xff]  ;;  %v833_v1 = vld [vmem:[%s5097_s16 + $0x3a] sm:$0xff]  ;;  %v4851_v5 = vld [vmem:[%s6550_s1 + $0x50] sm:$0xff]  }
  0x29   : > { %v5315_v2 = vpack.c.bf16 %v831_v63, %v830_v57  ;;  %v5317_v3 = vpack.c.bf16 %v833_v1, %v832_v0  ;;  %v4849_v4 = vld [vmem:[%s6550_s1 + $0x40] sm:$0xff]   ;;  %v835_v6 = vld [vmem:[%s5097_s16 + $0x52] sm:$0xff]  ;;  %v837_v12 = vld [vmem:[%s5097_s16 + $0x6a] sm:$0xff] }
  0x2a   : > { %v836_v11 = vld [vmem:[%s5097_s16 + $0x62] sm:$0xff]  ;;  %v5349_v14 = vld [vmem:[%s6550_s1 + $0x78] sm:$0xff]   ;;  %v842_v30 = vld [vmem:[%s5097_s16 + $0xaa] sm:$0xff] }
  0x2b   : > { %v5341_v13 = vld [vmem:[%s6550_s1 + $0x68] sm:$0xff]   ;;  %v5351_v16 = vpack.c.bf16 %v837_v12, %v836_v11  ;;  %v840_v20 = vld [vmem:[%s5097_s16 + $0x92] sm:$0xff]  ;;  %v841_v21 = vld [vmem:[%s5097_s16 + $0x9a] sm:$0xff] }
  0x2c   : > { %v839_v18 = vld [vmem:[%s5097_s16 + $0x82] sm:$0xff]  ;;  %v5369_v29 = vpack.c.bf16 %v841_v21, %v840_v20  ;;  %v843_v31 = vld [vmem:[%s5097_s16 + $0xb2] sm:$0xff]  ;;  %v845_v37 = vld [vmem:[%s5097_s16 + $0xca] sm:$0xff] }
  0x2d   : > { %v844_v32 = vld [vmem:[%s5097_s16 + $0xc2] sm:$0xff]  ;;  %v5383_v38 = vpack.c.bf16 %v843_v31, %v842_v30  ;;  %v846_v44 = vld [vmem:[%s5097_s16 + $0xda] sm:$0xff]  ;;  %v848_v50 = vld [vmem:[%s5097_s16 + $0xf2] sm:$0xff] }
  0x2e   : > { %4488 = vmatmul.mubr.msk.bf16.gmra.mxu0 %vm397_vm0, %v5194_v58  ;;  %v5385_v39 = vpack.c.bf16 %v845_v37, %v844_v32  ;;  %v847_v49 = vld [vmem:[%s5097_s16 + $0xe2] sm:$0xff]  ;;  %v849_v51 = vld [vmem:[%s5097_s16 + $0xfa] sm:$0xff]  ;;  %v851_v57 = vld [vmem:[%s5097_s16 + $0x112] sm:$0xff] }
  0x2f   : > { %4524 = vmatmul.mubr.msk.bf16.gmra.mxu1 %vm397_vm0, %v5201_v60  ;;  %4491 = vmatprep.mubr.msk.bf16.mxu0 %vm397_vm0, %v5203_v61  ;;  %v869_v52 = vpack.c.bf16 %v847_v49, %v846_v44  ;;  %v870_v53 = vpack.c.bf16 %v849_v51, %v848_v50  ;;  %v852_v63 = vld [vmem:[%s5097_s16 + $0x122] sm:$0xff]  ;;  %v853_v0 = vld [vmem:[%s5097_s16 + $0x12a] sm:$0xff]  ;;  %v857_v11 = vld [vmem:[%s5097_s16 + $0x15a] sm:$0xff] }
  0x30   : > { %4527 = vmatprep.mubr.msk.bf16.mxu1 %vm397_vm0, %v5205_v62  ;;  %v859_v20 = vld [vmem:[%s5097_s16 + $0x172] sm:$0xff]  ;;  %v3940_v21 = vld [vmem:[%s5097_s16 + $0x180] sm:$0xff]  ;;  %v3941_v30 = vld [vmem:[%s5097_s16 + $0x188] sm:$0xff] }
  0x31   : > { %v5429_v32 = vpack.c.bf16 %v3941_v30, %v3940_v21  ;;  %v4853_v37 = vld [vmem:[%s6550_s1 + $0x60] sm:$0xff]   ;;  %v4855_v44 = vld [vmem:[%s6550_s1 + $0x70] sm:$0xff]  }
  0x36   : > { %4492 = vmatmul.mubr.msk.bf16.gmra.mxu0 %vm397_vm0, %v5224_v7 }
  0x37   : > { %4528 = vmatmul.mubr.msk.bf16.gmra.mxu1 %vm397_vm0, %v5226_v8  ;;  %4495 = vmatprep.mubr.msk.bf16.mxu0 %vm397_vm0, %v5228_v9 }
  0x38   : > { %4531 = vmatprep.mubr.msk.bf16.mxu1 %vm397_vm0, %v5230_v10 }
  0x3e   : > { %4496 = vmatmul.mubr.msk.bf16.gmra.mxu0 %vm397_vm0, %v5254_v22 }
  0x3f   : > { %4532 = vmatmul.mubr.msk.bf16.gmra.mxu1 %vm397_vm0, %v5256_v25  ;;  %4499 = vmatprep.mubr.msk.bf16.mxu0 %vm397_vm0, %v5258_v26 }
  0x40   : > { %4535 = vmatprep.mubr.msk.bf16.mxu1 %vm397_vm0, %v5260_v27 }
  0x46   : > { %4500 = vmatmul.mubr.msk.bf16.gmra.mxu0 %vm397_vm0, %v5278_v40 }
  0x47   : > { %4536 = vmatmul.mubr.msk.bf16.gmra.mxu1 %vm397_vm0, %v5280_v41  ;;  %4503 = vmatprep.mubr.msk.bf16.mxu0 %vm397_vm0, %v5282_v42 }
  0x48   : > { %4539 = vmatprep.mubr.msk.bf16.mxu1 %vm397_vm0, %v5284_v43 }
  0x4e   : > { %4504 = vmatmul.mubr.msk.bf16.gmra.mxu0 %vm397_vm0, %v5300_v54 }
  0x4f   : > { %4540 = vmatmul.mubr.msk.bf16.gmra.mxu1 %vm397_vm0, %v5302_v55  ;;  %4547 = vmatprep.mubr.msk.bf16.mxu0 %vm397_vm0, %v860_v56  ;;  %v850_v56 = vld [vmem:[%s5097_s16 + $0x10a] sm:$0xff] }
  0x50   : > { %4583 = vmatprep.mubr.msk.bf16.mxu1 %vm397_vm0, %v5117_v19  ;;  %v834_v19 = vld [vmem:[%s5097_s16 + $0x4a] sm:$0xff]  ;;  %v871_v1 = vpack.c.bf16 %v851_v57, %v850_v56 }
  0x56   : > { %4548 = vmatmul.mubr.msk.bf16.vlgmr.msra.gmra.mxu0 %vm397_vm0, %v5315_v2 }
  0x57   : > { %4616 = vmatpush3.bf16.msra.mxu0 %v5199_v59  ;;  %4584 = vmatmul.mubr.msk.bf16.vlgmr.msra.gmra.mxu1 %vm397_vm0, %v5127_v24  ;;  %v5344_v59 = vpack.c.bf16 %v835_v6, %v834_v19  ;;  %v855_v19 = vld [vmem:[%s5097_s16 + $0x142] sm:$0xff]  ;;  %v856_v6 = vld [vmem:[%s5097_s16 + $0x152] sm:$0xff] }
  0x58   : > { %4551 = vmatprep.mubr.msk.bf16.mxu0 %vm397_vm0, %v5317_v3  ;;  %4587 = vmatprep.mubr.msk.bf16.mxu1 %vm397_vm0, %v5145_v34 }
  0x59   : > { %4617 = vmatprep.subr.bf16.mxu0 %v4849_v4  ;;  %4652 = vmatpush3.bf16.msra.mxu1 %v5242_v17  ;;  %v838_v17 = vld [vmem:[%s5097_s16 + $0x7a] sm:$0xff] }
  0x5a   : > { %4653 = vmatprep.subr.bf16.mxu1 %v4851_v5  ;;  %v5367_v28 = vpack.c.bf16 %v839_v18, %v838_v17  ;;  %v874_v17 = vpack.c.bf16 %v857_v11, %v856_v6  ;;  %v858_v18 = vld [vmem:[%s5097_s16 + $0x16a] sm:$0xff] }
  0x5b   : > { %4618 = vmatpush3.bf16.msra.mxu0 %v4849_v4  ;;  %v872_v4 = vpack.c.bf16 %v853_v0, %v852_v63  ;;  %v875_v31 = vpack.c.bf16 %v859_v20, %v858_v18 }
  0x5c   : > { %4687 = vmatprep.subr.bf16.mxu0 %v5341_v13 }
  0x5d   : > { %4654 = vmatpush3.bf16.msra.mxu1 %v4851_v5  ;;  %v854_v5 = vld [vmem:[%s5097_s16 + $0x13a] sm:$0xff] }
  0x5e   : > { %4552 = vmatmul.mubr.msk.bf16.gmra.mxu0 %vm397_vm0, %v5344_v59  ;;  %4723 = vmatprep.subr.bf16.mxu1 %v5349_v14  ;;  %v873_v12 = vpack.c.bf16 %v855_v19, %v854_v5 }
  0x5f   : > { %4588 = vmatmul.mubr.msk.bf16.gmra.mxu1 %vm397_vm0, %v5149_v36  ;;  %4555 = vmatprep.mubr.msk.bf16.mxu0 %vm397_vm0, %v5351_v16 }
  0x60   : > { %4591 = vmatprep.mubr.msk.bf16.mxu1 %vm397_vm0, %v5169_v46 }
  0x66   : > { %4556 = vmatmul.mubr.msk.bf16.gmra.mxu0 %vm397_vm0, %v5367_v28 }
  0x67   : > { %4592 = vmatmul.mubr.msk.bf16.gmra.mxu1 %vm397_vm0, %v5173_v48  ;;  %4559 = vmatprep.mubr.msk.bf16.mxu0 %vm397_vm0, %v5369_v29 }
  0x68   : > { %4595 = vmatprep.mubr.msk.bf16.mxu1 %vm397_vm0, %v5201_v60 }
  0x6e   : > { %4560 = vmatmul.mubr.msk.bf16.gmra.mxu0 %vm397_vm0, %v5383_v38 }
  0x6f   : > { %4596 = vmatmul.mubr.msk.bf16.gmra.mxu1 %vm397_vm0, %v5205_v62  ;;  %4563 = vmatprep.mubr.msk.bf16.mxu0 %vm397_vm0, %v5385_v39 }
  0x70   : > { %4599 = vmatprep.mubr.msk.bf16.mxu1 %vm397_vm0, %v5226_v8 }
  0x76   : > { %4564 = vmatmul.mubr.msk.bf16.gmra.mxu0 %vm397_vm0, %v869_v52 }
  0x77   : > { %4600 = vmatmul.mubr.msk.bf16.gmra.mxu1 %vm397_vm0, %v5230_v10  ;;  %4567 = vmatprep.mubr.msk.bf16.mxu0 %vm397_vm0, %v870_v53 }
  0x78   : > { %4603 = vmatprep.mubr.msk.bf16.mxu1 %vm397_vm0, %v5256_v25 }
  0x7e   : > { %4568 = vmatmul.mubr.msk.bf16.gmra.mxu0 %vm397_vm0, %v871_v1 }
  0x7f   : > { %4604 = vmatmul.mubr.msk.bf16.gmra.mxu1 %vm397_vm0, %v5260_v27  ;;  %4571 = vmatprep.mubr.msk.bf16.mxu0 %vm397_vm0, %v872_v4 }
  0x80   : > { %4607 = vmatprep.mubr.msk.bf16.mxu1 %vm397_vm0, %v5280_v41 }
  0x86   : > { %4572 = vmatmul.mubr.msk.bf16.gmra.mxu0 %vm397_vm0, %v873_v12 }
  0x87   : > { %4608 = vmatmul.mubr.msk.bf16.gmra.mxu1 %vm397_vm0, %v5284_v43  ;;  %4575 = vmatprep.mubr.msk.bf16.mxu0 %vm397_vm0, %v874_v17 }
  0x88   : > { %4611 = vmatprep.mubr.msk.bf16.mxu1 %vm397_vm0, %v5302_v55 }
  0x8e   : > { %4576 = vmatmul.mubr.msk.bf16.gmra.mxu0 %vm397_vm0, %v875_v31 }
  0x8f   : > { %4612 = vmatmul.mubr.msk.bf16.gmra.mxu1 %vm397_vm0, %v5429_v32  ;;  %4619 = vmatprep.mubr.msk.bf16.mxu0 %vm397_vm0, %v5111_v15  ;;  %v4856_v15 = vld [vmem:[%s6550_s1 + $0x88] sm:$0xff]  }
  0x90   : > { %4655 = vmatprep.mubr.msk.bf16.mxu1 %vm397_vm0, %v5315_v2  ;;  %v3994_v2 = vld [vmem:[%s5097_s16 + $0x181] sm:$0xff] }
  0x96   : > { %4620 = vmatmul.mubr.msk.bf16.vlgmr.msra.gmra.mxu0 %vm397_vm0, %v5125_v23 }
  0x97   : > { %4688 = vmatpush3.bf16.msra.mxu0 %v5341_v13  ;;  %4656 = vmatmul.mubr.msk.bf16.vlgmr.msra.gmra.mxu1 %vm397_vm0, %v5317_v3  ;;  %v3995_v13 = vld [vmem:[%s5097_s16 + $0x189] sm:$0xff] }
  0x98   : > { %4623 = vmatprep.mubr.msk.bf16.mxu0 %vm397_vm0, %v5143_v33  ;;  %4659 = vmatprep.mubr.msk.bf16.mxu1 %vm397_vm0, %v5344_v59 }
  0x99   : > { %4689 = vmatprep.subr.bf16.mxu0 %v4853_v37  ;;  %4724 = vmatpush3.bf16.msra.mxu1 %v5349_v14  ;;  %v4048_v14 = vld [vmem:[%s5097_s16 + $0x182] sm:$0xff] }
  0x9a   : > { %4725 = vmatprep.subr.bf16.mxu1 %v4855_v44 }
  0x9b   : > { %4690 = vmatpush3.bf16.msra.mxu0 %v4853_v37 }
  0x9c   : > { %4759 = vmatprep.subr.bf16.mxu0 %v4856_v15 }
  0x9d   : > { %4726 = vmatpush3.bf16.msra.mxu1 %v4855_v44 }
  0x9e   : > { %4624 = vmatmul.mubr.msk.bf16.gmra.mxu0 %vm397_vm0, %v5147_v35 }
  0x9f   : > { %4660 = vmatmul.mubr.msk.bf16.gmra.mxu1 %vm397_vm0, %v5351_v16  ;;  %4627 = vmatprep.mubr.msk.bf16.mxu0 %vm397_vm0, %v5167_v45  ;;  %v4049_v16 = vld [vmem:[%s5097_s16 + $0x18a] sm:$0xff] }
  0xa0   : > { %4663 = vmatprep.mubr.msk.bf16.mxu1 %vm397_vm0, %v5367_v28  ;;  %v5502_v28 = vpack.c.bf16 %v3995_v13, %v3994_v2 }
  0xa6   : > { %4628 = vmatmul.mubr.msk.bf16.gmra.mxu0 %vm397_vm0, %v5171_v47 }
  0xa7   : > { %4664 = vmatmul.mubr.msk.bf16.gmra.mxu1 %vm397_vm0, %v5369_v29  ;;  %4631 = vmatprep.mubr.msk.bf16.mxu0 %vm397_vm0, %v5194_v58  ;;  %v5504_v29 = vpack.c.bf16 %v4049_v16, %v4048_v14 }
  0xa8   : > { %4667 = vmatprep.mubr.msk.bf16.mxu1 %vm397_vm0, %v5383_v38  ;;  %v4857_v38 = vld [vmem:[%s6550_s1 + $0x80] sm:$0xff]  }
  0xae   : > { %4632 = vmatmul.mubr.msk.bf16.gmra.mxu0 %vm397_vm0, %v5203_v61 }
  0xaf   : > { %4668 = vmatmul.mubr.msk.bf16.gmra.mxu1 %vm397_vm0, %v5385_v39  ;;  %4635 = vmatprep.mubr.msk.bf16.mxu0 %vm397_vm0, %v5224_v7 }
  0xb0   : > { %4671 = vmatprep.mubr.msk.bf16.mxu1 %vm397_vm0, %v869_v52 }
  0xb6   : > { %4636 = vmatmul.mubr.msk.bf16.gmra.mxu0 %vm397_vm0, %v5228_v9 }
  0xb7   : > { %4672 = vmatmul.mubr.msk.bf16.gmra.mxu1 %vm397_vm0, %v870_v53  ;;  %4639 = vmatprep.mubr.msk.bf16.mxu0 %vm397_vm0, %v5254_v22 }
  0xb8   : > { %4675 = vmatprep.mubr.msk.bf16.mxu1 %vm397_vm0, %v871_v1 }
  0xbe   : > { %4640 = vmatmul.mubr.msk.bf16.gmra.mxu0 %vm397_vm0, %v5258_v26 }
  0xbf   : > { %4676 = vmatmul.mubr.msk.bf16.gmra.mxu1 %vm397_vm0, %v872_v4  ;;  %4643 = vmatprep.mubr.msk.bf16.mxu0 %vm397_vm0, %v5278_v40 }
  0xc0   : > { %4679 = vmatprep.mubr.msk.bf16.mxu1 %vm397_vm0, %v873_v12 }
  0xc6   : > { %4644 = vmatmul.mubr.msk.bf16.gmra.mxu0 %vm397_vm0, %v5282_v42 }
  0xc7   : > { %4680 = vmatmul.mubr.msk.bf16.gmra.mxu1 %vm397_vm0, %v874_v17  ;;  %4647 = vmatprep.mubr.msk.bf16.mxu0 %vm397_vm0, %v5300_v54 }
  0xc8   : > { %4683 = vmatprep.mubr.msk.bf16.mxu1 %vm397_vm0, %v875_v31 }
  0xce   : > { %4648 = vmatmul.mubr.msk.bf16.gmra.mxu0 %vm397_vm0, %v5502_v28 }
  0xcf   : > { %4684 = vmatmul.mubr.msk.bf16.gmra.mxu1 %vm397_vm0, %v5504_v29  ;;  %4691 = vmatprep.mubr.msk.bf16.mxu0 %vm397_vm0, %v5127_v24 }
  0xd0   : > { %4727 = vmatprep.mubr.msk.bf16.mxu1 %vm397_vm0, %v5125_v23 }
  0xd6   : > { %v4477_v39 = vpop.f32.mrf.mxu0  ;;  %4692 = vmatmul.mubr.msk.bf16.vlgmr.msra.gmra.mxu0 %vm397_vm0, %v5145_v34 }
  0xd7   : > { %v4513_v49 = vpop.f32.mrf.mxu1  ;;  %4760 = vmatpush3.bf16.msra.mxu0 %v4856_v15  ;;  %4728 = vmatmul.mubr.msk.bf16.vlgmr.msra.gmra.mxu1 %vm397_vm0, %v5143_v33 }
  0xd8   : > { %v5521_v50 = vadd.f32 %v4513_v49, %v4477_v39  ;;  %v480_v51 = vpop.f32.mrf.mxu0  ;;  %4695 = vmatprep.mubr.msk.bf16.mxu0 %vm397_vm0, %v5149_v36  ;;  %4731 = vmatprep.mubr.msk.bf16.mxu1 %vm397_vm0, %v5147_v35 }
  0xd9   : > { %v701_v23 = vpop.f32.mrf.mxu1  ;;  %4761 = vmatprep.subr.bf16.mxu0 %v4857_v38 }
  0xda   : > { %v5527_v24 = vadd.f32 %v701_v23, %v480_v51  ;;  %v4478_v52 = vpop.f32.mrf.mxu0 }
  0xdb   : > { %v4514_v34 = vpop.f32.mrf.mxu1  ;;  %4762 = vmatpush3.bf16.msra.mxu0 %v4857_v38 }
  0xdc   : > { %v5529_v53 = vadd.f32 %v4514_v34, %v4478_v52  ;;  %v483_v56 = vpop.f32.mrf.mxu0 }
  0xdd   : > { %v704_v33 = vpop.f32.mrf.mxu1 }
  0xde   : > { %v5531_v57 = vadd.f32 %v704_v33, %v483_v56  ;;  %v4481_v63 = vpop.f32.mrf.mxu0  ;;  %4696 = vmatmul.mubr.msk.bf16.gmra.mxu0 %vm397_vm0, %v5169_v46 }
  0xdf   : > { %v4517_v36 = vpop.f32.mrf.mxu1  ;;  %4732 = vmatmul.mubr.msk.bf16.gmra.mxu1 %vm397_vm0, %v5167_v45  ;;  %4699 = vmatprep.mubr.msk.bf16.mxu0 %vm397_vm0, %v5173_v48 }
  0xe0   : > { %v5539_v35 = vadd.f32 %v4517_v36, %v4481_v63  ;;  %v496_v0 = vpop.f32.mrf.mxu0  ;;  %4735 = vmatprep.mubr.msk.bf16.mxu1 %vm397_vm0, %v5171_v47 }
  0xe1   : > { %v717_v1 = vpop.f32.mrf.mxu1 }
  0xe2   : > { %v5543_v4 = vadd.f32 %v717_v1, %v496_v0  ;;  %v4482_v5 = vpop.f32.mrf.mxu0 }
  0xe3   : > { %v4518_v19 = vpop.f32.mrf.mxu1 }
  0xe4   : > { %v5545_v6 = vadd.f32 %v4518_v19, %v4482_v5  ;;  %v499_v46 = vpop.f32.mrf.mxu0 }
  0xe5   : > { %v720_v11 = vpop.f32.mrf.mxu1 }
  0xe6   : > { %v5547_v12 = vadd.f32 %v720_v11, %v499_v46  ;;  %v4485_v45 = vpop.f32.mrf.mxu0  ;;  %4700 = vmatmul.mubr.msk.bf16.gmra.mxu0 %vm397_vm0, %v5201_v60 }
  0xe7   : > { %v4521_v48 = vpop.f32.mrf.mxu1  ;;  %4736 = vmatmul.mubr.msk.bf16.gmra.mxu1 %vm397_vm0, %v5194_v58  ;;  %4703 = vmatprep.mubr.msk.bf16.mxu0 %vm397_vm0, %v5205_v62 }
  0xe8   : > { %v5555_v47 = vadd.f32 %v4521_v48, %v4485_v45  ;;  %v512_v17 = vpop.f32.mrf.mxu0  ;;  %4739 = vmatprep.mubr.msk.bf16.mxu1 %vm397_vm0, %v5203_v61  ;;  %v4103_v45 = vld [vmem:[%s5097_s16 + $0x1a0] sm:$0xff] }
  0xe9   : > { %v733_v18 = vpop.f32.mrf.mxu1 }
  0xea   : > { %v5559_v20 = vadd.f32 %v733_v18, %v512_v17  ;;  %v4486_v21 = vpop.f32.mrf.mxu0  ;;  %v4156_v18 = vld [vmem:[%s5097_s16 + $0x199] sm:$0xff] }
  0xeb   : > { %v4522_v30 = vpop.f32.mrf.mxu1 }
  0xec   : > { %v5561_v31 = vadd.f32 %v4522_v30, %v4486_v21  ;;  %v515_v60 = vpop.f32.mrf.mxu0  ;;  %v4157_v21 = vld [vmem:[%s5097_s16 + $0x1a1] sm:$0xff] }
  0xed   : > { %v736_v37 = vpop.f32.mrf.mxu1 }
  0xee   : > { %v5563_v44 = vadd.f32 %v736_v37, %v515_v60  ;;  %v4489_v58 = vpop.f32.mrf.mxu0  ;;  %4704 = vmatmul.mubr.msk.bf16.gmra.mxu0 %vm397_vm0, %v5226_v8 }
  0xef   : > { %v4525_v62 = vpop.f32.mrf.mxu1  ;;  %4740 = vmatmul.mubr.msk.bf16.gmra.mxu1 %vm397_vm0, %v5224_v7  ;;  %4707 = vmatprep.mubr.msk.bf16.mxu0 %vm397_vm0, %v5230_v10 }
  0xf0   : > { %v5571_v61 = vadd.f32 %v4525_v62, %v4489_v58  ;;  %v528_v15 = vpop.f32.mrf.mxu0  ;;  %4743 = vmatprep.mubr.msk.bf16.mxu1 %vm397_vm0, %v5228_v9  ;;  %v2407_v58 = vpack.c.bf16 %v4157_v21, %v4156_v18 }
  0xf1   : > { %v749_v2 = vpop.f32.mrf.mxu1 }
  0xf2   : > { %v5575_v13 = vadd.f32 %v749_v2, %v528_v15  ;;  %v4490_v14 = vpop.f32.mrf.mxu0 }
  0xf3   : > { %v4526_v16 = vpop.f32.mrf.mxu1 }
  0xf4   : > { %v5577_v38 = vadd.f32 %v4526_v16, %v4490_v14  ;;  %v531_v8 = vpop.f32.mrf.mxu0 }
  0xf5   : > { %v752_v39 = vpop.f32.mrf.mxu1 }
  0xf6   : > { %v5579_v49 = vadd.f32 %v752_v39, %v531_v8  ;;  %v4493_v7 = vpop.f32.mrf.mxu0  ;;  %4708 = vmatmul.mubr.msk.bf16.gmra.mxu0 %vm397_vm0, %v5256_v25  ;;  %v4184_v8 = vld [vmem:[%s5097_s16 + $0x62] sm:$0xff]  ;;  %v4185_v39 = vld [vmem:[%s5097_s16 + $0x6a] sm:$0xff] }
  0xf7   : > { %v4529_v10 = vpop.f32.mrf.mxu1  ;;  %4744 = vmatmul.mubr.msk.bf16.gmra.mxu1 %vm397_vm0, %v5254_v22  ;;  %4711 = vmatprep.mubr.msk.bf16.mxu0 %vm397_vm0, %v5260_v27 }
  0xf8   : > { %v5587_v9 = vadd.f32 %v4529_v10, %v4493_v7  ;;  %v544_v51 = vpop.f32.mrf.mxu0  ;;  %4747 = vmatprep.mubr.msk.bf16.mxu1 %vm397_vm0, %v5258_v26 }
  0xf9   : > { %v765_v23 = vpop.f32.mrf.mxu1 }
  0xfa   : > { %v5591_v52 = vadd.f32 %v765_v23, %v544_v51  ;;  %v4494_v34 = vpop.f32.mrf.mxu0 }
  0xfb   : > { %v4530_v56 = vpop.f32.mrf.mxu1 }
  0xfc   : > { %v5593_v33 = vadd.f32 %v4530_v56, %v4494_v34  ;;  %v5595_v25 = vpop.f32.mrf.mxu0  ;;  %v2700_v34 = vpack.c.bf16 %v4185_v39, %v4184_v8  ;;  %v4190_v8 = vld [vmem:[%s5097_s16 + $0xaa] sm:$0xff]  ;;  %v4191_v39 = vld [vmem:[%s5097_s16 + $0xb2] sm:$0xff] }
  0xfd   : > { %v5597_v63 = vpop.f32.mrf.mxu1 }
  0xfe   : > { %v4497_v22 = vpop.f32.mrf.mxu0  ;;  %4712 = vmatmul.mubr.msk.bf16.gmra.mxu0 %vm397_vm0, %v5280_v41 }
  0xff   : > { %v4533_v27 = vpop.f32.mrf.mxu1  ;;  %4748 = vmatmul.mubr.msk.bf16.gmra.mxu1 %vm397_vm0, %v5278_v40  ;;  %4715 = vmatprep.mubr.msk.bf16.mxu0 %vm397_vm0, %v5284_v43 }
 0x100   : > { %v5605_v26 = vadd.f32 %v4533_v27, %v4497_v22  ;;  %v560_v36 = vpop.f32.mrf.mxu0  ;;  %4751 = vmatprep.mubr.msk.bf16.mxu1 %vm397_vm0, %v5282_v42  ;;  %v4102_v42 = vld [vmem:[%s5097_s16 + $0x198] sm:$0xff] }
 0x101   : > { %v781_v0 = vpop.f32.mrf.mxu1 }
 0x102   : > { %v5609_v1 = vadd.f32 %v781_v0, %v560_v36  ;;  %v4498_v41 = vpop.f32.mrf.mxu0 }
 0x103   : > { %v4534_v5 = vpop.f32.mrf.mxu1 }
 0x104   : > { %v5611_v19 = vadd.f32 %v4534_v5, %v4498_v41  ;;  %v5613_v40 = vpop.f32.mrf.mxu0  ;;  %v4186_v41 = vld [vmem:[%s5097_s16 + $0x7a] sm:$0xff]  ;;  %v4187_v5 = vld [vmem:[%s5097_s16 + $0x82] sm:$0xff] }
 0x105   : > { %v5615_v43 = vpop.f32.mrf.mxu1 }
 0x106   : > { %v4501_v46 = vpop.f32.mrf.mxu0  ;;  %4716 = vmatmul.mubr.msk.bf16.gmra.mxu0 %vm397_vm0, %v5302_v55 }
 0x107   : > { %v4537_v11 = vpop.f32.mrf.mxu1  ;;  %4752 = vmatmul.mubr.msk.bf16.gmra.mxu1 %vm397_vm0, %v5300_v54  ;;  %4719 = vmatprep.mubr.msk.bf16.mxu0 %vm397_vm0, %v5429_v32  ;;  %v2101_v54 = vpack.c.bf16 %v4103_v45, %v4102_v42  ;;  %v4189_v42 = vld [vmem:[%s5097_s16 + $0x9a] sm:$0xff] }
 0x108   : > { %v5625_v48 = vadd.f32 %v4537_v11, %v4501_v46  ;;  %v576_v17 = vpop.f32.mrf.mxu0  ;;  %4755 = vmatprep.mubr.msk.bf16.mxu1 %vm397_vm0, %v5502_v28  ;;  %v4188_v11 = vld [vmem:[%s5097_s16 + $0x92] sm:$0xff] }
 0x109   : > { %v797_v30 = vpop.f32.mrf.mxu1 }
 0x10a   : > { %v5631_v55 = vadd.f32 %v797_v30, %v576_v17  ;;  %v4502_v60 = vpop.f32.mrf.mxu0  ;;  %v2701_v30 = vpack.c.bf16 %v4187_v5, %v4186_v41 }
 0x10b   : > { %v4538_v37 = vpop.f32.mrf.mxu1 }
 0x10c   : > { %v5633_v32 = vadd.f32 %v4538_v37, %v4502_v60  ;;  %v5635_v62 = vpop.f32.mrf.mxu0 }
 0x10d   : > { %v5637_v15 = vpop.f32.mrf.mxu1 }
 0x10e   : > { %v4505_v2 = vpop.f32.mrf.mxu0  ;;  %4720 = vmatmul.mubr.msk.bf16.gmra.mxu0 %vm397_vm0, %v2101_v54  ;;  %v2702_v54 = vpack.c.bf16 %v4189_v42, %v4188_v11 }
 0x10f   : > { %v4541_v28 = vpop.f32.mrf.mxu1  ;;  %4756 = vmatmul.mubr.msk.bf16.gmra.mxu1 %vm397_vm0, %v2407_v58  ;;  %4763 = vmatprep.mubr.msk.bf16.mxu0 %vm397_vm0, %v5317_v3 }
 0x110   : > { %v5643_v14 = vadd.f32 %v4541_v28, %v4505_v2  ;;  %v592_v16 = vpop.f32.mrf.mxu0 }
 0x111   : > { %v813_v7 = vpop.f32.mrf.mxu1 }
 0x112   : > { %v5647_v10 = vadd.f32 %v813_v7, %v592_v16  ;;  %v4506_v51 = vpop.f32.mrf.mxu0 }
 0x113   : > { %v4542_v23 = vpop.f32.mrf.mxu1 }
 0x114   : > { %v5649_v56 = vadd.f32 %v4542_v23, %v4506_v51  ;;  %v5651_v22 = vpop.f32.mrf.mxu0  ;;  %v4192_v51 = vld [vmem:[%s5097_s16 + $0xc2] sm:$0xff]  ;;  %v4193_v23 = vld [vmem:[%s5097_s16 + $0xca] sm:$0xff] }
 0x115   : > { %v5653_v3 = vpop.f32.mrf.mxu1 }
 0x116   : > { %v4549_v27 = vpop.f32.mrf.mxu0  ;;  %4764 = vmatmul.mubr.msk.bf16.vlgmr.msra.gmra.mxu0 %vm397_vm0, %v5344_v59 }
 0x117   : > { %v1104_v36 = vadd.f32 %v4549_v27, %v5521_v50  ;;  %v4585_v0 = vpop.f32.mrf.mxu1  ;;  %4767 = vmatprep.mubr.msk.bf16.mxu0 %vm397_vm0, %v2700_v34 }
 0x118   : > { %v975_v46 = vpop.f32.mrf.mxu0 }
 0x119   : > { %v1102_v45 = vadd.f32 %v975_v46, %v5527_v24  ;;  %v5664_v17 = vadd.f32 %v4585_v0, %v1104_v36  ;;  %v1282_v18 = vpop.f32.mrf.mxu1  ;;  %v2703_v0 = vpack.c.bf16 %v4191_v39, %v4190_v8  ;;  %v2704_v46 = vpack.c.bf16 %v4193_v23, %v4192_v51 }
 0x11a   : > { %v4550_v21 = vpop.f32.mrf.mxu0 }
 0x11b   : > { %v1105_v59 = vadd.f32 %v4550_v21, %v5529_v53  ;;  %v5667_v50 = vadd.f32 %v1282_v18, %v1102_v45  ;;  %v4586_v60 = vpop.f32.mrf.mxu1 }
 0x11c   : > { %v978_v37 = vpop.f32.mrf.mxu0 }
 0x11d   : > { %v5670_v58 = vadd.f32 %v978_v37, %v5531_v57  ;;  %v5672_v24 = vadd.f32 %v4586_v60, %v1105_v59  ;;  %v5674_v2 = vpop.f32.mrf.mxu1  ;;  %v4195_v59 = vld [vmem:[%s5097_s16 + $0xe2] sm:$0xff]  ;;  %v4197_v37 = vld [vmem:[%s5097_s16 + $0xfa] sm:$0xff] }
 0x11e   : > { %v4553_v28 = vpop.f32.mrf.mxu0  ;;  %4768 = vmatmul.mubr.msk.bf16.gmra.mxu0 %vm397_vm0, %v2701_v30  ;;  %v4194_v30 = vld [vmem:[%s5097_s16 + $0xda] sm:$0xff] }
 0x11f   : > { %v1108_v16 = vadd.f32 %v4553_v28, %v5539_v35  ;;  %v4589_v53 = vpop.f32.mrf.mxu1  ;;  %4771 = vmatprep.mubr.msk.bf16.mxu0 %vm397_vm0, %v2702_v54  ;;  %v4196_v54 = vld [vmem:[%s5097_s16 + $0xf2] sm:$0xff]  ;;  %v2705_v39 = vpack.c.bf16 %v4195_v59, %v4194_v30 }
 0x120   : > { %v991_v7 = vpop.f32.mrf.mxu0  ;;  %v2706_v23 = vpack.c.bf16 %v4197_v37, %v4196_v54 }
 0x121   : > { %v1106_v57 = vadd.f32 %v991_v7, %v5543_v4  ;;  %v5684_v34 = vadd.f32 %v4589_v53, %v1108_v16  ;;  %v1298_v27 = vpop.f32.mrf.mxu1  ;;  %v4858_v53 = vld [vmem:[%s6553_s4 + $0x8] sm:$0xff]  }
 0x122   : > { %v4554_v36 = vpop.f32.mrf.mxu0  ;;  %4795 = vmatprep.subr.bf16.mxu1 %v4858_v53 }
 0x123   : > { %v1109_v41 = vadd.f32 %v4554_v36, %v5545_v6  ;;  %v5687_v35 = vadd.f32 %v1298_v27, %v1106_v57  ;;  %v4590_v5 = vpop.f32.mrf.mxu1  ;;  %4796 = vmatpush3.bf16.msra.mxu1 %v4858_v53 }
 0x124   : > { %v994_v11 = vpop.f32.mrf.mxu0 }
 0x125   : > { %v5690_v42 = vadd.f32 %v994_v11, %v5547_v12  ;;  %v5692_v4 = vadd.f32 %v4590_v5, %v1109_v41  ;;  %v5694_v45 = vpop.f32.mrf.mxu1  ;;  %v4198_v5 = vld [vmem:[%s5097_s16 + $0x10a] sm:$0xff] }
 0x126   : > { %v4557_v18 = vpop.f32.mrf.mxu0  ;;  %4772 = vmatmul.mubr.msk.bf16.gmra.mxu0 %vm397_vm0, %v2703_v0 }
 0x127   : > { %v1112_v21 = vadd.f32 %v4557_v18, %v5555_v47  ;;  %v4593_v6 = vpop.f32.mrf.mxu1  ;;  %4775 = vmatprep.mubr.msk.bf16.mxu0 %vm397_vm0, %v2704_v46  ;;  %v4199_v46 = vld [vmem:[%s5097_s16 + $0x112] sm:$0xff]  ;;  %v4200_v18 = vld [vmem:[%s5097_s16 + $0x122] sm:$0xff] }
 0x128   : > { %v1007_v60 = vpop.f32.mrf.mxu0 }
 0x129   : > { %v1110_v12 = vadd.f32 %v1007_v60, %v5559_v20  ;;  %v5704_v28 = vadd.f32 %v4593_v6, %v1112_v21  ;;  %v1314_v16 = vpop.f32.mrf.mxu1  ;;  %v4201_v21 = vld [vmem:[%s5097_s16 + $0x12a] sm:$0xff]  ;;  %v2707_v60 = vpack.c.bf16 %v4199_v46, %v4198_v5 }
 0x12a   : > { %v4558_v8 = vpop.f32.mrf.mxu0 }
 0x12b   : > { %v1113_v47 = vadd.f32 %v4558_v8, %v5561_v31  ;;  %v5710_v7 = vadd.f32 %v1314_v16, %v1110_v12  ;;  %v4594_v51 = vpop.f32.mrf.mxu1  ;;  %v2708_v12 = vpack.c.bf16 %v4201_v21, %v4200_v18  ;;  %v769_v18 = vadd.f32 %v5597_v63, %v5595_v25  ;;  %v4207_v63 = vld [vmem:[%s5097_s16 + $0x172] sm:$0xff] }
 0x12c   : > { %v1010_v20 = vpop.f32.mrf.mxu0 }
 0x12d   : > { %v5713_v57 = vadd.f32 %v1010_v20, %v5563_v44  ;;  %v5715_v27 = vadd.f32 %v4594_v51, %v1113_v47  ;;  %v5717_v36 = vpop.f32.mrf.mxu1  ;;  %v4202_v51 = vld [vmem:[%s5097_s16 + $0x13a] sm:$0xff] }
 0x12e   : > { %v4561_v0 = vpop.f32.mrf.mxu0  ;;  %4776 = vmatmul.mubr.msk.bf16.gmra.mxu0 %vm397_vm0, %v2705_v39 }
 0x12f   : > { %v1116_v31 = vadd.f32 %v4561_v0, %v5571_v61  ;;  %v4597_v41 = vpop.f32.mrf.mxu1  ;;  %4779 = vmatprep.mubr.msk.bf16.mxu0 %vm397_vm0, %v2706_v23  ;;  %v4203_v23 = vld [vmem:[%s5097_s16 + $0x142] sm:$0xff]  ;;  %v4204_v0 = vld [vmem:[%s5097_s16 + $0x152] sm:$0xff] }
 0x130   : > { %v1023_v11 = vpop.f32.mrf.mxu0 }
 0x131   : > { %v1114_v44 = vadd.f32 %v1023_v11, %v5575_v13  ;;  %v5727_v6 = vadd.f32 %v4597_v41, %v1116_v31  ;;  %v1330_v30 = vpop.f32.mrf.mxu1  ;;  %v4205_v31 = vld [vmem:[%s5097_s16 + $0x15a] sm:$0xff]  ;;  %v2709_v11 = vpack.c.bf16 %v4203_v23, %v4202_v51 }
 0x132   : > { %v4562_v59 = vpop.f32.mrf.mxu0 }
 0x133   : > { %v1117_v54 = vadd.f32 %v4562_v59, %v5577_v38  ;;  %v5730_v61 = vadd.f32 %v1330_v30, %v1114_v44  ;;  %v4598_v37 = vpop.f32.mrf.mxu1  ;;  %v2710_v30 = vpack.c.bf16 %v4205_v31, %v4204_v0 }
 0x134   : > { %v1026_v16 = vpop.f32.mrf.mxu0 }
 0x135   : > { %v5733_v53 = vadd.f32 %v1026_v16, %v5579_v49  ;;  %v5735_v13 = vadd.f32 %v4598_v37, %v1117_v54  ;;  %v5737_v8 = vpop.f32.mrf.mxu1 }
 0x136   : > { %v4565_v39 = vpop.f32.mrf.mxu0  ;;  %4780 = vmatmul.mubr.msk.bf16.gmra.mxu0 %vm397_vm0, %v2707_v60 }
 0x137   : > { %v1120_v47 = vadd.f32 %v4565_v39, %v5587_v9  ;;  %v4601_v38 = vpop.f32.mrf.mxu1  ;;  %4783 = vmatprep.mubr.msk.bf16.mxu0 %vm397_vm0, %v2708_v12 }
 0x138   : > { %v1039_v20 = vpop.f32.mrf.mxu0 }
 0x139   : > { %v1118_v49 = vadd.f32 %v1039_v20, %v5591_v52  ;;  %v5747_v41 = vadd.f32 %v4601_v38, %v1120_v47  ;;  %v1346_v5 = vpop.f32.mrf.mxu1 }
 0x13a   : > { %v4566_v46 = vpop.f32.mrf.mxu0 }
 0x13b   : > { %v1121_v9 = vadd.f32 %v4566_v46, %v5593_v33  ;;  %v5752_v21 = vadd.f32 %v1346_v5, %v1118_v49  ;;  %v4602_v44 = vpop.f32.mrf.mxu1  ;;  %v4206_v33 = vld [vmem:[%s5097_s16 + $0x16a] sm:$0xff] }
 0x13c   : > { %v1042_v59 = vpop.f32.mrf.mxu0  ;;  %v2711_v20 = vpack.c.bf16 %v4207_v63, %v4206_v33 }
 0x13d   : > { %v1119_v60 = vadd.f32 %v1042_v59, %v769_v18  ;;  %v5754_v54 = vadd.f32 %v4602_v44, %v1121_v9  ;;  %v1349_v52 = vpop.f32.mrf.mxu1 }
 0x13e   : > { %v4569_v37 = vpop.f32.mrf.mxu0  ;;  %4784 = vmatmul.mubr.msk.bf16.gmra.mxu0 %vm397_vm0, %v2709_v11 }
 0x13f   : > { %v1124_v12 = vadd.f32 %v4569_v37, %v5605_v26  ;;  %v5758_v16 = vadd.f32 %v1349_v52, %v1119_v60  ;;  %v4605_v25 = vpop.f32.mrf.mxu1  ;;  %4787 = vmatprep.mubr.msk.bf16.mxu0 %vm397_vm0, %v2710_v30  ;;  %v785_v26 = vadd.f32 %v5615_v43, %v5613_v40  ;;  %v4211_v40 = vld [vmem:[%s5097_s16 + $0x1a2] sm:$0xff] }
 0x140   : > { %v1055_v39 = vpop.f32.mrf.mxu0  ;;  %v4859_v37 = vld [vmem:[%s6553_s4] sm:$0xff]  }
 0x141   : > { %v1122_v47 = vadd.f32 %v1055_v39, %v5609_v1  ;;  %v5764_v38 = vadd.f32 %v4605_v25, %v1124_v12  ;;  %v1362_v51 = vpop.f32.mrf.mxu1  ;;  %v801_v25 = vadd.f32 %v5637_v15, %v5635_v62  ;;  %4797 = vmatprep.subr.bf16.mxu1 %v4859_v37 }
 0x142   : > { %v4570_v23 = vpop.f32.mrf.mxu0  ;;  %4798 = vmatpush3.bf16.msra.mxu1 %v4859_v37 }
 0x143   : > { %v1125_v0 = vadd.f32 %v4570_v23, %v5611_v19  ;;  %v5769_v31 = vadd.f32 %v1362_v51, %v1122_v47  ;;  %v4606_v49 = vpop.f32.mrf.mxu1  ;;  %v4210_v19 = vld [vmem:[%s5097_s16 + $0x19a] sm:$0xff] }
 0x144   : > { %v1058_v5 = vpop.f32.mrf.mxu0 }
 0x145   : > { %v1123_v46 = vadd.f32 %v1058_v5, %v785_v26  ;;  %v5771_v11 = vadd.f32 %v4606_v49, %v1125_v0  ;;  %v1365_v1 = vpop.f32.mrf.mxu1 }
 0x146   : > { %v4573_v18 = vpop.f32.mrf.mxu0  ;;  %4788 = vmatmul.mubr.msk.bf16.gmra.mxu0 %vm397_vm0, %v2711_v20 }
 0x147   : > { %v1128_v9 = vadd.f32 %v4573_v18, %v5625_v48  ;;  %v5775_v44 = vadd.f32 %v1365_v1, %v1123_v46  ;;  %v4609_v30 = vpop.f32.mrf.mxu1  ;;  %4791 = vmatprep.mubr.msk.bf16.mxu0 %vm397_vm0, %v5504_v29  ;;  %v2713_v48 = vpack.c.bf16 %v4211_v40, %v4210_v19  ;;  %v817_v46 = vadd.f32 %v5653_v3, %v5651_v22 }
 0x148   : > { %v1071_v43 = vpop.f32.mrf.mxu0 }
 0x149   : > { %v1126_v59 = vadd.f32 %v1071_v43, %v5631_v55  ;;  %v5782_v60 = vadd.f32 %v4609_v30, %v1128_v9  ;;  %v1378_v52 = vpop.f32.mrf.mxu1 }
 0x14a   : > { %v4574_v12 = vpop.f32.mrf.mxu0 }
 0x14b   : > { %v1129_v33 = vadd.f32 %v4574_v12, %v5633_v32  ;;  %v5790_v29 = vadd.f32 %v1378_v52, %v1126_v59  ;;  %v4610_v63 = vpop.f32.mrf.mxu1 }
 0x14c   : > { %v1074_v39 = vpop.f32.mrf.mxu0 }
 0x14d   : > { %v1127_v55 = vadd.f32 %v1074_v39, %v801_v25  ;;  %v5792_v47 = vadd.f32 %v4610_v63, %v1129_v33  ;;  %v1381_v51 = vpop.f32.mrf.mxu1 }
 0x14e   : > { %v4577_v23 = vpop.f32.mrf.mxu0  ;;  %4792 = vmatmul.mubr.msk.bf16.gmra.mxu0 %vm397_vm0, %v2713_v48  ;;  %v1410_v48 = vadd.f32 %v5674_v2, %v5670_v58 }
 0x14f   : > { %v1132_v20 = vadd.f32 %v4577_v23, %v5643_v14  ;;  %v5796_v26 = vadd.f32 %v1381_v51, %v1127_v55  ;;  %v4613_v62 = vpop.f32.mrf.mxu1 }
 0x150   : > { %v1087_v15 = vpop.f32.mrf.mxu0 }
 0x151   : > { %v1130_v32 = vadd.f32 %v1087_v15, %v5647_v10  ;;  %v5799_v0 = vadd.f32 %v4613_v62, %v1132_v20  ;;  %v1394_v49 = vpop.f32.mrf.mxu1 }
 0x152   : > { %v4578_v5 = vpop.f32.mrf.mxu0 }
 0x153   : > { %v1133_v1 = vadd.f32 %v4578_v5, %v5649_v56  ;;  %v5804_v18 = vadd.f32 %v1394_v49, %v1130_v32  ;;  %v4614_v9 = vpop.f32.mrf.mxu1  ;;  %v1414_v32 = vadd.f32 %v5694_v45, %v5690_v42 }
 0x154   : > { %v1090_v30 = vpop.f32.mrf.mxu0 }
 0x155   : > { %v1131_v14 = vadd.f32 %v1090_v30, %v817_v46  ;;  %v5806_v19 = vadd.f32 %v4614_v9, %v1133_v1  ;;  %v1397_v40 = vpop.f32.mrf.mxu1 }
 0x156   : > { %v4621_v43 = vpop.f32.mrf.mxu0 }
 0x157   : > { %v5808_v59 = vadd.f32 %v1397_v40, %v1131_v14  ;;  %v1717_v10 = vadd.f32 %v4621_v43, %v5664_v17  ;;  %v4657_v52 = vpop.f32.mrf.mxu1 }
 0x158   : > { %v1588_v37 = vpop.f32.mrf.mxu0 }
 0x159   : > { %v1715_v12 = vadd.f32 %v1588_v37, %v5667_v50  ;;  %v5812_v22 = vadd.f32 %v4657_v52, %v1717_v10  ;;  %v1894_v56 = vpop.f32.mrf.mxu1  ;;  %v1418_v52 = vadd.f32 %v5717_v36, %v5713_v57 }
 0x15a   : > { %v4622_v3 = vpop.f32.mrf.mxu0 }
 0x15b   : > { %v1718_v25 = vadd.f32 %v4622_v3, %v5672_v24  ;;  %v5817_v33 = vadd.f32 %v1894_v56, %v1715_v12  ;;  %v4658_v63 = vpop.f32.mrf.mxu1 }
 0x15c   : > { %v1591_v39 = vpop.f32.mrf.mxu0 }
 0x15d   : > { %v5819_v55 = vadd.f32 %v1591_v39, %v1410_v48  ;;  %v5821_v17 = vadd.f32 %v4658_v63, %v1718_v25  ;;  %v5823_v51 = vpop.f32.mrf.mxu1 }
 0x15e   : > { %v4625_v50 = vpop.f32.mrf.mxu0 }
 0x15f   : > { %v1721_v23 = vadd.f32 %v4625_v50, %v5684_v34  ;;  %v4661_v20 = vpop.f32.mrf.mxu1 }
 0x160   : > { %v1604_v62 = vpop.f32.mrf.mxu0 }
 0x161   : > { %v1719_v15 = vadd.f32 %v1604_v62, %v5687_v35  ;;  %v5827_v58 = vadd.f32 %v4661_v20, %v1721_v23  ;;  %v1910_v24 = vpop.f32.mrf.mxu1  ;;  %v1422_v20 = vadd.f32 %v5737_v8, %v5733_v53 }
 0x162   : > { %v4626_v2 = vpop.f32.mrf.mxu0 }
 0x163   : > { %v1722_v49 = vadd.f32 %v4626_v2, %v5692_v4  ;;  %v5832_v5 = vadd.f32 %v1910_v24, %v1719_v15  ;;  %v4662_v46 = vpop.f32.mrf.mxu1 }
 0x164   : > { %v1607_v1 = vpop.f32.mrf.mxu0 }
 0x165   : > { %v5834_v9 = vadd.f32 %v1607_v1, %v1414_v32  ;;  %v5836_v34 = vadd.f32 %v4662_v46, %v1722_v49  ;;  %v5838_v30 = vpop.f32.mrf.mxu1 }
 0x166   : > { %v4629_v35 = vpop.f32.mrf.mxu0 }
 0x167   : > { %v1725_v14 = vadd.f32 %v4629_v35, %v5704_v28  ;;  %v4665_v40 = vpop.f32.mrf.mxu1 }
 0x168   : > { %v1620_v43 = vpop.f32.mrf.mxu0 }
 0x169   : > { %v1723_v10 = vadd.f32 %v1620_v43, %v5710_v7  ;;  %v5842_v42 = vadd.f32 %v4665_v40, %v1725_v14  ;;  %v1926_v4 = vpop.f32.mrf.mxu1 }
 0x16a   : > { %v4630_v45 = vpop.f32.mrf.mxu0 }
 0x16b   : > { %v1726_v37 = vadd.f32 %v4630_v45, %v5715_v27  ;;  %v5847_v12 = vadd.f32 %v1926_v4, %v1723_v10  ;;  %v4666_v56 = vpop.f32.mrf.mxu1 }
 0x16c   : > { %v1623_v3 = vpop.f32.mrf.mxu0 }
 0x16d   : > { %v5849_v48 = vadd.f32 %v1623_v3, %v1418_v52  ;;  %v5851_v28 = vadd.f32 %v4666_v56, %v1726_v37  ;;  %v5853_v25 = vpop.f32.mrf.mxu1 }
 0x16e   : > { %v4633_v7 = vpop.f32.mrf.mxu0 }
 0x16f   : > { %v1729_v63 = vadd.f32 %v4633_v7, %v5727_v6  ;;  %v4669_v39 = vpop.f32.mrf.mxu1 }
 0x170   : > { %v1636_v50 = vpop.f32.mrf.mxu0 }
 0x171   : > { %v1727_v23 = vadd.f32 %v1636_v50, %v5730_v61  ;;  %v5857_v57 = vadd.f32 %v4669_v39, %v1729_v63  ;;  %v1942_v27 = vpop.f32.mrf.mxu1 }
 0x172   : > { %v4634_v36 = vpop.f32.mrf.mxu0 }
 0x173   : > { %v1730_v62 = vadd.f32 %v4634_v36, %v5735_v13  ;;  %v5862_v15 = vadd.f32 %v1942_v27, %v1727_v23  ;;  %v4670_v24 = vpop.f32.mrf.mxu1 }
 0x174   : > { %v1639_v2 = vpop.f32.mrf.mxu0 }
 0x175   : > { %v5864_v32 = vadd.f32 %v1639_v2, %v1422_v20  ;;  %v5866_v6 = vadd.f32 %v4670_v24, %v1730_v62  ;;  %v5868_v49 = vpop.f32.mrf.mxu1 }
 0x176   : > { %v4637_v61 = vpop.f32.mrf.mxu0 }
 0x177   : > { %v1733_v46 = vadd.f32 %v4637_v61, %v5747_v41  ;;  %v4673_v1 = vpop.f32.mrf.mxu1 }
 0x178   : > { %v1652_v35 = vpop.f32.mrf.mxu0 }
 0x179   : > { %v1731_v14 = vadd.f32 %v1652_v35, %v5752_v21  ;;  %v5872_v53 = vadd.f32 %v4673_v1, %v1733_v46  ;;  %v1958_v13 = vpop.f32.mrf.mxu1 }
 0x17a   : > { %v4638_v8 = vpop.f32.mrf.mxu0 }
 0x17b   : > { %v1734_v40 = vadd.f32 %v4638_v8, %v5754_v54  ;;  %v5875_v43 = vadd.f32 %v1958_v13, %v1731_v14  ;;  %v4674_v10 = vpop.f32.mrf.mxu1 }
 0x17c   : > { %v1655_v4 = vpop.f32.mrf.mxu0 }
 0x17d   : > { %v5878_v45 = vadd.f32 %v1655_v4, %v5758_v16  ;;  %v5880_v52 = vadd.f32 %v4674_v10, %v1734_v40  ;;  %v5882_v41 = vpop.f32.mrf.mxu1 }
 0x17e   : > { %v4641_v37 = vpop.f32.mrf.mxu0 }
 0x17f   : > { %v1737_v21 = vadd.f32 %v4641_v37, %v5764_v38  ;;  %v4677_v56 = vpop.f32.mrf.mxu1 }
 0x180   : > { %v1668_v3 = vpop.f32.mrf.mxu0 }
 0x181   : > { %v1735_v7 = vadd.f32 %v1668_v3, %v5769_v31  ;;  %v5886_v63 = vadd.f32 %v4677_v56, %v1737_v21  ;;  %v1974_v54 = vpop.f32.mrf.mxu1 }
 0x182   : > { %v4642_v39 = vpop.f32.mrf.mxu0 }
 0x183   : > { %v1738_v50 = vadd.f32 %v4642_v39, %v5771_v11  ;;  %v5889_v23 = vadd.f32 %v1974_v54, %v1735_v7  ;;  %v4678_v16 = vpop.f32.mrf.mxu1 }
 0x184   : > { %v1671_v27 = vpop.f32.mrf.mxu0 }
 0x185   : > { %v5892_v36 = vadd.f32 %v1671_v27, %v5775_v44  ;;  %v5894_v20 = vadd.f32 %v4678_v16, %v1738_v50  ;;  %v5896_v38 = vpop.f32.mrf.mxu1 }
 0x186   : > { %v4645_v62 = vpop.f32.mrf.mxu0 }
 0x187   : > { %v1741_v31 = vadd.f32 %v4645_v62, %v5782_v60  ;;  %v4681_v24 = vpop.f32.mrf.mxu1 }
 0x188   : > { %v1684_v2 = vpop.f32.mrf.mxu0 }
 0x189   : > { %v1739_v61 = vadd.f32 %v1684_v2, %v5790_v29  ;;  %v5900_v46 = vadd.f32 %v4681_v24, %v1741_v31  ;;  %v1990_v11 = vpop.f32.mrf.mxu1 }
 0x18a   : > { %v4646_v1 = vpop.f32.mrf.mxu0 }
 0x18b   : > { %v1742_v35 = vadd.f32 %v4646_v1, %v5792_v47  ;;  %v5903_v14 = vadd.f32 %v1990_v11, %v1739_v61  ;;  %v4682_v44 = vpop.f32.mrf.mxu1 }
 0x18c   : > { %v1687_v13 = vpop.f32.mrf.mxu0 }
 0x18d   : > { %v5906_v8 = vadd.f32 %v1687_v13, %v5796_v26  ;;  %v5908_v40 = vadd.f32 %v4682_v44, %v1742_v35  ;;  %v5910_v60 = vpop.f32.mrf.mxu1 }
 0x18e   : > { %6558 = vst [vmem:[#allocation3_spill] sm:$0xff] %v5910_v60  ;;  %v4649_v10 = vpop.f32.mrf.mxu0 }
 0x18f   : > { %6557 = vst [vmem:[#allocation2_spill] sm:$0xff] %v5906_v8  ;;  %v1745_v29 = vadd.f32 %v4649_v10, %v5799_v0  ;;  %v4685_v4 = vpop.f32.mrf.mxu1 }
 0x190   : > { %v1700_v37 = vpop.f32.mrf.mxu0 }
 0x191   : > { %v1743_v21 = vadd.f32 %v1700_v37, %v5804_v18  ;;  %v5914_v56 = vadd.f32 %v4685_v4, %v1745_v29  ;;  %v2006_v47 = vpop.f32.mrf.mxu1 }
 0x192   : > { %v4650_v3 = vpop.f32.mrf.mxu0 }
 0x193   : > { %v1746_v7 = vadd.f32 %v4650_v3, %v5806_v19  ;;  %v5917_v54 = vadd.f32 %v2006_v47, %v1743_v21  ;;  %v4686_v26 = vpop.f32.mrf.mxu1 }
 0x194   : > { %v1703_v39 = vpop.f32.mrf.mxu0 }
 0x195   : > { %v5920_v50 = vadd.f32 %v1703_v39, %v5808_v59  ;;  %v5922_v16 = vadd.f32 %v4686_v26, %v1746_v7  ;;  %v5924_v0 = vpop.f32.mrf.mxu1 }
 0x196   : > { %6560 = vst [vmem:[#allocation5_spill] sm:$0xff] %v5924_v0  ;;  %v4693_v27 = vpop.f32.mrf.mxu0 }
 0x197   : > { %6559 = vst [vmem:[#allocation4_spill] sm:$0xff] %v5920_v50  ;;  %v5927_v18 = vadd.f32 %v4693_v27, %v5812_v22  ;;  %v5929_v62 = vpop.f32.mrf.mxu1 }
 0x198   : > { %v2201_v31 = vpop.f32.mrf.mxu0 }
 0x199   : > { %v5932_v19 = vadd.f32 %v2201_v31, %v5817_v33  ;;  %v5934_v24 = vpop.f32.mrf.mxu1 }
 0x19a   : > { %v4694_v2 = vpop.f32.mrf.mxu0 }
 0x19b   : > { %v5937_v59 = vadd.f32 %v4694_v2, %v5821_v17  ;;  %v5941_v11 = vpop.f32.mrf.mxu1 }
 0x19c   : > { %v5939_v61 = vpop.f32.mrf.mxu0 }
 0x19d   : > { %v5946_v35 = vpop.f32.mrf.mxu1 }
 0x19e   : > { %v4697_v1 = vpop.f32.mrf.mxu0 }
 0x19f   : > { %v5944_v22 = vadd.f32 %v4697_v1, %v5827_v58  ;;  %v5954_v17 = vpop.f32.mrf.mxu1 }
 0x1a0   : > { %v2217_v44 = vpop.f32.mrf.mxu0 }
 0x1a1   : > { %v5949_v33 = vadd.f32 %v2217_v44, %v5832_v5  ;;  %v5961_v58 = vpop.f32.mrf.mxu1 }
 0x1a2   : > { %v4698_v13 = vpop.f32.mrf.mxu0 }
 0x1a3   : > { %v5952_v10 = vadd.f32 %v4698_v13, %v5836_v34  ;;  %v5969_v34 = vpop.f32.mrf.mxu1 }
 0x1a4   : > { %v5956_v29 = vpop.f32.mrf.mxu0 }
 0x1a6   : > { %v4701_v4 = vpop.f32.mrf.mxu0 }
 0x1a7   : > { %v5959_v37 = vadd.f32 %v4701_v4, %v5842_v42  ;;  %v5976_v42 = vpop.f32.mrf.mxu1 }
 0x1a8   : > { %v2233_v21 = vpop.f32.mrf.mxu0 }
 0x1a9   : > { %v5964_v47 = vadd.f32 %v2233_v21, %v5847_v12 }
 0x1aa   : > { %v4702_v5 = vpop.f32.mrf.mxu0 }
 0x1ab   : > { %v5967_v3 = vadd.f32 %v4702_v5, %v5851_v28  ;;  %v5984_v28 = vpop.f32.mrf.mxu1 }
 0x1ac   : > { %v5971_v7 = vpop.f32.mrf.mxu0 }
 0x1ae   : > { %v4705_v26 = vpop.f32.mrf.mxu0 }
 0x1af   : > { %v5974_v39 = vadd.f32 %v4705_v26, %v5857_v57  ;;  %v5991_v57 = vpop.f32.mrf.mxu1 }
 0x1b0   : > { %v2249_v27 = vpop.f32.mrf.mxu0 }
 0x1b1   : > { %v5979_v31 = vadd.f32 %v2249_v27, %v5862_v15 }
 0x1b2   : > { %v4706_v12 = vpop.f32.mrf.mxu0 }
 0x1b3   : > { %v5982_v2 = vadd.f32 %v4706_v12, %v5866_v6  ;;  %v5999_v6 = vpop.f32.mrf.mxu1 }
 0x1b4   : > { %v5986_v1 = vpop.f32.mrf.mxu0 }
 0x1b6   : > { %v4709_v44 = vpop.f32.mrf.mxu0 }
 0x1b7   : > { %v5989_v13 = vadd.f32 %v4709_v44, %v5872_v53  ;;  %v6006_v53 = vpop.f32.mrf.mxu1 }
 0x1b8   : > { %v2265_v4 = vpop.f32.mrf.mxu0 }
 0x1b9   : > { %v5994_v21 = vadd.f32 %v2265_v4, %v5875_v43 }
 0x1ba   : > { %v4710_v15 = vpop.f32.mrf.mxu0 }
 0x1bb   : > { %v5997_v5 = vadd.f32 %v4710_v15, %v5880_v52  ;;  %v6014_v52 = vpop.f32.mrf.mxu1 }
 0x1bc   : > { %v6001_v26 = vpop.f32.mrf.mxu0 }
 0x1be   : > { %v4713_v27 = vpop.f32.mrf.mxu0 }
 0x1bf   : > { %v6004_v12 = vadd.f32 %v4713_v27, %v5886_v63  ;;  %v6021_v63 = vpop.f32.mrf.mxu1 }
 0x1c0   : > { %v2281_v44 = vpop.f32.mrf.mxu0 }
 0x1c1   : > { %v6009_v0 = vadd.f32 %v2281_v44, %v5889_v23 }
 0x1c2   : > { %v4714_v43 = vpop.f32.mrf.mxu0 }
 0x1c3   : > { %v6012_v4 = vadd.f32 %v4714_v43, %v5894_v20  ;;  %v6029_v20 = vpop.f32.mrf.mxu1 }
 0x1c4   : > { %v6016_v15 = vpop.f32.mrf.mxu0 }
 0x1c5   : > { %6561 = vst [vmem:[#allocation6_spill] sm:$0xff] %v6012_v4  ;;  %6562 = vst [vmem:[#allocation7_spill] sm:$0xff] %v6016_v15 }
 0x1c6   : > { %v4717_v50 = vpop.f32.mrf.mxu0 }
 0x1c7   : > { %v6019_v60 = vadd.f32 %v4717_v50, %v5900_v46  ;;  %v6036_v46 = vpop.f32.mrf.mxu1 }
 0x1c8   : > { %v2297_v27 = vpop.f32.mrf.mxu0 }
 0x1c9   : > { %6563 = vst [vmem:[#allocation8_spill] sm:$0xff] %v6019_v60  ;;  %v6024_v8 = vadd.f32 %v2297_v27, %v5903_v14 }
 0x1ca   : > { %v4718_v23 = vpop.f32.mrf.mxu0 }
 0x1cb   : > { %v6027_v44 = vadd.f32 %v4718_v23, %v5908_v40  ;;  %v6044_v40 = vpop.f32.mrf.mxu1 }
 0x1cc   : > { %v6031_v43 = vpop.f32.mrf.mxu0 }
 0x1cd   : > { %6564 = vst [vmem:[#allocation9_spill] sm:$0xff] %v6027_v44  ;;  %6565 = vst [vmem:[#allocation10_spill] sm:$0xff] %v6031_v43  ;;  %v2636_v44 = vadd.f32 %v5929_v62, %v5927_v18  ;;  %v6065_v18 = vld [vmem:[%s6552_s3] ss:$0 sm:$0xff] }
 0x1ce   : > { %v4721_v4 = vpop.f32.mrf.mxu0 }
 0x1cf   : > { %v6034_v15 = vadd.f32 %v4721_v4, %v5914_v56  ;;  %v2022_v56 = vadd.f32 %v5823_v51, %v5819_v55  ;;  %v2637_v51 = vadd.f32 %v5941_v11, %v5937_v59  ;;  %v2640_v11 = vadd.f32 %v5954_v17, %v5944_v22 }
 0x1d0   : > { %v2313_v50 = vpop.f32.mrf.mxu0 }
 0x1d1   : > { %6566 = vst [vmem:[#allocation11_spill] sm:$0xff] %v6034_v15  ;;  %v6039_v60 = vadd.f32 %v2313_v50, %v5917_v54  ;;  %v6055_v54 = vld [vmem:[%s6551_s2] ss:$0 sm:$0xff] }
 0x1d2   : > { %v4722_v14 = vpop.f32.mrf.mxu0 }
 0x1d3   : > { %6567 = vst [vmem:[#allocation12_spill] sm:$0xff] %v6039_v60  ;;  %v6042_v27 = vadd.f32 %v4722_v14, %v5922_v16  ;;  %v2634_v16 = vadd.f32 %v5934_v24, %v5932_v19  ;;  %v2329_v14 = vadd.f32 %v5939_v61, %v2022_v56  ;;  %v2026_v19 = vadd.f32 %v5838_v30, %v5834_v9 }
 0x1d4   : > { %v6046_v23 = vpop.f32.mrf.mxu0 }
 0x1d5   : > { %6568 = vst [vmem:[#allocation13_spill] sm:$0xff] %v6042_v27  ;;  %6569 = vst [vmem:[#allocation14_spill] sm:$0xff] %v6046_v23  ;;  %v6060_v27 = vpop.f32.mrf.mxu1  ;;  %v2635_v56 = vadd.f32 %v5946_v35, %v2329_v14  ;;  %v2333_v43 = vadd.f32 %v5956_v29, %v2026_v19  ;;  %v2641_v29 = vadd.f32 %v5969_v34, %v5952_v10 }
 0x1d6   : > { %v4765_v4 = vpop.f32.mrf.mxu0 }
 0x1d7   : > { %v2942_v50 = vadd.f32 %v4765_v4, %v2636_v44  ;;  %v6075_v4 = vpop.f32.mrf.mxu1 }
 0x1d8   : > { %v2813_v55 = vpop.f32.mrf.mxu0 }
 0x1d9   : > { %v2981_v62 = vmul.f32 %v6055_v54, %v2942_v50  ;;  %v2940_v23 = vadd.f32 %v2813_v55, %v2634_v16  ;;  %v6089_v14 = vpop.f32.mrf.mxu1 }
 0x1da   : > { %v4766_v60 = vpop.f32.mrf.mxu0 }
 0x1db   : > { %v3020_v24 = vadd.f32 %v6065_v18, %v2981_v62  ;;  %v2979_v61 = vmul.f32 %v6055_v54, %v2940_v23  ;;  %v2943_v44 = vadd.f32 %v4766_v60, %v2637_v51  ;;  %v2638_v60 = vadd.f32 %v5961_v58, %v5949_v33 }
 0x1dc   : > { %v2816_v15 = vpop.f32.mrf.mxu0  ;;  %v2030_v23 = vadd.f32 %v5853_v25, %v5849_v48 }
 0x1dd   : > { %v2982_v59 = vmul.f32 %v6055_v54, %v2943_v44  ;;  %v3084_v16 = vmul.f32 0.01, %v3020_v24  ;;  %v3018_v9 = vadd.f32 %v6065_v18, %v2979_v61  ;;  %v2941_v30 = vadd.f32 %v2816_v15, %v2635_v56  ;;  %v6096_v44 = vpop.f32.mrf.mxu1 }
 0x1de   : > { %v4769_v50 = vpop.f32.mrf.mxu0  ;;  %vm3052_vm1 = vcmp.ge.f32.partialorder %v3020_v24, 0.0  ;;  %v2639_v15 = vadd.f32 %v5976_v42, %v2333_v43 }
 0x1df   : > { %v3021_v35 = vadd.f32 %v6065_v18, %v2982_v59  ;;  %v2980_v22 = vmul.f32 %v6055_v54, %v2941_v30  ;;  %v2946_v17 = vadd.f32 %v4769_v50, %v2640_v11  ;;  %v3116_v58 = vsel %vm3052_vm1, %v3020_v24, %v3084_v16 }
 0x1e0   : > { %v2829_v55 = vpop.f32.mrf.mxu0  ;;  %vm3050_vm3 = vcmp.ge.f32.partialorder %v3018_v9, 0.0  ;;  %v3082_v19 = vmul.f32 0.01, %v3018_v9  ;;  %v2644_v24 = vadd.f32 %v5984_v28, %v5959_v37  ;;  %v2642_v50 = vadd.f32 %v5991_v57, %v5964_v47 }
 0x1e1   : > { %vm3053_vm2 = vcmp.ge.f32.partialorder %v3021_v35, 0.0  ;;  %v3085_v51 = vmul.f32 0.01, %v3021_v35  ;;  %v2944_v33 = vadd.f32 %v2829_v55, %v2638_v60  ;;  %v3019_v62 = vadd.f32 %v6065_v18, %v2980_v22 }
 0x1e2   : > { %v2985_v48 = vmul.f32 %v6055_v54, %v2946_v17  ;;  %v4770_v25 = vpop.f32.mrf.mxu0  ;;  %v2337_v60 = vadd.f32 %v5971_v7, %v2030_v23  ;;  %v3114_v37 = vsel %vm3050_vm3, %v3018_v9, %v3082_v19  ;;  %v2645_v28 = vadd.f32 %v5999_v6, %v5967_v3 }
 0x1e3   : > { %v3117_v10 = vsel %vm3053_vm2, %v3021_v35, %v3085_v51  ;;  %v2983_v34 = vmul.f32 %v6055_v54, %v2944_v33  ;;  %v2947_v61 = vadd.f32 %v4770_v25, %v2641_v29  ;;  %vm3051_vm4 = vcmp.ge.f32.partialorder %v3019_v62, 0.0  ;;  %v6111_v51 = vpop.f32.mrf.mxu1 }
 0x1e4   : > { %v3147_v56 = vpack.c.bf16 %v3117_v10, %v3116_v58  ;;  %v3083_v42 = vmul.f32 0.01, %v3019_v62  ;;  %v3024_v43 = vadd.f32 %v6065_v18, %v2985_v48  ;;  %v2832_v59 = vpop.f32.mrf.mxu0  ;;  %v2034_v10 = vadd.f32 %v5868_v49, %v5864_v32 }
 0x1e5   : > { %v3022_v11 = vadd.f32 %v6065_v18, %v2983_v34  ;;  %v2986_v16 = vmul.f32 %v6055_v54, %v2947_v61  ;;  %v2945_v30 = vadd.f32 %v2832_v59, %v2639_v15  ;;  %v6121_v34 = vpop.f32.mrf.mxu1  ;;  %v2648_v59 = vadd.f32 %v6014_v52, %v5974_v39 }
 0x1e6   : > { %v3088_v35 = vmul.f32 0.01, %v3024_v43  ;;  %v4773_v29 = vpop.f32.mrf.mxu0  ;;  %v3115_v22 = vsel %vm3051_vm4, %v3019_v62, %v3083_v42  ;;  %vm3056_vm5 = vcmp.ge.f32.partialorder %v3024_v43, 0.0  ;;  %v2643_v62 = vadd.f32 %v6006_v53, %v2337_v60 }
 0x1e7   : > { %v3025_v17 = vadd.f32 %v6065_v18, %v2986_v16  ;;  %v2984_v55 = vmul.f32 %v6055_v54, %v2945_v30  ;;  %v3086_v15 = vmul.f32 0.01, %v3022_v11  ;;  %v2950_v33 = vadd.f32 %v4773_v29, %v2644_v24 }
 0x1e8   : > { %v2845_v47 = vpop.f32.mrf.mxu0  ;;  %v3146_v57 = vpack.c.bf16 %v3115_v22, %v3114_v37  ;;  %v3120_v48 = vsel %vm3056_vm5, %v3024_v43, %v3088_v35  ;;  %vm3054_vm7 = vcmp.ge.f32.partialorder %v3022_v11, 0.0  ;;  %v2646_v35 = vadd.f32 %v6021_v63, %v5979_v31 }
 0x1e9   : > { %vm3057_vm6 = vcmp.ge.f32.partialorder %v3025_v17, 0.0  ;;  %v3089_v7 = vmul.f32 0.01, %v3025_v17  ;;  %v3023_v23 = vadd.f32 %v6065_v18, %v2984_v55  ;;  %v2948_v58 = vadd.f32 %v2845_v47, %v2642_v50 }
 0x1ea   : > { %v2989_v9 = vmul.f32 %v6055_v54, %v2950_v33  ;;  %4799 = vmatprep.mubr.msk.bf16.mxu1 %vm397_vm0, %v3146_v57  ;;  %v4774_v3 = vpop.f32.mrf.mxu0  ;;  %v3118_v16 = vsel %vm3054_vm7, %v3022_v11, %v3086_v15  ;;  %v2341_v50 = vadd.f32 %v5986_v1, %v2034_v10  ;;  %v2038_v39 = vadd.f32 %v5882_v41, %v5878_v45  ;;  %v6137_v11 = vpop.f32.mrf.mxu1 }
 0x1eb   : > { %v3121_v6 = vsel %vm3057_vm6, %v3025_v17, %v3089_v7  ;;  %vm3055_vm8 = vcmp.ge.f32.partialorder %v3023_v23, 0.0  ;;  %v3087_v25 = vmul.f32 0.01, %v3023_v23  ;;  %v2987_v19 = vmul.f32 %v6055_v54, %v2948_v58  ;;  %4800 = vmatmul.mubr.msk.bf16.vlgmr.msra.gmra.mxu1 %vm397_vm0, %v3147_v56 }
 0x1ec   : > { %v3149_v53 = vpack.c.bf16 %v3121_v6, %v3120_v48  ;;  %v3028_v61 = vadd.f32 %v6065_v18, %v2989_v9  ;;  %v2951_v42 = vadd.f32 %v4774_v3, %v2645_v28  ;;  %v2848_v43 = vpop.f32.mrf.mxu0  ;;  %v2649_v52 = vadd.f32 %v6029_v20, %v5982_v2  ;;  %v6147_v47 = vpop.f32.mrf.mxu1 }
 0x1ed   : > { %v2949_v24 = vadd.f32 %v2848_v43, %v2643_v62  ;;  %v3119_v30 = vsel %vm3055_vm8, %v3023_v23, %v3087_v25  ;;  %v3026_v56 = vadd.f32 %v6065_v18, %v2987_v19  ;;  %v2647_v28 = vadd.f32 %v6036_v46, %v2341_v50 }
 0x1ee   : > { %v2990_v32 = vmul.f32 %v6055_v54, %v2951_v42  ;;  %v4777_v49 = vpop.f32.mrf.mxu0  ;;  %v3148_v60 = vpack.c.bf16 %v3119_v30, %v3118_v16  ;;  %v3092_v1 = vmul.f32 0.01, %v3028_v61  ;;  %vm3060_vm9 = vcmp.ge.f32.partialorder %v3028_v61, 0.0 }
 0x1ef   : > { %v2988_v29 = vmul.f32 %v6055_v54, %v2949_v24  ;;  %v2954_v22 = vadd.f32 %v4777_v49, %v2648_v59  ;;  %v3090_v45 = vmul.f32 0.01, %v3026_v56  ;;  %vm3058_vm12 = vcmp.ge.f32.partialorder %v3026_v56, 0.0 }
 0x1f0   : > { %v3029_v17 = vadd.f32 %v6065_v18, %v2990_v32  ;;  %v2861_v55 = vpop.f32.mrf.mxu0  ;;  %4803 = vmatprep.mubr.msk.bf16.mxu1 %vm397_vm0, %v3148_v60  ;;  %v3124_v57 = vsel %vm3060_vm9, %v3028_v61, %v3092_v1  ;;  %v2652_v46 = vadd.f32 %v6044_v40, %v5989_v13  ;;  %v2650_v62 = vadd.f32 %v6060_v27, %v5994_v21  ;;  %v6160_v21 = vpop.f32.mrf.mxu1 }
 0x1f1   : > { %v3027_v31 = vadd.f32 %v6065_v18, %v2988_v29  ;;  %v2993_v63 = vmul.f32 %v6055_v54, %v2954_v22  ;;  %v2952_v37 = vadd.f32 %v2861_v55, %v2646_v35  ;;  %v2345_v48 = vadd.f32 %v6001_v26, %v2038_v39 }
 0x1f2   : > { %vm3061_vm10 = vcmp.ge.f32.partialorder %v3029_v17, 0.0  ;;  %v3093_v41 = vmul.f32 0.01, %v3029_v17  ;;  %v4778_v2 = vpop.f32.mrf.mxu0  ;;  %v3122_v42 = vsel %vm3058_vm12, %v3026_v56, %v3090_v45  ;;  %v2042_v13 = vadd.f32 %v5896_v38, %v5892_v36 }
 0x1f3   : > { %vm3059_vm11 = vcmp.ge.f32.partialorder %v3027_v31, 0.0  ;;  %v3091_v20 = vmul.f32 0.01, %v3027_v31  ;;  %v3032_v15 = vadd.f32 %v6065_v18, %v2993_v63  ;;  %v2991_v33 = vmul.f32 %v6055_v54, %v2952_v37  ;;  %4804 = vmatmul.mubr.msk.bf16.gmra.mxu1 %vm397_vm0, %v3149_v53 }
 0x1f4   : > { %v3125_v7 = vsel %vm3061_vm10, %v3029_v17, %v3093_v41  ;;  %v2955_v23 = vadd.f32 %v4778_v2, %v2649_v52  ;;  %v2864_v58 = vpop.f32.mrf.mxu0  ;;  %v2653_v59 = vadd.f32 %v6075_v4, %v5997_v5  ;;  %v2651_v24 = vadd.f32 %v6089_v14, %v2345_v48  ;;  %v6173_v4 = vpop.f32.mrf.mxu1  ;;  %v6570_v52 = vld [vmem:[#allocation7_spill] sm:$0xff] }
 0x1f5   : > { %v3151_v9 = vpack.c.bf16 %v3125_v7, %v3124_v57  ;;  %v3096_v3 = vmul.f32 0.01, %v3032_v15  ;;  %v2953_v25 = vadd.f32 %v2864_v58, %v2647_v28  ;;  %v3123_v10 = vsel %vm3059_vm11, %v3027_v31, %v3091_v20  ;;  %v6571_v20 = vld [vmem:[#allocation2_spill] sm:$0xff] }
 0x1f6   : > { %v2994_v6 = vmul.f32 %v6055_v54, %v2955_v23  ;;  %v4781_v19 = vpop.f32.mrf.mxu0  ;;  %vm3064_vm13 = vcmp.ge.f32.partialorder %v3032_v15, 0.0  ;;  %v3030_v53 = vadd.f32 %v6065_v18, %v2991_v33  ;;  %v3150_v43 = vpack.c.bf16 %v3123_v10, %v3122_v42  ;;  %v6573_v7 = vld [vmem:[#allocation6_spill] sm:$0xff] }
 0x1f7   : > { %v2958_v61 = vadd.f32 %v4781_v19, %v2652_v46  ;;  %v2992_v27 = vmul.f32 %v6055_v54, %v2953_v25  ;;  %v3128_v50 = vsel %vm3064_vm13, %v3032_v15, %v3096_v3  ;;  %v2656_v22 = vadd.f32 %v6096_v44, %v6004_v12  ;;  %v6572_v12 = vld [vmem:[#allocation3_spill] sm:$0xff]  ;;  %v2606_v15 = vpop.f32.mrf.mxu1 }
 0x1f8   : > { %v3033_v26 = vadd.f32 %v6065_v18, %v2994_v6  ;;  %v2877_v40 = vpop.f32.mrf.mxu0  ;;  %4807 = vmatprep.mubr.msk.bf16.mxu1 %vm397_vm0, %v3150_v43  ;;  %v3094_v32 = vmul.f32 0.01, %v3030_v53  ;;  %vm3062_vm15 = vcmp.ge.f32.partialorder %v3030_v53, 0.0  ;;  %v2654_v39 = vadd.f32 %v6111_v51, %v6009_v0 }
 0x1f9   : > { %v2997_v16 = vmul.f32 %v6055_v54, %v2958_v61  ;;  %v2956_v30 = vadd.f32 %v2877_v40, %v2650_v62  ;;  %v3031_v36 = vadd.f32 %v6065_v18, %v2992_v27  ;;  %v2349_v1 = vadd.f32 %v6570_v52, %v2042_v13  ;;  %v6574_v13 = vld [vmem:[#allocation8_spill] sm:$0xff]  ;;  %v6575_v40 = vld [vmem:[#allocation10_spill] sm:$0xff] }
 0x1fa   : > { %vm3065_vm14 = vcmp.ge.f32.partialorder %v3033_v26, 0.0  ;;  %v3097_v56 = vmul.f32 0.01, %v3033_v26  ;;  %v4782_v38 = vpop.f32.mrf.mxu0  ;;  %v3126_v2 = vsel %vm3062_vm15, %v3030_v53, %v3094_v32  ;;  %v2046_v44 = vadd.f32 %v6572_v12, %v6571_v20  ;;  %v6578_v20 = vld [vmem:[#allocation5_spill] sm:$0xff] }
 0x1fb   : > { %v3036_v49 = vadd.f32 %v6065_v18, %v2997_v16  ;;  %v2995_v60 = vmul.f32 %v6055_v54, %v2956_v30  ;;  %4808 = vmatmul.mubr.msk.bf16.gmra.mxu1 %vm397_vm0, %v3151_v9  ;;  %v2959_v5 = vadd.f32 %v4782_v38, %v2653_v59  ;;  %vm3063_vm1 = vcmp.ge.f32.partialorder %v3031_v36, 0.0 }
 0x1fc   : > { %v3129_v14 = vsel %vm3065_vm14, %v3033_v26, %v3097_v56  ;;  %v3095_v35 = vmul.f32 0.01, %v3031_v36  ;;  %v2880_v29 = vpop.f32.mrf.mxu0  ;;  %v2657_v23 = vadd.f32 %v6121_v34, %v6573_v7  ;;  %v2655_v58 = vadd.f32 %v6137_v11, %v2349_v1  ;;  %v4757_v11 = vpop.f32.mrf.mxu1 }
 0x1fd   : > { %v3153_v17 = vpack.c.bf16 %v3129_v14, %v3128_v50  ;;  %v3100_v55 = vmul.f32 0.01, %v3036_v49  ;;  %v2998_v31 = vmul.f32 %v6055_v54, %v2959_v5  ;;  %v2957_v63 = vadd.f32 %v2880_v29, %v2651_v24  ;;  %v6576_v5 = vld [vmem:[#allocation9_spill] sm:$0xff] }
 0x1fe   : > { %v4785_v37 = vpop.f32.mrf.mxu0  ;;  %v3127_v28 = vsel %vm3063_vm1, %v3031_v36, %v3095_v35  ;;  %vm3068_vm2 = vcmp.ge.f32.partialorder %v3036_v49, 0.0  ;;  %v3034_v45 = vadd.f32 %v6065_v18, %v2995_v60  ;;  %v2660_v26 = vadd.f32 %v6147_v47, %v6574_v13 }
 0x1ff   : > { %v2962_v41 = vadd.f32 %v4785_v37, %v2656_v22  ;;  %v3037_v0 = vadd.f32 %v6065_v18, %v2998_v31  ;;  %v2996_v51 = vmul.f32 %v6055_v54, %v2957_v63  ;;  %v3152_v57 = vpack.c.bf16 %v3127_v28, %v3126_v2  ;;  %v6577_v2 = vld [vmem:[#allocation4_spill] sm:$0xff] }
 0x200   : > { %v2893_v33 = vpop.f32.mrf.mxu0  ;;  %v3132_v48 = vsel %vm3068_vm2, %v3036_v49, %v3100_v55  ;;  %v3098_v25 = vmul.f32 0.01, %v3034_v45  ;;  %vm3066_vm4 = vcmp.ge.f32.partialorder %v3034_v45, 0.0  ;;  %v2658_v27 = vadd.f32 %v6160_v21, %v6024_v8  ;;  %v2619_v49 = vpop.f32.mrf.mxu1 }
 0x201   : > { %v3001_v46 = vmul.f32 %v6055_v54, %v2962_v41  ;;  %v2960_v62 = vadd.f32 %v2893_v33, %v2654_v39  ;;  %vm3069_vm3 = vcmp.ge.f32.partialorder %v3037_v0, 0.0  ;;  %v3101_v9 = vmul.f32 0.01, %v3037_v0  ;;  %4811 = vmatprep.mubr.msk.bf16.mxu1 %vm397_vm0, %v3152_v57  ;;  %v6580_v33 = vld [vmem:[#allocation12_spill] sm:$0xff] }
 0x202   : > { %v3035_v3 = vadd.f32 %v6065_v18, %v2996_v51  ;;  %v4786_v6 = vpop.f32.mrf.mxu0  ;;  %v2353_v43 = vadd.f32 %v6575_v40, %v2046_v44  ;;  %v3130_v32 = vsel %vm3066_vm4, %v3034_v45, %v3098_v25  ;;  %v2661_v14 = vadd.f32 %v6173_v4, %v6576_v5  ;;  %v4758_v37 = vpop.f32.mrf.mxu1  ;;  %v6579_v44 = vld [vmem:[#allocation11_spill] sm:$0xff] }
 0x203   : > { %v3040_v19 = vadd.f32 %v6065_v18, %v3001_v46  ;;  %v2999_v10 = vmul.f32 %v6055_v54, %v2960_v62  ;;  %4812 = vmatmul.mubr.msk.bf16.gmra.mxu1 %vm397_vm0, %v3153_v17  ;;  %v2963_v34 = vadd.f32 %v4786_v6, %v2657_v23  ;;  %v3133_v53 = vsel %vm3069_vm3, %v3037_v0, %v3101_v9  ;;  %v6581_v62 = vld [vmem:[#allocation14_spill] sm:$0xff] }
 0x204   : > { %vm3067_vm5 = vcmp.ge.f32.partialorder %v3035_v3, 0.0  ;;  %v3099_v61 = vmul.f32 0.01, %v3035_v3  ;;  %v2896_v42 = vpop.f32.mrf.mxu0  ;;  %v3155_v59 = vpack.c.bf16 %v3133_v53, %v3132_v48  ;;  %v2659_v35 = vadd.f32 %v2606_v15, %v2353_v43  ;;  %v2622_v25 = vpop.f32.mrf.mxu1  ;;  %v6582_v53 = vld [vmem:[#allocation13_spill] sm:$0xff] }
 0x205   : > { %v3104_v24 = vmul.f32 0.01, %v3040_v19  ;;  %v3002_v16 = vmul.f32 %v6055_v54, %v2963_v34  ;;  %v2961_v30 = vadd.f32 %v2896_v42, %v2655_v58  ;;  %vm3072_vm6 = vcmp.ge.f32.partialorder %v3040_v19, 0.0 }
 0x206   : > { %v4789_v50 = vpop.f32.mrf.mxu0  ;;  %v3131_v56 = vsel %vm3067_vm5, %v3035_v3, %v3099_v61  ;;  %v3038_v36 = vadd.f32 %v6065_v18, %v2999_v10  ;;  %v2050_v12 = vadd.f32 %v6578_v20, %v6577_v2  ;;  %v2664_v15 = vadd.f32 %v4757_v11, %v6579_v44  ;;  %v4988_v44 = vld [vmem:[%s5097_s16 + $0x31] sm:$0xff] }
 0x207   : > { %v2966_v38 = vadd.f32 %v4789_v50, %v2660_v26  ;;  %v3041_v47 = vadd.f32 %v6065_v18, %v3002_v16  ;;  %v3000_v8 = vmul.f32 %v6055_v54, %v2961_v30  ;;  %v3154_v60 = vpack.c.bf16 %v3131_v56, %v3130_v32 }
 0x208   : > { %v2909_v21 = vpop.f32.mrf.mxu0  ;;  %v3136_v39 = vsel %vm3072_vm6, %v3040_v19, %v3104_v24  ;;  %v3102_v55 = vmul.f32 0.01, %v3038_v36  ;;  %vm3070_vm8 = vcmp.ge.f32.partialorder %v3038_v36, 0.0  ;;  %v2662_v57 = vadd.f32 %v2619_v49, %v6580_v33 }
 0x209   : > { %v3005_v29 = vmul.f32 %v6055_v54, %v2966_v38  ;;  %v2964_v22 = vadd.f32 %v2909_v21, %v2658_v27  ;;  %vm3073_vm7 = vcmp.ge.f32.partialorder %v3041_v47, 0.0  ;;  %v3105_v52 = vmul.f32 0.01, %v3041_v47  ;;  %4815 = vmatprep.mubr.msk.bf16.mxu1 %vm397_vm0, %v3154_v60 }
 0x20a   : > { %v3039_v1 = vadd.f32 %v6065_v18, %v3000_v8  ;;  %v4790_v17 = vpop.f32.mrf.mxu0  ;;  %v2357_v48 = vadd.f32 %v6581_v62, %v2050_v12  ;;  %v3134_v6 = vsel %vm3070_vm8, %v3038_v36, %v3102_v55  ;;  %v2665_v61 = vadd.f32 %v4758_v37, %v6582_v53  ;;  %v4991_v53 = vld [vmem:[%s5097_s16 + $0x21] sm:$0xff] }
 0x20b   : > { %v3044_v31 = vadd.f32 %v6065_v18, %v3005_v29  ;;  %v3003_v63 = vmul.f32 %v6055_v54, %v2964_v22  ;;  %4816 = vmatmul.mubr.msk.bf16.gmra.mxu1 %vm397_vm0, %v3155_v59  ;;  %v2967_v4 = vadd.f32 %v4790_v17, %v2661_v14  ;;  %v3137_v28 = vsel %vm3073_vm7, %v3041_v47, %v3105_v52 }
 0x20c   : > { %vm3071_vm9 = vcmp.ge.f32.partialorder %v3039_v1, 0.0  ;;  %v3103_v45 = vmul.f32 0.01, %v3039_v1  ;;  %v2912_v41 = vpop.f32.mrf.mxu0  ;;  %v3157_v0 = vpack.c.bf16 %v3137_v28, %v3136_v39  ;;  %v2663_v59 = vadd.f32 %v2622_v25, %v2357_v48  ;;  %v6250_v28 = vld [vmem:[%s6555_s6] ss:$0 sm:$0xff] }
 0x20d   : > { %v3042_v51 = vadd.f32 %v6065_v18, %v3003_v63  ;;  %v3006_v7 = vmul.f32 %v6055_v54, %v2967_v4  ;;  %v2965_v23 = vadd.f32 %v2912_v41, %v2659_v35  ;;  %v3108_v9 = vmul.f32 0.01, %v3044_v31 }
 0x20e   : > { %v4793_v58 = vpop.f32.mrf.mxu0  ;;  %v3135_v46 = vsel %vm3071_vm9, %v3039_v1, %v3103_v45  ;;  %vm3076_vm10 = vcmp.ge.f32.partialorder %v3044_v31, 0.0 }
 0x20f   : > { %v2970_v3 = vadd.f32 %v4793_v58, %v2664_v15  ;;  %v3045_v19 = vadd.f32 %v6065_v18, %v3006_v7  ;;  %v3004_v10 = vmul.f32 %v6055_v54, %v2965_v23  ;;  %v3156_v11 = vpack.c.bf16 %v3135_v46, %v3134_v6  ;;  %v4989_v7 = vld [vmem:[%s5097_s16 + $0x19] sm:$0xff] }
 0x210   : > { %v2925_v34 = vpop.f32.mrf.mxu0  ;;  %v3106_v42 = vmul.f32 0.01, %v3042_v51  ;;  %vm3074_vm11 = vcmp.ge.f32.partialorder %v3042_v51, 0.0  ;;  %v3140_v24 = vsel %vm3076_vm10, %v3044_v31, %v3108_v9 }
 0x211   : > { %v3009_v13 = vmul.f32 %v6055_v54, %v2970_v3  ;;  %v2968_v26 = vadd.f32 %v2925_v34, %v2662_v57  ;;  %vm3077_vm12 = vcmp.ge.f32.partialorder %v3045_v19, 0.0  ;;  %v3109_v27 = vmul.f32 0.01, %v3045_v19  ;;  %4819 = vmatprep.mubr.msk.bf16.mxu1 %vm397_vm0, %v3156_v11  ;;  %v4990_v3 = vld [vmem:[%s5097_s16 + $0x39] sm:$0xff] }
 0x212   : > { %v3043_v40 = vadd.f32 %v6065_v18, %v3004_v10  ;;  %v4794_v43 = vpop.f32.mrf.mxu0  ;;  %v3138_v49 = vsel %vm3074_vm11, %v3042_v51, %v3106_v42 }
 0x213   : > { %v3007_v16 = vmul.f32 %v6055_v54, %v2968_v26  ;;  %4820 = vmatmul.mubr.msk.bf16.gmra.mxu1 %vm397_vm0, %v3157_v0  ;;  %v2971_v30 = vadd.f32 %v4794_v43, %v2665_v61  ;;  %v3141_v50 = vsel %vm3077_vm12, %v3045_v19, %v3109_v27  ;;  %v3048_v36 = vadd.f32 %v6065_v18, %v3009_v13 }
 0x214   : > { %vm3075_vm13 = vcmp.ge.f32.partialorder %v3043_v40, 0.0  ;;  %v3107_v56 = vmul.f32 0.01, %v3043_v40  ;;  %v2928_v38 = vpop.f32.mrf.mxu0  ;;  %v3159_v32 = vpack.c.bf16 %v3141_v50, %v3140_v24 }
 0x215   : > { %v3046_v47 = vadd.f32 %v6065_v18, %v3007_v16  ;;  %v3010_v8 = vmul.f32 %v6055_v54, %v2971_v30  ;;  %v2969_v21 = vadd.f32 %v2928_v38, %v2663_v59  ;;  %v3112_v14 = vmul.f32 0.01, %v3048_v36  ;;  %v4992_v59 = vld [vmem:[%s5097_s16 + $0x61] sm:$0xff] }
 0x216   : > { %v3139_v60 = vsel %vm3075_vm13, %v3043_v40, %v3107_v56  ;;  %vm3080_vm14 = vcmp.ge.f32.partialorder %v3048_v36, 0.0 }
 0x217   : > { %v3158_v5 = vpack.c.bf16 %v3139_v60, %v3138_v49  ;;  %v3049_v35 = vadd.f32 %v6065_v18, %v3010_v8  ;;  %v3008_v29 = vmul.f32 %v6055_v54, %v2969_v21  ;;  %v3110_v22 = vmul.f32 0.01, %v3046_v47  ;;  %v4994_v8 = vld [vmem:[%s5097_s16 + $0x69] sm:$0xff] }
 0x218   : > { %vm3078_vm1 = vcmp.ge.f32.partialorder %v3046_v47, 0.0  ;;  %v3144_v1 = vsel %vm3080_vm14, %v3048_v36, %v3112_v14 }
 0x219   : > { %4823 = vmatprep.mubr.msk.bf16.mxu1 %vm397_vm0, %v3158_v5  ;;  %vm3081_vm15 = vcmp.ge.f32.partialorder %v3049_v35, 0.0  ;;  %v3113_v39 = vmul.f32 0.01, %v3049_v35  ;;  %v3047_v52 = vadd.f32 %v6065_v18, %v3008_v29  ;;  %v3142_v63 = vsel %vm3078_vm1, %v3046_v47, %v3110_v22  ;;  %v6245_v18 = vld [vmem:[%s6554_s5] ss:$0 sm:$0xff] }
 0x21b   : > { %4824 = vmatmul.mubr.msk.bf16.gmra.mxu1 %vm397_vm0, %v3159_v32  ;;  %v3145_v17 = vsel %vm3081_vm15, %v3049_v35, %v3113_v39  ;;  %vm3079_vm2 = vcmp.ge.f32.partialorder %v3047_v52, 0.0  ;;  %v3111_v55 = vmul.f32 0.01, %v3047_v52  ;;  %v4993_v32 = vld [vmem:[%s5097_s16 + $0x49] sm:$0xff]  ;;  %v4995_v39 = vld [vmem:[%s5097_s16 + $0x51] sm:$0xff] }
 0x21c   : > { %v3161_v31 = vpack.c.bf16 %v3145_v17, %v3144_v1 }
 0x21d   : > { %v3143_v4 = vsel %vm3079_vm2, %v3047_v52, %v3111_v55 }
 0x21e   : > { %v3160_v54 = vpack.c.bf16 %v3143_v4, %v3142_v63 }
 0x220   : > { %4827 = vmatprep.mubr.msk.bf16.mxu1 %vm397_vm0, %v3160_v54  ;;  %v4996_v54 = vld [vmem:[%s5097_s16 + $0x91] sm:$0xff] }
 0x223   : > { %4828 = vmatmul.mubr.msk.bf16.gmra.mxu1 %vm397_vm0, %v3161_v31 }
 0x2ab   : > { %v4801_v37 = vpop.f32.mrf.mxu1 }
 0x2ac   : > { %v3396_v45 = vmul.f32 %v4801_v37, %v6245_v18 }
 0x2ad   : > { %v3260_v41 = vpop.f32.mrf.mxu1 }
 0x2ae   : > { %v3435_v2 = vadd.f32 %v6250_v28, %v3396_v45  ;;  %v3394_v20 = vmul.f32 %v6245_v18, %v3260_v41 }
 0x2af   : > { %v4802_v12 = vpop.f32.mrf.mxu1 }
 0x2b0   : > { %v6256_v15 = vadd.f32 %v4988_v44, %v3435_v2  ;;  %v3433_v0 = vadd.f32 %v6250_v28, %v3394_v20  ;;  %v3397_v51 = vmul.f32 %v4802_v12, %v6245_v18  ;;  %v4997_v44 = vld [vmem:[%s5097_s16 + $0x79] sm:$0xff] }
 0x2b1   : > { %v3263_v33 = vpop.f32.mrf.mxu1 }
 0x2b2   : > { %v4258_v57 = vmul.f32 -1.702, %v6256_v15  ;;  %v6262_v23 = vadd.f32 %v4989_v7, %v3433_v0  ;;  %v3436_v58 = vadd.f32 %v6250_v28, %v3397_v51  ;;  %v3395_v46 = vmul.f32 %v6245_v18, %v3263_v33 }
 0x2b3   : > { %v4805_v62 = vpop.f32.mrf.mxu1 }
 0x2b4   : > { %v3565_v48 = vmul.f32 1.442695, %v4258_v57  ;;  %v4256_v9 = vmul.f32 -1.702, %v6262_v23  ;;  %v6268_v6 = vadd.f32 %v4990_v3, %v3436_v58  ;;  %v3434_v25 = vadd.f32 %v6250_v28, %v3395_v46 }
 0x2b5   : > { %v3400_v19 = vmul.f32 %v4805_v62, %v6245_v18  ;;  %v3276_v10 = vpop.f32.mrf.mxu1 }
 0x2b6   : > { %4860 = vpow2.f32 %v3565_v48  ;;  %v3561_v34 = vmul.f32 1.442695, %v4256_v9  ;;  %v4259_v11 = vmul.f32 -1.702, %v6268_v6  ;;  %v6274_v61 = vadd.f32 %v4991_v53, %v3434_v25  ;;  %v4998_v9 = vld [vmem:[%s5097_s16 + $0x99] sm:$0xff] }
 0x2b7   : > { %v3439_v42 = vadd.f32 %v6250_v28, %v3400_v19  ;;  %v3398_v13 = vmul.f32 %v6245_v18, %v3276_v10  ;;  %v4806_v26 = vpop.f32.mrf.mxu1 }
 0x2b8   : > { %4862 = vpow2.f32 %v3561_v34  ;;  %v3567_v27 = vmul.f32 1.442695, %v4259_v11  ;;  %v4257_v40 = vmul.f32 -1.702, %v6274_v61  ;;  %v3401_v43 = vmul.f32 %v4806_v26, %v6245_v18  ;;  %v4999_v26 = vld [vmem:[%s5097_s16 + $0x81] sm:$0xff] }
 0x2b9   : > { %v6281_v24 = vadd.f32 %v4992_v59, %v3439_v42  ;;  %v3437_v16 = vadd.f32 %v6250_v28, %v3398_v13  ;;  %v3279_v30 = vpop.f32.mrf.mxu1 }
 0x2ba   : > { %4864 = vpow2.f32 %v3567_v27  ;;  %v3563_v50 = vmul.f32 1.442695, %v4257_v40  ;;  %v3440_v56 = vadd.f32 %v6250_v28, %v3401_v43  ;;  %v3399_v36 = vmul.f32 %v6245_v18, %v3279_v30 }
 0x2bb   : > { %v4262_v38 = vmul.f32 -1.702, %v6281_v24  ;;  %v6288_v49 = vadd.f32 %v4993_v32, %v3437_v16  ;;  %v4809_v47 = vpop.f32.mrf.mxu1 }
 0x2bc   : > { %4866 = vpow2.f32 %v3563_v50  ;;  %v6291_v21 = vadd.f32 %v4994_v8, %v3440_v56  ;;  %v3438_v60 = vadd.f32 %v6250_v28, %v3399_v36  ;;  %v3404_v5 = vmul.f32 %v4809_v47, %v6245_v18 }
 0x2bd   : > { %v3573_v14 = vmul.f32 1.442695, %v4262_v38  ;;  %v4260_v35 = vmul.f32 -1.702, %v6288_v49  ;;  %v3292_v29 = vpop.f32.mrf.mxu1  ;;  %v5000_v38 = vld [vmem:[%s5097_s16 + $0xc1] sm:$0xff] }
 0x2be   : > { %v4263_v22 = vmul.f32 -1.702, %v6291_v21  ;;  %v6298_v52 = vadd.f32 %v4995_v39, %v3438_v60  ;;  %v3443_v1 = vadd.f32 %v6250_v28, %v3404_v5  ;;  %v3402_v17 = vmul.f32 %v6245_v18, %v3292_v29  ;;  %v5001_v60 = vld [vmem:[%s5097_s16 + $0xa9] sm:$0xff] }
 0x2bf   : > { %4868 = vpow2.f32 %v3573_v14  ;;  %v3569_v55 = vmul.f32 1.442695, %v4260_v35  ;;  %v4810_v31 = vpop.f32.mrf.mxu1 }
 0x2c0   : > { %v3575_v63 = vmul.f32 1.442695, %v4263_v22  ;;  %v4261_v4 = vmul.f32 -1.702, %v6298_v52  ;;  %v6304_v37 = vadd.f32 %v4996_v54, %v3443_v1  ;;  %v3441_v45 = vadd.f32 %v6250_v28, %v3402_v17 }
 0x2c1   : > { %4870 = vpow2.f32 %v3569_v55  ;;  %v3405_v41 = vmul.f32 %v4810_v31, %v6245_v18  ;;  %v3295_v2 = vpop.f32.mrf.mxu1  ;;  %v5002_v55 = vld [vmem:[%s5097_s16 + $0xc9] sm:$0xff] }
 0x2c2   : > { %4872 = vpow2.f32 %v3575_v63  ;;  %v3571_v20 = vmul.f32 1.442695, %v4261_v4  ;;  %v4266_v12 = vmul.f32 -1.702, %v6304_v37  ;;  %v6310_v0 = vadd.f32 %v4997_v44, %v3441_v45 }
 0x2c3   : > { %v4861_v51 = vpop.eup %4860  ;;  %v3444_v33 = vadd.f32 %v6250_v28, %v3405_v41  ;;  %v3403_v57 = vmul.f32 %v6245_v18, %v3295_v2  ;;  %v4813_v7 = vpop.f32.mrf.mxu1 }
 0x2c4   : > { %v3627_v58 = vadd.f32 1.0, %v4861_v51  ;;  %4874 = vpow2.f32 %v3571_v20  ;;  %v3581_v46 = vmul.f32 1.442695, %v4266_v12  ;;  %v4264_v62 = vmul.f32 -1.702, %v6310_v0 }
 0x2c5   : > { %v4863_v48 = vpop.eup %4862  ;;  %v6316_v3 = vadd.f32 %v4998_v9, %v3444_v33  ;;  %v3442_v25 = vadd.f32 %v6250_v28, %v3403_v57  ;;  %v3408_v19 = vmul.f32 %v4813_v7, %v6245_v18  ;;  %v3308_v10 = vpop.f32.mrf.mxu1  ;;  %v5003_v7 = vld [vmem:[%s5097_s16 + $0xb1] sm:$0xff] }
 0x2c6   : > { %4876 = vrcp.f32 %v3627_v58  ;;  %v3625_v34 = vadd.f32 1.0, %v4863_v48  ;;  %v3577_v11 = vmul.f32 1.442695, %v4264_v62  ;;  %v3406_v53 = vmul.f32 %v6245_v18, %v3308_v10  ;;  %v5004_v9 = vld [vmem:[%s5097_s16 + $0xf1] sm:$0xff] }
 0x2c7   : > { %v4865_v42 = vpop.eup %4864  ;;  %4878 = vpow2.f32 %v3581_v46  ;;  %v4267_v13 = vmul.f32 -1.702, %v6316_v3  ;;  %v6323_v27 = vadd.f32 %v4999_v26, %v3442_v25  ;;  %v3447_v40 = vadd.f32 %v6250_v28, %v3408_v19  ;;  %v4814_v43 = vpop.f32.mrf.mxu1 }
 0x2c8   : > { %4880 = vrcp.f32 %v3625_v34  ;;  %v3628_v59 = vadd.f32 1.0, %v4865_v42  ;;  %v3445_v16 = vadd.f32 %v6250_v28, %v3406_v53  ;;  %v3409_v30 = vmul.f32 %v4814_v43, %v6245_v18 }
 0x2c9   : > { %v4867_v50 = vpop.eup %4866  ;;  %4882 = vpow2.f32 %v3577_v11  ;;  %v3583_v56 = vmul.f32 1.442695, %v4267_v13  ;;  %v4265_v36 = vmul.f32 -1.702, %v6323_v27  ;;  %v6330_v32 = vadd.f32 %v5000_v38, %v3447_v40  ;;  %v3311_v47 = vpop.f32.mrf.mxu1 }
 0x2ca   : > { %4884 = vrcp.f32 %v3628_v59  ;;  %v3626_v8 = vadd.f32 1.0, %v4867_v50  ;;  %v6333_v5 = vadd.f32 %v5001_v60, %v3445_v16  ;;  %v3448_v14 = vadd.f32 %v6250_v28, %v3409_v30  ;;  %v5005_v59 = vld [vmem:[%s5097_s16 + $0xd9] sm:$0xff] }
 0x2cb   : > { %4886 = vpow2.f32 %v3583_v56  ;;  %v3579_v35 = vmul.f32 1.442695, %v4265_v36  ;;  %v4270_v29 = vmul.f32 -1.702, %v6330_v32  ;;  %v3407_v22 = vmul.f32 %v6245_v18, %v3311_v47  ;;  %v4817_v39 = vpop.f32.mrf.mxu1 }
 0x2cc   : > { %v4869_v1 = vpop.eup %4868  ;;  %4888 = vrcp.f32 %v3626_v8  ;;  %v4268_v17 = vmul.f32 -1.702, %v6333_v5  ;;  %v6340_v31 = vadd.f32 %v5002_v55, %v3448_v14  ;;  %v3412_v63 = vmul.f32 %v4817_v39, %v6245_v18 }
 0x2cd   : > { %v3631_v4 = vadd.f32 1.0, %v4869_v1  ;;  %4890 = vpow2.f32 %v3579_v35  ;;  %v3589_v54 = vmul.f32 1.442695, %v4270_v29  ;;  %v3446_v45 = vadd.f32 %v6250_v28, %v3407_v22  ;;  %v3324_v41 = vpop.f32.mrf.mxu1  ;;  %v5006_v35 = vld [vmem:[%s5097_s16 + $0xf9] sm:$0xff] }
 0x2ce   : > { %v4871_v2 = vpop.eup %4870  ;;  %v4271_v20 = vmul.f32 -1.702, %v6340_v31  ;;  %v3451_v12 = vadd.f32 %v6250_v28, %v3412_v63  ;;  %v3410_v44 = vmul.f32 %v6245_v18, %v3324_v41  ;;  %v3585_v57 = vmul.f32 1.442695, %v4268_v17 }
 0x2cf   : > { %v4873_v51 = vpop.eup %4872  ;;  %4892 = vrcp.f32 %v3631_v4  ;;  %v3629_v33 = vadd.f32 1.0, %v4871_v2  ;;  %v6348_v58 = vadd.f32 %v5003_v7, %v3446_v45  ;;  %v4818_v46 = vpop.f32.mrf.mxu1 }
 0x2d0   : > { %v3632_v62 = vadd.f32 1.0, %v4873_v51  ;;  %4894 = vpow2.f32 %v3589_v54  ;;  %v3591_v48 = vmul.f32 1.442695, %v4271_v20  ;;  %v6352_v25 = vadd.f32 %v5004_v9, %v3451_v12 }
 0x2d1   : > { %v4875_v19 = vpop.eup %4874  ;;  %4896 = vrcp.f32 %v3629_v33  ;;  %v4269_v10 = vmul.f32 -1.702, %v6348_v58  ;;  %v3449_v34 = vadd.f32 %v6250_v28, %v3410_v44  ;;  %v3413_v11 = vmul.f32 %v4818_v46, %v6245_v18  ;;  %v3327_v53 = vpop.f32.mrf.mxu1 }
 0x2d2   : > { %4898 = vrcp.f32 %v3632_v62  ;;  %v3630_v42 = vadd.f32 1.0, %v4875_v19  ;;  %v4274_v13 = vmul.f32 -1.702, %v6352_v25  ;;  %v3411_v26 = vmul.f32 %v6245_v18, %v3327_v53 }
 0x2d3   : > { %v4877_v40 = vpop.eup %4876  ;;  %4900 = vpow2.f32 %v3585_v57  ;;  %v3587_v43 = vmul.f32 1.442695, %v4269_v10  ;;  %v6365_v16 = vadd.f32 %v5005_v59, %v3449_v34  ;;  %v3452_v30 = vadd.f32 %v6250_v28, %v3413_v11  ;;  %v4821_v50 = vpop.f32.mrf.mxu1 }
 0x2d4   : > { %v4879_v56 = vpop.eup %4878  ;;  %v3723_v36 = vmul.f32 %v4877_v40, %v6256_v15  ;;  %4902 = vrcp.f32 %v3630_v42  ;;  %v3597_v38 = vmul.f32 1.442695, %v4274_v13  ;;  %v3450_v47 = vadd.f32 %v6250_v28, %v3411_v26  ;;  %v5007_v15 = vld [vmem:[%s5097_s16 + $0xe1] sm:$0xff] }
 0x2d5   : > { %v4881_v8 = vpop.eup %4880  ;;  %v3635_v60 = vadd.f32 1.0, %v4879_v56  ;;  %4904 = vpow2.f32 %v3591_v48  ;;  %v4272_v14 = vmul.f32 -1.702, %v6365_v16  ;;  %v6372_v29 = vadd.f32 %v5006_v35, %v3452_v30  ;;  %v3340_v22 = vpop.f32.mrf.mxu1  ;;  %v5008_v48 = vld [vmem:[%s5097_s16 + $0x121] sm:$0xff] }
 0x2d6   : > { %v4883_v39 = vpop.eup %4882  ;;  %3755 = vst.msk [vmem:[%s6362_s17 + $0x10] sm:$0xff] %vm397_vm0, %v3723_v36  ;;  %v3721_v1 = vmul.f32 %v4881_v8, %v6262_v23  ;;  %4906 = vpow2.f32 %v3587_v43  ;;  %v6378_v17 = vadd.f32 %v5007_v15, %v3450_v47  ;;  %v3416_v55 = vmul.f32 %v4821_v50, %v6245_v18  ;;  %v5009_v43 = vld [vmem:[%s5097_s16 + $0x109] sm:$0xff] }
 0x2d7   : > { %v4885_v63 = vpop.eup %4884  ;;  %4908 = vrcp.f32 %v3635_v60  ;;  %v3633_v4 = vadd.f32 1.0, %v4883_v39  ;;  %v3593_v54 = vmul.f32 1.442695, %v4272_v14  ;;  %v4275_v45 = vmul.f32 -1.702, %v6372_v29  ;;  %v4822_v41 = vpop.f32.mrf.mxu1  ;;  %v5010_v14 = vld [vmem:[%s5097_s16 + $0x129] sm:$0xff] }
 0x2d8   : > { %v4887_v2 = vpop.eup %4886  ;;  %3753 = vst.msk [vmem:[%s6362_s17] sm:$0xff] %vm397_vm0, %v3721_v1  ;;  %v3724_v23 = vmul.f32 %v4885_v63, %v6268_v6  ;;  %4910 = vpow2.f32 %v3597_v38  ;;  %v4273_v20 = vmul.f32 -1.702, %v6378_v17  ;;  %v3455_v12 = vadd.f32 %v6250_v28, %v3416_v55  ;;  %v5011_v55 = vld [vmem:[%s5097_s16 + $0x111] sm:$0xff] }
 0x2d9   : > { %v4889_v44 = vpop.eup %4888  ;;  %4912 = vrcp.f32 %v3633_v4  ;;  %v3636_v51 = vadd.f32 1.0, %v4887_v2  ;;  %v3599_v33 = vmul.f32 1.442695, %v4275_v45  ;;  %v3414_v57 = vmul.f32 %v6245_v18, %v3340_v22  ;;  %v3343_v7 = vpop.f32.mrf.mxu1 }
 0x2da   : > { %v4891_v46 = vpop.eup %4890  ;;  %3756 = vst.msk [vmem:[%s6362_s17 + $0x18] sm:$0xff] %vm397_vm0, %v3724_v23  ;;  %v3722_v62 = vmul.f32 %v4889_v44, %v6274_v61  ;;  %4914 = vpow2.f32 %v3593_v54  ;;  %v3595_v6 = vmul.f32 1.442695, %v4273_v20  ;;  %v6392_v9 = vadd.f32 %v5008_v48, %v3455_v12  ;;  %v5012_v12 = vld [vmem:[%s5097_s16 + $0x151] sm:$0xff] }
 0x2db   : > { %4916 = vrcp.f32 %v3636_v51  ;;  %v3634_v19 = vadd.f32 1.0, %v4891_v46  ;;  %v3453_v10 = vadd.f32 %v6250_v28, %v3414_v57  ;;  %v3417_v34 = vmul.f32 %v4822_v41, %v6245_v18  ;;  %v4825_v11 = vpop.f32.mrf.mxu1 }
 0x2dc   : > { %v4893_v53 = vpop.eup %4892  ;;  %3754 = vst.msk [vmem:[%s6362_s17 + $0x8] sm:$0xff] %vm397_vm0, %v3722_v62  ;;  %4918 = vpow2.f32 %v3599_v33  ;;  %v4278_v42 = vmul.f32 -1.702, %v6392_v9  ;;  %v3415_v61 = vmul.f32 %v6245_v18, %v3343_v7  ;;  %v3420_v13 = vmul.f32 %v4825_v11, %v6245_v18  ;;  %v5013_v11 = vld [vmem:[%s5097_s16 + $0x139] sm:$0xff] }
 0x2dd   : > { %v4895_v26 = vpop.eup %4894  ;;  %v3727_v40 = vmul.f32 %v4893_v53, %v6281_v24  ;;  %4920 = vrcp.f32 %v3634_v19  ;;  %v6403_v59 = vadd.f32 %v5009_v43, %v3453_v10  ;;  %v3456_v30 = vadd.f32 %v6250_v28, %v3417_v34  ;;  %v3356_v50 = vpop.f32.mrf.mxu1 }
 0x2de   : > { %v4897_v56 = vpop.eup %4896  ;;  %v3639_v36 = vadd.f32 1.0, %v4895_v26  ;;  %4922 = vpow2.f32 %v3595_v6  ;;  %v3605_v38 = vmul.f32 1.442695, %v4278_v42  ;;  %v3454_v47 = vadd.f32 %v6250_v28, %v3415_v61 }
 0x2df   : > { %v4899_v8 = vpop.eup %4898  ;;  %3759 = vst.msk [vmem:[%s6362_s17 + $0x30] sm:$0xff] %vm397_vm0, %v3727_v40  ;;  %v3725_v24 = vmul.f32 %v4897_v56, %v6288_v49  ;;  %v4276_v60 = vmul.f32 -1.702, %v6403_v59  ;;  %v6412_v35 = vadd.f32 %v5010_v14, %v3456_v30  ;;  %v3459_v22 = vadd.f32 %v6250_v28, %v3420_v13  ;;  %v4826_v39 = vpop.f32.mrf.mxu1  ;;  %v5014_v56 = vld [vmem:[%s5097_s16 + $0x159] sm:$0xff] }
 0x2e0   : > { %v4901_v1 = vpop.eup %4900  ;;  %v3728_v15 = vmul.f32 %v4899_v8, %v6291_v21  ;;  %4924 = vrcp.f32 %v3639_v36  ;;  %v6417_v63 = vadd.f32 %v5011_v55, %v3454_v47  ;;  %v3418_v4 = vmul.f32 %v6245_v18, %v3356_v50  ;;  %v5015_v55 = vld [vmem:[%s5097_s16 + $0x141] sm:$0xff] }
 0x2e1   : > { %v4903_v49 = vpop.eup %4902  ;;  %3757 = vst.msk [vmem:[%s6362_s17 + $0x20] sm:$0xff] %vm397_vm0, %v3725_v24  ;;  %v3637_v54 = vadd.f32 1.0, %v4901_v1  ;;  %4926 = vpow2.f32 %v3605_v38  ;;  %v3601_v45 = vmul.f32 1.442695, %v4276_v60  ;;  %v4279_v41 = vmul.f32 -1.702, %v6412_v35  ;;  %v3359_v2 = vpop.f32.mrf.mxu1 }
 0x2e2   : > { %v4905_v23 = vpop.eup %4904  ;;  %3760 = vst.msk [vmem:[%s6362_s17 + $0x38] sm:$0xff] %vm397_vm0, %v3728_v15  ;;  %v3726_v21 = vmul.f32 %v4903_v49, %v6298_v52  ;;  %v4277_v20 = vmul.f32 -1.702, %v6417_v63  ;;  %v6428_v44 = vadd.f32 %v5012_v12, %v3459_v22  ;;  %v3457_v51 = vadd.f32 %v6250_v28, %v3418_v4 }
 0x2e3   : > { %v4907_v33 = vpop.eup %4906  ;;  %4928 = vrcp.f32 %v3637_v54  ;;  %v3640_v57 = vadd.f32 1.0, %v4905_v23  ;;  %v3607_v7 = vmul.f32 1.442695, %v4279_v41  ;;  %v3421_v46 = vmul.f32 %v4826_v39, %v6245_v18  ;;  %v4829_v62 = vpop.f32.mrf.mxu1 }
 0x2e4   : > { %v4909_v6 = vpop.eup %4908  ;;  %3758 = vst.msk [vmem:[%s6362_s17 + $0x28] sm:$0xff] %vm397_vm0, %v3726_v21  ;;  %v3638_v48 = vadd.f32 1.0, %v4907_v33  ;;  %4930 = vpow2.f32 %v3601_v45  ;;  %v3603_v52 = vmul.f32 1.442695, %v4277_v20  ;;  %v4282_v19 = vmul.f32 -1.702, %v6428_v44 }
 0x2e5   : > { %v4911_v10 = vpop.eup %4910  ;;  %v3731_v34 = vmul.f32 %v4909_v6, %v6304_v37  ;;  %4932 = vrcp.f32 %v3640_v57  ;;  %v6437_v53 = vadd.f32 %v5013_v11, %v3457_v51  ;;  %v3460_v42 = vadd.f32 %v6250_v28, %v3421_v46  ;;  %v3372_v61 = vpop.f32.mrf.mxu1  ;;  %v5016_v20 = vld [vmem:[%s5097_s16 + $0x181] sm:$0xff] }
 0x2e6   : > { %v4913_v13 = vpop.eup %4912  ;;  %4934 = vrcp.f32 %v3638_v48  ;;  %v3643_v26 = vadd.f32 1.0, %v4911_v10  ;;  %v3613_v40 = vmul.f32 1.442695, %v4282_v19  ;;  %v3419_v43 = vmul.f32 %v6245_v18, %v3359_v2 }
 0x2e7   : > { %v4915_v30 = vpop.eup %4914  ;;  %3763 = vst.msk [vmem:[%s6362_s17 + $0x50] sm:$0xff] %vm397_vm0, %v3731_v34  ;;  %v3729_v37 = vmul.f32 %v4913_v13, %v6310_v0  ;;  %4936 = vpow2.f32 %v3607_v7  ;;  %v4280_v50 = vmul.f32 -1.702, %v6437_v53  ;;  %v6446_v36 = vadd.f32 %v5014_v56, %v3460_v42  ;;  %v4830_v38 = vpop.f32.mrf.mxu1  ;;  %v5018_v13 = vld [vmem:[%s5097_s16 + $0x189] sm:$0xff] }
 0x2e8   : > { %v4917_v47 = vpop.eup %4916  ;;  %4938 = vrcp.f32 %v3643_v26  ;;  %v3641_v8 = vadd.f32 1.0, %v4915_v30  ;;  %v3458_v24 = vadd.f32 %v6250_v28, %v3419_v43  ;;  %v3424_v60 = vmul.f32 %v4829_v62, %v6245_v18  ;;  %v5019_v30 = vld [vmem:[%s5097_s16 + $0x171] sm:$0xff] }
 0x2e9   : > { %v4919_v14 = vpop.eup %4918  ;;  %3761 = vst.msk [vmem:[%s6362_s17 + $0x40] sm:$0xff] %vm397_vm0, %v3729_v37  ;;  %v3732_v0 = vmul.f32 %v4917_v47, %v6316_v3  ;;  %4940 = vpow2.f32 %v3603_v52  ;;  %v3609_v22 = vmul.f32 1.442695, %v4280_v50  ;;  %v4283_v39 = vmul.f32 -1.702, %v6446_v36  ;;  %v3375_v54 = vpop.f32.mrf.mxu1  ;;  %v5017_v52 = vld [vmem:[%s5097_s16 + $0x169] sm:$0xff] }
 0x2ea   : > { %v4921_v1 = vpop.eup %4920  ;;  %4942 = vrcp.f32 %v3641_v8  ;;  %v3644_v15 = vadd.f32 1.0, %v4919_v14  ;;  %v6455_v4 = vadd.f32 %v5015_v55, %v3458_v24  ;;  %v3463_v49 = vadd.f32 %v6250_v28, %v3424_v60 }
 0x2eb   : > { %v4923_v45 = vpop.eup %4922  ;;  %3764 = vst.msk [vmem:[%s6362_s17 + $0x58] sm:$0xff] %vm397_vm0, %v3732_v0  ;;  %v3730_v3 = vmul.f32 %v4921_v1, %v6323_v27  ;;  %4944 = vpow2.f32 %v3613_v40  ;;  %v3615_v41 = vmul.f32 1.442695, %v4283_v39  ;;  %v3422_v2 = vmul.f32 %v6245_v18, %v3372_v61 }
 0x2ec   : > { %4946 = vrcp.f32 %v3644_v15  ;;  %v3642_v23 = vadd.f32 1.0, %v4923_v45  ;;  %v4281_v21 = vmul.f32 -1.702, %v6455_v4  ;;  %v6464_v12 = vadd.f32 %v5016_v20, %v3463_v49 }
 0x2ed   : > { %v4925_v51 = vpop.eup %4924  ;;  %3762 = vst.msk [vmem:[%s6362_s17 + $0x48] sm:$0xff] %vm397_vm0, %v3730_v3  ;;  %4948 = vpow2.f32 %v3609_v22  ;;  %v3461_v33 = vadd.f32 %v6250_v28, %v3422_v2  ;;  %v3425_v27 = vmul.f32 %v4830_v38, %v6245_v18  ;;  %v3423_v57 = vmul.f32 %v6245_v18, %v3375_v54 }
 0x2ee   : > { %v4927_v7 = vpop.eup %4926  ;;  %v3735_v46 = vmul.f32 %v4925_v51, %v6330_v32  ;;  %4950 = vrcp.f32 %v3642_v23  ;;  %v3611_v62 = vmul.f32 1.442695, %v4281_v21  ;;  %v4286_v6 = vmul.f32 -1.702, %v6464_v12 }
 0x2ef   : > { %v3647_v48 = vadd.f32 1.0, %v4927_v7  ;;  %4952 = vpow2.f32 %v3615_v41  ;;  %v6474_v19 = vadd.f32 %v5017_v52, %v3461_v33  ;;  %v3464_v10 = vadd.f32 %v6250_v28, %v3425_v27 }
 0x2f0   : > { %v4929_v34 = vpop.eup %4928  ;;  %3767 = vst.msk [vmem:[%s6362_s17 + $0x70] sm:$0xff] %vm397_vm0, %v3735_v46  ;;  %4954 = vpow2.f32 %v3611_v62  ;;  %v3621_v18 = vmul.f32 1.442695, %v4286_v6  ;;  %v3462_v32 = vadd.f32 %v6250_v28, %v3423_v57 }
 0x2f1   : > { %v4931_v11 = vpop.eup %4930  ;;  %v3733_v42 = vmul.f32 %v4929_v34, %v6333_v5  ;;  %4956 = vrcp.f32 %v3647_v48  ;;  %v4284_v61 = vmul.f32 -1.702, %v6474_v19  ;;  %v6483_v26 = vadd.f32 %v5018_v13, %v3464_v10 }
 0x2f2   : > { %v4933_v40 = vpop.eup %4932  ;;  %v3645_v43 = vadd.f32 1.0, %v4931_v11  ;;  %4958 = vpow2.f32 %v3621_v18  ;;  %v6486_v37 = vadd.f32 %v5019_v30, %v3462_v32 }
 0x2f3   : > { %v4935_v50 = vpop.eup %4934  ;;  %3765 = vst.msk [vmem:[%s6362_s17 + $0x60] sm:$0xff] %vm397_vm0, %v3733_v42  ;;  %v3736_v28 = vmul.f32 %v4933_v40, %v6340_v31  ;;  %v3617_v5 = vmul.f32 1.442695, %v4284_v61  ;;  %v4287_v56 = vmul.f32 -1.702, %v6483_v26 }
 0x2f4   : > { %v4937_v38 = vpop.eup %4936  ;;  %v3734_v47 = vmul.f32 %v4935_v50, %v6348_v58  ;;  %4960 = vrcp.f32 %v3645_v43  ;;  %v4285_v8 = vmul.f32 -1.702, %v6486_v37 }
 0x2f5   : > { %v4939_v24 = vpop.eup %4938  ;;  %3768 = vst.msk [vmem:[%s6362_s17 + $0x78] sm:$0xff] %vm397_vm0, %v3736_v28  ;;  %v3648_v60 = vadd.f32 1.0, %v4937_v38  ;;  %4962 = vpow2.f32 %v3617_v5  ;;  %v3623_v14 = vmul.f32 1.442695, %v4287_v56 }
 0x2f6   : > { %v4941_v0 = vpop.eup %4940  ;;  %3766 = vst.msk [vmem:[%s6362_s17 + $0x68] sm:$0xff] %vm397_vm0, %v3734_v47  ;;  %v3739_v31 = vmul.f32 %v4939_v24, %v6352_v25  ;;  %v3619_v22 = vmul.f32 1.442695, %v4285_v8 }
 0x2f7   : > { %v4943_v39 = vpop.eup %4942  ;;  %4964 = vrcp.f32 %v3648_v60  ;;  %v3646_v58 = vadd.f32 1.0, %v4941_v0 }
 0x2f8   : > { %v4945_v1 = vpop.eup %4944  ;;  %3771 = vst.msk [vmem:[%s6362_s17 + $0x90] sm:$0xff] %vm397_vm0, %v3739_v31  ;;  %v3737_v15 = vmul.f32 %v4943_v39, %v6365_v16  ;;  %4966 = vpow2.f32 %v3623_v14 }
 0x2f9   : > { %v4947_v55 = vpop.eup %4946  ;;  %4968 = vrcp.f32 %v3646_v58  ;;  %v3651_v49 = vadd.f32 1.0, %v4945_v1 }
 0x2fa   : > { %v4949_v54 = vpop.eup %4948  ;;  %3769 = vst.msk [vmem:[%s6362_s17 + $0x80] sm:$0xff] %vm397_vm0, %v3737_v15  ;;  %v3740_v25 = vmul.f32 %v4947_v55, %v6372_v29  ;;  %4970 = vpow2.f32 %v3619_v22 }
 0x2fb   : > { %v4951_v45 = vpop.eup %4950  ;;  %4972 = vrcp.f32 %v3651_v49  ;;  %v3649_v3 = vadd.f32 1.0, %v4949_v54 }
 0x2fc   : > { %v4953_v41 = vpop.eup %4952  ;;  %3772 = vst.msk [vmem:[%s6362_s17 + $0x98] sm:$0xff] %vm397_vm0, %v3740_v25  ;;  %v3738_v16 = vmul.f32 %v4951_v45, %v6378_v17 }
 0x2fd   : > { %v4955_v2 = vpop.eup %4954  ;;  %4974 = vrcp.f32 %v3649_v3  ;;  %v3652_v23 = vadd.f32 1.0, %v4953_v41 }
 0x2fe   : > { %v4957_v21 = vpop.eup %4956  ;;  %3770 = vst.msk [vmem:[%s6362_s17 + $0x88] sm:$0xff] %vm397_vm0, %v3738_v16  ;;  %v3650_v20 = vadd.f32 1.0, %v4955_v2 }
 0x2ff   : > { %v4959_v51 = vpop.eup %4958  ;;  %v3743_v29 = vmul.f32 %v4957_v21, %v6392_v9  ;;  %4976 = vrcp.f32 %v3652_v23 }
 0x300   : > { %4978 = vrcp.f32 %v3650_v20  ;;  %v3655_v33 = vadd.f32 1.0, %v4959_v51 }
 0x301   : > { %v4961_v27 = vpop.eup %4960  ;;  %3775 = vst.msk [vmem:[%s6362_s17 + $0xb0] sm:$0xff] %vm397_vm0, %v3743_v29 }
 0x302   : > { %v4963_v57 = vpop.eup %4962  ;;  %v3741_v17 = vmul.f32 %v4961_v27, %v6403_v59  ;;  %4980 = vrcp.f32 %v3655_v33 }
 0x303   : > { %v3653_v7 = vadd.f32 1.0, %v4963_v57 }
 0x304   : > { %v4965_v46 = vpop.eup %4964  ;;  %3773 = vst.msk [vmem:[%s6362_s17 + $0xa0] sm:$0xff] %vm397_vm0, %v3741_v17 }
 0x305   : > { %v4967_v62 = vpop.eup %4966  ;;  %v3744_v9 = vmul.f32 %v4965_v46, %v6412_v35  ;;  %4982 = vrcp.f32 %v3653_v7 }
 0x306   : > { %v4969_v6 = vpop.eup %4968  ;;  %v3656_v48 = vadd.f32 1.0, %v4967_v62 }
 0x307   : > { %v4971_v52 = vpop.eup %4970  ;;  %3776 = vst.msk [vmem:[%s6362_s17 + $0xb8] sm:$0xff] %vm397_vm0, %v3744_v9  ;;  %v3742_v10 = vmul.f32 %v4969_v6, %v6417_v63 }
 0x308   : > { %v4973_v59 = vpop.eup %4972  ;;  %4984 = vrcp.f32 %v3656_v48  ;;  %v3654_v34 = vadd.f32 1.0, %v4971_v52 }
 0x309   : > { %3774 = vst.msk [vmem:[%s6362_s17 + $0xa8] sm:$0xff] %vm397_vm0, %v3742_v10  ;;  %v3747_v18 = vmul.f32 %v4973_v59, %v6428_v44 }
 0x30a   : > { %v4975_v35 = vpop.eup %4974  ;;  %4986 = vrcp.f32 %v3654_v34 }
 0x30b   : > { %3779 = vst.msk [vmem:[%s6362_s17 + $0xd0] sm:$0xff] %vm397_vm0, %v3747_v18  ;;  %v3745_v32 = vmul.f32 %v4975_v35, %v6437_v53 }
 0x30c   : > { %v4977_v11 = vpop.eup %4976 }
 0x30d   : > { %v4979_v63 = vpop.eup %4978  ;;  %3777 = vst.msk [vmem:[%s6362_s17 + $0xc0] sm:$0xff] %vm397_vm0, %v3745_v32  ;;  %v3748_v42 = vmul.f32 %v4977_v11, %v6446_v36 }
 0x30e   : > { %v3746_v61 = vmul.f32 %v4979_v63, %v6455_v4 }
 0x30f   : > { %v4981_v13 = vpop.eup %4980  ;;  %3780 = vst.msk [vmem:[%s6362_s17 + $0xd8] sm:$0xff] %vm397_vm0, %v3748_v42 }
 0x310   : > { %3778 = vst.msk [vmem:[%s6362_s17 + $0xc8] sm:$0xff] %vm397_vm0, %v3746_v61  ;;  %v3751_v44 = vmul.f32 %v4981_v13, %v6464_v12 }
 0x312   : > { %v4983_v40 = vpop.eup %4982  ;;  %3783 = vst.msk [vmem:[%s6362_s17 + $0xf0] sm:$0xff] %vm397_vm0, %v3751_v44 }
 0x313   : > { %v3749_v53 = vmul.f32 %v4983_v40, %v6474_v19 }
 0x315   : > { %v4985_v43 = vpop.eup %4984  ;;  %3781 = vst.msk [vmem:[%s6362_s17 + $0xe0] sm:$0xff] %vm397_vm0, %v3749_v53 }
 0x316   : > { %v3752_v30 = vmul.f32 %v4985_v43, %v6483_v26 }
 0x317   : > { %v4987_v36 = vpop.eup %4986 }
 0x318   : > { %3784 = vst.msk [vmem:[%s6362_s17 + $0xf8] sm:$0xff] %vm397_vm0, %v3752_v30  ;;  %v3750_v4 = vmul.f32 %v4987_v36, %v6486_v37 }
 0x31a   : > { %3782 = vst.msk [vmem:[%s6362_s17 + $0xe8] sm:$0xff] %vm397_vm0, %v3750_v4 }
 0x31b PF: > { %s17_s24 = sadd.s32 1, %s5026_s24  }
 0x31c   : > { %p14_p4 = scmp.ge.s32.totalorder %s17_s24, 4  }
 0x31e   :  { %16 = sbr.rel (!%p14_p4) target bundleno = 1 (0x1), region = 88 }

</bundles_post_ra>
